<compile_context>
chip_gen: v5e
topology: v5e:2x2
jax: 0.10.0
libtpu: 0.0.40
codegen_flags: <defaults>
</compile_context>

<pallas_src>
import functools

import jax
import jax.numpy as jnp
from jax import lax
from jax.experimental import pallas as pl
from jax.experimental.pallas import tpu as pltpu


LANES = 128                       # pad all output-channel dims to this
VMEM_LIMIT = 32 * 1024 * 1024     # explicit scoped-VMEM limit (safe on v5e/v6e/v7x)


# ----------------------------------------------------------------------------
# Pallas kernels
# ----------------------------------------------------------------------------
def _mm_kernel_nk1(x_ref, w_ref, b_ref, *refs, stats):
    """Single-K-step matmul: y = x @ w + b written directly (no accumulator).
    Optionally emits per-M-tile partial column sums / sums-of-squares (computed
    from the f32 dot result, before the bf16 downcast of y)."""
    y = jnp.dot(x_ref[...], w_ref[...],
                preferred_element_type=jnp.float32) + b_ref[...]
    if stats:
        y_ref, s_ref, ss_ref = refs
        s_ref[...] = jnp.sum(y, axis=0, keepdims=True)[None]
        ss_ref[...] = jnp.sum(y * y, axis=0, keepdims=True)[None]
    else:
        (y_ref,) = refs
    y_ref[...] = y.astype(y_ref.dtype)


def _mm_kernel_ktiled(x_ref, w_ref, b_ref, *refs, n_k, stats):
    """K-tiled fallback (only used when K > tk_cap): f32 VMEM accumulator over the
    'arbitrary' K axis; bias add / stats / store at the last K step."""
    if stats:
        y_ref, s_ref, ss_ref, acc_ref = refs
    else:
        y_ref, acc_ref = refs

    kk = pl.program_id(1)

    @pl.when(kk == 0)
    def _():
        acc_ref[...] = jnp.zeros_like(acc_ref)

    acc_ref[...] += jnp.dot(x_ref[...], w_ref[...],
                            preferred_element_type=jnp.float32)

    @pl.when(kk == n_k - 1)
    def _():
        y = acc_ref[...] + b_ref[...]
        y_ref[...] = y.astype(y_ref.dtype)
        if stats:
            s_ref[...] = jnp.sum(y, axis=0, keepdims=True)[None]
            ss_ref[...] = jnp.sum(y * y, axis=0, keepdims=True)[None]


def _bn_stats_act_kernel(y_ref, s_ref, ss_ref, g_ref, be_ref, o_ref,
                         *, slope, inv_count, eps):
    """Fused BN finalization + normalization + LeakyReLU.
    Reduces the per-M-tile partial sums to mean/var, builds the (1,128)
    scale/shift in-kernel (cheap VPU work), applies them lane-dense."""
    mean = jnp.sum(s_ref[...], axis=0) * inv_count            # (1, Npad) f32
    ex2 = jnp.sum(ss_ref[...], axis=0) * inv_count
    var = ex2 - mean * mean                                   # biased (train BN)
    scale = g_ref[...] * lax.rsqrt(var + eps)                 # gamma=0 on pad lanes
    shift = be_ref[...] - mean * scale
    v = y_ref[...].astype(jnp.float32) * scale + shift
    o_ref[...] = jnp.where(v >= 0.0, v, slope * v).astype(o_ref.dtype)


# ----------------------------------------------------------------------------
# Pallas wrappers
# ----------------------------------------------------------------------------
def _pick_tile(dim, cap, mult=8):
    """Largest divisor of `dim` that is <= cap and a multiple of `mult`;
    falls back to the full dim (always a legal block)."""
    if dim <= cap:
        return dim
    t = (cap // mult) * mult
    while t >= mult:
        if dim % t == 0:
            return t
        t -= mult
    return dim


def matmul_bias(x, w, b, *, stats, out_dtype=jnp.bfloat16,
                tm_cap=512, tk_cap=4096):
    """y = x @ w + b (bf16 in, f32 accumulate).  If stats: also returns per-tile
    partial column sums and sums-of-squares of y, shape (n_m, 1, N)."""
    M, K = x.shape
    Npad = w.shape[1]
    # Cap TM at M//2 so the "parallel" M axis has >= 2 steps (v7x 2-TC split).
    TM = _pick_tile(M, min(tm_cap, max(M // 2, 8)), mult=8)
    TK = _pick_tile(K, tk_cap, mult=128)
    n_m, n_k = M // TM, K // TK

    out_shape = [jax.ShapeDtypeStruct((M, Npad), out_dtype)]

    if n_k == 1:
        in_specs = [pl.BlockSpec((TM, K), lambda i: (i, 0)),
                    pl.BlockSpec((K, Npad), lambda i: (0, 0)),
                    pl.BlockSpec((1, Npad), lambda i: (0, 0))]
        out_specs = [pl.BlockSpec((TM, Npad), lambda i: (i, 0))]
        if stats:
            out_shape += [jax.ShapeDtypeStruct((n_m, 1, Npad), jnp.float32)] * 2
            out_specs += [pl.BlockSpec((1, 1, Npad), lambda i: (i, 0, 0))] * 2
        res = pl.pallas_call(
            functools.partial(_mm_kernel_nk1, stats=stats),
            out_shape=tuple(out_shape),
            grid_spec=pltpu.PrefetchScalarGridSpec(
                num_scalar_prefetch=0,
                grid=(n_m,),
                in_specs=in_specs,
                out_specs=tuple(out_specs)),
            compiler_params=pltpu.CompilerParams(
                dimension_semantics=("parallel",),
                vmem_limit_bytes=VMEM_LIMIT),
        )(x, w, b)
    else:
        in_specs = [pl.BlockSpec((TM, TK), lambda i, kk: (i, kk)),
                    pl.BlockSpec((TK, Npad), lambda i, kk: (kk, 0)),
                    pl.BlockSpec((1, Npad), lambda i, kk: (0, 0))]
        out_specs = [pl.BlockSpec((TM, Npad), lambda i, kk: (i, 0))]
        if stats:
            out_shape += [jax.ShapeDtypeStruct((n_m, 1, Npad), jnp.float32)] * 2
            out_specs += [pl.BlockSpec((1, 1, Npad), lambda i, kk: (i, 0, 0))] * 2
        res = pl.pallas_call(
            functools.partial(_mm_kernel_ktiled, n_k=n_k, stats=stats),
            out_shape=tuple(out_shape),
            grid_spec=pltpu.PrefetchScalarGridSpec(
                num_scalar_prefetch=0,
                grid=(n_m, n_k),
                in_specs=in_specs,
                out_specs=tuple(out_specs),
                scratch_shapes=[pltpu.VMEM((TM, Npad), jnp.float32)]),
            compiler_params=pltpu.CompilerParams(
                dimension_semantics=("parallel", "arbitrary"),
                vmem_limit_bytes=VMEM_LIMIT),
        )(x, w, b)

    return res if stats else res[0]


def bn_stats_act(y, s, ss, gamma_p, beta_p, *, count, slope=0.2, eps=1e-5,
                 out_dtype=jnp.bfloat16, tm_cap=512):
    """Fused BN-finalize + normalize + LeakyReLU over (M, 128) lane-dense y."""
    M, Npad = y.shape
    n_p = s.shape[0]
    TM = _pick_tile(M, min(tm_cap, max(M // 2, 8)), mult=8)
    n_m = M // TM
    return pl.pallas_call(
        functools.partial(_bn_stats_act_kernel, slope=slope,
                          inv_count=1.0 / count, eps=eps),
        out_shape=jax.ShapeDtypeStruct((M, Npad), out_dtype),
        grid_spec=pltpu.PrefetchScalarGridSpec(
            num_scalar_prefetch=0,
            grid=(n_m,),
            in_specs=[
                pl.BlockSpec((TM, Npad), lambda i: (i, 0)),
                pl.BlockSpec((n_p, 1, Npad), lambda i: (0, 0, 0)),
                pl.BlockSpec((n_p, 1, Npad), lambda i: (0, 0, 0)),
                pl.BlockSpec((1, Npad), lambda i: (0, 0)),
                pl.BlockSpec((1, Npad), lambda i: (0, 0)),
            ],
            out_specs=pl.BlockSpec((TM, Npad), lambda i: (i, 0))),
        compiler_params=pltpu.CompilerParams(
            dimension_semantics=("parallel",),
            vmem_limit_bytes=VMEM_LIMIT),
    )(y, s, ss, gamma_p, beta_p)


# ----------------------------------------------------------------------------
# XLA glue: im2col (bf16) with K padded to a multiple of 128
# ----------------------------------------------------------------------------
def _pad_lanes(a, n=LANES):
    pad = n - a.shape[-1]
    if pad == 0:
        return a
    return jnp.pad(a, [(0, 0)] * (a.ndim - 1) + [(0, pad)])


def _im2col(x_nhwc, k, stride, pad, kpad):
    B, H, W, C = x_nhwc.shape
    Ho = (H + 2 * pad - k) // stride + 1
    Wo = (W + 2 * pad - k) // stride + 1
    xp = jnp.pad(x_nhwc, ((0, 0), (pad, pad), (pad, pad), (0, 0)))
    cols = [xp[:, u:u + (Ho - 1) * stride + 1:stride,
               v:v + (Wo - 1) * stride + 1:stride, :]
            for u in range(k) for v in range(k)]
    patches = jnp.stack(cols, axis=3).reshape(B * Ho * Wo, k * k * C)
    kdim = k * k * C
    if kpad > kdim:                                   # zero rows: free numerically
        patches = jnp.pad(patches, ((0, 0), (0, kpad - kdim)))
    return patches, (B, Ho, Wo)


# ----------------------------------------------------------------------------
# Parameter packing (once, outside the forward) and the jitted forward
# ----------------------------------------------------------------------------
def pack_params(params):
    """Transpose/pad/cast all weights once; split static metadata from arrays."""
    conv_arrays, conv_meta = [], []
    for layer in params["convs"]:
        Wc = layer["W"]                               # (Cout, Cin, k, k)
        cout, cin, k, _ = Wc.shape
        K = cin * k * k
        Kpad = ((K + LANES - 1) // LANES) * LANES
        Wm = jnp.transpose(Wc, (2, 3, 1, 0)).reshape(K, cout)      # (u,v,cin) x cout
        Wm = jnp.pad(Wm, ((0, Kpad - K), (0, LANES - cout))).astype(jnp.bfloat16)
        conv_arrays.append(dict(
            Wm=Wm,
            bm=_pad_lanes(layer["b"].reshape(1, cout)).astype(jnp.float32),
            gm=_pad_lanes(layer["gamma"].reshape(1, cout)).astype(jnp.float32),
            betam=_pad_lanes(layer["beta"].reshape(1, cout)).astype(jnp.float32)))
        conv_meta.append((k, layer["stride"], layer["pad"], cout))

    z_dim, in_features = params["Wlin"].shape
    Kpad = ((in_features + LANES - 1) // LANES) * LANES
    Wlin = jnp.pad(params["Wlin"].T,
                   ((0, Kpad - in_features), (0, LANES - z_dim))).astype(jnp.bfloat16)
    blin = _pad_lanes(params["blin"].reshape(1, z_dim)).astype(jnp.float32)

    arrays = dict(convs=conv_arrays, Wlin=Wlin, blin=blin)
    meta = dict(convs=conv_meta, z_dim=z_dim)
    return arrays, meta


def build_encoder(meta, slope=0.2, eps=1e-5):
    conv_meta = meta["convs"]
    z_dim = meta["z_dim"]

    @jax.jit
    def forward(arrays, x_nchw):
        feat = jnp.transpose(x_nchw, (0, 2, 3, 1)).astype(jnp.bfloat16)   # NHWC
        for (k, stride, pad, cout), arr in zip(conv_meta, arrays["convs"]):
            kpad = arr["Wm"].shape[0]
            patches, (B, Ho, Wo) = _im2col(feat, k, stride, pad, kpad)
            y, s, ss = matmul_bias(patches, arr["Wm"], arr["bm"], stats=True)
            out = bn_stats_act(y, s, ss, arr["gm"], arr["betam"],
                               count=float(B * Ho * Wo), slope=slope, eps=eps)
            feat = out[:, :cout].reshape(B, Ho, Wo, cout)

        B = feat.shape[0]
        # PyTorch Flatten is over NCHW -> keep that channel-major ordering.
        flat = jnp.transpose(feat, (0, 3, 1, 2)).reshape(B, -1)
        Kp = arrays["Wlin"].shape[0]
        if flat.shape[1] < Kp:
            flat = jnp.pad(flat, ((0, 0), (0, Kp - flat.shape[1])))
        Mp = max(8, ((B + 7) // 8) * 8)                        # sublane-pad rows
        flat_p = jnp.zeros((Mp, Kp), jnp.bfloat16).at[:B].set(flat)
        # Final Linear: single K step (K=4096 <= tk_cap), no BN -> no stats.
        z_pad = matmul_bias(flat_p, arrays["Wlin"], arrays["blin"],
                            stats=False, out_dtype=jnp.float32)
        return z_pad[:B, :z_dim]

    return forward


# ----------------------------------------------------------------------------
# Deterministic parameter init (shapes from the PyTorch __init__)
# ----------------------------------------------------------------------------
def init_params(key, z_dim=10, nc=3, nf=16, h=32, w=32):
    specs = [
        (nc,     nf,     7, 1, 3),   # Conv2d(nc, nf, 7, 1, 3)
        (nf,     nf,     5, 1, 2),   # Conv2d(nf, nf, 5, 1, 2)
        (nf,     2 * nf, 4, 2, 1),   # Conv2d(nf, 2nf, 4, 2, 1)
        (2 * nf, 2 * nf, 3, 1, 1),   # Conv2d(2nf, 2nf, 3, 1, 1)
        (2 * nf, 4 * nf, 4, 2, 1),   # Conv2d(2nf, 4nf, 4, 2, 1)
    ]
    keys = jax.random.split(key, 4 * len(specs) + 2)
    convs, ki = [], 0
    for (cin, cout, k, stride, pad) in specs:
        fan_in = cin * k * k
        W = jax.random.normal(keys[ki], (cout, cin, k, k), jnp.float32) * fan_in ** -0.5
        ki += 1
        b = 0.01 * jax.random.normal(keys[ki], (cout,), jnp.float32); ki += 1
        gamma = 1.0 + 0.1 * jax.random.normal(keys[ki], (cout,), jnp.float32); ki += 1
        beta = 0.1 * jax.random.normal(keys[ki], (cout,), jnp.float32); ki += 1
        convs.append(dict(W=W, b=b, gamma=gamma, beta=beta, stride=stride, pad=pad))
    in_features = 4 * nf * (h // 4) * (w // 4)
    Wlin = jax.random.normal(keys[ki], (z_dim, in_features), jnp.float32) * in_features ** -0.5
    ki += 1
    blin = 0.01 * jax.random.normal(keys[ki], (z_dim,), jnp.float32)
    return dict(convs=convs, Wlin=Wlin, blin=blin)


# ----------------------------------------------------------------------------
# Pure-JAX reference (XLA convs, same bf16-input / f32-accumulate policy)
# ----------------------------------------------------------------------------
def reference_forward(params, x_nchw, slope=0.2, eps=1e-5):
    feat = jnp.transpose(x_nchw, (0, 2, 3, 1))
    for layer in params["convs"]:
        Wc = layer["W"]
        Whwio = jnp.transpose(Wc, (2, 3, 1, 0)).astype(jnp.bfloat16)
        y = jax.lax.conv_general_dilated(
            feat.astype(jnp.bfloat16), Whwio,
            window_strides=(layer["stride"], layer["stride"]),
            padding=[(layer["pad"], layer["pad"])] * 2,
            dimension_numbers=("NHWC", "HWIO", "NHWC"),
            preferred_element_type=jnp.float32)
        y = y + layer["b"]
        mean = jnp.mean(y, axis=(0, 1, 2))
        var = jnp.var(y, axis=(0, 1, 2))
        y = (y - mean) * (layer["gamma"] / jnp.sqrt(var + eps)) + layer["beta"]
        feat = jnp.where(y >= 0, y, slope * y)
    B = feat.shape[0]
    flat = jnp.transpose(feat, (0, 3, 1, 2)).reshape(B, -1)
    z = jnp.dot(flat.astype(jnp.bfloat16), params["Wlin"].T.astype(jnp.bfloat16),
                preferred_element_type=jnp.float32) + params["blin"]
    return z


if __name__ == "__main__":
    key = jax.random.PRNGKey(0)
    pkey, xkey = jax.random.split(key)

    B, nc, h, w, nf, z_dim = 2, 3, 32, 32, 16, 10
    params = init_params(pkey, z_dim=z_dim, nc=nc, nf=nf, h=h, w=w)
    x = jax.random.normal(xkey, (B, nc, h, w), jnp.float32)

    arrays, meta = pack_params(params)          # one-time packing (outside forward)
    encoder = build_encoder(meta)

    z = jax.block_until_ready(encoder(arrays, x))
    assert z.shape == (B, z_dim), z.shape

    ref = jax.block_until_ready(reference_forward(params, x))
    err = float(jnp.max(jnp.abs(z - ref)))
    # Tolerance slightly relaxed vs. the f32-y version: y is now stored bf16
    # between the matmul and BN kernels (reference keeps f32 pre-BN activations).
    assert err < 5e-2, f"max abs err {err}"

    print("KERNEL_OK")
</pallas_src>

<mosaic_0001>
module attributes {stable_mosaic.version = 11 : i64} {
  func.func @_mm_kernel_nk1(%arg0: i32, %arg1: memref<512x256xbf16, #tpu.memory_space<vmem>>, %arg2: memref<256x128xbf16, #tpu.memory_space<vmem>>, %arg3: memref<1x128xf32, #tpu.memory_space<vmem>>, %arg4: memref<512x128xbf16, #tpu.memory_space<vmem>>, %arg5: memref<1x1x128xf32, #tpu.memory_space<vmem>>, %arg6: memref<1x1x128xf32, #tpu.memory_space<vmem>>) attributes {dimension_semantics = [#tpu.dimension_semantics<parallel>], iteration_bounds = array<i64: 4>, scalar_prefetch = 0 : i64, scratch_operands = 0 : i64, tpu.core_type = #tpu.core_type<tc>, window_params = [{transform_indices = @transform_0, window_bounds = array<i64: 512, 256>}, {pipeline_mode = #tpu.pipeline_mode<synchronous>, transform_indices = @transform_1, window_bounds = array<i64: 256, 128>}, {pipeline_mode = #tpu.pipeline_mode<synchronous>, transform_indices = @transform_2, window_bounds = array<i64: 1, 128>}, {transform_indices = @transform_3, window_bounds = array<i64: 512, 128>}, {transform_indices = @transform_4, window_bounds = array<i64: 1, 1, 128>}, {transform_indices = @transform_5, window_bounds = array<i64: 1, 1, 128>}]} {
    %c0 = arith.constant 0 : index
    %c0_0 = arith.constant 0 : index
    %0 = vector.load %arg1[%c0, %c0_0] : memref<512x256xbf16, #tpu.memory_space<vmem>>, vector<512x256xbf16>
    %c0_1 = arith.constant 0 : index
    %c0_2 = arith.constant 0 : index
    %1 = vector.load %arg2[%c0_1, %c0_2] : memref<256x128xbf16, #tpu.memory_space<vmem>>, vector<256x128xbf16>
    %cst = arith.constant dense<0.000000e+00> : vector<512x128xf32>
    %2 = tpu.matmul %0, %1, %cst {dimension_numbers = #tpu.dot_dimension_numbers<[1], [0], [0], [1], [0, 0, 1, 1], [], []>} : vector<512x256xbf16>, vector<256x128xbf16>, vector<512x128xf32> -> vector<512x128xf32>
    %c0_3 = arith.constant 0 : index
    %c0_4 = arith.constant 0 : index
    %3 = vector.load %arg3[%c0_3, %c0_4] : memref<1x128xf32, #tpu.memory_space<vmem>>, vector<1x128xf32>
    %4 = vector.broadcast %3 : vector<1x128xf32> to vector<512x128xf32>
    %5 = arith.addf %2, %4 : vector<512x128xf32>
    %cst_5 = arith.constant dense<0.000000e+00> : vector<128xf32>
    %6 = vector.multi_reduction <add>, %5, %cst_5 [0] : vector<512x128xf32> to vector<128xf32>
    %7 = vector.shape_cast %6 : vector<128xf32> to vector<1x128xf32>
    %8 = vector.shape_cast %7 : vector<1x128xf32> to vector<1x1x128xf32>
    %c0_6 = arith.constant 0 : index
    %c0_7 = arith.constant 0 : index
    %c0_8 = arith.constant 0 : index
    %9 = vector.load %arg5[%c0_6, %c0_7, %c0_8] : memref<1x1x128xf32, #tpu.memory_space<vmem>>, vector<1x1x128xf32>
    tpu.vector_store %arg5[%c0_6, %c0_7, %c0_8], %8 {strides = array<i32>} : memref<1x1x128xf32, #tpu.memory_space<vmem>>, vector<1x1x128xf32>,
    %10 = arith.mulf %5, %5 : vector<512x128xf32>
    %cst_9 = arith.constant dense<0.000000e+00> : vector<128xf32>
    %11 = vector.multi_reduction <add>, %10, %cst_9 [0] : vector<512x128xf32> to vector<128xf32>
    %12 = vector.shape_cast %11 : vector<128xf32> to vector<1x128xf32>
    %13 = vector.shape_cast %12 : vector<1x128xf32> to vector<1x1x128xf32>
    %c0_10 = arith.constant 0 : index
    %c0_11 = arith.constant 0 : index
    %c0_12 = arith.constant 0 : index
    %14 = vector.load %arg6[%c0_10, %c0_11, %c0_12] : memref<1x1x128xf32, #tpu.memory_space<vmem>>, vector<1x1x128xf32>
    tpu.vector_store %arg6[%c0_10, %c0_11, %c0_12], %13 {strides = array<i32>} : memref<1x1x128xf32, #tpu.memory_space<vmem>>, vector<1x1x128xf32>,
    %15 = arith.truncf %5 : vector<512x128xf32> to vector<512x128xbf16>
    %c0_13 = arith.constant 0 : index
    %c0_14 = arith.constant 0 : index
    %16 = vector.load %arg4[%c0_13, %c0_14] : memref<512x128xbf16, #tpu.memory_space<vmem>>, vector<512x128xbf16>
    tpu.vector_store %arg4[%c0_13, %c0_14], %15 {strides = array<i32>} : memref<512x128xbf16, #tpu.memory_space<vmem>>, vector<512x128xbf16>,
    return
  }
  func.func @transform_0(%arg0: i32) -> (i32, i32) {
    %c0_i32 = arith.constant 0 : i32
    %c0_i32_0 = arith.constant 0 : i32
    return %arg0, %c0_i32 : i32, i32
  }
  func.func @transform_1(%arg0: i32) -> (i32, i32) {
    %c0_i32 = arith.constant 0 : i32
    %c0_i32_0 = arith.constant 0 : i32
    %c0_i32_1 = arith.constant 0 : i32
    return %c0_i32, %c0_i32_0 : i32, i32
  }
  func.func @transform_2(%arg0: i32) -> (i32, i32) {
    %c0_i32 = arith.constant 0 : i32
    %c0_i32_0 = arith.constant 0 : i32
    %c0_i32_1 = arith.constant 0 : i32
    return %c0_i32, %c0_i32_0 : i32, i32
  }
  func.func @transform_3(%arg0: i32) -> (i32, i32) {
    %c0_i32 = arith.constant 0 : i32
    %c0_i32_0 = arith.constant 0 : i32
    return %arg0, %c0_i32 : i32, i32
  }
  func.func @transform_4(%arg0: i32) -> (i32, i32, i32) {
    %c0_i32 = arith.constant 0 : i32
    %c0_i32_0 = arith.constant 0 : i32
    %c0_i32_1 = arith.constant 0 : i32
    return %arg0, %c0_i32, %c0_i32_0 : i32, i32, i32
  }
  func.func @transform_5(%arg0: i32) -> (i32, i32, i32) {
    %c0_i32 = arith.constant 0 : i32
    %c0_i32_0 = arith.constant 0 : i32
    %c0_i32_1 = arith.constant 0 : i32
    return %arg0, %c0_i32, %c0_i32_0 : i32, i32, i32
  }
}

module attributes {stable_mosaic.version = 11 : i64} {
  func.func @_bn_stats_act_kernel(%arg0: i32, %arg1: memref<512x128xbf16, #tpu.memory_space<vmem>>, %arg2: memref<4x1x128xf32, #tpu.memory_space<vmem>>, %arg3: memref<4x1x128xf32, #tpu.memory_space<vmem>>, %arg4: memref<1x128xf32, #tpu.memory_space<vmem>>, %arg5: memref<1x128xf32, #tpu.memory_space<vmem>>, %arg6: memref<512x128xbf16, #tpu.memory_space<vmem>>) attributes {dimension_semantics = [#tpu.dimension_semantics<parallel>], iteration_bounds = array<i64: 4>, scalar_prefetch = 0 : i64, scratch_operands = 0 : i64, tpu.core_type = #tpu.core_type<tc>, window_params = [{transform_indices = @transform_0, window_bounds = array<i64: 512, 128>}, {pipeline_mode = #tpu.pipeline_mode<synchronous>, transform_indices = @transform_1, window_bounds = array<i64: 4, 1, 128>}, {pipeline_mode = #tpu.pipeline_mode<synchronous>, transform_indices = @transform_2, window_bounds = array<i64: 4, 1, 128>}, {pipeline_mode = #tpu.pipeline_mode<synchronous>, transform_indices = @transform_3, window_bounds = array<i64: 1, 128>}, {pipeline_mode = #tpu.pipeline_mode<synchronous>, transform_indices = @transform_4, window_bounds = array<i64: 1, 128>}, {transform_indices = @transform_5, window_bounds = array<i64: 512, 128>}]} {
    %c0 = arith.constant 0 : index
    %c0_0 = arith.constant 0 : index
    %c0_1 = arith.constant 0 : index
    %0 = vector.load %arg2[%c0, %c0_0, %c0_1] : memref<4x1x128xf32, #tpu.memory_space<vmem>>, vector<4x1x128xf32>
    %cst = arith.constant dense<0.000000e+00> : vector<1x128xf32>
    %1 = vector.multi_reduction <add>, %0, %cst [0] : vector<4x1x128xf32> to vector<1x128xf32>
    %cst_2 = arith.constant 4.8828125E-4 : f32
    %2 = vector.broadcast %cst_2 : f32 to vector<1x128xf32>
    %3 = arith.mulf %1, %2 : vector<1x128xf32>
    %c0_3 = arith.constant 0 : index
    %c0_4 = arith.constant 0 : index
    %c0_5 = arith.constant 0 : index
    %4 = vector.load %arg3[%c0_3, %c0_4, %c0_5] : memref<4x1x128xf32, #tpu.memory_space<vmem>>, vector<4x1x128xf32>
    %cst_6 = arith.constant dense<0.000000e+00> : vector<1x128xf32>
    %5 = vector.multi_reduction <add>, %4, %cst_6 [0] : vector<4x1x128xf32> to vector<1x128xf32>
    %cst_7 = arith.constant 4.8828125E-4 : f32
    %6 = vector.broadcast %cst_7 : f32 to vector<1x128xf32>
    %7 = arith.mulf %5, %6 : vector<1x128xf32>
    %8 = arith.mulf %3, %3 : vector<1x128xf32>
    %9 = arith.subf %7, %8 : vector<1x128xf32>
    %c0_8 = arith.constant 0 : index
    %c0_9 = arith.constant 0 : index
    %10 = vector.load %arg4[%c0_8, %c0_9] : memref<1x128xf32, #tpu.memory_space<vmem>>, vector<1x128xf32>
    %cst_10 = arith.constant 9.99999974E-6 : f32
    %11 = vector.broadcast %cst_10 : f32 to vector<1x128xf32>
    %12 = arith.addf %9, %11 : vector<1x128xf32>
    %13 = math.rsqrt %12 : vector<1x128xf32>
    %14 = arith.mulf %10, %13 : vector<1x128xf32>
    %c0_11 = arith.constant 0 : index
    %c0_12 = arith.constant 0 : index
    %15 = vector.load %arg5[%c0_11, %c0_12] : memref<1x128xf32, #tpu.memory_space<vmem>>, vector<1x128xf32>
    %16 = arith.mulf %3, %14 : vector<1x128xf32>
    %17 = arith.subf %15, %16 : vector<1x128xf32>
    %c0_13 = arith.constant 0 : index
    %c0_14 = arith.constant 0 : index
    %18 = vector.load %arg1[%c0_13, %c0_14] : memref<512x128xbf16, #tpu.memory_space<vmem>>, vector<512x128xbf16>
    %19 = arith.extf %18 : vector<512x128xbf16> to vector<512x128xf32>
    %20 = vector.broadcast %14 : vector<1x128xf32> to vector<512x128xf32>
    %21 = arith.mulf %19, %20 : vector<512x128xf32>
    %22 = vector.broadcast %17 : vector<1x128xf32> to vector<512x128xf32>
    %23 = arith.addf %21, %22 : vector<512x128xf32>
    %cst_15 = arith.constant 0.000000e+00 : f32
    %24 = vector.broadcast %cst_15 : f32 to vector<512x128xf32>
    %25 = arith.cmpf oge, %23, %24 : vector<512x128xf32>
    %cst_16 = arith.constant 2.000000e-01 : f32
    %26 = vector.broadcast %cst_16 : f32 to vector<512x128xf32>
    %27 = arith.mulf %26, %23 : vector<512x128xf32>
    %28 = arith.select %25, %23, %27 : vector<512x128xi1>, vector<512x128xf32>
    %29 = arith.truncf %28 : vector<512x128xf32> to vector<512x128xbf16>
    %c0_17 = arith.constant 0 : index
    %c0_18 = arith.constant 0 : index
    %30 = vector.load %arg6[%c0_17, %c0_18] : memref<512x128xbf16, #tpu.memory_space<vmem>>, vector<512x128xbf16>
    tpu.vector_store %arg6[%c0_17, %c0_18], %29 {strides = array<i32>} : memref<512x128xbf16, #tpu.memory_space<vmem>>, vector<512x128xbf16>,
    return
  }
  func.func @transform_0(%arg0: i32) -> (i32, i32) {
    %c0_i32 = arith.constant 0 : i32
    %c0_i32_0 = arith.constant 0 : i32
    return %arg0, %c0_i32 : i32, i32
  }
  func.func @transform_1(%arg0: i32) -> (i32, i32, i32) {
    %c0_i32 = arith.constant 0 : i32
    %c0_i32_0 = arith.constant 0 : i32
    %c0_i32_1 = arith.constant 0 : i32
    %c0_i32_2 = arith.constant 0 : i32
    return %c0_i32, %c0_i32_0, %c0_i32_1 : i32, i32, i32
  }
  func.func @transform_2(%arg0: i32) -> (i32, i32, i32) {
    %c0_i32 = arith.constant 0 : i32
    %c0_i32_0 = arith.constant 0 : i32
    %c0_i32_1 = arith.constant 0 : i32
    %c0_i32_2 = arith.constant 0 : i32
    return %c0_i32, %c0_i32_0, %c0_i32_1 : i32, i32, i32
  }
  func.func @transform_3(%arg0: i32) -> (i32, i32) {
    %c0_i32 = arith.constant 0 : i32
    %c0_i32_0 = arith.constant 0 : i32
    %c0_i32_1 = arith.constant 0 : i32
    return %c0_i32, %c0_i32_0 : i32, i32
  }
  func.func @transform_4(%arg0: i32) -> (i32, i32) {
    %c0_i32 = arith.constant 0 : i32
    %c0_i32_0 = arith.constant 0 : i32
    %c0_i32_1 = arith.constant 0 : i32
    return %c0_i32, %c0_i32_0 : i32, i32
  }
  func.func @transform_5(%arg0: i32) -> (i32, i32) {
    %c0_i32 = arith.constant 0 : i32
    %c0_i32_0 = arith.constant 0 : i32
    return %arg0, %c0_i32 : i32, i32
  }
}

module attributes {stable_mosaic.version = 11 : i64} {
  func.func @_mm_kernel_nk1(%arg0: i32, %arg1: memref<512x512xbf16, #tpu.memory_space<vmem>>, %arg2: memref<512x128xbf16, #tpu.memory_space<vmem>>, %arg3: memref<1x128xf32, #tpu.memory_space<vmem>>, %arg4: memref<512x128xbf16, #tpu.memory_space<vmem>>, %arg5: memref<1x1x128xf32, #tpu.memory_space<vmem>>, %arg6: memref<1x1x128xf32, #tpu.memory_space<vmem>>) attributes {dimension_semantics = [#tpu.dimension_semantics<parallel>], iteration_bounds = array<i64: 4>, scalar_prefetch = 0 : i64, scratch_operands = 0 : i64, tpu.core_type = #tpu.core_type<tc>, window_params = [{transform_indices = @transform_0, window_bounds = array<i64: 512, 512>}, {pipeline_mode = #tpu.pipeline_mode<synchronous>, transform_indices = @transform_1, window_bounds = array<i64: 512, 128>}, {pipeline_mode = #tpu.pipeline_mode<synchronous>, transform_indices = @transform_2, window_bounds = array<i64: 1, 128>}, {transform_indices = @transform_3, window_bounds = array<i64: 512, 128>}, {transform_indices = @transform_4, window_bounds = array<i64: 1, 1, 128>}, {transform_indices = @transform_5, window_bounds = array<i64: 1, 1, 128>}]} {
    %c0 = arith.constant 0 : index
    %c0_0 = arith.constant 0 : index
    %0 = vector.load %arg1[%c0, %c0_0] : memref<512x512xbf16, #tpu.memory_space<vmem>>, vector<512x512xbf16>
    %c0_1 = arith.constant 0 : index
    %c0_2 = arith.constant 0 : index
    %1 = vector.load %arg2[%c0_1, %c0_2] : memref<512x128xbf16, #tpu.memory_space<vmem>>, vector<512x128xbf16>
    %cst = arith.constant dense<0.000000e+00> : vector<512x128xf32>
    %2 = tpu.matmul %0, %1, %cst {dimension_numbers = #tpu.dot_dimension_numbers<[1], [0], [0], [1], [0, 0, 1, 1], [], []>} : vector<512x512xbf16>, vector<512x128xbf16>, vector<512x128xf32> -> vector<512x128xf32>
    %c0_3 = arith.constant 0 : index
    %c0_4 = arith.constant 0 : index
    %3 = vector.load %arg3[%c0_3, %c0_4] : memref<1x128xf32, #tpu.memory_space<vmem>>, vector<1x128xf32>
    %4 = vector.broadcast %3 : vector<1x128xf32> to vector<512x128xf32>
    %5 = arith.addf %2, %4 : vector<512x128xf32>
    %cst_5 = arith.constant dense<0.000000e+00> : vector<128xf32>
    %6 = vector.multi_reduction <add>, %5, %cst_5 [0] : vector<512x128xf32> to vector<128xf32>
    %7 = vector.shape_cast %6 : vector<128xf32> to vector<1x128xf32>
    %8 = vector.shape_cast %7 : vector<1x128xf32> to vector<1x1x128xf32>
    %c0_6 = arith.constant 0 : index
    %c0_7 = arith.constant 0 : index
    %c0_8 = arith.constant 0 : index
    %9 = vector.load %arg5[%c0_6, %c0_7, %c0_8] : memref<1x1x128xf32, #tpu.memory_space<vmem>>, vector<1x1x128xf32>
    tpu.vector_store %arg5[%c0_6, %c0_7, %c0_8], %8 {strides = array<i32>} : memref<1x1x128xf32, #tpu.memory_space<vmem>>, vector<1x1x128xf32>,
    %10 = arith.mulf %5, %5 : vector<512x128xf32>
    %cst_9 = arith.constant dense<0.000000e+00> : vector<128xf32>
    %11 = vector.multi_reduction <add>, %10, %cst_9 [0] : vector<512x128xf32> to vector<128xf32>
    %12 = vector.shape_cast %11 : vector<128xf32> to vector<1x128xf32>
    %13 = vector.shape_cast %12 : vector<1x128xf32> to vector<1x1x128xf32>
    %c0_10 = arith.constant 0 : index
    %c0_11 = arith.constant 0 : index
    %c0_12 = arith.constant 0 : index
    %14 = vector.load %arg6[%c0_10, %c0_11, %c0_12] : memref<1x1x128xf32, #tpu.memory_space<vmem>>, vector<1x1x128xf32>
    tpu.vector_store %arg6[%c0_10, %c0_11, %c0_12], %13 {strides = array<i32>} : memref<1x1x128xf32, #tpu.memory_space<vmem>>, vector<1x1x128xf32>,
    %15 = arith.truncf %5 : vector<512x128xf32> to vector<512x128xbf16>
    %c0_13 = arith.constant 0 : index
    %c0_14 = arith.constant 0 : index
    %16 = vector.load %arg4[%c0_13, %c0_14] : memref<512x128xbf16, #tpu.memory_space<vmem>>, vector<512x128xbf16>
    tpu.vector_store %arg4[%c0_13, %c0_14], %15 {strides = array<i32>} : memref<512x128xbf16, #tpu.memory_space<vmem>>, vector<512x128xbf16>,
    return
  }
  func.func @transform_0(%arg0: i32) -> (i32, i32) {
    %c0_i32 = arith.constant 0 : i32
    %c0_i32_0 = arith.constant 0 : i32
    return %arg0, %c0_i32 : i32, i32
  }
  func.func @transform_1(%arg0: i32) -> (i32, i32) {
    %c0_i32 = arith.constant 0 : i32
    %c0_i32_0 = arith.constant 0 : i32
    %c0_i32_1 = arith.constant 0 : i32
    return %c0_i32, %c0_i32_0 : i32, i32
  }
  func.func @transform_2(%arg0: i32) -> (i32, i32) {
    %c0_i32 = arith.constant 0 : i32
    %c0_i32_0 = arith.constant 0 : i32
    %c0_i32_1 = arith.constant 0 : i32
    return %c0_i32, %c0_i32_0 : i32, i32
  }
  func.func @transform_3(%arg0: i32) -> (i32, i32) {
    %c0_i32 = arith.constant 0 : i32
    %c0_i32_0 = arith.constant 0 : i32
    return %arg0, %c0_i32 : i32, i32
  }
  func.func @transform_4(%arg0: i32) -> (i32, i32, i32) {
    %c0_i32 = arith.constant 0 : i32
    %c0_i32_0 = arith.constant 0 : i32
    %c0_i32_1 = arith.constant 0 : i32
    return %arg0, %c0_i32, %c0_i32_0 : i32, i32, i32
  }
  func.func @transform_5(%arg0: i32) -> (i32, i32, i32) {
    %c0_i32 = arith.constant 0 : i32
    %c0_i32_0 = arith.constant 0 : i32
    %c0_i32_1 = arith.constant 0 : i32
    return %arg0, %c0_i32, %c0_i32_0 : i32, i32, i32
  }
}

module attributes {stable_mosaic.version = 11 : i64} {
  func.func @_mm_kernel_nk1(%arg0: i32, %arg1: memref<256x256xbf16, #tpu.memory_space<vmem>>, %arg2: memref<256x128xbf16, #tpu.memory_space<vmem>>, %arg3: memref<1x128xf32, #tpu.memory_space<vmem>>, %arg4: memref<256x128xbf16, #tpu.memory_space<vmem>>, %arg5: memref<1x1x128xf32, #tpu.memory_space<vmem>>, %arg6: memref<1x1x128xf32, #tpu.memory_space<vmem>>) attributes {dimension_semantics = [#tpu.dimension_semantics<parallel>], iteration_bounds = array<i64: 2>, scalar_prefetch = 0 : i64, scratch_operands = 0 : i64, tpu.core_type = #tpu.core_type<tc>, window_params = [{transform_indices = @transform_0, window_bounds = array<i64: 256, 256>}, {pipeline_mode = #tpu.pipeline_mode<synchronous>, transform_indices = @transform_1, window_bounds = array<i64: 256, 128>}, {pipeline_mode = #tpu.pipeline_mode<synchronous>, transform_indices = @transform_2, window_bounds = array<i64: 1, 128>}, {transform_indices = @transform_3, window_bounds = array<i64: 256, 128>}, {transform_indices = @transform_4, window_bounds = array<i64: 1, 1, 128>}, {transform_indices = @transform_5, window_bounds = array<i64: 1, 1, 128>}]} {
    %c0 = arith.constant 0 : index
    %c0_0 = arith.constant 0 : index
    %0 = vector.load %arg1[%c0, %c0_0] : memref<256x256xbf16, #tpu.memory_space<vmem>>, vector<256x256xbf16>
    %c0_1 = arith.constant 0 : index
    %c0_2 = arith.constant 0 : index
    %1 = vector.load %arg2[%c0_1, %c0_2] : memref<256x128xbf16, #tpu.memory_space<vmem>>, vector<256x128xbf16>
    %cst = arith.constant dense<0.000000e+00> : vector<256x128xf32>
    %2 = tpu.matmul %0, %1, %cst {dimension_numbers = #tpu.dot_dimension_numbers<[1], [0], [0], [1], [0, 0, 1, 1], [], []>} : vector<256x256xbf16>, vector<256x128xbf16>, vector<256x128xf32> -> vector<256x128xf32>
    %c0_3 = arith.constant 0 : index
    %c0_4 = arith.constant 0 : index
    %3 = vector.load %arg3[%c0_3, %c0_4] : memref<1x128xf32, #tpu.memory_space<vmem>>, vector<1x128xf32>
    %4 = vector.broadcast %3 : vector<1x128xf32> to vector<256x128xf32>
    %5 = arith.addf %2, %4 : vector<256x128xf32>
    %cst_5 = arith.constant dense<0.000000e+00> : vector<128xf32>
    %6 = vector.multi_reduction <add>, %5, %cst_5 [0] : vector<256x128xf32> to vector<128xf32>
    %7 = vector.shape_cast %6 : vector<128xf32> to vector<1x128xf32>
    %8 = vector.shape_cast %7 : vector<1x128xf32> to vector<1x1x128xf32>
    %c0_6 = arith.constant 0 : index
    %c0_7 = arith.constant 0 : index
    %c0_8 = arith.constant 0 : index
    %9 = vector.load %arg5[%c0_6, %c0_7, %c0_8] : memref<1x1x128xf32, #tpu.memory_space<vmem>>, vector<1x1x128xf32>
    tpu.vector_store %arg5[%c0_6, %c0_7, %c0_8], %8 {strides = array<i32>} : memref<1x1x128xf32, #tpu.memory_space<vmem>>, vector<1x1x128xf32>,
    %10 = arith.mulf %5, %5 : vector<256x128xf32>
    %cst_9 = arith.constant dense<0.000000e+00> : vector<128xf32>
    %11 = vector.multi_reduction <add>, %10, %cst_9 [0] : vector<256x128xf32> to vector<128xf32>
    %12 = vector.shape_cast %11 : vector<128xf32> to vector<1x128xf32>
    %13 = vector.shape_cast %12 : vector<1x128xf32> to vector<1x1x128xf32>
    %c0_10 = arith.constant 0 : index
    %c0_11 = arith.constant 0 : index
    %c0_12 = arith.constant 0 : index
    %14 = vector.load %arg6[%c0_10, %c0_11, %c0_12] : memref<1x1x128xf32, #tpu.memory_space<vmem>>, vector<1x1x128xf32>
    tpu.vector_store %arg6[%c0_10, %c0_11, %c0_12], %13 {strides = array<i32>} : memref<1x1x128xf32, #tpu.memory_space<vmem>>, vector<1x1x128xf32>,
    %15 = arith.truncf %5 : vector<256x128xf32> to vector<256x128xbf16>
    %c0_13 = arith.constant 0 : index
    %c0_14 = arith.constant 0 : index
    %16 = vector.load %arg4[%c0_13, %c0_14] : memref<256x128xbf16, #tpu.memory_space<vmem>>, vector<256x128xbf16>
    tpu.vector_store %arg4[%c0_13, %c0_14], %15 {strides = array<i32>} : memref<256x128xbf16, #tpu.memory_space<vmem>>, vector<256x128xbf16>,
    return
  }
  func.func @transform_0(%arg0: i32) -> (i32, i32) {
    %c0_i32 = arith.constant 0 : i32
    %c0_i32_0 = arith.constant 0 : i32
    return %arg0, %c0_i32 : i32, i32
  }
  func.func @transform_1(%arg0: i32) -> (i32, i32) {
    %c0_i32 = arith.constant 0 : i32
    %c0_i32_0 = arith.constant 0 : i32
    %c0_i32_1 = arith.constant 0 : i32
    return %c0_i32, %c0_i32_0 : i32, i32
  }
  func.func @transform_2(%arg0: i32) -> (i32, i32) {
    %c0_i32 = arith.constant 0 : i32
    %c0_i32_0 = arith.constant 0 : i32
    %c0_i32_1 = arith.constant 0 : i32
    return %c0_i32, %c0_i32_0 : i32, i32
  }
  func.func @transform_3(%arg0: i32) -> (i32, i32) {
    %c0_i32 = arith.constant 0 : i32
    %c0_i32_0 = arith.constant 0 : i32
    return %arg0, %c0_i32 : i32, i32
  }
  func.func @transform_4(%arg0: i32) -> (i32, i32, i32) {
    %c0_i32 = arith.constant 0 : i32
    %c0_i32_0 = arith.constant 0 : i32
    %c0_i32_1 = arith.constant 0 : i32
    return %arg0, %c0_i32, %c0_i32_0 : i32, i32, i32
  }
  func.func @transform_5(%arg0: i32) -> (i32, i32, i32) {
    %c0_i32 = arith.constant 0 : i32
    %c0_i32_0 = arith.constant 0 : i32
    %c0_i32_1 = arith.constant 0 : i32
    return %arg0, %c0_i32, %c0_i32_0 : i32, i32, i32
  }
}

module attributes {stable_mosaic.version = 11 : i64} {
  func.func @_bn_stats_act_kernel(%arg0: i32, %arg1: memref<256x128xbf16, #tpu.memory_space<vmem>>, %arg2: memref<2x1x128xf32, #tpu.memory_space<vmem>>, %arg3: memref<2x1x128xf32, #tpu.memory_space<vmem>>, %arg4: memref<1x128xf32, #tpu.memory_space<vmem>>, %arg5: memref<1x128xf32, #tpu.memory_space<vmem>>, %arg6: memref<256x128xbf16, #tpu.memory_space<vmem>>) attributes {dimension_semantics = [#tpu.dimension_semantics<parallel>], iteration_bounds = array<i64: 2>, scalar_prefetch = 0 : i64, scratch_operands = 0 : i64, tpu.core_type = #tpu.core_type<tc>, window_params = [{transform_indices = @transform_0, window_bounds = array<i64: 256, 128>}, {pipeline_mode = #tpu.pipeline_mode<synchronous>, transform_indices = @transform_1, window_bounds = array<i64: 2, 1, 128>}, {pipeline_mode = #tpu.pipeline_mode<synchronous>, transform_indices = @transform_2, window_bounds = array<i64: 2, 1, 128>}, {pipeline_mode = #tpu.pipeline_mode<synchronous>, transform_indices = @transform_3, window_bounds = array<i64: 1, 128>}, {pipeline_mode = #tpu.pipeline_mode<synchronous>, transform_indices = @transform_4, window_bounds = array<i64: 1, 128>}, {transform_indices = @transform_5, window_bounds = array<i64: 256, 128>}]} {
    %c0 = arith.constant 0 : index
    %c0_0 = arith.constant 0 : index
    %c0_1 = arith.constant 0 : index
    %0 = vector.load %arg2[%c0, %c0_0, %c0_1] : memref<2x1x128xf32, #tpu.memory_space<vmem>>, vector<2x1x128xf32>
    %cst = arith.constant dense<0.000000e+00> : vector<1x128xf32>
    %1 = vector.multi_reduction <add>, %0, %cst [0] : vector<2x1x128xf32> to vector<1x128xf32>
    %cst_2 = arith.constant 0.001953125 : f32
    %2 = vector.broadcast %cst_2 : f32 to vector<1x128xf32>
    %3 = arith.mulf %1, %2 : vector<1x128xf32>
    %c0_3 = arith.constant 0 : index
    %c0_4 = arith.constant 0 : index
    %c0_5 = arith.constant 0 : index
    %4 = vector.load %arg3[%c0_3, %c0_4, %c0_5] : memref<2x1x128xf32, #tpu.memory_space<vmem>>, vector<2x1x128xf32>
    %cst_6 = arith.constant dense<0.000000e+00> : vector<1x128xf32>
    %5 = vector.multi_reduction <add>, %4, %cst_6 [0] : vector<2x1x128xf32> to vector<1x128xf32>
    %cst_7 = arith.constant 0.001953125 : f32
    %6 = vector.broadcast %cst_7 : f32 to vector<1x128xf32>
    %7 = arith.mulf %5, %6 : vector<1x128xf32>
    %8 = arith.mulf %3, %3 : vector<1x128xf32>
    %9 = arith.subf %7, %8 : vector<1x128xf32>
    %c0_8 = arith.constant 0 : index
    %c0_9 = arith.constant 0 : index
    %10 = vector.load %arg4[%c0_8, %c0_9] : memref<1x128xf32, #tpu.memory_space<vmem>>, vector<1x128xf32>
    %cst_10 = arith.constant 9.99999974E-6 : f32
    %11 = vector.broadcast %cst_10 : f32 to vector<1x128xf32>
    %12 = arith.addf %9, %11 : vector<1x128xf32>
    %13 = math.rsqrt %12 : vector<1x128xf32>
    %14 = arith.mulf %10, %13 : vector<1x128xf32>
    %c0_11 = arith.constant 0 : index
    %c0_12 = arith.constant 0 : index
    %15 = vector.load %arg5[%c0_11, %c0_12] : memref<1x128xf32, #tpu.memory_space<vmem>>, vector<1x128xf32>
    %16 = arith.mulf %3, %14 : vector<1x128xf32>
    %17 = arith.subf %15, %16 : vector<1x128xf32>
    %c0_13 = arith.constant 0 : index
    %c0_14 = arith.constant 0 : index
    %18 = vector.load %arg1[%c0_13, %c0_14] : memref<256x128xbf16, #tpu.memory_space<vmem>>, vector<256x128xbf16>
    %19 = arith.extf %18 : vector<256x128xbf16> to vector<256x128xf32>
    %20 = vector.broadcast %14 : vector<1x128xf32> to vector<256x128xf32>
    %21 = arith.mulf %19, %20 : vector<256x128xf32>
    %22 = vector.broadcast %17 : vector<1x128xf32> to vector<256x128xf32>
    %23 = arith.addf %21, %22 : vector<256x128xf32>
    %cst_15 = arith.constant 0.000000e+00 : f32
    %24 = vector.broadcast %cst_15 : f32 to vector<256x128xf32>
    %25 = arith.cmpf oge, %23, %24 : vector<256x128xf32>
    %cst_16 = arith.constant 2.000000e-01 : f32
    %26 = vector.broadcast %cst_16 : f32 to vector<256x128xf32>
    %27 = arith.mulf %26, %23 : vector<256x128xf32>
    %28 = arith.select %25, %23, %27 : vector<256x128xi1>, vector<256x128xf32>
    %29 = arith.truncf %28 : vector<256x128xf32> to vector<256x128xbf16>
    %c0_17 = arith.constant 0 : index
    %c0_18 = arith.constant 0 : index
    %30 = vector.load %arg6[%c0_17, %c0_18] : memref<256x128xbf16, #tpu.memory_space<vmem>>, vector<256x128xbf16>
    tpu.vector_store %arg6[%c0_17, %c0_18], %29 {strides = array<i32>} : memref<256x128xbf16, #tpu.memory_space<vmem>>, vector<256x128xbf16>,
    return
  }
  func.func @transform_0(%arg0: i32) -> (i32, i32) {
    %c0_i32 = arith.constant 0 : i32
    %c0_i32_0 = arith.constant 0 : i32
    return %arg0, %c0_i32 : i32, i32
  }
  func.func @transform_1(%arg0: i32) -> (i32, i32, i32) {
    %c0_i32 = arith.constant 0 : i32
    %c0_i32_0 = arith.constant 0 : i32
    %c0_i32_1 = arith.constant 0 : i32
    %c0_i32_2 = arith.constant 0 : i32
    return %c0_i32, %c0_i32_0, %c0_i32_1 : i32, i32, i32
  }
  func.func @transform_2(%arg0: i32) -> (i32, i32, i32) {
    %c0_i32 = arith.constant 0 : i32
    %c0_i32_0 = arith.constant 0 : i32
    %c0_i32_1 = arith.constant 0 : i32
    %c0_i32_2 = arith.constant 0 : i32
    return %c0_i32, %c0_i32_0, %c0_i32_1 : i32, i32, i32
  }
  func.func @transform_3(%arg0: i32) -> (i32, i32) {
    %c0_i32 = arith.constant 0 : i32
    %c0_i32_0 = arith.constant 0 : i32
    %c0_i32_1 = arith.constant 0 : i32
    return %c0_i32, %c0_i32_0 : i32, i32
  }
  func.func @transform_4(%arg0: i32) -> (i32, i32) {
    %c0_i32 = arith.constant 0 : i32
    %c0_i32_0 = arith.constant 0 : i32
    %c0_i32_1 = arith.constant 0 : i32
    return %c0_i32, %c0_i32_0 : i32, i32
  }
  func.func @transform_5(%arg0: i32) -> (i32, i32) {
    %c0_i32 = arith.constant 0 : i32
    %c0_i32_0 = arith.constant 0 : i32
    return %arg0, %c0_i32 : i32, i32
  }
}

module attributes {stable_mosaic.version = 11 : i64} {
  func.func @_mm_kernel_nk1(%arg0: i32, %arg1: memref<256x384xbf16, #tpu.memory_space<vmem>>, %arg2: memref<384x128xbf16, #tpu.memory_space<vmem>>, %arg3: memref<1x128xf32, #tpu.memory_space<vmem>>, %arg4: memref<256x128xbf16, #tpu.memory_space<vmem>>, %arg5: memref<1x1x128xf32, #tpu.memory_space<vmem>>, %arg6: memref<1x1x128xf32, #tpu.memory_space<vmem>>) attributes {dimension_semantics = [#tpu.dimension_semantics<parallel>], iteration_bounds = array<i64: 2>, scalar_prefetch = 0 : i64, scratch_operands = 0 : i64, tpu.core_type = #tpu.core_type<tc>, window_params = [{transform_indices = @transform_0, window_bounds = array<i64: 256, 384>}, {pipeline_mode = #tpu.pipeline_mode<synchronous>, transform_indices = @transform_1, window_bounds = array<i64: 384, 128>}, {pipeline_mode = #tpu.pipeline_mode<synchronous>, transform_indices = @transform_2, window_bounds = array<i64: 1, 128>}, {transform_indices = @transform_3, window_bounds = array<i64: 256, 128>}, {transform_indices = @transform_4, window_bounds = array<i64: 1, 1, 128>}, {transform_indices = @transform_5, window_bounds = array<i64: 1, 1, 128>}]} {
    %c0 = arith.constant 0 : index
    %c0_0 = arith.constant 0 : index
    %0 = vector.load %arg1[%c0, %c0_0] : memref<256x384xbf16, #tpu.memory_space<vmem>>, vector<256x384xbf16>
    %c0_1 = arith.constant 0 : index
    %c0_2 = arith.constant 0 : index
    %1 = vector.load %arg2[%c0_1, %c0_2] : memref<384x128xbf16, #tpu.memory_space<vmem>>, vector<384x128xbf16>
    %cst = arith.constant dense<0.000000e+00> : vector<256x128xf32>
    %2 = tpu.matmul %0, %1, %cst {dimension_numbers = #tpu.dot_dimension_numbers<[1], [0], [0], [1], [0, 0, 1, 1], [], []>} : vector<256x384xbf16>, vector<384x128xbf16>, vector<256x128xf32> -> vector<256x128xf32>
    %c0_3 = arith.constant 0 : index
    %c0_4 = arith.constant 0 : index
    %3 = vector.load %arg3[%c0_3, %c0_4] : memref<1x128xf32, #tpu.memory_space<vmem>>, vector<1x128xf32>
    %4 = vector.broadcast %3 : vector<1x128xf32> to vector<256x128xf32>
    %5 = arith.addf %2, %4 : vector<256x128xf32>
    %cst_5 = arith.constant dense<0.000000e+00> : vector<128xf32>
    %6 = vector.multi_reduction <add>, %5, %cst_5 [0] : vector<256x128xf32> to vector<128xf32>
    %7 = vector.shape_cast %6 : vector<128xf32> to vector<1x128xf32>
    %8 = vector.shape_cast %7 : vector<1x128xf32> to vector<1x1x128xf32>
    %c0_6 = arith.constant 0 : index
    %c0_7 = arith.constant 0 : index
    %c0_8 = arith.constant 0 : index
    %9 = vector.load %arg5[%c0_6, %c0_7, %c0_8] : memref<1x1x128xf32, #tpu.memory_space<vmem>>, vector<1x1x128xf32>
    tpu.vector_store %arg5[%c0_6, %c0_7, %c0_8], %8 {strides = array<i32>} : memref<1x1x128xf32, #tpu.memory_space<vmem>>, vector<1x1x128xf32>,
    %10 = arith.mulf %5, %5 : vector<256x128xf32>
    %cst_9 = arith.constant dense<0.000000e+00> : vector<128xf32>
    %11 = vector.multi_reduction <add>, %10, %cst_9 [0] : vector<256x128xf32> to vector<128xf32>
    %12 = vector.shape_cast %11 : vector<128xf32> to vector<1x128xf32>
    %13 = vector.shape_cast %12 : vector<1x128xf32> to vector<1x1x128xf32>
    %c0_10 = arith.constant 0 : index
    %c0_11 = arith.constant 0 : index
    %c0_12 = arith.constant 0 : index
    %14 = vector.load %arg6[%c0_10, %c0_11, %c0_12] : memref<1x1x128xf32, #tpu.memory_space<vmem>>, vector<1x1x128xf32>
    tpu.vector_store %arg6[%c0_10, %c0_11, %c0_12], %13 {strides = array<i32>} : memref<1x1x128xf32, #tpu.memory_space<vmem>>, vector<1x1x128xf32>,
    %15 = arith.truncf %5 : vector<256x128xf32> to vector<256x128xbf16>
    %c0_13 = arith.constant 0 : index
    %c0_14 = arith.constant 0 : index
    %16 = vector.load %arg4[%c0_13, %c0_14] : memref<256x128xbf16, #tpu.memory_space<vmem>>, vector<256x128xbf16>
    tpu.vector_store %arg4[%c0_13, %c0_14], %15 {strides = array<i32>} : memref<256x128xbf16, #tpu.memory_space<vmem>>, vector<256x128xbf16>,
    return
  }
  func.func @transform_0(%arg0: i32) -> (i32, i32) {
    %c0_i32 = arith.constant 0 : i32
    %c0_i32_0 = arith.constant 0 : i32
    return %arg0, %c0_i32 : i32, i32
  }
  func.func @transform_1(%arg0: i32) -> (i32, i32) {
    %c0_i32 = arith.constant 0 : i32
    %c0_i32_0 = arith.constant 0 : i32
    %c0_i32_1 = arith.constant 0 : i32
    return %c0_i32, %c0_i32_0 : i32, i32
  }
  func.func @transform_2(%arg0: i32) -> (i32, i32) {
    %c0_i32 = arith.constant 0 : i32
    %c0_i32_0 = arith.constant 0 : i32
    %c0_i32_1 = arith.constant 0 : i32
    return %c0_i32, %c0_i32_0 : i32, i32
  }
  func.func @transform_3(%arg0: i32) -> (i32, i32) {
    %c0_i32 = arith.constant 0 : i32
    %c0_i32_0 = arith.constant 0 : i32
    return %arg0, %c0_i32 : i32, i32
  }
  func.func @transform_4(%arg0: i32) -> (i32, i32, i32) {
    %c0_i32 = arith.constant 0 : i32
    %c0_i32_0 = arith.constant 0 : i32
    %c0_i32_1 = arith.constant 0 : i32
    return %arg0, %c0_i32, %c0_i32_0 : i32, i32, i32
  }
  func.func @transform_5(%arg0: i32) -> (i32, i32, i32) {
    %c0_i32 = arith.constant 0 : i32
    %c0_i32_0 = arith.constant 0 : i32
    %c0_i32_1 = arith.constant 0 : i32
    return %arg0, %c0_i32, %c0_i32_0 : i32, i32, i32
  }
}

module attributes {stable_mosaic.version = 11 : i64} {
  func.func @_mm_kernel_nk1(%arg0: i32, %arg1: memref<64x512xbf16, #tpu.memory_space<vmem>>, %arg2: memref<512x128xbf16, #tpu.memory_space<vmem>>, %arg3: memref<1x128xf32, #tpu.memory_space<vmem>>, %arg4: memref<64x128xbf16, #tpu.memory_space<vmem>>, %arg5: memref<1x1x128xf32, #tpu.memory_space<vmem>>, %arg6: memref<1x1x128xf32, #tpu.memory_space<vmem>>) attributes {dimension_semantics = [#tpu.dimension_semantics<parallel>], iteration_bounds = array<i64: 2>, scalar_prefetch = 0 : i64, scratch_operands = 0 : i64, tpu.core_type = #tpu.core_type<tc>, window_params = [{transform_indices = @transform_0, window_bounds = array<i64: 64, 512>}, {pipeline_mode = #tpu.pipeline_mode<synchronous>, transform_indices = @transform_1, window_bounds = array<i64: 512, 128>}, {pipeline_mode = #tpu.pipeline_mode<synchronous>, transform_indices = @transform_2, window_bounds = array<i64: 1, 128>}, {transform_indices = @transform_3, window_bounds = array<i64: 64, 128>}, {transform_indices = @transform_4, window_bounds = array<i64: 1, 1, 128>}, {transform_indices = @transform_5, window_bounds = array<i64: 1, 1, 128>}]} {
    %c0 = arith.constant 0 : index
    %c0_0 = arith.constant 0 : index
    %0 = vector.load %arg1[%c0, %c0_0] : memref<64x512xbf16, #tpu.memory_space<vmem>>, vector<64x512xbf16>
    %c0_1 = arith.constant 0 : index
    %c0_2 = arith.constant 0 : index
    %1 = vector.load %arg2[%c0_1, %c0_2] : memref<512x128xbf16, #tpu.memory_space<vmem>>, vector<512x128xbf16>
    %cst = arith.constant dense<0.000000e+00> : vector<64x128xf32>
    %2 = tpu.matmul %0, %1, %cst {dimension_numbers = #tpu.dot_dimension_numbers<[1], [0], [0], [1], [0, 0, 1, 1], [], []>} : vector<64x512xbf16>, vector<512x128xbf16>, vector<64x128xf32> -> vector<64x128xf32>
    %c0_3 = arith.constant 0 : index
    %c0_4 = arith.constant 0 : index
    %3 = vector.load %arg3[%c0_3, %c0_4] : memref<1x128xf32, #tpu.memory_space<vmem>>, vector<1x128xf32>
    %4 = vector.broadcast %3 : vector<1x128xf32> to vector<64x128xf32>
    %5 = arith.addf %2, %4 : vector<64x128xf32>
    %cst_5 = arith.constant dense<0.000000e+00> : vector<128xf32>
    %6 = vector.multi_reduction <add>, %5, %cst_5 [0] : vector<64x128xf32> to vector<128xf32>
    %7 = vector.shape_cast %6 : vector<128xf32> to vector<1x128xf32>
    %8 = vector.shape_cast %7 : vector<1x128xf32> to vector<1x1x128xf32>
    %c0_6 = arith.constant 0 : index
    %c0_7 = arith.constant 0 : index
    %c0_8 = arith.constant 0 : index
    %9 = vector.load %arg5[%c0_6, %c0_7, %c0_8] : memref<1x1x128xf32, #tpu.memory_space<vmem>>, vector<1x1x128xf32>
    tpu.vector_store %arg5[%c0_6, %c0_7, %c0_8], %8 {strides = array<i32>} : memref<1x1x128xf32, #tpu.memory_space<vmem>>, vector<1x1x128xf32>,
    %10 = arith.mulf %5, %5 : vector<64x128xf32>
    %cst_9 = arith.constant dense<0.000000e+00> : vector<128xf32>
    %11 = vector.multi_reduction <add>, %10, %cst_9 [0] : vector<64x128xf32> to vector<128xf32>
    %12 = vector.shape_cast %11 : vector<128xf32> to vector<1x128xf32>
    %13 = vector.shape_cast %12 : vector<1x128xf32> to vector<1x1x128xf32>
    %c0_10 = arith.constant 0 : index
    %c0_11 = arith.constant 0 : index
    %c0_12 = arith.constant 0 : index
    %14 = vector.load %arg6[%c0_10, %c0_11, %c0_12] : memref<1x1x128xf32, #tpu.memory_space<vmem>>, vector<1x1x128xf32>
    tpu.vector_store %arg6[%c0_10, %c0_11, %c0_12], %13 {strides = array<i32>} : memref<1x1x128xf32, #tpu.memory_space<vmem>>, vector<1x1x128xf32>,
    %15 = arith.truncf %5 : vector<64x128xf32> to vector<64x128xbf16>
    %c0_13 = arith.constant 0 : index
    %c0_14 = arith.constant 0 : index
    %16 = vector.load %arg4[%c0_13, %c0_14] : memref<64x128xbf16, #tpu.memory_space<vmem>>, vector<64x128xbf16>
    tpu.vector_store %arg4[%c0_13, %c0_14], %15 {strides = array<i32>} : memref<64x128xbf16, #tpu.memory_space<vmem>>, vector<64x128xbf16>,
    return
  }
  func.func @transform_0(%arg0: i32) -> (i32, i32) {
    %c0_i32 = arith.constant 0 : i32
    %c0_i32_0 = arith.constant 0 : i32
    return %arg0, %c0_i32 : i32, i32
  }
  func.func @transform_1(%arg0: i32) -> (i32, i32) {
    %c0_i32 = arith.constant 0 : i32
    %c0_i32_0 = arith.constant 0 : i32
    %c0_i32_1 = arith.constant 0 : i32
    return %c0_i32, %c0_i32_0 : i32, i32
  }
  func.func @transform_2(%arg0: i32) -> (i32, i32) {
    %c0_i32 = arith.constant 0 : i32
    %c0_i32_0 = arith.constant 0 : i32
    %c0_i32_1 = arith.constant 0 : i32
    return %c0_i32, %c0_i32_0 : i32, i32
  }
  func.func @transform_3(%arg0: i32) -> (i32, i32) {
    %c0_i32 = arith.constant 0 : i32
    %c0_i32_0 = arith.constant 0 : i32
    return %arg0, %c0_i32 : i32, i32
  }
  func.func @transform_4(%arg0: i32) -> (i32, i32, i32) {
    %c0_i32 = arith.constant 0 : i32
    %c0_i32_0 = arith.constant 0 : i32
    %c0_i32_1 = arith.constant 0 : i32
    return %arg0, %c0_i32, %c0_i32_0 : i32, i32, i32
  }
  func.func @transform_5(%arg0: i32) -> (i32, i32, i32) {
    %c0_i32 = arith.constant 0 : i32
    %c0_i32_0 = arith.constant 0 : i32
    %c0_i32_1 = arith.constant 0 : i32
    return %arg0, %c0_i32, %c0_i32_0 : i32, i32, i32
  }
}

module attributes {stable_mosaic.version = 11 : i64} {
  func.func @_bn_stats_act_kernel(%arg0: i32, %arg1: memref<64x128xbf16, #tpu.memory_space<vmem>>, %arg2: memref<2x1x128xf32, #tpu.memory_space<vmem>>, %arg3: memref<2x1x128xf32, #tpu.memory_space<vmem>>, %arg4: memref<1x128xf32, #tpu.memory_space<vmem>>, %arg5: memref<1x128xf32, #tpu.memory_space<vmem>>, %arg6: memref<64x128xbf16, #tpu.memory_space<vmem>>) attributes {dimension_semantics = [#tpu.dimension_semantics<parallel>], iteration_bounds = array<i64: 2>, scalar_prefetch = 0 : i64, scratch_operands = 0 : i64, tpu.core_type = #tpu.core_type<tc>, window_params = [{transform_indices = @transform_0, window_bounds = array<i64: 64, 128>}, {pipeline_mode = #tpu.pipeline_mode<synchronous>, transform_indices = @transform_1, window_bounds = array<i64: 2, 1, 128>}, {pipeline_mode = #tpu.pipeline_mode<synchronous>, transform_indices = @transform_2, window_bounds = array<i64: 2, 1, 128>}, {pipeline_mode = #tpu.pipeline_mode<synchronous>, transform_indices = @transform_3, window_bounds = array<i64: 1, 128>}, {pipeline_mode = #tpu.pipeline_mode<synchronous>, transform_indices = @transform_4, window_bounds = array<i64: 1, 128>}, {transform_indices = @transform_5, window_bounds = array<i64: 64, 128>}]} {
    %c0 = arith.constant 0 : index
    %c0_0 = arith.constant 0 : index
    %c0_1 = arith.constant 0 : index
    %0 = vector.load %arg2[%c0, %c0_0, %c0_1] : memref<2x1x128xf32, #tpu.memory_space<vmem>>, vector<2x1x128xf32>
    %cst = arith.constant dense<0.000000e+00> : vector<1x128xf32>
    %1 = vector.multi_reduction <add>, %0, %cst [0] : vector<2x1x128xf32> to vector<1x128xf32>
    %cst_2 = arith.constant 7.812500e-03 : f32
    %2 = vector.broadcast %cst_2 : f32 to vector<1x128xf32>
    %3 = arith.mulf %1, %2 : vector<1x128xf32>
    %c0_3 = arith.constant 0 : index
    %c0_4 = arith.constant 0 : index
    %c0_5 = arith.constant 0 : index
    %4 = vector.load %arg3[%c0_3, %c0_4, %c0_5] : memref<2x1x128xf32, #tpu.memory_space<vmem>>, vector<2x1x128xf32>
    %cst_6 = arith.constant dense<0.000000e+00> : vector<1x128xf32>
    %5 = vector.multi_reduction <add>, %4, %cst_6 [0] : vector<2x1x128xf32> to vector<1x128xf32>
    %cst_7 = arith.constant 7.812500e-03 : f32
    %6 = vector.broadcast %cst_7 : f32 to vector<1x128xf32>
    %7 = arith.mulf %5, %6 : vector<1x128xf32>
    %8 = arith.mulf %3, %3 : vector<1x128xf32>
    %9 = arith.subf %7, %8 : vector<1x128xf32>
    %c0_8 = arith.constant 0 : index
    %c0_9 = arith.constant 0 : index
    %10 = vector.load %arg4[%c0_8, %c0_9] : memref<1x128xf32, #tpu.memory_space<vmem>>, vector<1x128xf32>
    %cst_10 = arith.constant 9.99999974E-6 : f32
    %11 = vector.broadcast %cst_10 : f32 to vector<1x128xf32>
    %12 = arith.addf %9, %11 : vector<1x128xf32>
    %13 = math.rsqrt %12 : vector<1x128xf32>
    %14 = arith.mulf %10, %13 : vector<1x128xf32>
    %c0_11 = arith.constant 0 : index
    %c0_12 = arith.constant 0 : index
    %15 = vector.load %arg5[%c0_11, %c0_12] : memref<1x128xf32, #tpu.memory_space<vmem>>, vector<1x128xf32>
    %16 = arith.mulf %3, %14 : vector<1x128xf32>
    %17 = arith.subf %15, %16 : vector<1x128xf32>
    %c0_13 = arith.constant 0 : index
    %c0_14 = arith.constant 0 : index
    %18 = vector.load %arg1[%c0_13, %c0_14] : memref<64x128xbf16, #tpu.memory_space<vmem>>, vector<64x128xbf16>
    %19 = arith.extf %18 : vector<64x128xbf16> to vector<64x128xf32>
    %20 = vector.broadcast %14 : vector<1x128xf32> to vector<64x128xf32>
    %21 = arith.mulf %19, %20 : vector<64x128xf32>
    %22 = vector.broadcast %17 : vector<1x128xf32> to vector<64x128xf32>
    %23 = arith.addf %21, %22 : vector<64x128xf32>
    %cst_15 = arith.constant 0.000000e+00 : f32
    %24 = vector.broadcast %cst_15 : f32 to vector<64x128xf32>
    %25 = arith.cmpf oge, %23, %24 : vector<64x128xf32>
    %cst_16 = arith.constant 2.000000e-01 : f32
    %26 = vector.broadcast %cst_16 : f32 to vector<64x128xf32>
    %27 = arith.mulf %26, %23 : vector<64x128xf32>
    %28 = arith.select %25, %23, %27 : vector<64x128xi1>, vector<64x128xf32>
    %29 = arith.truncf %28 : vector<64x128xf32> to vector<64x128xbf16>
    %c0_17 = arith.constant 0 : index
    %c0_18 = arith.constant 0 : index
    %30 = vector.load %arg6[%c0_17, %c0_18] : memref<64x128xbf16, #tpu.memory_space<vmem>>, vector<64x128xbf16>
    tpu.vector_store %arg6[%c0_17, %c0_18], %29 {strides = array<i32>} : memref<64x128xbf16, #tpu.memory_space<vmem>>, vector<64x128xbf16>,
    return
  }
  func.func @transform_0(%arg0: i32) -> (i32, i32) {
    %c0_i32 = arith.constant 0 : i32
    %c0_i32_0 = arith.constant 0 : i32
    return %arg0, %c0_i32 : i32, i32
  }
  func.func @transform_1(%arg0: i32) -> (i32, i32, i32) {
    %c0_i32 = arith.constant 0 : i32
    %c0_i32_0 = arith.constant 0 : i32
    %c0_i32_1 = arith.constant 0 : i32
    %c0_i32_2 = arith.constant 0 : i32
    return %c0_i32, %c0_i32_0, %c0_i32_1 : i32, i32, i32
  }
  func.func @transform_2(%arg0: i32) -> (i32, i32, i32) {
    %c0_i32 = arith.constant 0 : i32
    %c0_i32_0 = arith.constant 0 : i32
    %c0_i32_1 = arith.constant 0 : i32
    %c0_i32_2 = arith.constant 0 : i32
    return %c0_i32, %c0_i32_0, %c0_i32_1 : i32, i32, i32
  }
  func.func @transform_3(%arg0: i32) -> (i32, i32) {
    %c0_i32 = arith.constant 0 : i32
    %c0_i32_0 = arith.constant 0 : i32
    %c0_i32_1 = arith.constant 0 : i32
    return %c0_i32, %c0_i32_0 : i32, i32
  }
  func.func @transform_4(%arg0: i32) -> (i32, i32) {
    %c0_i32 = arith.constant 0 : i32
    %c0_i32_0 = arith.constant 0 : i32
    %c0_i32_1 = arith.constant 0 : i32
    return %c0_i32, %c0_i32_0 : i32, i32
  }
  func.func @transform_5(%arg0: i32) -> (i32, i32) {
    %c0_i32 = arith.constant 0 : i32
    %c0_i32_0 = arith.constant 0 : i32
    return %arg0, %c0_i32 : i32, i32
  }
}

module attributes {stable_mosaic.version = 11 : i64} {
  func.func @_mm_kernel_nk1(%arg0: i32, %arg1: memref<8x4096xbf16, #tpu.memory_space<vmem>>, %arg2: memref<4096x128xbf16, #tpu.memory_space<vmem>>, %arg3: memref<1x128xf32, #tpu.memory_space<vmem>>, %arg4: memref<8x128xf32, #tpu.memory_space<vmem>>) attributes {dimension_semantics = [#tpu.dimension_semantics<parallel>], iteration_bounds = array<i64: 1>, scalar_prefetch = 0 : i64, scratch_operands = 0 : i64, tpu.core_type = #tpu.core_type<tc>, window_params = [{transform_indices = @transform_0, window_bounds = array<i64: 8, 4096>}, {pipeline_mode = #tpu.pipeline_mode<synchronous>, transform_indices = @transform_1, window_bounds = array<i64: 4096, 128>}, {pipeline_mode = #tpu.pipeline_mode<synchronous>, transform_indices = @transform_2, window_bounds = array<i64: 1, 128>}, {transform_indices = @transform_3, window_bounds = array<i64: 8, 128>}]} {
    %c0 = arith.constant 0 : index
    %c0_0 = arith.constant 0 : index
    %0 = vector.load %arg1[%c0, %c0_0] : memref<8x4096xbf16, #tpu.memory_space<vmem>>, vector<8x4096xbf16>
    %c0_1 = arith.constant 0 : index
    %c0_2 = arith.constant 0 : index
    %1 = vector.load %arg2[%c0_1, %c0_2] : memref<4096x128xbf16, #tpu.memory_space<vmem>>, vector<4096x128xbf16>
    %cst = arith.constant dense<0.000000e+00> : vector<8x128xf32>
    %2 = tpu.matmul %0, %1, %cst {dimension_numbers = #tpu.dot_dimension_numbers<[1], [0], [0], [1], [0, 0, 1, 1], [], []>} : vector<8x4096xbf16>, vector<4096x128xbf16>, vector<8x128xf32> -> vector<8x128xf32>
    %c0_3 = arith.constant 0 : index
    %c0_4 = arith.constant 0 : index
    %3 = vector.load %arg3[%c0_3, %c0_4] : memref<1x128xf32, #tpu.memory_space<vmem>>, vector<1x128xf32>
    %4 = vector.broadcast %3 : vector<1x128xf32> to vector<8x128xf32>
    %5 = arith.addf %2, %4 : vector<8x128xf32>
    %c0_5 = arith.constant 0 : index
    %c0_6 = arith.constant 0 : index
    %6 = vector.load %arg4[%c0_5, %c0_6] : memref<8x128xf32, #tpu.memory_space<vmem>>, vector<8x128xf32>
    tpu.vector_store %arg4[%c0_5, %c0_6], %5 {strides = array<i32>} : memref<8x128xf32, #tpu.memory_space<vmem>>, vector<8x128xf32>,
    return
  }
  func.func @transform_0(%arg0: i32) -> (i32, i32) {
    %c0_i32 = arith.constant 0 : i32
    %c0_i32_0 = arith.constant 0 : i32
    return %arg0, %c0_i32 : i32, i32
  }
  func.func @transform_1(%arg0: i32) -> (i32, i32) {
    %c0_i32 = arith.constant 0 : i32
    %c0_i32_0 = arith.constant 0 : i32
    %c0_i32_1 = arith.constant 0 : i32
    return %c0_i32, %c0_i32_0 : i32, i32
  }
  func.func @transform_2(%arg0: i32) -> (i32, i32) {
    %c0_i32 = arith.constant 0 : i32
    %c0_i32_0 = arith.constant 0 : i32
    %c0_i32_1 = arith.constant 0 : i32
    return %c0_i32, %c0_i32_0 : i32, i32
  }
  func.func @transform_3(%arg0: i32) -> (i32, i32) {
    %c0_i32 = arith.constant 0 : i32
    %c0_i32_0 = arith.constant 0 : i32
    return %arg0, %c0_i32 : i32, i32
  }
}

</mosaic_0001>

<bundles_post_ra>
// kernel: forward.11
= control target key start
LH: loop header
LB: loop body
LE: loop exit
PB: predicated region body
PF: predicated region fallthrough
CT: control target
= control target key end

     0   :  { %s2208_s18 = smov 0   ;;  %s2735_s0 = inlined_call_operand.vmem [shape: bf16[2048,256], index: 0, kind: input, shape index: {}]   ;;  %s2736_s1 = inlined_call_operand.vmem [shape: bf16[256,128], index: 1, kind: input, shape index: {}]   ;;  %s2737_s2 = inlined_call_operand.vmem [shape: f32[1,128], index: 2, kind: input, shape index: {}]   ;;  %s2738_s3 = inlined_call_operand.vmem [shape: bf16[2048,128], index: 3, kind: output, shape index: {0}]   ;;  %s2739_s4 = inlined_call_operand.vmem [shape: f32[4,1,128], index: 4, kind: output, shape index: {1}]   ;;  %s2740_s5 = inlined_call_operand.vmem [shape: f32[4,1,128], index: 5, kind: output, shape index: {2}]  }
   0x1 LB: > { %s2214_s19 = sadd.s32 4294967295, %s2176_s18   ;;  %p1544_p0 = scmp.ge.s32.totalorder %s2176_s18, 1  ;;  %s2176_s18 = sphi %s2208_s18, %s16_s18  }
   0x2   : > { %p194_p1 = scmp.lt.s32.totalorder %s2176_s18, 5 }
   0x4   : > { %p195_p2 = pnand %p1544_p0, %p194_p1 }
   0x5   : > { %s1545_s7 = sshll.u32 (!%p195_p2), %s2214_s19, 6  ;;  %p242_p4 = scmp.lt.s32.totalorder (!%p195_p2), %s2214_s19, 3 }
   0x6   : > { %198 = sbr.rel (%p195_p2) target bundleno = 502 (0x1f6), region = 32  ;;  %p230_p3 = scmp.lt.s32.totalorder (!%p195_p2), %s1545_s7, 255 }
   0xb   : > { %v1944_v0 = vld [vmem:[%s2736_s1 + $0x38] sm:$0xff]  ;;  %v1943_v2 = vld [vmem:[%s2736_s1 + $0x30] sm:$0xff]  ;;  %v1942_v4 = vld [vmem:[%s2736_s1 + $0x28] sm:$0xff]  ;;  %s2742_s7 = smov (!%p230_p3, %s1545_s7), 255  ;;  %s2744_s19 = smov (!%p242_p4, %s2214_s19), 3 }
   0xc   : > { %v1952_v1 = vld [vmem:[%s2736_s1 + $0x78] sm:$0xff]  ;;  %764 = vmatpush.bf16.msra.mxu0 %v1944_v0  ;;  %v1951_v3 = vld [vmem:[%s2736_s1 + $0x70] sm:$0xff]  ;;  %2144 = vmatpush.bf16.msra.mxu2 %v1944_v0  ;;  %v1950_v5 = vld [vmem:[%s2736_s1 + $0x68] sm:$0xff]  ;;  %s1872_s22 = sshll.u32 %s2742_s7, 3  ;;  %s1549_s12 = sshll.u32 %s2742_s7, 2 }
   0xd   : > { %933 = vmatpush.bf16.msra.mxu1 %v1952_v1  ;;  %2152 = vmatpush.bf16.msra.mxu3 %v1952_v1  ;;  %v1941_v6 = vld [vmem:[%s2736_s1 + $0x20] sm:$0xff]  ;;  %v1940_v8 = vld [vmem:[%s2736_s1 + $0x18] sm:$0xff]  ;;  %v1939_v10 = vld [vmem:[%s2736_s1 + $0x10] sm:$0xff]  ;;  %s2267_s29 = scalar_lea.vmem %s2735_s0, %s1872_s22  ;;  %s2355_s15 = scalar_lea.vmem %s2738_s3, %s1549_s12 }
   0xe   : > { %v1949_v7 = vld [vmem:[%s2736_s1 + $0x60] sm:$0xff]  ;;  %v1948_v9 = vld [vmem:[%s2736_s1 + $0x58] sm:$0xff]  ;;  %v1947_v11 = vld [vmem:[%s2736_s1 + $0x50] sm:$0xff]  ;;  %s244_s21 = scalar_lea.vmem %s2739_s4, %s2744_s19  ;;  %s247_s24 = scalar_lea.vmem %s2740_s5, %s2744_s19 }
   0xf   : > { %v1938_v12 = vld [vmem:[%s2736_s1 + $0x8] sm:$0xff]  ;;  %v1937_v14 = vld [vmem:[%s2736_s1] sm:$0xff]  ;;  %v1560_v22 = vld [vmem:[%s2267_s29 + $0x10] sm:$0xf] }
  0x10   : > { %765 = vmatpush.bf16.msra.mxu0 %v1943_v2  ;;  %2145 = vmatpush.bf16.msra.mxu2 %v1943_v2  ;;  %v1946_v13 = vld [vmem:[%s2736_s1 + $0x48] sm:$0xff]  ;;  %v1945_v15 = vld [vmem:[%s2736_s1 + $0x40] sm:$0xff]  ;;  %v1876_v23 = vld [vmem:[%s2267_s29 + $0x14] sm:$0xf0] }
  0x11   : > { %934 = vmatpush.bf16.msra.mxu1 %v1951_v3  ;;  %2153 = vmatpush.bf16.msra.mxu3 %v1951_v3  ;;  %v1552_v16 = vld [vmem:[%s2267_s29] sm:$0xf]  ;;  %v1874_v17 = vld [vmem:[%s2267_s29 + $0x4] sm:$0xf0]  ;;  %v1873_v18 = vld [vmem:[%s2267_s29 + $0x4] sm:$0xf]  ;;  %v1561_v26 = vor.u32 %v1876_v23, %v1560_v22 }
  0x12   : > { %v1554_v19 = vld [vmem:[%s2267_s29 + $0x8] sm:$0xf0]  ;;  %v1553_v20 = vor.u32 %v1874_v17, %v1552_v16  ;;  %v1875_v24 = vld [vmem:[%s2267_s29 + $0x14] sm:$0xf]  ;;  %v1562_v25 = vld [vmem:[%s2267_s29 + $0x18] sm:$0xf0] }
  0x13   : > { %v1557_v21 = vor.u32 %v1873_v18, %v1554_v19  ;;  %v1565_v27 = vor.u32 %v1875_v24, %v1562_v25  ;;  %v1680_v28 = vld [vmem:[%s2267_s29 + $0x100] sm:$0xf]  ;;  %v1906_v29 = vld [vmem:[%s2267_s29 + $0x104] sm:$0xf0]  ;;  %v1905_v31 = vld [vmem:[%s2267_s29 + $0x104] sm:$0xf] }
  0x14   : > { %766 = vmatpush.bf16.msra.mxu0 %v1942_v4  ;;  %2146 = vmatpush.bf16.msra.mxu2 %v1942_v4  ;;  %v1681_v30 = vor.u32 %v1906_v29, %v1680_v28  ;;  %v1682_v32 = vld [vmem:[%s2267_s29 + $0x108] sm:$0xf0]  ;;  %v1568_v34 = vld [vmem:[%s2267_s29 + $0x20] sm:$0xf]  ;;  %v1878_v35 = vld [vmem:[%s2267_s29 + $0x24] sm:$0xf0] }
  0x15   : > { %935 = vmatpush.bf16.msra.mxu1 %v1950_v5  ;;  %2154 = vmatpush.bf16.msra.mxu3 %v1950_v5  ;;  %v1685_v33 = vor.u32 %v1905_v31, %v1682_v32  ;;  %v1877_v36 = vld [vmem:[%s2267_s29 + $0x24] sm:$0xf]  ;;  %v1570_v37 = vld [vmem:[%s2267_s29 + $0x28] sm:$0xf0]  ;;  %v1569_v38 = vor.u32 %v1878_v35, %v1568_v34  ;;  %v1688_v40 = vld [vmem:[%s2267_s29 + $0x110] sm:$0xf] }
  0x16   : > { %v1573_v39 = vor.u32 %v1877_v36, %v1570_v37  ;;  %v1908_v41 = vld [vmem:[%s2267_s29 + $0x114] sm:$0xf0]  ;;  %v1907_v43 = vld [vmem:[%s2267_s29 + $0x114] sm:$0xf]  ;;  %v1690_v44 = vld [vmem:[%s2267_s29 + $0x118] sm:$0xf0] }
  0x17   : > { %v1689_v42 = vor.u32 %v1908_v41, %v1688_v40  ;;  %v1693_v45 = vor.u32 %v1907_v43, %v1690_v44  ;;  %v1576_v46 = vld [vmem:[%s2267_s29 + $0x30] sm:$0xf]  ;;  %v1880_v47 = vld [vmem:[%s2267_s29 + $0x34] sm:$0xf0]  ;;  %v1879_v48 = vld [vmem:[%s2267_s29 + $0x34] sm:$0xf] }
  0x18   : > { %767 = vmatpush.bf16.msra.mxu0 %v1941_v6  ;;  %2147 = vmatpush.bf16.msra.mxu2 %v1941_v6  ;;  %v1578_v49 = vld [vmem:[%s2267_s29 + $0x38] sm:$0xf0]  ;;  %v1577_v50 = vor.u32 %v1880_v47, %v1576_v46  ;;  %v1696_v52 = vld [vmem:[%s2267_s29 + $0x120] sm:$0xf]  ;;  %v1910_v53 = vld [vmem:[%s2267_s29 + $0x124] sm:$0xf0] }
  0x19   : > { %936 = vmatpush.bf16.msra.mxu1 %v1949_v7  ;;  %2155 = vmatpush.bf16.msra.mxu3 %v1949_v7  ;;  %v1581_v51 = vor.u32 %v1879_v48, %v1578_v49  ;;  %v1697_v54 = vor.u32 %v1910_v53, %v1696_v52  ;;  %v1909_v55 = vld [vmem:[%s2267_s29 + $0x124] sm:$0xf]  ;;  %v1698_v56 = vld [vmem:[%s2267_s29 + $0x128] sm:$0xf0]  ;;  %v1584_v58 = vld [vmem:[%s2267_s29 + $0x40] sm:$0xf] }
  0x1a   : > { %v1701_v57 = vor.u32 %v1909_v55, %v1698_v56  ;;  %v1882_v59 = vld [vmem:[%s2267_s29 + $0x44] sm:$0xf0]  ;;  %v1881_v60 = vld [vmem:[%s2267_s29 + $0x44] sm:$0xf]  ;;  %v1586_v61 = vld [vmem:[%s2267_s29 + $0x48] sm:$0xf0] }
  0x1b   : > { %v1585_v62 = vor.u32 %v1882_v59, %v1584_v58  ;;  %v1589_v63 = vor.u32 %v1881_v60, %v1586_v61  ;;  %v1704_v0 = vld [vmem:[%s2267_s29 + $0x130] sm:$0xf]  ;;  %v1912_v1 = vld [vmem:[%s2267_s29 + $0x134] sm:$0xf0]  ;;  %v1911_v3 = vld [vmem:[%s2267_s29 + $0x134] sm:$0xf] }
  0x1c   : > { %768 = vmatpush.bf16.msra.mxu0 %v1940_v8  ;;  %2148 = vmatpush.bf16.msra.mxu2 %v1940_v8  ;;  %v1705_v2 = vor.u32 %v1912_v1, %v1704_v0  ;;  %v1706_v4 = vld [vmem:[%s2267_s29 + $0x138] sm:$0xf0]  ;;  %v1592_v6 = vld [vmem:[%s2267_s29 + $0x50] sm:$0xf]  ;;  %v1884_v7 = vld [vmem:[%s2267_s29 + $0x54] sm:$0xf0] }
  0x1d   : > { %937 = vmatpush.bf16.msra.mxu1 %v1948_v9  ;;  %2156 = vmatpush.bf16.msra.mxu3 %v1948_v9  ;;  %v1709_v5 = vor.u32 %v1911_v3, %v1706_v4  ;;  %v1883_v8 = vld [vmem:[%s2267_s29 + $0x54] sm:$0xf]  ;;  %v1594_v9 = vld [vmem:[%s2267_s29 + $0x58] sm:$0xf0]  ;;  %v1714_v16 = vld [vmem:[%s2267_s29 + $0x148] sm:$0xf0] }
  0x1e   : > { %v1600_v18 = vld [vmem:[%s2267_s29 + $0x60] sm:$0xf]  ;;  %v1886_v19 = vld [vmem:[%s2267_s29 + $0x64] sm:$0xf0]  ;;  %v1720_v24 = vld [vmem:[%s2267_s29 + $0x150] sm:$0xf] }
  0x1f   : > { %v1601_v22 = vor.u32 %v1886_v19, %v1600_v18  ;;  %v1916_v25 = vld [vmem:[%s2267_s29 + $0x154] sm:$0xf0]  ;;  %v1722_v28 = vld [vmem:[%s2267_s29 + $0x158] sm:$0xf0]  ;;  %v1887_v32 = vld [vmem:[%s2267_s29 + $0x74] sm:$0xf] }
  0x20   : > { %769 = vmatpush.bf16.msra.mxu0 %v1939_v10  ;;  %2149 = vmatpush.bf16.msra.mxu2 %v1939_v10  ;;  %v1593_v10 = vor.u32 %v1884_v7, %v1592_v6  ;;  %v1888_v31 = vld [vmem:[%s2267_s29 + $0x74] sm:$0xf0]  ;;  %v1728_v36 = vld [vmem:[%s2267_s29 + $0x160] sm:$0xf]  ;;  %v1918_v37 = vld [vmem:[%s2267_s29 + $0x164] sm:$0xf0] }
  0x21   : > { %938 = vmatpush.bf16.msra.mxu1 %v1947_v11  ;;  %2157 = vmatpush.bf16.msra.mxu3 %v1947_v11  ;;  %v1597_v11 = vor.u32 %v1883_v8, %v1594_v9  ;;  %v1730_v40 = vld [vmem:[%s2267_s29 + $0x168] sm:$0xf0]  ;;  %v1890_v43 = vld [vmem:[%s2267_s29 + $0x84] sm:$0xf0]  ;;  %v1889_v44 = vld [vmem:[%s2267_s29 + $0x84] sm:$0xf] }
  0x22   : > { %v1920_v52 = vld [vmem:[%s2267_s29 + $0x174] sm:$0xf0]  ;;  %v1738_v55 = vld [vmem:[%s2267_s29 + $0x178] sm:$0xf0]  ;;  %v1891_v1 = vld [vmem:[%s2267_s29 + $0x94] sm:$0xf] }
  0x23   : > { %v1892_v0 = vld [vmem:[%s2267_s29 + $0x94] sm:$0xf0]  ;;  %v1746_v18 = vld [vmem:[%s2267_s29 + $0x188] sm:$0xf0] }
  0x24   : > { %770 = vmatpush.bf16.msra.mxu0 %v1938_v12  ;;  %2150 = vmatpush.bf16.msra.mxu2 %v1938_v12  ;;  %v1712_v12 = vld [vmem:[%s2267_s29 + $0x140] sm:$0xf] }
  0x25   : > { %939 = vmatpush.bf16.msra.mxu1 %v1946_v13  ;;  %2158 = vmatpush.bf16.msra.mxu3 %v1946_v13  ;;  %v1914_v13 = vld [vmem:[%s2267_s29 + $0x144] sm:$0xf0] }
  0x28   : > { %771 = vmatpush.bf16.msra.mxu0 %v1937_v14  ;;  %2151 = vmatpush.bf16.msra.mxu2 %v1937_v14  ;;  %v1713_v14 = vor.u32 %v1914_v13, %v1712_v12  ;;  %v1744_v13 = vld [vmem:[%s2267_s29 + $0x180] sm:$0xf] }
  0x29   : > { %940 = vmatpush.bf16.msra.mxu1 %v1945_v15  ;;  %2159 = vmatpush.bf16.msra.mxu3 %v1945_v15  ;;  %v1913_v15 = vld [vmem:[%s2267_s29 + $0x144] sm:$0xf] }
  0x2a   : > { %v1717_v17 = vor.u32 %v1913_v15, %v1714_v16 }
  0x2b   : > { %772 = vmatmul.bf16.vlgmr.msra.gmra.mxu0 %v1553_v20  ;;  %852 = vmatmul.bf16.vlgmr.msra.gmra.mxu2 %v1681_v30  ;;  %v1885_v20 = vld [vmem:[%s2267_s29 + $0x64] sm:$0xf]  ;;  %v1608_v30 = vld [vmem:[%s2267_s29 + $0x70] sm:$0xf] }
  0x2c   : > { %941 = vmatmul.bf16.vlgmr.msra.gmra.mxu1 %v1557_v21  ;;  %1021 = vmatmul.bf16.vlgmr.msra.gmra.mxu3 %v1685_v33  ;;  %v1602_v21 = vld [vmem:[%s2267_s29 + $0x68] sm:$0xf0]  ;;  %v1610_v33 = vld [vmem:[%s2267_s29 + $0x78] sm:$0xf0]  ;;  %v1609_v34 = vor.u32 %v1888_v31, %v1608_v30  ;;  %v1894_v30 = vld [vmem:[%s2267_s29 + $0xa4] sm:$0xf0] }
  0x2d   : > { %v1605_v23 = vor.u32 %v1885_v20, %v1602_v21  ;;  %v1613_v35 = vor.u32 %v1887_v32, %v1610_v33  ;;  %v1893_v31 = vld [vmem:[%s2267_s29 + $0xa4] sm:$0xf]  ;;  %v1634_v32 = vld [vmem:[%s2267_s29 + $0xa8] sm:$0xf0] }
  0x3b   : > { %777 = vmatmul.bf16.gmra.mxu0 %v1561_v26  ;;  %857 = vmatmul.bf16.gmra.mxu2 %v1689_v42  ;;  %v1721_v26 = vor.u32 %v1916_v25, %v1720_v24  ;;  %v1616_v42 = vld [vmem:[%s2267_s29 + $0x80] sm:$0xf] }
  0x3c   : > { %946 = vmatmul.bf16.gmra.mxu1 %v1565_v27  ;;  %1026 = vmatmul.bf16.gmra.mxu3 %v1693_v45  ;;  %v1915_v27 = vld [vmem:[%s2267_s29 + $0x154] sm:$0xf]  ;;  %v1618_v45 = vld [vmem:[%s2267_s29 + $0x88] sm:$0xf0]  ;;  %v1617_v46 = vor.u32 %v1890_v43, %v1616_v42 }
  0x3d   : > { %v1725_v29 = vor.u32 %v1915_v27, %v1722_v28  ;;  %v1621_v47 = vor.u32 %v1889_v44, %v1618_v45 }
  0x4b   : > { %782 = vmatmul.bf16.gmra.mxu0 %v1569_v38  ;;  %862 = vmatmul.bf16.gmra.mxu2 %v1697_v54  ;;  %v1729_v38 = vor.u32 %v1918_v37, %v1728_v36  ;;  %v1919_v54 = vld [vmem:[%s2267_s29 + $0x174] sm:$0xf] }
  0x4c   : > { %951 = vmatmul.bf16.gmra.mxu1 %v1573_v39  ;;  %1031 = vmatmul.bf16.gmra.mxu3 %v1701_v57  ;;  %v1917_v39 = vld [vmem:[%s2267_s29 + $0x164] sm:$0xf]  ;;  %v1741_v57 = vor.u32 %v1919_v54, %v1738_v55  ;;  %v1754_v54 = vld [vmem:[%s2267_s29 + $0x198] sm:$0xf0] }
  0x4d   : > { %v1733_v41 = vor.u32 %v1917_v39, %v1730_v40  ;;  %v1637_v39 = vor.u32 %v1893_v31, %v1634_v32 }
  0x5b   : > { %787 = vmatmul.bf16.gmra.mxu0 %v1577_v50  ;;  %867 = vmatmul.bf16.gmra.mxu2 %v1705_v2  ;;  %v2342_v50 = vld [vmem:[%s2737_s2] ss:$0 sm:$0xff]  ;;  %v1626_v2 = vld [vmem:[%s2267_s29 + $0x98] sm:$0xf0] }
  0x5c   : > { %956 = vmatmul.bf16.gmra.mxu1 %v1581_v51  ;;  %1036 = vmatmul.bf16.gmra.mxu3 %v1709_v5  ;;  %v1736_v51 = vld [vmem:[%s2267_s29 + $0x170] sm:$0xf]  ;;  %v1629_v9 = vor.u32 %v1891_v1, %v1626_v2 }
  0x5d   : > { %v1737_v53 = vor.u32 %v1920_v52, %v1736_v51  ;;  %v1640_v2 = vld [vmem:[%s2267_s29 + $0xb0] sm:$0xf] }
  0x6b   : > { %792 = vmatmul.bf16.gmra.mxu0 %v1585_v62  ;;  %872 = vmatmul.bf16.gmra.mxu2 %v1713_v14  ;;  %v1922_v14 = vld [vmem:[%s2267_s29 + $0x184] sm:$0xf0] }
  0x6c   : > { %961 = vmatmul.bf16.gmra.mxu1 %v1589_v63  ;;  %1041 = vmatmul.bf16.gmra.mxu3 %v1717_v17  ;;  %v1624_v63 = vld [vmem:[%s2267_s29 + $0x90] sm:$0xf]  ;;  %v1745_v16 = vor.u32 %v1922_v14, %v1744_v13  ;;  %v1921_v17 = vld [vmem:[%s2267_s29 + $0x184] sm:$0xf] }
  0x6d   : > { %v1625_v8 = vor.u32 %v1892_v0, %v1624_v63  ;;  %v1749_v21 = vor.u32 %v1921_v17, %v1746_v18 }
  0x7b   : > { %797 = vmatmul.bf16.gmra.mxu0 %v1593_v10  ;;  %877 = vmatmul.bf16.gmra.mxu2 %v1721_v26 }
  0x7c   : > { %966 = vmatmul.bf16.gmra.mxu1 %v1597_v11  ;;  %1046 = vmatmul.bf16.gmra.mxu3 %v1725_v29  ;;  %v1632_v29 = vld [vmem:[%s2267_s29 + $0xa0] sm:$0xf] }
  0x8b   : > { %802 = vmatmul.bf16.gmra.mxu0 %v1601_v22  ;;  %882 = vmatmul.bf16.gmra.mxu2 %v1729_v38  ;;  %v1633_v38 = vor.u32 %v1894_v30, %v1632_v29 }
  0x8c   : > { %971 = vmatmul.bf16.gmra.mxu1 %v1605_v23  ;;  %1051 = vmatmul.bf16.gmra.mxu3 %v1733_v41 }
  0x9b   : > { %807 = vmatmul.bf16.gmra.mxu0 %v1609_v34  ;;  %887 = vmatmul.bf16.gmra.mxu2 %v1737_v53  ;;  %v1923_v53 = vld [vmem:[%s2267_s29 + $0x194] sm:$0xf] }
  0x9c   : > { %976 = vmatmul.bf16.gmra.mxu1 %v1613_v35  ;;  %1056 = vmatmul.bf16.gmra.mxu3 %v1741_v57  ;;  %v1757_v57 = vor.u32 %v1923_v53, %v1754_v54 }
  0xa8   : > { %v773_v48 = vpop.f32.mrf.mxu0 }
  0xa9   : > { %v942_v49 = vpop.f32.mrf.mxu1  ;;  %v774_v56 = vadd.f32 %v2342_v50, %v773_v48  ;;  %v1924_v48 = vld [vmem:[%s2267_s29 + $0x194] sm:$0xf0] }
  0xab   : > { %812 = vmatmul.bf16.gmra.mxu0 %v1617_v46  ;;  %v943_v60 = vadd.f32 %v942_v49, %v774_v56  ;;  %892 = vmatmul.bf16.gmra.mxu2 %v1745_v16 }
  0xac   : > { %981 = vmatmul.bf16.gmra.mxu1 %v1621_v47  ;;  %1061 = vmatmul.bf16.gmra.mxu3 %v1749_v21  ;;  %v1752_v47 = vld [vmem:[%s2267_s29 + $0x190] sm:$0xf]  ;;  %v1926_v21 = vld [vmem:[%s2267_s29 + $0x1a4] sm:$0xf0] }
  0xad   : > { %v1172_v3 = vmul.f32 %v943_v60, %v943_v60  ;;  %v1753_v51 = vor.u32 %v1924_v48, %v1752_v47 }
  0xae   : > { %v853_v26 = vpop.f32.mrf.mxu2 }
  0xaf   : > { %v1022_v27 = vpop.f32.mrf.mxu3  ;;  %v854_v36 = vadd.f32 %v2342_v50, %v853_v26  ;;  %v1762_v26 = vld [vmem:[%s2267_s29 + $0x1a8] sm:$0xf0] }
  0xb0   : > { %v775_v58 = vpop.f32.mrf.mxu0 }
  0xb1   : > { %v944_v59 = vpop.f32.mrf.mxu1  ;;  %v776_v61 = vadd.f32 %v2342_v50, %v775_v58  ;;  %v2374_v44 = vadd.f32 %v1022_v27, %v854_v36 }
  0xb3   : > { %v945_v62 = vadd.f32 %v944_v59, %v776_v61 }
  0xb5   : > { %v1102_v4 = vadd.f32 %v945_v62, %v943_v60  ;;  %v1173_v5 = vmul.f32 %v945_v62, %v945_v62  ;;  %v1956_v6 = vpack.c.bf16 %v945_v62, %v943_v60 }
  0xb6   : > { %v855_v43 = vpop.f32.mrf.mxu2 }
  0xb7   : > { %v1236_v7 = vadd.f32 %v1173_v5, %v1172_v3  ;;  %1957 = vst [vmem:[%s2355_s15] sm:$0xff] %v1956_v6   ;;  %v856_v45 = vadd.f32 %v2342_v50, %v855_v43  ;;  %v1024_v46 = vpop.f32.mrf.mxu3  ;;  %v1896_v3 = vld [vmem:[%s2267_s29 + $0xb4] sm:$0xf0]  ;;  %v1642_v5 = vld [vmem:[%s2267_s29 + $0xb8] sm:$0xf0] }
  0xb8   : > { %v778_v10 = vpop.f32.mrf.mxu0 }
  0xb9   : > { %v947_v11 = vpop.f32.mrf.mxu1  ;;  %v779_v12 = vadd.f32 %v2342_v50, %v778_v10  ;;  %v2379_v52 = vadd.f32 %v1024_v46, %v856_v45 }
  0xbb   : > { %v948_v15 = vadd.f32 %v947_v11, %v779_v12  ;;  %817 = vmatmul.bf16.gmra.mxu0 %v1625_v8  ;;  %897 = vmatmul.bf16.gmra.mxu2 %v1753_v51  ;;  %v2036_v58 = vpack.c.bf16 %v2379_v52, %v2374_v44  ;;  %v1641_v11 = vor.u32 %v1896_v3, %v1640_v2 }
  0xbc   : > { %986 = vmatmul.bf16.gmra.mxu1 %v1629_v9  ;;  %1066 = vmatmul.bf16.gmra.mxu3 %v1757_v57 }
  0xbd   : > { %v1103_v19 = vadd.f32 %v1102_v4, %v948_v15  ;;  %v1174_v20 = vmul.f32 %v948_v15, %v948_v15  ;;  %2128 = vst [vmem:[%s2355_s15 + $0x80] sm:$0xff] %v2036_v58   ;;  %v1895_v4 = vld [vmem:[%s2267_s29 + $0xb4] sm:$0xf] }
  0xbe   : > { %v858_v63 = vpop.f32.mrf.mxu2  ;;  %v1645_v12 = vor.u32 %v1895_v4, %v1642_v5 }
  0xbf   : > { %v1237_v22 = vadd.f32 %v1236_v7, %v1174_v20  ;;  %v1027_v0 = vpop.f32.mrf.mxu3  ;;  %v859_v9 = vadd.f32 %v2342_v50, %v858_v63  ;;  %v1760_v20 = vld [vmem:[%s2267_s29 + $0x1a0] sm:$0xf] }
  0xc0   : > { %v780_v23 = vpop.f32.mrf.mxu0 }
  0xc1   : > { %v949_v24 = vpop.f32.mrf.mxu1  ;;  %v781_v25 = vadd.f32 %v2342_v50, %v780_v23  ;;  %v2394_v17 = vadd.f32 %v1027_v0, %v859_v9  ;;  %v1761_v23 = vor.u32 %v1926_v21, %v1760_v20  ;;  %v1927_v0 = vld [vmem:[%s2267_s29 + $0x1b4] sm:$0xf] }
  0xc3   : > { %v950_v28 = vadd.f32 %v949_v24, %v781_v25  ;;  %v1925_v25 = vld [vmem:[%s2267_s29 + $0x1a4] sm:$0xf] }
  0xc4   : > { %v1765_v29 = vor.u32 %v1925_v25, %v1762_v26 }
  0xc5   : > { %v1104_v33 = vadd.f32 %v1103_v19, %v950_v28  ;;  %v1175_v34 = vmul.f32 %v950_v28, %v950_v28  ;;  %v1961_v35 = vpack.c.bf16 %v950_v28, %v948_v15 }
  0xc6   : > { %v860_v16 = vpop.f32.mrf.mxu2 }
  0xc7   : > { %v1238_v37 = vadd.f32 %v1237_v22, %v1175_v34  ;;  %2113 = vst [vmem:[%s2355_s15 + $0x8] sm:$0xff] %v1961_v35   ;;  %v861_v18 = vadd.f32 %v2342_v50, %v860_v16  ;;  %v1029_v19 = vpop.f32.mrf.mxu3  ;;  %v1658_v16 = vld [vmem:[%s2267_s29 + $0xd8] sm:$0xf0] }
  0xc8   : > { %v783_v40 = vpop.f32.mrf.mxu0 }
  0xc9   : > { %v952_v41 = vpop.f32.mrf.mxu1  ;;  %v784_v42 = vadd.f32 %v2342_v50, %v783_v40  ;;  %v2399_v24 = vadd.f32 %v1029_v19, %v861_v18  ;;  %v1897_v40 = vld [vmem:[%s2267_s29 + $0xc4] sm:$0xf] }
  0xcb   : > { %v953_v49 = vadd.f32 %v952_v41, %v784_v42  ;;  %822 = vmatmul.bf16.gmra.mxu0 %v1633_v38  ;;  %902 = vmatmul.bf16.gmra.mxu2 %v1761_v23  ;;  %v2041_v30 = vpack.c.bf16 %v2399_v24, %v2394_v17  ;;  %v1648_v38 = vld [vmem:[%s2267_s29 + $0xc0] sm:$0xf]  ;;  %v1650_v41 = vld [vmem:[%s2267_s29 + $0xc8] sm:$0xf0] }
  0xcc   : > { %991 = vmatmul.bf16.gmra.mxu1 %v1637_v39  ;;  %1071 = vmatmul.bf16.gmra.mxu3 %v1765_v29  ;;  %v1898_v39 = vld [vmem:[%s2267_s29 + $0xc4] sm:$0xf0] }
  0xcd   : > { %v1105_v55 = vadd.f32 %v1104_v33, %v953_v49  ;;  %v1176_v56 = vmul.f32 %v953_v49, %v953_v49  ;;  %2129 = vst [vmem:[%s2355_s15 + $0x88] sm:$0xff] %v2041_v30   ;;  %v1649_v48 = vor.u32 %v1898_v39, %v1648_v38  ;;  %v1929_v38 = vld [vmem:[%s2267_s29 + $0x1c4] sm:$0xf]  ;;  %v1778_v39 = vld [vmem:[%s2267_s29 + $0x1c8] sm:$0xf0] }
  0xce   : > { %v863_v35 = vpop.f32.mrf.mxu2 }
  0xcf   : > { %v1239_v59 = vadd.f32 %v1238_v37, %v1176_v56  ;;  %v1032_v36 = vpop.f32.mrf.mxu3  ;;  %v864_v46 = vadd.f32 %v2342_v50, %v863_v35 }
  0xd0   : > { %v785_v60 = vpop.f32.mrf.mxu0 }
  0xd1   : > { %v954_v61 = vpop.f32.mrf.mxu1  ;;  %v786_v62 = vadd.f32 %v2342_v50, %v785_v60  ;;  %v2414_v56 = vadd.f32 %v1032_v36, %v864_v46  ;;  %v1928_v60 = vld [vmem:[%s2267_s29 + $0x1b4] sm:$0xf0] }
  0xd3   : > { %v955_v1 = vadd.f32 %v954_v61, %v786_v62 }
  0xd5   : > { %v1106_v6 = vadd.f32 %v1105_v55, %v955_v1  ;;  %v1177_v7 = vmul.f32 %v955_v1, %v955_v1  ;;  %v1966_v8 = vpack.c.bf16 %v955_v1, %v953_v49  ;;  %v1653_v49 = vor.u32 %v1897_v40, %v1650_v41  ;;  %v1770_v1 = vld [vmem:[%s2267_s29 + $0x1b8] sm:$0xf0] }
  0xd6   : > { %v865_v55 = vpop.f32.mrf.mxu2  ;;  %v1773_v4 = vor.u32 %v1927_v0, %v1770_v1 }
  0xd7   : > { %v1240_v10 = vadd.f32 %v1239_v59, %v1177_v7  ;;  %2114 = vst [vmem:[%s2355_s15 + $0x10] sm:$0xff] %v1966_v8   ;;  %v866_v57 = vadd.f32 %v2342_v50, %v865_v55  ;;  %v1034_v58 = vpop.f32.mrf.mxu3  ;;  %v1768_v59 = vld [vmem:[%s2267_s29 + $0x1b0] sm:$0xf]  ;;  %v1902_v55 = vld [vmem:[%s2267_s29 + $0xe4] sm:$0xf0] }
  0xd8   : > { %v788_v13 = vpop.f32.mrf.mxu0  ;;  %v1769_v62 = vor.u32 %v1928_v60, %v1768_v59 }
  0xd9   : > { %v957_v14 = vpop.f32.mrf.mxu1  ;;  %v789_v15 = vadd.f32 %v2342_v50, %v788_v13  ;;  %v2419_v63 = vadd.f32 %v1034_v58, %v866_v57  ;;  %v1656_v13 = vld [vmem:[%s2267_s29 + $0xd0] sm:$0xf]  ;;  %v1901_v57 = vld [vmem:[%s2267_s29 + $0xe4] sm:$0xf]  ;;  %v1666_v58 = vld [vmem:[%s2267_s29 + $0xe8] sm:$0xf0] }
  0xdb   : > { %v958_v22 = vadd.f32 %v957_v14, %v789_v15  ;;  %827 = vmatmul.bf16.gmra.mxu0 %v1641_v11  ;;  %907 = vmatmul.bf16.gmra.mxu2 %v1769_v62  ;;  %v2046_v5 = vpack.c.bf16 %v2419_v63, %v2414_v56  ;;  %v1900_v14 = vld [vmem:[%s2267_s29 + $0xd4] sm:$0xf0]  ;;  %v1899_v15 = vld [vmem:[%s2267_s29 + $0xd4] sm:$0xf] }
  0xdc   : > { %996 = vmatmul.bf16.gmra.mxu1 %v1645_v12  ;;  %1076 = vmatmul.bf16.gmra.mxu3 %v1773_v4  ;;  %v1657_v23 = vor.u32 %v1900_v14, %v1656_v13  ;;  %v1661_v25 = vor.u32 %v1899_v15, %v1658_v16  ;;  %v1931_v15 = vld [vmem:[%s2267_s29 + $0x1d4] sm:$0xf]  ;;  %v1786_v16 = vld [vmem:[%s2267_s29 + $0x1d8] sm:$0xf0] }
  0xdd   : > { %v1107_v27 = vadd.f32 %v1106_v6, %v958_v22  ;;  %v1178_v28 = vmul.f32 %v958_v22, %v958_v22  ;;  %2130 = vst [vmem:[%s2355_s15 + $0x90] sm:$0xff] %v2046_v5  }
  0xdf   : > { %v1241_v31 = vadd.f32 %v1240_v10, %v1178_v28  ;;  %v868_v10 = vpop.f32.mrf.mxu2  ;;  %v1037_v11 = vpop.f32.mrf.mxu3 }
  0xe0   : > { %v790_v32 = vpop.f32.mrf.mxu0  ;;  %v869_v21 = vadd.f32 %v2342_v50, %v868_v10  ;;  %v1784_v10 = vld [vmem:[%s2267_s29 + $0x1d0] sm:$0xf] }
  0xe1   : > { %v959_v33 = vpop.f32.mrf.mxu1  ;;  %v791_v34 = vadd.f32 %v2342_v50, %v790_v32 }
  0xe2   : > { %v2434_v30 = vadd.f32 %v1037_v11, %v869_v21  ;;  %v1932_v11 = vld [vmem:[%s2267_s29 + $0x1d4] sm:$0xf0] }
  0xe3   : > { %v960_v37 = vadd.f32 %v959_v33, %v791_v34  ;;  %v1776_v33 = vld [vmem:[%s2267_s29 + $0x1c0] sm:$0xf]  ;;  %v1930_v34 = vld [vmem:[%s2267_s29 + $0x1c4] sm:$0xf0]  ;;  %v1785_v13 = vor.u32 %v1932_v11, %v1784_v10 }
  0xe4   : > { %v1777_v36 = vor.u32 %v1930_v34, %v1776_v33  ;;  %v1903_v33 = vld [vmem:[%s2267_s29 + $0xf4] sm:$0xf]  ;;  %v1674_v34 = vld [vmem:[%s2267_s29 + $0xf8] sm:$0xf0] }
  0xe5   : > { %v1108_v42 = vadd.f32 %v1107_v27, %v960_v37  ;;  %v1179_v43 = vmul.f32 %v960_v37, %v960_v37  ;;  %v1971_v45 = vpack.c.bf16 %v960_v37, %v958_v22 }
  0xe7   : > { %v1242_v47 = vadd.f32 %v1241_v31, %v1179_v43  ;;  %2115 = vst [vmem:[%s2355_s15 + $0x18] sm:$0xff] %v1971_v45   ;;  %v870_v29 = vpop.f32.mrf.mxu2  ;;  %v1039_v32 = vpop.f32.mrf.mxu3 }
  0xe8   : > { %v793_v51 = vpop.f32.mrf.mxu0  ;;  %v871_v31 = vadd.f32 %v2342_v50, %v870_v29 }
  0xe9   : > { %v962_v53 = vpop.f32.mrf.mxu1  ;;  %v794_v54 = vadd.f32 %v2342_v50, %v793_v51 }
  0xea   : > { %v2439_v37 = vadd.f32 %v1039_v32, %v871_v31  ;;  %v1672_v31 = vld [vmem:[%s2267_s29 + $0xf0] sm:$0xf]  ;;  %v1904_v32 = vld [vmem:[%s2267_s29 + $0xf4] sm:$0xf0] }
  0xeb   : > { %v963_v61 = vadd.f32 %v962_v53, %v794_v54  ;;  %832 = vmatmul.bf16.gmra.mxu0 %v1649_v48  ;;  %912 = vmatmul.bf16.gmra.mxu2 %v1777_v36  ;;  %v1664_v54 = vld [vmem:[%s2267_s29 + $0xe0] sm:$0xf] }
  0xec   : > { %1001 = vmatmul.bf16.gmra.mxu1 %v1653_v49  ;;  %v2051_v43 = vpack.c.bf16 %v2439_v37, %v2434_v30  ;;  %v1665_v1 = vor.u32 %v1902_v55, %v1664_v54  ;;  %v1934_v54 = vld [vmem:[%s2267_s29 + $0x1e4] sm:$0xf0] }
  0xed   : > { %v1109_v2 = vadd.f32 %v1108_v42, %v963_v61  ;;  %v1180_v3 = vmul.f32 %v963_v61, %v963_v61  ;;  %v1781_v42 = vor.u32 %v1929_v38, %v1778_v39 }
  0xee   : > { %2131 = vst [vmem:[%s2355_s15 + $0x98] sm:$0xff] %v2051_v43  }
  0xef   : > { %v1243_v6 = vadd.f32 %v1242_v47, %v1180_v3  ;;  %1081 = vmatmul.bf16.gmra.mxu3 %v1781_v42  ;;  %v873_v49 = vpop.f32.mrf.mxu2  ;;  %v1042_v51 = vpop.f32.mrf.mxu3  ;;  %v1677_v42 = vor.u32 %v1903_v33, %v1674_v34 }
  0xf0   : > { %v795_v7 = vpop.f32.mrf.mxu0  ;;  %v874_v62 = vadd.f32 %v2342_v50, %v873_v49 }
  0xf1   : > { %v964_v8 = vpop.f32.mrf.mxu1  ;;  %v796_v9 = vadd.f32 %v2342_v50, %v795_v7 }
  0xf2   : > { %v2454_v7 = vadd.f32 %v1042_v51, %v874_v62 }
  0xf3   : > { %v965_v12 = vadd.f32 %v964_v8, %v796_v9 }
  0xf5   : > { %v1110_v18 = vadd.f32 %v1109_v2, %v965_v12  ;;  %v1181_v19 = vmul.f32 %v965_v12, %v965_v12  ;;  %v1976_v20 = vpack.c.bf16 %v965_v12, %v963_v61  ;;  %v1669_v2 = vor.u32 %v1901_v57, %v1666_v58 }
  0xf7   : > { %v1244_v22 = vadd.f32 %v1243_v6, %v1181_v19  ;;  %2116 = vst [vmem:[%s2355_s15 + $0x20] sm:$0xff] %v1976_v20   ;;  %v875_v6 = vpop.f32.mrf.mxu2  ;;  %v1044_v9 = vpop.f32.mrf.mxu3  ;;  %v1789_v20 = vor.u32 %v1931_v15, %v1786_v16 }
  0xf8   : > { %v798_v26 = vpop.f32.mrf.mxu0  ;;  %v876_v8 = vadd.f32 %v2342_v50, %v875_v6 }
  0xf9   : > { %v967_v27 = vpop.f32.mrf.mxu1  ;;  %v799_v28 = vadd.f32 %v2342_v50, %v798_v26 }
  0xfa   : > { %v2459_v14 = vadd.f32 %v1044_v9, %v876_v8 }
  0xfb   : > { %v968_v35 = vadd.f32 %v967_v27, %v799_v28  ;;  %837 = vmatmul.bf16.gmra.mxu0 %v1657_v23  ;;  %917 = vmatmul.bf16.gmra.mxu2 %v1785_v13 }
  0xfc   : > { %1006 = vmatmul.bf16.gmra.mxu1 %v1661_v25  ;;  %v2056_v21 = vpack.c.bf16 %v2459_v14, %v2454_v7 }
  0xfd   : > { %v1111_v40 = vadd.f32 %v1110_v18, %v968_v35  ;;  %v1182_v41 = vmul.f32 %v968_v35, %v968_v35 }
  0xfe   : > { %2132 = vst [vmem:[%s2355_s15 + $0xa0] sm:$0xff] %v2056_v21  }
  0xff   : > { %v1245_v45 = vadd.f32 %v1244_v22, %v1182_v41  ;;  %1086 = vmatmul.bf16.gmra.mxu3 %v1789_v20  ;;  %v878_v27 = vpop.f32.mrf.mxu2  ;;  %v1047_v28 = vpop.f32.mrf.mxu3  ;;  %v1673_v41 = vor.u32 %v1904_v32, %v1672_v31  ;;  %v1935_v31 = vld [vmem:[%s2267_s29 + $0x1f4] sm:$0xf]  ;;  %v1802_v32 = vld [vmem:[%s2267_s29 + $0x1f8] sm:$0xf0] }
 0x100   : > { %v800_v46 = vpop.f32.mrf.mxu0  ;;  %v879_v39 = vadd.f32 %v2342_v50, %v878_v27 }
 0x101   : > { %v969_v47 = vpop.f32.mrf.mxu1  ;;  %v801_v48 = vadd.f32 %v2342_v50, %v800_v46 }
 0x103   : > { %v970_v53 = vadd.f32 %v969_v47, %v801_v48  ;;  %v2474_v48 = vadd.f32 %v1047_v28, %v879_v39 }
 0x105   : > { %v1112_v59 = vadd.f32 %v1111_v40, %v970_v53  ;;  %v1183_v60 = vmul.f32 %v970_v53, %v970_v53  ;;  %v1981_v61 = vpack.c.bf16 %v970_v53, %v968_v35  ;;  %v1792_v53 = vld [vmem:[%s2267_s29 + $0x1e0] sm:$0xf] }
 0x106   : > { %v1793_v57 = vor.u32 %v1934_v54, %v1792_v53 }
 0x107   : > { %v1246_v0 = vadd.f32 %v1245_v45, %v1183_v60  ;;  %2117 = vst [vmem:[%s2355_s15 + $0x28] sm:$0xff] %v1981_v61   ;;  %v880_v47 = vpop.f32.mrf.mxu2  ;;  %v1049_v51 = vpop.f32.mrf.mxu3  ;;  %v1794_v60 = vld [vmem:[%s2267_s29 + $0x1e8] sm:$0xf0] }
 0x108   : > { %v803_v3 = vpop.f32.mrf.mxu0  ;;  %v881_v49 = vadd.f32 %v2342_v50, %v880_v47 }
 0x109   : > { %v972_v4 = vpop.f32.mrf.mxu1  ;;  %v804_v5 = vadd.f32 %v2342_v50, %v803_v3 }
 0x10a   : > { %v2479_v58 = vadd.f32 %v1049_v51, %v881_v49 }
 0x10b   : > { %v973_v12 = vadd.f32 %v972_v4, %v804_v5  ;;  %842 = vmatmul.bf16.gmra.mxu0 %v1665_v1  ;;  %922 = vmatmul.bf16.gmra.mxu2 %v1793_v57 }
 0x10c   : > { %1011 = vmatmul.bf16.gmra.mxu1 %v1669_v2  ;;  %v2061_v1 = vpack.c.bf16 %v2479_v58, %v2474_v48 }
 0x10d   : > { %v1113_v18 = vadd.f32 %v1112_v59, %v973_v12  ;;  %v1184_v19 = vmul.f32 %v973_v12, %v973_v12  ;;  %v1933_v59 = vld [vmem:[%s2267_s29 + $0x1e4] sm:$0xf] }
 0x10e   : > { %2133 = vst [vmem:[%s2355_s15 + $0xa8] sm:$0xff] %v2061_v1  }
 0x10f   : > { %v1247_v22 = vadd.f32 %v1246_v0, %v1184_v19  ;;  %v1797_v0 = vor.u32 %v1933_v59, %v1794_v60  ;;  %v883_v6 = vpop.f32.mrf.mxu2  ;;  %v1052_v8 = vpop.f32.mrf.mxu3 }
 0x110   : > { %v805_v23 = vpop.f32.mrf.mxu0  ;;  %v884_v13 = vadd.f32 %v2342_v50, %v883_v6 }
 0x111   : > { %v974_v25 = vpop.f32.mrf.mxu1  ;;  %v806_v26 = vadd.f32 %v2342_v50, %v805_v23  ;;  %1091 = vmatmul.bf16.gmra.mxu3 %v1797_v0 }
 0x112   : > { %v2490_v21 = vadd.f32 %v1052_v8, %v884_v13 }
 0x113   : > { %v975_v29 = vadd.f32 %v974_v25, %v806_v26  ;;  %v1800_v25 = vld [vmem:[%s2267_s29 + $0x1f0] sm:$0xf]  ;;  %v1936_v26 = vld [vmem:[%s2267_s29 + $0x1f4] sm:$0xf0] }
 0x114   : > { %v1801_v28 = vor.u32 %v1936_v26, %v1800_v25 }
 0x115   : > { %v1114_v35 = vadd.f32 %v1113_v18, %v975_v29  ;;  %v1185_v36 = vmul.f32 %v975_v29, %v975_v29  ;;  %v1986_v38 = vpack.c.bf16 %v975_v29, %v973_v12 }
 0x117   : > { %v1248_v40 = vadd.f32 %v1247_v22, %v1185_v36  ;;  %2118 = vst [vmem:[%s2355_s15 + $0x30] sm:$0xff] %v1986_v38   ;;  %v885_v20 = vpop.f32.mrf.mxu2  ;;  %v1054_v23 = vpop.f32.mrf.mxu3 }
 0x118   : > { %v808_v43 = vpop.f32.mrf.mxu0  ;;  %v886_v22 = vadd.f32 %v2342_v50, %v885_v20 }
 0x119   : > { %v977_v45 = vpop.f32.mrf.mxu1  ;;  %v809_v46 = vadd.f32 %v2342_v50, %v808_v43 }
 0x11a   : > { %v2495_v29 = vadd.f32 %v1054_v23, %v886_v22 }
 0x11b   : > { %v978_v55 = vadd.f32 %v977_v45, %v809_v46  ;;  %847 = vmatmul.bf16.gmra.mxu0 %v1673_v41  ;;  %927 = vmatmul.bf16.gmra.mxu2 %v1801_v28 }
 0x11c   : > { %1016 = vmatmul.bf16.gmra.mxu1 %v1677_v42  ;;  %v2066_v36 = vpack.c.bf16 %v2495_v29, %v2490_v21 }
 0x11d   : > { %v1115_v61 = vadd.f32 %v1114_v35, %v978_v55  ;;  %v1186_v62 = vmul.f32 %v978_v55, %v978_v55  ;;  %v1805_v35 = vor.u32 %v1935_v31, %v1802_v32 }
 0x11e   : > { %2134 = vst [vmem:[%s2355_s15 + $0xb0] sm:$0xff] %v2066_v36  }
 0x11f   : > { %v1249_v2 = vadd.f32 %v1248_v40, %v1186_v62  ;;  %v888_v42 = vpop.f32.mrf.mxu2  ;;  %v1057_v43 = vpop.f32.mrf.mxu3 }
 0x120   : > { %v810_v3 = vpop.f32.mrf.mxu0  ;;  %v889_v51 = vadd.f32 %v2342_v50, %v888_v42 }
 0x121   : > { %v979_v4 = vpop.f32.mrf.mxu1  ;;  %v811_v5 = vadd.f32 %v2342_v50, %v810_v3  ;;  %1096 = vmatmul.bf16.gmra.mxu3 %v1805_v35 }
 0x122   : > { %v2506_v60 = vadd.f32 %v1057_v43, %v889_v51 }
 0x123   : > { %v980_v9 = vadd.f32 %v979_v4, %v811_v5 }
 0x125   : > { %v1116_v10 = vadd.f32 %v1115_v61, %v980_v9  ;;  %v1187_v11 = vmul.f32 %v980_v9, %v980_v9  ;;  %v1991_v12 = vpack.c.bf16 %v980_v9, %v978_v55 }
 0x127   : > { %v1250_v15 = vadd.f32 %v1249_v2, %v1187_v11  ;;  %2119 = vst [vmem:[%s2355_s15 + $0x38] sm:$0xff] %v1991_v12   ;;  %v890_v59 = vpop.f32.mrf.mxu2  ;;  %v1059_v62 = vpop.f32.mrf.mxu3 }
 0x128   : > { %v813_v16 = vpop.f32.mrf.mxu0  ;;  %v891_v61 = vadd.f32 %v2342_v50, %v890_v59 }
 0x129   : > { %v982_v18 = vpop.f32.mrf.mxu1  ;;  %v814_v19 = vadd.f32 %v2342_v50, %v813_v16 }
 0x12a   : > { %v2509_v1 = vadd.f32 %v1059_v62, %v891_v61 }
 0x12b   : > { %v983_v27 = vadd.f32 %v982_v18, %v814_v19 }
 0x12c   : > { %v2071_v4 = vpack.c.bf16 %v2509_v1, %v2506_v60 }
 0x12d   : > { %v1117_v33 = vadd.f32 %v1116_v10, %v983_v27  ;;  %v1188_v34 = vmul.f32 %v983_v27, %v983_v27 }
 0x12e   : > { %2135 = vst [vmem:[%s2355_s15 + $0xb8] sm:$0xff] %v2071_v4  }
 0x12f   : > { %v1251_v38 = vadd.f32 %v1250_v15, %v1188_v34  ;;  %v893_v10 = vpop.f32.mrf.mxu2  ;;  %v1062_v11 = vpop.f32.mrf.mxu3 }
 0x130   : > { %v815_v39 = vpop.f32.mrf.mxu0  ;;  %v894_v18 = vadd.f32 %v2342_v50, %v893_v10 }
 0x131   : > { %v984_v40 = vpop.f32.mrf.mxu1  ;;  %v816_v41 = vadd.f32 %v2342_v50, %v815_v39 }
 0x132   : > { %v2521_v25 = vadd.f32 %v1062_v11, %v894_v18 }
 0x133   : > { %v985_v45 = vadd.f32 %v984_v40, %v816_v41 }
 0x135   : > { %v1118_v46 = vadd.f32 %v1117_v33, %v985_v45  ;;  %v1189_v47 = vmul.f32 %v985_v45, %v985_v45  ;;  %v1996_v49 = vpack.c.bf16 %v985_v45, %v983_v27 }
 0x137   : > { %v1252_v53 = vadd.f32 %v1251_v38, %v1189_v47  ;;  %2120 = vst [vmem:[%s2355_s15 + $0x40] sm:$0xff] %v1996_v49   ;;  %v895_v23 = vpop.f32.mrf.mxu2  ;;  %v1064_v27 = vpop.f32.mrf.mxu3 }
 0x138   : > { %v818_v54 = vpop.f32.mrf.mxu0  ;;  %v896_v26 = vadd.f32 %v2342_v50, %v895_v23 }
 0x139   : > { %v987_v55 = vpop.f32.mrf.mxu1  ;;  %v819_v57 = vadd.f32 %v2342_v50, %v818_v54 }
 0x13a   : > { %v2524_v28 = vadd.f32 %v1064_v27, %v896_v26 }
 0x13b   : > { %v988_v0 = vadd.f32 %v987_v55, %v819_v57 }
 0x13c   : > { %v2076_v31 = vpack.c.bf16 %v2524_v28, %v2521_v25 }
 0x13d   : > { %v1119_v2 = vadd.f32 %v1118_v46, %v988_v0  ;;  %v1190_v3 = vmul.f32 %v988_v0, %v988_v0 }
 0x13e   : > { %2136 = vst [vmem:[%s2355_s15 + $0xc0] sm:$0xff] %v2076_v31  }
 0x13f   : > { %v1253_v5 = vadd.f32 %v1252_v53, %v1190_v3  ;;  %v898_v36 = vpop.f32.mrf.mxu2  ;;  %v1067_v38 = vpop.f32.mrf.mxu3 }
 0x140   : > { %v820_v6 = vpop.f32.mrf.mxu0  ;;  %v899_v42 = vadd.f32 %v2342_v50, %v898_v36 }
 0x141   : > { %v989_v8 = vpop.f32.mrf.mxu1  ;;  %v821_v9 = vadd.f32 %v2342_v50, %v820_v6 }
 0x142   : > { %v2539_v47 = vadd.f32 %v1067_v38, %v899_v42 }
 0x143   : > { %v990_v12 = vadd.f32 %v989_v8, %v821_v9 }
 0x145   : > { %v2515_v13 = vadd.f32 %v1119_v2, %v990_v12  ;;  %v1191_v15 = vmul.f32 %v990_v12, %v990_v12  ;;  %v2001_v16 = vpack.c.bf16 %v990_v12, %v988_v0 }
 0x147   : > { %v2518_v19 = vadd.f32 %v1253_v5, %v1191_v15  ;;  %2121 = vst [vmem:[%s2355_s15 + $0x48] sm:$0xff] %v2001_v16   ;;  %v900_v46 = vpop.f32.mrf.mxu2  ;;  %v1069_v51 = vpop.f32.mrf.mxu3 }
 0x148   : > { %v823_v20 = vpop.f32.mrf.mxu0  ;;  %v901_v49 = vadd.f32 %v2342_v50, %v900_v46 }
 0x149   : > { %v992_v22 = vpop.f32.mrf.mxu1  ;;  %v824_v32 = vadd.f32 %v2342_v50, %v823_v20 }
 0x14a   : > { %v2542_v53 = vadd.f32 %v1069_v51, %v901_v49 }
 0x14b   : > { %v2531_v39 = vadd.f32 %v992_v22, %v824_v32 }
 0x14c   : > { %v2081_v54 = vpack.c.bf16 %v2542_v53, %v2539_v47 }
 0x14e   : > { %2137 = vst [vmem:[%s2355_s15 + $0xc8] sm:$0xff] %v2081_v54  }
 0x14f   : > { %v903_v62 = vpop.f32.mrf.mxu2  ;;  %v1072_v0 = vpop.f32.mrf.mxu3 }
 0x150   : > { %v825_v33 = vpop.f32.mrf.mxu0  ;;  %v904_v5 = vadd.f32 %v2342_v50, %v903_v62 }
 0x151   : > { %v994_v34 = vpop.f32.mrf.mxu1  ;;  %v826_v35 = vadd.f32 %v2342_v50, %v825_v33 }
 0x152   : > { %v2557_v10 = vadd.f32 %v1072_v0, %v904_v5 }
 0x153   : > { %v2533_v40 = vadd.f32 %v994_v34, %v826_v35 }
 0x155   : > { %v2006_v41 = vpack.c.bf16 %v2533_v40, %v2531_v39 }
 0x157   : > { %2122 = vst [vmem:[%s2355_s15 + $0x50] sm:$0xff] %v2006_v41   ;;  %v905_v9 = vpop.f32.mrf.mxu2  ;;  %v1074_v12 = vpop.f32.mrf.mxu3 }
 0x158   : > { %v828_v43 = vpop.f32.mrf.mxu0  ;;  %v906_v11 = vadd.f32 %v2342_v50, %v905_v9 }
 0x159   : > { %v997_v45 = vpop.f32.mrf.mxu1  ;;  %v829_v55 = vadd.f32 %v2342_v50, %v828_v43 }
 0x15a   : > { %v2560_v15 = vadd.f32 %v1074_v12, %v906_v11 }
 0x15b   : > { %v2549_v2 = vadd.f32 %v997_v45, %v829_v55 }
 0x15c   : > { %v2086_v16 = vpack.c.bf16 %v2560_v15, %v2557_v10 }
 0x15e   : > { %2138 = vst [vmem:[%s2355_s15 + $0xd0] sm:$0xff] %v2086_v16   ;;  %v1192_v16 = vmul.f32 %v2531_v39, %v2531_v39 }
 0x15f   : > { %v908_v26 = vpop.f32.mrf.mxu2  ;;  %v1077_v27 = vpop.f32.mrf.mxu3 }
 0x160   : > { %v830_v57 = vpop.f32.mrf.mxu0  ;;  %v909_v34 = vadd.f32 %v2342_v50, %v908_v26 }
 0x161   : > { %v999_v59 = vpop.f32.mrf.mxu1  ;;  %v831_v61 = vadd.f32 %v2342_v50, %v830_v57 }
 0x162   : > { %v2569_v41 = vadd.f32 %v1077_v27, %v909_v34  ;;  %v1255_v27 = vadd.f32 %v2518_v19, %v1192_v16 }
 0x163   : > { %v2551_v3 = vadd.f32 %v999_v59, %v831_v61 }
 0x165   : > { %v2011_v4 = vpack.c.bf16 %v2551_v3, %v2549_v2 }
 0x167   : > { %2123 = vst [vmem:[%s2355_s15 + $0x58] sm:$0xff] %v2011_v4   ;;  %v910_v38 = vpop.f32.mrf.mxu2  ;;  %v1079_v43 = vpop.f32.mrf.mxu3 }
 0x168   : > { %v833_v6 = vpop.f32.mrf.mxu0  ;;  %v911_v42 = vadd.f32 %v2342_v50, %v910_v38 }
 0x169   : > { %v1002_v8 = vpop.f32.mrf.mxu1  ;;  %v834_v18 = vadd.f32 %v2342_v50, %v833_v6 }
 0x16a   : > { %v2572_v45 = vadd.f32 %v1079_v43, %v911_v42 }
 0x16b   : > { %v1003_v31 = vadd.f32 %v1002_v8, %v834_v18 }
 0x16c   : > { %v2091_v46 = vpack.c.bf16 %v2572_v45, %v2569_v41 }
 0x16e   : > { %2139 = vst [vmem:[%s2355_s15 + $0xd8] sm:$0xff] %v2091_v46  }
 0x16f   : > { %v913_v57 = vpop.f32.mrf.mxu2 }
 0x170   : > { %v835_v20 = vpop.f32.mrf.mxu0  ;;  %v914_v4 = vadd.f32 %v2342_v50, %v913_v57 }
 0x171   : > { %v1004_v22 = vpop.f32.mrf.mxu1  ;;  %v836_v23 = vadd.f32 %v2342_v50, %v835_v20  ;;  %v1193_v20 = vmul.f32 %v2533_v40, %v2533_v40 }
 0x172   : > { %v1082_v59 = vpop.f32.mrf.mxu3 }
 0x173   : > { %v1005_v32 = vadd.f32 %v1004_v22, %v836_v23  ;;  %v2582_v12 = vadd.f32 %v1082_v59, %v914_v4  ;;  %v1121_v23 = vadd.f32 %v2515_v13, %v2531_v39  ;;  %v1256_v43 = vadd.f32 %v1255_v27, %v1193_v20 }
 0x174   : > { %v1195_v13 = vmul.f32 %v2551_v3, %v2551_v3 }
 0x175   : > { %v2016_v33 = vpack.c.bf16 %v1005_v32, %v1003_v31 }
 0x177   : > { %2124 = vst [vmem:[%s2355_s15 + $0x60] sm:$0xff] %v2016_v33   ;;  %v915_v8 = vpop.f32.mrf.mxu2  ;;  %v1194_v33 = vmul.f32 %v2549_v2, %v2549_v2 }
 0x178   : > { %v838_v35 = vpop.f32.mrf.mxu0  ;;  %v916_v9 = vadd.f32 %v2342_v50, %v915_v8 }
 0x179   : > { %v1007_v36 = vpop.f32.mrf.mxu1  ;;  %v839_v49 = vadd.f32 %v2342_v50, %v838_v35 }
 0x17a   : > { %v1084_v11 = vpop.f32.mrf.mxu3 }
 0x17b   : > { %v1008_v61 = vadd.f32 %v1007_v36, %v839_v49  ;;  %v2586_v18 = vadd.f32 %v1084_v11, %v916_v9  ;;  %v1122_v36 = vadd.f32 %v1121_v23, %v2533_v40 }
 0x17d   : > { %v2096_v22 = vpack.c.bf16 %v2586_v18, %v2582_v12  ;;  %v1123_v46 = vadd.f32 %v1122_v36, %v2549_v2  ;;  %v1198_v11 = vmul.f32 %v1008_v61, %v1008_v61 }
 0x17f   : > { %2140 = vst [vmem:[%s2355_s15 + $0xe0] sm:$0xff] %v2096_v22   ;;  %v918_v42 = vpop.f32.mrf.mxu2 }
 0x180   : > { %v840_v51 = vpop.f32.mrf.mxu0  ;;  %v919_v2 = vadd.f32 %v2342_v50, %v918_v42 }
 0x181   : > { %v1009_v54 = vpop.f32.mrf.mxu1  ;;  %v841_v55 = vadd.f32 %v2342_v50, %v840_v51  ;;  %v1257_v51 = vadd.f32 %v1256_v43, %v1194_v33 }
 0x182   : > { %v1087_v39 = vpop.f32.mrf.mxu3 }
 0x183   : > { %v1010_v62 = vadd.f32 %v1009_v54, %v841_v55  ;;  %v1196_v54 = vmul.f32 %v1003_v31, %v1003_v31  ;;  %v1124_v55 = vadd.f32 %v1123_v46, %v2551_v3  ;;  %v1258_v59 = vadd.f32 %v1257_v51, %v1195_v13 }
 0x185   : > { %v2021_v0 = vpack.c.bf16 %v1010_v62, %v1008_v61  ;;  %v1125_v40 = vadd.f32 %v1124_v55, %v1003_v31  ;;  %v1259_v4 = vadd.f32 %v1258_v59, %v1196_v54  ;;  %v2609_v31 = vadd.f32 %v1087_v39, %v919_v2  ;;  %v2169_v39 = vld [vmem:[%s2737_s2] ss:$0 sm:$0xff] }
 0x187   : > { %2125 = vst [vmem:[%s2355_s15 + $0x68] sm:$0xff] %v2021_v0   ;;  %v1197_v0 = vmul.f32 %v1005_v32, %v1005_v32  ;;  %v1126_v9 = vadd.f32 %v1125_v40, %v1005_v32 }
 0x188   : > { %v843_v5 = vpop.f32.mrf.mxu0 }
 0x189   : > { %v1012_v6 = vpop.f32.mrf.mxu1  ;;  %v844_v26 = vadd.f32 %v2342_v50, %v843_v5  ;;  %v1260_v3 = vadd.f32 %v1259_v4, %v1197_v0  ;;  %v1127_v23 = vadd.f32 %v1126_v9, %v1008_v61 }
 0x18a   : > { %v1089_v22 = vpop.f32.mrf.mxu3 }
 0x18b   : > { %v1013_v19 = vadd.f32 %v1012_v6, %v844_v26  ;;  %v920_v6 = vpop.f32.mrf.mxu2  ;;  %v1199_v26 = vmul.f32 %v1010_v62, %v1010_v62  ;;  %v1261_v33 = vadd.f32 %v1260_v3, %v1198_v11  ;;  %v1205_v11 = vmul.f32 %v2379_v52, %v2379_v52 }
 0x18c   : > { %v921_v20 = vadd.f32 %v2342_v50, %v920_v6 }
 0x18d   : > { %v1200_v32 = vmul.f32 %v1013_v19, %v1013_v19 }
 0x18e   : > { %v2611_v27 = vadd.f32 %v1089_v22, %v921_v20 }
 0x190   : > { %v845_v34 = vpop.f32.mrf.mxu0  ;;  %v2101_v36 = vpack.c.bf16 %v2611_v27, %v2609_v31 }
 0x191   : > { %v1014_v35 = vpop.f32.mrf.mxu1  ;;  %v846_v38 = vadd.f32 %v2342_v50, %v845_v34  ;;  %v1128_v34 = vadd.f32 %v1127_v23, %v1010_v62  ;;  %v1206_v23 = vmul.f32 %v2394_v17, %v2394_v17 }
 0x192   : > { %2141 = vst [vmem:[%s2355_s15 + $0xe8] sm:$0xff] %v2101_v36  }
 0x193   : > { %v1015_v49 = vadd.f32 %v1014_v35, %v846_v38  ;;  %v1262_v38 = vadd.f32 %v1261_v33, %v1199_v26  ;;  %v1129_v42 = vadd.f32 %v1128_v34, %v1013_v19  ;;  %v923_v62 = vpop.f32.mrf.mxu2 }
 0x194   : > { %v1092_v55 = vpop.f32.mrf.mxu3  ;;  %v924_v6 = vadd.f32 %v2169_v39, %v923_v62 }
 0x195   : > { %v2026_v57 = vpack.c.bf16 %v1015_v49, %v1013_v19  ;;  %v1201_v43 = vmul.f32 %v1015_v49, %v1015_v49  ;;  %v1263_v13 = vadd.f32 %v1262_v38, %v1200_v32  ;;  %v1130_v46 = vadd.f32 %v1129_v42, %v1015_v49 }
 0x196   : > { %v1204_v49 = vmul.f32 %v2374_v44, %v2374_v44  ;;  %v1207_v32 = vmul.f32 %v2399_v24, %v2399_v24  ;;  %v1208_v38 = vmul.f32 %v2414_v56, %v2414_v56 }
 0x197   : > { %2126 = vst [vmem:[%s2355_s15 + $0x70] sm:$0xff] %v2026_v57   ;;  %v1264_v57 = vadd.f32 %v1263_v13, %v1201_v43  ;;  %v1209_v43 = vmul.f32 %v2419_v63, %v2419_v63 }
 0x198   : > { %v848_v5 = vpop.f32.mrf.mxu0 }
 0x199   : > { %v1017_v8 = vpop.f32.mrf.mxu1  ;;  %v849_v16 = vadd.f32 %v2342_v50, %v848_v5 }
 0x19b   : > { %v1018_v35 = vadd.f32 %v1017_v8, %v849_v16  ;;  %v925_v20 = vpop.f32.mrf.mxu2 }
 0x19c   : > { %v926_v22 = vadd.f32 %v2169_v39, %v925_v20  ;;  %v1094_v3 = vpop.f32.mrf.mxu3 }
 0x19d   : > { %v1202_v61 = vmul.f32 %v1018_v35, %v1018_v35  ;;  %v1131_v59 = vadd.f32 %v1130_v46, %v1018_v35 }
 0x19e   : > { %v2631_v34 = vadd.f32 %v1094_v3, %v926_v22 }
 0x19f   : > { %v1265_v0 = vadd.f32 %v1264_v57, %v1202_v61  ;;  %v1212_v57 = vmul.f32 %v2454_v7, %v2454_v7 }
 0x1a0   : > { %v850_v50 = vpop.f32.mrf.mxu0 }
 0x1a1   : > { %v851_v51 = vadd.f32 %v2169_v39, %v850_v50  ;;  %v1019_v54 = vpop.f32.mrf.mxu1 }
 0x1a3   : > { %v1020_v40 = vadd.f32 %v1019_v54, %v851_v51  ;;  %v928_v46 = vpop.f32.mrf.mxu2  ;;  %v1211_v54 = vmul.f32 %v2439_v37, %v2439_v37 }
 0x1a4   : > { %v1097_v61 = vpop.f32.mrf.mxu3 }
 0x1a5   : > { %v1132_v19 = vadd.f32 %v1131_v59, %v1020_v40  ;;  %v1203_v4 = vmul.f32 %v1020_v40, %v1020_v40  ;;  %v2031_v5 = vpack.c.bf16 %v1020_v40, %v1018_v35  ;;  %v1213_v40 = vmul.f32 %v2459_v14, %v2459_v14 }
 0x1a7   : > { %v1133_v8 = vadd.f32 %v1132_v19, %v2374_v44  ;;  %v1266_v9 = vadd.f32 %v1265_v0, %v1203_v4  ;;  %2127 = vst [vmem:[%s2355_s15 + $0x78] sm:$0xff] %v2031_v5   ;;  %v2629_v44 = vadd.f32 %v1092_v55, %v924_v6 }
 0x1a9   : > { %v1134_v16 = vadd.f32 %v1133_v8, %v2379_v52  ;;  %v1267_v2 = vadd.f32 %v1266_v9, %v1204_v49  ;;  %v2106_v36 = vpack.c.bf16 %v2631_v34, %v2629_v44 }
 0x1ab   : > { %v1135_v26 = vadd.f32 %v1134_v16, %v2394_v17  ;;  %v1268_v33 = vadd.f32 %v1267_v2, %v1205_v11  ;;  %2142 = vst [vmem:[%s2355_s15 + $0xf0] sm:$0xff] %v2106_v36   ;;  %v930_v4 = vpop.f32.mrf.mxu2  ;;  %v1215_v16 = vmul.f32 %v2479_v58, %v2479_v58 }
 0x1ac   : > { %v931_v5 = vadd.f32 %v2169_v39, %v930_v4  ;;  %v1099_v49 = vpop.f32.mrf.mxu3 }
 0x1ad   : > { %v1136_v52 = vadd.f32 %v1135_v26, %v2399_v24  ;;  %v1269_v35 = vadd.f32 %v1268_v33, %v1206_v23  ;;  %v1210_v24 = vmul.f32 %v2434_v30, %v2434_v30  ;;  %v1218_v26 = vmul.f32 %v2506_v60, %v2506_v60 }
 0x1af   : > { %v1137_v42 = vadd.f32 %v1136_v52, %v2414_v56  ;;  %v1270_v17 = vadd.f32 %v1269_v35, %v1207_v32  ;;  %v1219_v32 = vmul.f32 %v2509_v1, %v2509_v1 }
 0x1b1   : > { %v1138_v50 = vadd.f32 %v1137_v42, %v2419_v63  ;;  %v1271_v13 = vadd.f32 %v1270_v17, %v1208_v38 }
 0x1b3   : > { %v1139_v51 = vadd.f32 %v1138_v50, %v2434_v30  ;;  %v1272_v62 = vadd.f32 %v1271_v13, %v1209_v43  ;;  %v929_v30 = vadd.f32 %v2169_v39, %v928_v46  ;;  %v1216_v39 = vmul.f32 %v2490_v21, %v2490_v21 }
 0x1b5   : > { %v1140_v56 = vadd.f32 %v1139_v51, %v2439_v37  ;;  %v1273_v55 = vadd.f32 %v1272_v62, %v1210_v24  ;;  %v1214_v37 = vmul.f32 %v2474_v48, %v2474_v48  ;;  %v1098_v11 = vadd.f32 %v1097_v61, %v929_v30 }
 0x1b6   : > { %v1230_v30 = vmul.f32 %v2609_v31, %v2609_v31 }
 0x1b7   : > { %v1141_v63 = vadd.f32 %v1140_v56, %v2454_v7  ;;  %v1274_v59 = vadd.f32 %v1273_v55, %v1211_v54  ;;  %v2660_v7 = vadd.f32 %v1099_v49, %v931_v5 }
 0x1b9   : > { %v1142_v0 = vadd.f32 %v1141_v63, %v2459_v14  ;;  %v1275_v19 = vadd.f32 %v1274_v59, %v1212_v57  ;;  %v2111_v6 = vpack.c.bf16 %v2660_v7, %v1098_v11  ;;  %v1228_v63 = vmul.f32 %v2582_v12, %v2582_v12 }
 0x1bb   : > { %v1143_v8 = vadd.f32 %v1142_v0, %v2474_v48  ;;  %v1276_v9 = vadd.f32 %v1275_v19, %v1213_v40  ;;  %2143 = vst [vmem:[%s2355_s15 + $0xf8] sm:$0xff] %v2111_v6   ;;  %v1217_v48 = vmul.f32 %v2495_v29, %v2495_v29  ;;  %v1229_v0 = vmul.f32 %v2586_v18, %v2586_v18 }
 0x1bd   : > { %v1144_v14 = vadd.f32 %v1143_v8, %v2479_v58  ;;  %v1277_v2 = vadd.f32 %v1276_v9, %v1214_v37  ;;  %v1232_v37 = vmul.f32 %v2629_v44, %v2629_v44 }
 0x1bf   : > { %v1278_v20 = vadd.f32 %v1277_v2, %v1215_v16  ;;  %v1145_v22 = vadd.f32 %v1144_v14, %v2490_v21  ;;  %v1220_v21 = vmul.f32 %v2521_v25, %v2521_v25  ;;  %v1234_v14 = vmul.f32 %v1098_v11, %v1098_v11 }
 0x1c1   : > { %v1146_v3 = vadd.f32 %v1145_v22, %v2495_v29  ;;  %v1279_v23 = vadd.f32 %v1278_v20, %v1216_v39  ;;  %v1221_v29 = vmul.f32 %v2524_v28, %v2524_v28 }
 0x1c3   : > { %v1147_v58 = vadd.f32 %v1146_v3, %v2506_v60  ;;  %v1280_v33 = vadd.f32 %v1279_v23, %v1217_v48  ;;  %v1222_v60 = vmul.f32 %v2539_v47, %v2539_v47 }
 0x1c5   : > { %v1148_v52 = vadd.f32 %v1147_v58, %v2509_v1  ;;  %v1281_v35 = vadd.f32 %v1280_v33, %v1218_v26  ;;  %v1223_v1 = vmul.f32 %v2542_v53, %v2542_v53 }
 0x1c7   : > { %v1149_v36 = vadd.f32 %v1148_v52, %v2521_v25  ;;  %v1282_v38 = vadd.f32 %v1281_v35, %v1219_v32  ;;  %v1224_v25 = vmul.f32 %v2557_v10, %v2557_v10 }
 0x1c9   : > { %v1150_v42 = vadd.f32 %v1149_v36, %v2524_v28  ;;  %v1283_v17 = vadd.f32 %v1282_v38, %v1220_v21  ;;  %v1225_v28 = vmul.f32 %v2560_v15, %v2560_v15 }
 0x1cb   : > { %v1151_v43 = vadd.f32 %v1150_v42, %v2539_v47  ;;  %v1284_v50 = vadd.f32 %v1283_v17, %v1221_v29  ;;  %v1226_v47 = vmul.f32 %v2569_v41, %v2569_v41 }
 0x1cd   : > { %v1152_v13 = vadd.f32 %v1151_v43, %v2542_v53  ;;  %v1285_v46 = vadd.f32 %v1284_v50, %v1222_v60  ;;  %v1227_v53 = vmul.f32 %v2572_v45, %v2572_v45 }
 0x1cf   : > { %v1153_v61 = vadd.f32 %v1152_v13, %v2557_v10  ;;  %v1286_v24 = vadd.f32 %v1285_v46, %v1223_v1 }
 0x1d1   : > { %v1154_v51 = vadd.f32 %v1153_v61, %v2560_v15  ;;  %v1287_v62 = vadd.f32 %v1286_v24, %v1224_v25 }
 0x1d3   : > { %v1155_v54 = vadd.f32 %v1154_v51, %v2569_v41  ;;  %v1288_v56 = vadd.f32 %v1287_v62, %v1225_v28 }
 0x1d5   : > { %v1156_v55 = vadd.f32 %v1155_v54, %v2572_v45  ;;  %v1289_v57 = vadd.f32 %v1288_v56, %v1226_v47 }
 0x1d7   : > { %v1157_v10 = vadd.f32 %v1156_v55, %v2582_v12  ;;  %v1290_v59 = vadd.f32 %v1289_v57, %v1227_v53  ;;  %v1231_v12 = vmul.f32 %v2611_v27, %v2611_v27 }
 0x1d9   : > { %v1291_v15 = vadd.f32 %v1290_v59, %v1228_v63  ;;  %v1158_v40 = vadd.f32 %v1157_v10, %v2586_v18 }
 0x1db   : > { %v1292_v41 = vadd.f32 %v1291_v15, %v1229_v0  ;;  %v1159_v19 = vadd.f32 %v1158_v40, %v2609_v31  ;;  %v1233_v31 = vmul.f32 %v2631_v34, %v2631_v34 }
 0x1dd   : > { %v1293_v45 = vadd.f32 %v1292_v41, %v1230_v30  ;;  %v1160_v4 = vadd.f32 %v1159_v19, %v2611_v27  ;;  %v1235_v27 = vmul.f32 %v2660_v7, %v2660_v7 }
 0x1df   : > { %v1294_v5 = vadd.f32 %v1293_v45, %v1231_v12  ;;  %v1161_v49 = vadd.f32 %v1160_v4, %v2629_v44 }
 0x1e1   : > { %v1295_v18 = vadd.f32 %v1294_v5, %v1232_v37  ;;  %v1162_v8 = vadd.f32 %v1161_v49, %v2631_v34 }
 0x1e3   : > { %v1296_v9 = vadd.f32 %v1295_v18, %v1233_v31  ;;  %v1163_v16 = vadd.f32 %v1162_v8, %v1098_v11 }
 0x1e5   : > { %v1297_v2 = vadd.f32 %v1296_v9, %v1234_v14  ;;  %v1164_v6 = vadd.f32 %v1163_v16, %v2660_v7 }
 0x1e7   : > { %v1165_v39 = vrot.slane %v1164_v6, 4  ;;  %v1298_v20 = vadd.f32 %v1297_v2, %v1235_v27 }
 0x1e9   : > { %v1166_v44 = vadd.f32 %v1165_v39, %v1164_v6  ;;  %v1299_v22 = vrot.slane %v1298_v20, 4 }
 0x1eb   : > { %v1167_v48 = vrot.slane %v1166_v44, 2  ;;  %v1300_v3 = vadd.f32 %v1299_v22, %v1298_v20 }
 0x1ed   : > { %v1168_v23 = vadd.f32 %v1167_v48, %v1166_v44  ;;  %v1301_v26 = vrot.slane %v1300_v3, 2 }
 0x1ef   : > { %v1169_v34 = vrot.slane %v1168_v23, 1  ;;  %v1302_v58 = vadd.f32 %v1301_v26, %v1300_v3 }
 0x1f1   : > { %v1170_v11 = vadd.f32 %v1169_v34, %v1168_v23  ;;  %v1303_v33 = vrot.slane %v1302_v58, 1 }
 0x1f3   : > { %1171 = vst [vmem:[%s244_s21] sm:$0x1] %v1170_v11  ;;  %v1304_v7 = vadd.f32 %v1303_v33, %v1302_v58 }
 0x1f5   : > { %1305 = vst [vmem:[%s247_s24] sm:$0x1] %v1304_v7 }
 0x1f6 PF: > { %s16_s18 = sadd.s32 1, %s2176_s18  }
 0x1f7   : > { %p13_p5 = scmp.ge.s32.totalorder %s16_s18, 6  }
 0x1f9   :  { %15 = sbr.rel (!%p13_p5) target bundleno = 1 (0x1), region = 86 }

// kernel: forward.12
= control target key start
LH: loop header
LB: loop body
LE: loop exit
PB: predicated region body
PF: predicated region fallthrough
CT: control target
= control target key end

     0   :  { %s1318_s18 = smov 0   ;;  %s1642_s0 = inlined_call_operand.vmem [shape: bf16[2048,128], index: 0, kind: input, shape index: {}]   ;;  %s1643_s1 = inlined_call_operand.vmem [shape: f32[4,1,128], index: 1, kind: input, shape index: {}]   ;;  %s1644_s2 = inlined_call_operand.vmem [shape: f32[4,1,128], index: 2, kind: input, shape index: {}]   ;;  %s1645_s3 = inlined_call_operand.vmem [shape: f32[1,128], index: 3, kind: input, shape index: {}]   ;;  %s1646_s4 = inlined_call_operand.vmem [shape: f32[1,128], index: 4, kind: input, shape index: {}]   ;;  %s1647_s5 = inlined_call_operand.vmem [shape: bf16[2048,128], index: 5, kind: output, shape index: {}]  }
   0x1 LB: > { %s909_s19 = sadd.s32 4294967295, %s1286_s18   ;;  %p913_p0 = scmp.ge.s32.totalorder %s1286_s18, 1  ;;  %s1286_s18 = sphi %s1318_s18, %s15_s18  }
   0x2   : > { %p188_p1 = scmp.lt.s32.totalorder %s1286_s18, 5 }
   0x4   : > { %p189_p2 = pnand %p913_p0, %p188_p1 }
   0x5   : > { %s914_s11 = sshll.u32 (!%p189_p2), %s909_s19, 6 }
   0x6   : > { %192 = sbr.rel (%p189_p2) target bundleno = 152 (0x98), region = 40  ;;  %p217_p3 = scmp.lt.s32.totalorder (!%p189_p2), %s914_s11, 255 }
   0xb   : > { %v228_v0 = vld [vmem:[%s1643_s1] sm:$0x1]  ;;  %v229_v1 = vld [vmem:[%s1643_s1 + $0x1] sm:$0x1]  ;;  %vm232_vm0 = vcmask 1040384   ;;  %s1651_s11 = smov (!%p217_p3, %s914_s11), 255 }
   0xc   : > { %v230_v2 = vld [vmem:[%s1643_s1 + $0x2] sm:$0x1]  ;;  %v231_v3 = vld [vmem:[%s1643_s1 + $0x3] sm:$0x1]  ;;  %v233_v4 = vsel %vm232_vm0, %v228_v0, 0.0  ;;  %v234_v5 = vsel %vm232_vm0, %v229_v1, 0.0 }
   0xd   : > { %v236_v6 = vsel %vm232_vm0, %v230_v2, 0.0  ;;  %v241_v7 = vld [vmem:[%s1644_s2] sm:$0x1]  ;;  %v235_v8 = vadd.f32 %v234_v5, %v233_v4  ;;  %v242_v9 = vld [vmem:[%s1644_s2 + $0x1] sm:$0x1]  ;;  %v238_v12 = vsel %vm232_vm0, %v231_v3, 0.0 }
   0xe   : > { %v243_v10 = vld [vmem:[%s1644_s2 + $0x2] sm:$0x1]  ;;  %v245_v11 = vsel %vm232_vm0, %v241_v7, 0.0  ;;  %v244_v13 = vld [vmem:[%s1644_s2 + $0x3] sm:$0x1]  ;;  %v246_v14 = vsel %vm232_vm0, %v242_v9, 0.0 }
   0xf   : > { %v248_v15 = vsel %vm232_vm0, %v243_v10, 0.0  ;;  %v237_v16 = vadd.f32 %v236_v6, %v235_v8  ;;  %v247_v17 = vadd.f32 %v246_v14, %v245_v11  ;;  %v250_v18 = vsel %vm232_vm0, %v244_v13, 0.0  ;;  %s915_s12 = sshll.u32 %s1651_s11, 2  ;;  %v255_v46 = vld [vmem:[%s1645_s3] sm:$0x1] }
  0x10   : > { %s1366_s15 = scalar_lea.vmem %s1642_s0, %s915_s12  ;;  %v268_v5 = vld [vmem:[%s1646_s4] sm:$0x1]  ;;  %s1453_s23 = scalar_lea.vmem %s1647_s5, %s915_s12 }
  0x11   : > { %v239_v19 = vadd.f32 %v238_v12, %v237_v16  ;;  %v249_v20 = vadd.f32 %v248_v15, %v247_v17  ;;  %v921_v30 = vld [vmem:[%s1366_s15] sm:$0xff]   ;;  %v1208_v32 = vld [vmem:[%s1366_s15 + $0x8] sm:$0xff]   ;;  %v1209_v33 = vld [vmem:[%s1366_s15 + $0x10] sm:$0xff]  }
  0x12   : > { %v1210_v34 = vld [vmem:[%s1366_s15 + $0x18] sm:$0xff]   ;;  %v922_v36 = vunpack.c.l.bf16 %v921_v30  ;;  %v1211_v37 = vld [vmem:[%s1366_s15 + $0x20] sm:$0xff]   ;;  %v1212_v38 = vld [vmem:[%s1366_s15 + $0x28] sm:$0xff]   ;;  %v923_v40 = vunpack.c.h.bf16 %v921_v30  ;;  %v926_v41 = vunpack.c.l.bf16 %v1208_v32  ;;  %v927_v42 = vunpack.c.h.bf16 %v1208_v32 }
  0x13   : > { %v240_v21 = vmul.f32 0.00048828125, %v239_v19  ;;  %v251_v22 = vadd.f32 %v250_v18, %v249_v20  ;;  %v930_v43 = vunpack.c.l.bf16 %v1209_v33  ;;  %v1213_v44 = vld [vmem:[%s1366_s15 + $0x30] sm:$0xff]   ;;  %v1380_v45 = vld [vmem:[%s1366_s15 + $0x38] sm:$0xff]   ;;  %v931_v48 = vunpack.c.h.bf16 %v1209_v33  ;;  %v1386_v51 = vld [vmem:[%s1366_s15 + $0x40] sm:$0xff]  }
  0x14   : > { %v934_v49 = vunpack.c.l.bf16 %v1210_v34  ;;  %v935_v50 = vunpack.c.h.bf16 %v1210_v34  ;;  %v938_v52 = vunpack.c.l.bf16 %v1211_v37  ;;  %v939_v53 = vunpack.c.h.bf16 %v1211_v37  ;;  %v1389_v56 = vld [vmem:[%s1366_s15 + $0x48] sm:$0xff]   ;;  %v1392_v57 = vld [vmem:[%s1366_s15 + $0x50] sm:$0xff]   ;;  %v1398_v62 = vld [vmem:[%s1366_s15 + $0x58] sm:$0xff]  }
  0x15   : > { %v252_v23 = vmul.f32 0.00048828125, %v251_v22  ;;  %v253_v24 = vmul.f32 %v240_v21, %v240_v21  ;;  %v942_v54 = vunpack.c.l.bf16 %v1212_v38  ;;  %v943_v55 = vunpack.c.h.bf16 %v1212_v38  ;;  %v1404_v3 = vld [vmem:[%s1366_s15 + $0x60] sm:$0xff]   ;;  %v1407_v4 = vld [vmem:[%s1366_s15 + $0x68] sm:$0xff]  }
  0x16   : > { %v946_v59 = vunpack.c.l.bf16 %v1213_v44  ;;  %v947_v60 = vunpack.c.h.bf16 %v1213_v44  ;;  %v950_v61 = vunpack.c.l.bf16 %v1380_v45  ;;  %v951_v0 = vunpack.c.h.bf16 %v1380_v45 }
  0x17   : > { %v254_v25 = vsub.f32 %v252_v23, %v253_v24  ;;  %v954_v1 = vunpack.c.l.bf16 %v1386_v51  ;;  %v955_v2 = vunpack.c.h.bf16 %v1386_v51  ;;  %v958_v6 = vunpack.c.l.bf16 %v1389_v56 }
  0x18   : > { %v959_v7 = vunpack.c.h.bf16 %v1389_v56  ;;  %v962_v8 = vunpack.c.l.bf16 %v1392_v57  ;;  %v963_v9 = vunpack.c.h.bf16 %v1392_v57  ;;  %v966_v12 = vunpack.c.l.bf16 %v1398_v62 }
  0x19   : > { %v256_v26 = vadd.f32 1e-05, %v254_v25  ;;  %v967_v13 = vunpack.c.h.bf16 %v1398_v62  ;;  %v970_v14 = vunpack.c.l.bf16 %v1404_v3  ;;  %v971_v15 = vunpack.c.h.bf16 %v1404_v3 }
  0x1a   : > { %v974_v16 = vunpack.c.l.bf16 %v1407_v4  ;;  %v975_v17 = vunpack.c.h.bf16 %v1407_v4 }
  0x1b   : > { %1278 = vrsqrt.f32 %v256_v26  ;;  %vm263_vm1 = vweird.f32 %v256_v26 }
  0x21   : > { %v1279_v27 = vpop.eup %1278 }
  0x22   : > { %v258_v28 = vmul.f32 %v1279_v27, %v256_v26  ;;  %vm264_vm2 = vweird.f32 %v1279_v27 }
  0x23   : > { %vm1374_vm3 = vmor %vm263_vm1, %vm264_vm2 }
  0x24   : > { %v259_v29 = vmul.f32 %v1279_v27, %v258_v28 }
  0x26   : > { %v260_v31 = vmul.f32 0.5, %v259_v29 }
  0x28   : > { %v261_v35 = vsub.f32 1.5, %v260_v31 }
  0x2a   : > { %v262_v47 = vmul.f32 %v1279_v27, %v261_v35 }
  0x2c   : > { %v266_v58 = vsel %vm1374_vm3, %v1279_v27, %v262_v47 }
  0x2d   : > { %v267_v63 = vmul.f32 %v266_v58, %v255_v46 }
  0x2f   : > { %v269_v10 = vmul.f32 %v267_v63, %v240_v21  ;;  %v1416_v11 = vperm.slane %v267_v63, 0 }
  0x31   : > { %v270_v18 = vsub.f32 %v268_v5, %v269_v10  ;;  %v402_v19 = vmul.f32 %v922_v36, %v1416_v11  ;;  %v403_v20 = vmul.f32 %v923_v40, %v1416_v11  ;;  %v404_v21 = vmul.f32 %v926_v41, %v1416_v11 }
  0x32   : > { %v405_v22 = vmul.f32 %v927_v42, %v1416_v11  ;;  %v406_v23 = vmul.f32 %v930_v43, %v1416_v11  ;;  %v407_v24 = vmul.f32 %v931_v48, %v1416_v11  ;;  %v408_v25 = vmul.f32 %v934_v49, %v1416_v11 }
  0x33   : > { %v1431_v26 = vperm.slane %v270_v18, 0  ;;  %v409_v27 = vmul.f32 %v935_v50, %v1416_v11  ;;  %v410_v28 = vmul.f32 %v938_v52, %v1416_v11  ;;  %v411_v29 = vmul.f32 %v939_v53, %v1416_v11 }
  0x34   : > { %v412_v30 = vmul.f32 %v942_v54, %v1416_v11  ;;  %v413_v31 = vmul.f32 %v943_v55, %v1416_v11  ;;  %v414_v32 = vmul.f32 %v946_v59, %v1416_v11  ;;  %v415_v33 = vmul.f32 %v947_v60, %v1416_v11 }
  0x35   : > { %v469_v34 = vadd.f32 %v1431_v26, %v402_v19  ;;  %v470_v35 = vadd.f32 %v1431_v26, %v403_v20  ;;  %v471_v36 = vadd.f32 %v1431_v26, %v404_v21  ;;  %v472_v37 = vadd.f32 %v1431_v26, %v405_v22 }
  0x36   : > { %v473_v38 = vadd.f32 %v1431_v26, %v406_v23  ;;  %v474_v39 = vadd.f32 %v1431_v26, %v407_v24  ;;  %v475_v40 = vadd.f32 %v1431_v26, %v408_v25  ;;  %v476_v41 = vadd.f32 %v1431_v26, %v409_v27 }
  0x37   : > { %vm533_vm4 = vcmp.ge.f32.partialorder %v469_v34, 0.0  ;;  %vm534_vm5 = vcmp.ge.f32.partialorder %v470_v35, 0.0  ;;  %v597_v42 = vmul.f32 0.2, %v469_v34  ;;  %v598_v43 = vmul.f32 0.2, %v470_v35 }
  0x38   : > { %vm535_vm6 = vcmp.ge.f32.partialorder %v471_v36, 0.0  ;;  %vm536_vm7 = vcmp.ge.f32.partialorder %v472_v37, 0.0  ;;  %v599_v44 = vmul.f32 0.2, %v471_v36  ;;  %v600_v46 = vmul.f32 0.2, %v472_v37 }
  0x39   : > { %v661_v47 = vsel %vm533_vm4, %v469_v34, %v597_v42  ;;  %v662_v48 = vsel %vm534_vm5, %v470_v35, %v598_v43  ;;  %vm537_vm8 = vcmp.ge.f32.partialorder %v473_v38, 0.0  ;;  %vm538_vm9 = vcmp.ge.f32.partialorder %v474_v39, 0.0 }
  0x3a   : > { %v1051_v49 = vpack.c.bf16 %v662_v48, %v661_v47  ;;  %v663_v50 = vsel %vm535_vm6, %v471_v36, %v599_v44  ;;  %v664_v52 = vsel %vm536_vm7, %v472_v37, %v600_v46  ;;  %v601_v53 = vmul.f32 0.2, %v473_v38 }
  0x3b   : > { %v1056_v54 = vpack.c.bf16 %v664_v52, %v663_v50  ;;  %v602_v55 = vmul.f32 0.2, %v474_v39  ;;  %vm539_vm10 = vcmp.ge.f32.partialorder %v475_v40, 0.0  ;;  %vm540_vm11 = vcmp.ge.f32.partialorder %v476_v41, 0.0 }
  0x3c   : > { %1052 = vst [vmem:[%s1453_s23] sm:$0xff] %v1051_v49   ;;  %v665_v58 = vsel %vm537_vm8, %v473_v38, %v601_v53  ;;  %v603_v59 = vmul.f32 0.2, %v475_v40  ;;  %v604_v60 = vmul.f32 0.2, %v476_v41  ;;  %v477_v63 = vadd.f32 %v1431_v26, %v410_v28 }
  0x3d   : > { %1239 = vst [vmem:[%s1453_s23 + $0x8] sm:$0xff] %v1056_v54   ;;  %v666_v5 = vsel %vm538_vm9, %v474_v39, %v602_v55  ;;  %v478_v10 = vadd.f32 %v1431_v26, %v411_v29  ;;  %v479_v18 = vadd.f32 %v1431_v26, %v412_v30  ;;  %v480_v19 = vadd.f32 %v1431_v26, %v413_v31 }
  0x3e   : > { %v1061_v20 = vpack.c.bf16 %v666_v5, %v665_v58  ;;  %v667_v21 = vsel %vm539_vm10, %v475_v40, %v603_v59  ;;  %v668_v22 = vsel %vm540_vm11, %v476_v41, %v604_v60  ;;  %vm541_vm12 = vcmp.ge.f32.partialorder %v477_v63, 0.0 }
  0x3f   : > { %v1066_v23 = vpack.c.bf16 %v668_v22, %v667_v21  ;;  %vm542_vm13 = vcmp.ge.f32.partialorder %v478_v10, 0.0  ;;  %v605_v24 = vmul.f32 0.2, %v477_v63  ;;  %v606_v25 = vmul.f32 0.2, %v478_v10 }
  0x40   : > { %1240 = vst [vmem:[%s1453_s23 + $0x10] sm:$0xff] %v1061_v20   ;;  %vm543_vm14 = vcmp.ge.f32.partialorder %v479_v18, 0.0  ;;  %vm544_vm15 = vcmp.ge.f32.partialorder %v480_v19, 0.0  ;;  %v607_v27 = vmul.f32 0.2, %v479_v18  ;;  %v481_v28 = vadd.f32 %v1431_v26, %v414_v32 }
  0x41   : > { %1241 = vst [vmem:[%s1453_s23 + $0x18] sm:$0xff] %v1066_v23   ;;  %v669_v29 = vsel %vm541_vm12, %v477_v63, %v605_v24  ;;  %v670_v30 = vsel %vm542_vm13, %v478_v10, %v606_v25  ;;  %v608_v34 = vmul.f32 0.2, %v480_v19  ;;  %v482_v31 = vadd.f32 %v1431_v26, %v415_v33 }
  0x42   : > { %v1071_v35 = vpack.c.bf16 %v670_v30, %v669_v29  ;;  %v671_v36 = vsel %vm543_vm14, %v479_v18, %v607_v27  ;;  %vm545_vm0 = vcmp.ge.f32.partialorder %v481_v28, 0.0  ;;  %v609_v37 = vmul.f32 0.2, %v481_v28 }
  0x43   : > { %v672_v38 = vsel %vm544_vm15, %v480_v19, %v608_v34  ;;  %vm546_vm1 = vcmp.ge.f32.partialorder %v482_v31, 0.0  ;;  %v610_v39 = vmul.f32 0.2, %v482_v31  ;;  %v416_v40 = vmul.f32 %v950_v61, %v1416_v11 }
  0x44   : > { %1242 = vst [vmem:[%s1453_s23 + $0x20] sm:$0xff] %v1071_v35   ;;  %v1076_v32 = vpack.c.bf16 %v672_v38, %v671_v36  ;;  %v673_v41 = vsel %vm545_vm0, %v481_v28, %v609_v37  ;;  %v417_v33 = vmul.f32 %v951_v0, %v1416_v11  ;;  %v418_v42 = vmul.f32 %v954_v1, %v1416_v11  ;;  %v1221_v28 = vld [vmem:[%s1366_s15 + $0x70] sm:$0xff]   ;;  %v1222_v38 = vld [vmem:[%s1366_s15 + $0x78] sm:$0xff]  }
  0x45   : > { %v674_v43 = vsel %vm546_vm1, %v482_v31, %v610_v39  ;;  %v483_v44 = vadd.f32 %v1431_v26, %v416_v40  ;;  %v419_v46 = vmul.f32 %v955_v2, %v1416_v11  ;;  %v420_v61 = vmul.f32 %v958_v6, %v1416_v11 }
  0x46   : > { %1243 = vst [vmem:[%s1453_s23 + $0x28] sm:$0xff] %v1076_v32   ;;  %v1081_v47 = vpack.c.bf16 %v674_v43, %v673_v41  ;;  %v484_v45 = vadd.f32 %v1431_v26, %v417_v33  ;;  %v485_v0 = vadd.f32 %v1431_v26, %v418_v42  ;;  %v421_v1 = vmul.f32 %v959_v7, %v1416_v11  ;;  %v1223_v33 = vld [vmem:[%s1366_s15 + $0x80] sm:$0xff]  }
  0x47   : > { %vm547_vm2 = vcmp.ge.f32.partialorder %v483_v44, 0.0  ;;  %v611_v48 = vmul.f32 0.2, %v483_v44  ;;  %v486_v49 = vadd.f32 %v1431_v26, %v419_v46  ;;  %v487_v51 = vadd.f32 %v1431_v26, %v420_v61 }
  0x48   : > { %1244 = vst [vmem:[%s1453_s23 + $0x30] sm:$0xff] %v1081_v47   ;;  %vm548_vm3 = vcmp.ge.f32.partialorder %v484_v45, 0.0  ;;  %v612_v2 = vmul.f32 0.2, %v484_v45  ;;  %vm549_vm4 = vcmp.ge.f32.partialorder %v485_v0, 0.0  ;;  %v488_v6 = vadd.f32 %v1431_v26, %v421_v1  ;;  %v1224_v47 = vld [vmem:[%s1366_s15 + $0x88] sm:$0xff]  }
  0x49   : > { %v675_v50 = vsel %vm547_vm2, %v483_v44, %v611_v48  ;;  %vm550_vm5 = vcmp.ge.f32.partialorder %v486_v49, 0.0  ;;  %v613_v52 = vmul.f32 0.2, %v485_v0  ;;  %v614_v53 = vmul.f32 0.2, %v486_v49 }
  0x4a   : > { %v676_v54 = vsel %vm548_vm3, %v484_v45, %v612_v2  ;;  %vm551_vm6 = vcmp.ge.f32.partialorder %v487_v51, 0.0  ;;  %vm552_vm7 = vcmp.ge.f32.partialorder %v488_v6, 0.0  ;;  %v615_v56 = vmul.f32 0.2, %v487_v51 }
  0x4b   : > { %v1086_v7 = vpack.c.bf16 %v676_v54, %v675_v50  ;;  %v677_v55 = vsel %vm549_vm4, %v485_v0, %v613_v52  ;;  %v678_v58 = vsel %vm550_vm5, %v486_v49, %v614_v53  ;;  %v616_v59 = vmul.f32 0.2, %v488_v6 }
  0x4c   : > { %v1091_v60 = vpack.c.bf16 %v678_v58, %v677_v55  ;;  %v679_v63 = vsel %vm551_vm6, %v487_v51, %v615_v56  ;;  %v422_v5 = vmul.f32 %v962_v8, %v1416_v11  ;;  %v423_v10 = vmul.f32 %v963_v9, %v1416_v11 }
  0x4d   : > { %1245 = vst [vmem:[%s1453_s23 + $0x38] sm:$0xff] %v1086_v7   ;;  %v680_v18 = vsel %vm552_vm7, %v488_v6, %v616_v59  ;;  %v424_v19 = vmul.f32 %v966_v12, %v1416_v11  ;;  %v425_v20 = vmul.f32 %v967_v13, %v1416_v11  ;;  %v426_v21 = vmul.f32 %v970_v14, %v1416_v11 }
  0x4e   : > { %1246 = vst [vmem:[%s1453_s23 + $0x40] sm:$0xff] %v1091_v60   ;;  %v1096_v8 = vpack.c.bf16 %v680_v18, %v679_v63  ;;  %v489_v57 = vadd.f32 %v1431_v26, %v422_v5  ;;  %v490_v9 = vadd.f32 %v1431_v26, %v423_v10  ;;  %v427_v22 = vmul.f32 %v971_v15, %v1416_v11 }
  0x4f   : > { %v491_v12 = vadd.f32 %v1431_v26, %v424_v19  ;;  %v492_v23 = vadd.f32 %v1431_v26, %v425_v20  ;;  %v493_v62 = vadd.f32 %v1431_v26, %v426_v21  ;;  %v428_v13 = vmul.f32 %v974_v16, %v1416_v11 }
  0x50   : > { %1247 = vst [vmem:[%s1453_s23 + $0x48] sm:$0xff] %v1096_v8   ;;  %vm553_vm8 = vcmp.ge.f32.partialorder %v489_v57, 0.0  ;;  %vm554_vm9 = vcmp.ge.f32.partialorder %v490_v9, 0.0  ;;  %v617_v14 = vmul.f32 0.2, %v489_v57  ;;  %v494_v24 = vadd.f32 %v1431_v26, %v427_v22 }
  0x51   : > { %v618_v25 = vmul.f32 0.2, %v490_v9  ;;  %vm555_vm10 = vcmp.ge.f32.partialorder %v491_v12, 0.0  ;;  %vm556_vm11 = vcmp.ge.f32.partialorder %v492_v23, 0.0  ;;  %v619_v3 = vmul.f32 0.2, %v491_v12 }
  0x52   : > { %v681_v15 = vsel %vm553_vm8, %v489_v57, %v617_v14  ;;  %v620_v27 = vmul.f32 0.2, %v492_v23  ;;  %vm557_vm12 = vcmp.ge.f32.partialorder %v493_v62, 0.0  ;;  %vm558_vm13 = vcmp.ge.f32.partialorder %v494_v24, 0.0  ;;  %v1225_v57 = vld [vmem:[%s1366_s15 + $0x90] sm:$0xff]  }
  0x53   : > { %v682_v29 = vsel %vm554_vm9, %v490_v9, %v618_v25  ;;  %v683_v16 = vsel %vm555_vm10, %v491_v12, %v619_v3  ;;  %v621_v30 = vmul.f32 0.2, %v493_v62  ;;  %v622_v34 = vmul.f32 0.2, %v494_v24 }
  0x54   : > { %v1101_v31 = vpack.c.bf16 %v682_v29, %v681_v15  ;;  %v684_v35 = vsel %vm556_vm11, %v492_v23, %v620_v27  ;;  %v429_v36 = vmul.f32 %v975_v17, %v1416_v11  ;;  %v495_v37 = vadd.f32 %v1431_v26, %v428_v13  ;;  %v1227_v13 = vld [vmem:[%s1366_s15 + $0xa0] sm:$0xff]  }
  0x55   : > { %v1106_v39 = vpack.c.bf16 %v684_v35, %v683_v16  ;;  %v685_v40 = vsel %vm557_vm12, %v493_v62, %v621_v30  ;;  %v686_v32 = vsel %vm558_vm13, %v494_v24, %v622_v34  ;;  %v978_v41 = vunpack.c.l.bf16 %v1221_v28  ;;  %v1226_v62 = vld [vmem:[%s1366_s15 + $0x98] sm:$0xff]  }
  0x56   : > { %1248 = vst [vmem:[%s1453_s23 + $0x50] sm:$0xff] %v1101_v31   ;;  %v1111_v42 = vpack.c.bf16 %v686_v32, %v685_v40  ;;  %v496_v43 = vadd.f32 %v1431_v26, %v429_v36  ;;  %vm559_vm14 = vcmp.ge.f32.partialorder %v495_v37, 0.0  ;;  %v623_v44 = vmul.f32 0.2, %v495_v37  ;;  %v1228_v32 = vld [vmem:[%s1366_s15 + $0xa8] sm:$0xff]  }
  0x57   : > { %1249 = vst [vmem:[%s1453_s23 + $0x58] sm:$0xff] %v1106_v39   ;;  %v979_v46 = vunpack.c.h.bf16 %v1221_v28  ;;  %v430_v4 = vmul.f32 %v978_v41, %v1416_v11  ;;  %v982_v17 = vunpack.c.l.bf16 %v1222_v38  ;;  %v983_v61 = vunpack.c.h.bf16 %v1222_v38 }
  0x58   : > { %1250 = vst [vmem:[%s1453_s23 + $0x60] sm:$0xff] %v1111_v42   ;;  %vm560_vm15 = vcmp.ge.f32.partialorder %v496_v43, 0.0  ;;  %v624_v45 = vmul.f32 0.2, %v496_v43  ;;  %v687_v0 = vsel %vm559_vm14, %v495_v37, %v623_v44  ;;  %v986_v1 = vunpack.c.l.bf16 %v1223_v33 }
  0x59   : > { %v431_v48 = vmul.f32 %v979_v46, %v1416_v11  ;;  %v497_v49 = vadd.f32 %v1431_v26, %v430_v4  ;;  %v432_v51 = vmul.f32 %v982_v17, %v1416_v11  ;;  %v433_v2 = vmul.f32 %v983_v61, %v1416_v11 }
  0x5a   : > { %v688_v6 = vsel %vm560_vm15, %v496_v43, %v624_v45  ;;  %v987_v50 = vunpack.c.h.bf16 %v1223_v33  ;;  %v434_v52 = vmul.f32 %v986_v1, %v1416_v11  ;;  %v990_v53 = vunpack.c.l.bf16 %v1224_v47 }
  0x5b   : > { %v1116_v54 = vpack.c.bf16 %v688_v6, %v687_v0  ;;  %v498_v56 = vadd.f32 %v1431_v26, %v431_v48  ;;  %vm561_vm0 = vcmp.ge.f32.partialorder %v497_v49, 0.0  ;;  %v625_v7 = vmul.f32 0.2, %v497_v49 }
  0x5c   : > { %v499_v55 = vadd.f32 %v1431_v26, %v432_v51  ;;  %v500_v58 = vadd.f32 %v1431_v26, %v433_v2  ;;  %v435_v59 = vmul.f32 %v987_v50, %v1416_v11  ;;  %v501_v60 = vadd.f32 %v1431_v26, %v434_v52 }
  0x5d   : > { %1251 = vst [vmem:[%s1453_s23 + $0x68] sm:$0xff] %v1116_v54   ;;  %vm562_vm1 = vcmp.ge.f32.partialorder %v498_v56, 0.0  ;;  %v626_v63 = vmul.f32 0.2, %v498_v56  ;;  %v689_v5 = vsel %vm561_vm0, %v497_v49, %v625_v7  ;;  %v991_v10 = vunpack.c.h.bf16 %v1224_v47  ;;  %v1229_v7 = vld [vmem:[%s1366_s15 + $0xb0] sm:$0xff]  }
  0x5e   : > { %vm563_vm2 = vcmp.ge.f32.partialorder %v499_v55, 0.0  ;;  %vm564_vm3 = vcmp.ge.f32.partialorder %v500_v58, 0.0  ;;  %v627_v18 = vmul.f32 0.2, %v499_v55  ;;  %v628_v19 = vmul.f32 0.2, %v500_v58 }
  0x5f   : > { %v690_v20 = vsel %vm562_vm1, %v498_v56, %v626_v63  ;;  %v502_v21 = vadd.f32 %v1431_v26, %v435_v59  ;;  %vm565_vm4 = vcmp.ge.f32.partialorder %v501_v60, 0.0  ;;  %v629_v8 = vmul.f32 0.2, %v501_v60 }
  0x60   : > { %v1121_v9 = vpack.c.bf16 %v690_v20, %v689_v5  ;;  %v691_v22 = vsel %vm563_vm2, %v499_v55, %v627_v18  ;;  %v692_v12 = vsel %vm564_vm3, %v500_v58, %v628_v19  ;;  %v436_v23 = vmul.f32 %v990_v53, %v1416_v11  ;;  %v1230_v55 = vld [vmem:[%s1366_s15 + $0xb8] sm:$0xff]  }
  0x61   : > { %v1126_v14 = vpack.c.bf16 %v692_v12, %v691_v22  ;;  %vm566_vm5 = vcmp.ge.f32.partialorder %v502_v21, 0.0  ;;  %v630_v24 = vmul.f32 0.2, %v502_v21  ;;  %v693_v25 = vsel %vm565_vm4, %v501_v60, %v629_v8  ;;  %v1231_v12 = vld [vmem:[%s1366_s15 + $0xc0] sm:$0xff]  }
  0x62   : > { %1252 = vst [vmem:[%s1453_s23 + $0x70] sm:$0xff] %v1121_v9   ;;  %v437_v3 = vmul.f32 %v991_v10, %v1416_v11  ;;  %v503_v15 = vadd.f32 %v1431_v26, %v436_v23  ;;  %v994_v27 = vunpack.c.l.bf16 %v1225_v57  ;;  %v995_v28 = vunpack.c.h.bf16 %v1225_v57 }
  0x63   : > { %1253 = vst [vmem:[%s1453_s23 + $0x78] sm:$0xff] %v1126_v14   ;;  %v694_v29 = vsel %vm566_vm5, %v502_v21, %v630_v24  ;;  %v998_v16 = vunpack.c.l.bf16 %v1226_v62  ;;  %v999_v30 = vunpack.c.h.bf16 %v1226_v62  ;;  %v1002_v34 = vunpack.c.l.bf16 %v1227_v13 }
  0x64   : > { %v1131_v31 = vpack.c.bf16 %v694_v29, %v693_v25  ;;  %v504_v35 = vadd.f32 %v1431_v26, %v437_v3  ;;  %vm567_vm6 = vcmp.ge.f32.partialorder %v503_v15, 0.0  ;;  %v631_v36 = vmul.f32 0.2, %v503_v15 }
  0x65   : > { %v438_v37 = vmul.f32 %v994_v27, %v1416_v11  ;;  %v439_v38 = vmul.f32 %v995_v28, %v1416_v11  ;;  %v440_v39 = vmul.f32 %v998_v16, %v1416_v11  ;;  %v441_v40 = vmul.f32 %v999_v30, %v1416_v11 }
  0x66   : > { %1254 = vst [vmem:[%s1453_s23 + $0x80] sm:$0xff] %v1131_v31   ;;  %vm568_vm7 = vcmp.ge.f32.partialorder %v504_v35, 0.0  ;;  %v632_v41 = vmul.f32 0.2, %v504_v35  ;;  %v695_v33 = vsel %vm567_vm6, %v503_v15, %v631_v36  ;;  %v1003_v42 = vunpack.c.h.bf16 %v1227_v13 }
  0x67   : > { %v505_v43 = vadd.f32 %v1431_v26, %v438_v37  ;;  %v506_v44 = vadd.f32 %v1431_v26, %v439_v38  ;;  %v507_v46 = vadd.f32 %v1431_v26, %v440_v39  ;;  %v508_v4 = vadd.f32 %v1431_v26, %v441_v40  ;;  %v1232_v37 = vld [vmem:[%s1366_s15 + $0xc8] sm:$0xff]  }
  0x68   : > { %v696_v17 = vsel %vm568_vm7, %v504_v35, %v632_v41  ;;  %v442_v61 = vmul.f32 %v1002_v34, %v1416_v11  ;;  %v443_v47 = vmul.f32 %v1003_v42, %v1416_v11  ;;  %v1006_v45 = vunpack.c.l.bf16 %v1228_v32 }
  0x69   : > { %v1136_v0 = vpack.c.bf16 %v696_v17, %v695_v33  ;;  %vm569_vm8 = vcmp.ge.f32.partialorder %v505_v43, 0.0  ;;  %vm570_vm9 = vcmp.ge.f32.partialorder %v506_v44, 0.0  ;;  %v633_v1 = vmul.f32 0.2, %v505_v43  ;;  %v1233_v33 = vld [vmem:[%s1366_s15 + $0xd0] sm:$0xff]  }
  0x6a   : > { %v634_v48 = vmul.f32 0.2, %v506_v44  ;;  %vm571_vm10 = vcmp.ge.f32.partialorder %v507_v46, 0.0  ;;  %vm572_vm11 = vcmp.ge.f32.partialorder %v508_v4, 0.0  ;;  %v635_v49 = vmul.f32 0.2, %v507_v46 }
  0x6b   : > { %1255 = vst [vmem:[%s1453_s23 + $0x88] sm:$0xff] %v1136_v0   ;;  %v697_v51 = vsel %vm569_vm8, %v505_v43, %v633_v1  ;;  %v636_v2 = vmul.f32 0.2, %v508_v4  ;;  %v509_v6 = vadd.f32 %v1431_v26, %v442_v61  ;;  %v510_v50 = vadd.f32 %v1431_v26, %v443_v47 }
  0x6c   : > { %v698_v52 = vsel %vm570_vm9, %v506_v44, %v634_v48  ;;  %v699_v53 = vsel %vm571_vm10, %v507_v46, %v635_v49  ;;  %v1007_v54 = vunpack.c.h.bf16 %v1228_v32  ;;  %v444_v56 = vmul.f32 %v1006_v45, %v1416_v11  ;;  %v1234_v49 = vld [vmem:[%s1366_s15 + $0xd8] sm:$0xff]  }
  0x6d   : > { %v1141_v58 = vpack.c.bf16 %v698_v52, %v697_v51  ;;  %v700_v59 = vsel %vm572_vm11, %v508_v4, %v636_v2  ;;  %vm573_vm12 = vcmp.ge.f32.partialorder %v509_v6, 0.0  ;;  %vm574_vm13 = vcmp.ge.f32.partialorder %v510_v50, 0.0 }
  0x6e   : > { %v1146_v60 = vpack.c.bf16 %v700_v59, %v699_v53  ;;  %v637_v63 = vmul.f32 0.2, %v509_v6  ;;  %v638_v5 = vmul.f32 0.2, %v510_v50  ;;  %v445_v10 = vmul.f32 %v1007_v54, %v1416_v11 }
  0x6f   : > { %1256 = vst [vmem:[%s1453_s23 + $0x90] sm:$0xff] %v1141_v58   ;;  %v511_v18 = vadd.f32 %v1431_v26, %v444_v56  ;;  %v1010_v19 = vunpack.c.l.bf16 %v1229_v7  ;;  %v1011_v20 = vunpack.c.h.bf16 %v1229_v7  ;;  %v1014_v21 = vunpack.c.l.bf16 %v1230_v55 }
  0x70   : > { %1257 = vst [vmem:[%s1453_s23 + $0x98] sm:$0xff] %v1146_v60   ;;  %v701_v8 = vsel %vm573_vm12, %v509_v6, %v637_v63  ;;  %v702_v57 = vsel %vm574_vm13, %v510_v50, %v638_v5  ;;  %v512_v9 = vadd.f32 %v1431_v26, %v445_v10  ;;  %v1015_v22 = vunpack.c.h.bf16 %v1230_v55 }
  0x71   : > { %v1151_v23 = vpack.c.bf16 %v702_v57, %v701_v8  ;;  %vm575_vm14 = vcmp.ge.f32.partialorder %v511_v18, 0.0  ;;  %v639_v62 = vmul.f32 0.2, %v511_v18  ;;  %v446_v13 = vmul.f32 %v1010_v19, %v1416_v11  ;;  %v1236_v8 = vld [vmem:[%s1366_s15 + $0xe8] sm:$0xff]  }
  0x72   : > { %vm576_vm15 = vcmp.ge.f32.partialorder %v512_v9, 0.0  ;;  %v640_v14 = vmul.f32 0.2, %v512_v9  ;;  %v447_v24 = vmul.f32 %v1011_v20, %v1416_v11  ;;  %v448_v25 = vmul.f32 %v1014_v21, %v1416_v11 }
  0x73   : > { %1258 = vst [vmem:[%s1453_s23 + $0xa0] sm:$0xff] %v1151_v23   ;;  %v703_v3 = vsel %vm575_vm14, %v511_v18, %v639_v62  ;;  %v513_v15 = vadd.f32 %v1431_v26, %v446_v13  ;;  %v449_v27 = vmul.f32 %v1015_v22, %v1416_v11  ;;  %v1018_v28 = vunpack.c.l.bf16 %v1231_v12  ;;  %v1235_v18 = vld [vmem:[%s1366_s15 + $0xe0] sm:$0xff]  }
  0x74   : > { %v704_v29 = vsel %vm576_vm15, %v512_v9, %v640_v14  ;;  %v514_v16 = vadd.f32 %v1431_v26, %v447_v24  ;;  %v515_v30 = vadd.f32 %v1431_v26, %v448_v25  ;;  %v1019_v34 = vunpack.c.h.bf16 %v1231_v12 }
  0x75   : > { %v1156_v31 = vpack.c.bf16 %v704_v29, %v703_v3  ;;  %vm577_vm0 = vcmp.ge.f32.partialorder %v513_v15, 0.0  ;;  %v641_v35 = vmul.f32 0.2, %v513_v15  ;;  %v516_v36 = vadd.f32 %v1431_v26, %v449_v27 }
  0x76   : > { %vm578_vm1 = vcmp.ge.f32.partialorder %v514_v16, 0.0  ;;  %v642_v38 = vmul.f32 0.2, %v514_v16  ;;  %vm579_vm2 = vcmp.ge.f32.partialorder %v515_v30, 0.0  ;;  %v643_v39 = vmul.f32 0.2, %v515_v30 }
  0x77   : > { %1259 = vst [vmem:[%s1453_s23 + $0xa8] sm:$0xff] %v1156_v31   ;;  %v705_v40 = vsel %vm577_vm0, %v513_v15, %v641_v35  ;;  %vm580_vm3 = vcmp.ge.f32.partialorder %v516_v36, 0.0  ;;  %v644_v32 = vmul.f32 0.2, %v516_v36  ;;  %v450_v41 = vmul.f32 %v1018_v28, %v1416_v11 }
  0x78   : > { %v706_v42 = vsel %vm578_vm1, %v514_v16, %v642_v38  ;;  %v707_v43 = vsel %vm579_vm2, %v515_v30, %v643_v39  ;;  %v451_v44 = vmul.f32 %v1019_v34, %v1416_v11  ;;  %v1022_v46 = vunpack.c.l.bf16 %v1232_v37  ;;  %v1237_v16 = vld [vmem:[%s1366_s15 + $0xf0] sm:$0xff]  }
  0x79   : > { %v1161_v4 = vpack.c.bf16 %v706_v42, %v705_v40  ;;  %v708_v17 = vsel %vm580_vm3, %v516_v36, %v644_v32  ;;  %v517_v61 = vadd.f32 %v1431_v26, %v450_v41  ;;  %v1023_v47 = vunpack.c.h.bf16 %v1232_v37 }
  0x7a   : > { %v1166_v45 = vpack.c.bf16 %v708_v17, %v707_v43  ;;  %v518_v0 = vadd.f32 %v1431_v26, %v451_v44  ;;  %v452_v1 = vmul.f32 %v1022_v46, %v1416_v11  ;;  %v1026_v48 = vunpack.c.l.bf16 %v1233_v33  ;;  %v1238_v43 = vld [vmem:[%s1366_s15 + $0xf8] sm:$0xff]  }
  0x7b   : > { %1260 = vst [vmem:[%s1453_s23 + $0xb0] sm:$0xff] %v1161_v4   ;;  %vm581_vm4 = vcmp.ge.f32.partialorder %v517_v61, 0.0  ;;  %v645_v51 = vmul.f32 0.2, %v517_v61  ;;  %v453_v2 = vmul.f32 %v1023_v47, %v1416_v11  ;;  %v1027_v6 = vunpack.c.h.bf16 %v1233_v33 }
  0x7c   : > { %1261 = vst [vmem:[%s1453_s23 + $0xb8] sm:$0xff] %v1166_v45   ;;  %vm582_vm5 = vcmp.ge.f32.partialorder %v518_v0, 0.0  ;;  %v646_v50 = vmul.f32 0.2, %v518_v0  ;;  %v519_v52 = vadd.f32 %v1431_v26, %v452_v1  ;;  %v454_v53 = vmul.f32 %v1026_v48, %v1416_v11 }
  0x7d   : > { %v709_v54 = vsel %vm581_vm4, %v517_v61, %v645_v51  ;;  %v520_v56 = vadd.f32 %v1431_v26, %v453_v2  ;;  %v455_v7 = vmul.f32 %v1027_v6, %v1416_v11  ;;  %v1030_v55 = vunpack.c.l.bf16 %v1234_v49 }
  0x7e   : > { %v710_v58 = vsel %vm582_vm5, %v518_v0, %v646_v50  ;;  %vm583_vm6 = vcmp.ge.f32.partialorder %v519_v52, 0.0  ;;  %v647_v59 = vmul.f32 0.2, %v519_v52  ;;  %v521_v60 = vadd.f32 %v1431_v26, %v454_v53 }
  0x7f   : > { %v1171_v63 = vpack.c.bf16 %v710_v58, %v709_v54  ;;  %vm584_vm7 = vcmp.ge.f32.partialorder %v520_v56, 0.0  ;;  %v648_v5 = vmul.f32 0.2, %v520_v56  ;;  %v522_v10 = vadd.f32 %v1431_v26, %v455_v7 }
  0x80   : > { %v711_v19 = vsel %vm583_vm6, %v519_v52, %v647_v59  ;;  %vm585_vm8 = vcmp.ge.f32.partialorder %v521_v60, 0.0  ;;  %v649_v20 = vmul.f32 0.2, %v521_v60  ;;  %v1031_v21 = vunpack.c.h.bf16 %v1234_v49 }
  0x81   : > { %1262 = vst [vmem:[%s1453_s23 + $0xc0] sm:$0xff] %v1171_v63   ;;  %v712_v57 = vsel %vm584_vm7, %v520_v56, %v648_v5  ;;  %vm586_vm9 = vcmp.ge.f32.partialorder %v522_v10, 0.0  ;;  %v650_v9 = vmul.f32 0.2, %v522_v10  ;;  %v456_v22 = vmul.f32 %v1030_v55, %v1416_v11 }
  0x82   : > { %v1176_v12 = vpack.c.bf16 %v712_v57, %v711_v19  ;;  %v713_v23 = vsel %vm585_vm8, %v521_v60, %v649_v20  ;;  %v457_v62 = vmul.f32 %v1031_v21, %v1416_v11  ;;  %v1034_v13 = vunpack.c.l.bf16 %v1235_v18 }
  0x83   : > { %v714_v14 = vsel %vm586_vm9, %v522_v10, %v650_v9  ;;  %v523_v24 = vadd.f32 %v1431_v26, %v456_v22  ;;  %v1035_v25 = vunpack.c.h.bf16 %v1235_v18  ;;  %v1038_v3 = vunpack.c.l.bf16 %v1236_v8 }
  0x84   : > { %1263 = vst [vmem:[%s1453_s23 + $0xc8] sm:$0xff] %v1176_v12   ;;  %v1181_v15 = vpack.c.bf16 %v714_v14, %v713_v23  ;;  %v524_v27 = vadd.f32 %v1431_v26, %v457_v62  ;;  %v458_v28 = vmul.f32 %v1034_v13, %v1416_v11  ;;  %v1039_v29 = vunpack.c.h.bf16 %v1236_v8 }
  0x85   : > { %vm587_vm10 = vcmp.ge.f32.partialorder %v523_v24, 0.0  ;;  %v651_v30 = vmul.f32 0.2, %v523_v24  ;;  %v459_v34 = vmul.f32 %v1035_v25, %v1416_v11  ;;  %v460_v31 = vmul.f32 %v1038_v3, %v1416_v11 }
  0x86   : > { %1264 = vst [vmem:[%s1453_s23 + $0xd0] sm:$0xff] %v1181_v15   ;;  %vm588_vm11 = vcmp.ge.f32.partialorder %v524_v27, 0.0  ;;  %v652_v35 = vmul.f32 0.2, %v524_v27  ;;  %v525_v36 = vadd.f32 %v1431_v26, %v458_v28  ;;  %v461_v37 = vmul.f32 %v1039_v29, %v1416_v11 }
  0x87   : > { %v715_v38 = vsel %vm587_vm10, %v523_v24, %v651_v30  ;;  %v526_v39 = vadd.f32 %v1431_v26, %v459_v34  ;;  %v527_v40 = vadd.f32 %v1431_v26, %v460_v31  ;;  %v1042_v32 = vunpack.c.l.bf16 %v1237_v16 }
  0x88   : > { %v716_v41 = vsel %vm588_vm11, %v524_v27, %v652_v35  ;;  %vm589_vm12 = vcmp.ge.f32.partialorder %v525_v36, 0.0  ;;  %v653_v33 = vmul.f32 0.2, %v525_v36  ;;  %v528_v42 = vadd.f32 %v1431_v26, %v461_v37 }
  0x89   : > { %v1186_v44 = vpack.c.bf16 %v716_v41, %v715_v38  ;;  %vm590_vm13 = vcmp.ge.f32.partialorder %v526_v39, 0.0  ;;  %v654_v46 = vmul.f32 0.2, %v526_v39  ;;  %vm591_vm14 = vcmp.ge.f32.partialorder %v527_v40, 0.0 }
  0x8a   : > { %v717_v4 = vsel %vm589_vm12, %v525_v36, %v653_v33  ;;  %vm592_vm15 = vcmp.ge.f32.partialorder %v528_v42, 0.0  ;;  %v655_v17 = vmul.f32 0.2, %v527_v40  ;;  %v656_v61 = vmul.f32 0.2, %v528_v42 }
  0x8b   : > { %1265 = vst [vmem:[%s1453_s23 + $0xd8] sm:$0xff] %v1186_v44   ;;  %v718_v47 = vsel %vm590_vm13, %v526_v39, %v654_v46  ;;  %v1043_v45 = vunpack.c.h.bf16 %v1237_v16  ;;  %v462_v0 = vmul.f32 %v1042_v32, %v1416_v11  ;;  %v1046_v1 = vunpack.c.l.bf16 %v1238_v43 }
  0x8c   : > { %v1191_v48 = vpack.c.bf16 %v718_v47, %v717_v4  ;;  %v719_v49 = vsel %vm591_vm14, %v527_v40, %v655_v17  ;;  %v720_v51 = vsel %vm592_vm15, %v528_v42, %v656_v61  ;;  %v1047_v2 = vunpack.c.h.bf16 %v1238_v43 }
  0x8d   : > { %v1196_v6 = vpack.c.bf16 %v720_v51, %v719_v49  ;;  %v463_v50 = vmul.f32 %v1043_v45, %v1416_v11  ;;  %v529_v52 = vadd.f32 %v1431_v26, %v462_v0  ;;  %v464_v53 = vmul.f32 %v1046_v1, %v1416_v11 }
  0x8e   : > { %1266 = vst [vmem:[%s1453_s23 + $0xe0] sm:$0xff] %v1191_v48   ;;  %v465_v54 = vmul.f32 %v1047_v2, %v1416_v11 }
  0x8f   : > { %1267 = vst [vmem:[%s1453_s23 + $0xe8] sm:$0xff] %v1196_v6   ;;  %v530_v56 = vadd.f32 %v1431_v26, %v463_v50  ;;  %vm593_vm0 = vcmp.ge.f32.partialorder %v529_v52, 0.0  ;;  %v657_v7 = vmul.f32 0.2, %v529_v52  ;;  %v531_v55 = vadd.f32 %v1431_v26, %v464_v53 }
  0x90   : > { %v532_v58 = vadd.f32 %v1431_v26, %v465_v54 }
  0x91   : > { %vm594_vm1 = vcmp.ge.f32.partialorder %v530_v56, 0.0  ;;  %v658_v59 = vmul.f32 0.2, %v530_v56  ;;  %v721_v60 = vsel %vm593_vm0, %v529_v52, %v657_v7  ;;  %vm595_vm2 = vcmp.ge.f32.partialorder %v531_v55, 0.0 }
  0x92   : > { %vm596_vm3 = vcmp.ge.f32.partialorder %v532_v58, 0.0  ;;  %v659_v63 = vmul.f32 0.2, %v531_v55  ;;  %v660_v5 = vmul.f32 0.2, %v532_v58 }
  0x93   : > { %v722_v10 = vsel %vm594_vm1, %v530_v56, %v658_v59 }
  0x94   : > { %v1201_v11 = vpack.c.bf16 %v722_v10, %v721_v60  ;;  %v723_v18 = vsel %vm595_vm2, %v531_v55, %v659_v63  ;;  %v724_v19 = vsel %vm596_vm3, %v532_v58, %v660_v5 }
  0x95   : > { %v1206_v20 = vpack.c.bf16 %v724_v19, %v723_v18 }
  0x96   : > { %1268 = vst [vmem:[%s1453_s23 + $0xf0] sm:$0xff] %v1201_v11  }
  0x97   : > { %1269 = vst [vmem:[%s1453_s23 + $0xf8] sm:$0xff] %v1206_v20  }
  0x98 PF: > { %s15_s18 = sadd.s32 1, %s1286_s18  }
  0x99   : > { %p12_p4 = scmp.ge.s32.totalorder %s15_s18, 6  }
  0x9b   :  { %14 = sbr.rel (!%p12_p4) target bundleno = 1 (0x1), region = 70 }

// kernel: forward.13
= control target key start
LH: loop header
LB: loop body
LE: loop exit
PB: predicated region body
PF: predicated region fallthrough
CT: control target
= control target key end

     0   :  { %s3443_s18 = smov 0   ;;  %s3966_s0 = inlined_call_operand.vmem [shape: bf16[2048,512], index: 0, kind: input, shape index: {}]   ;;  %s3967_s1 = inlined_call_operand.vmem [shape: bf16[512,128], index: 1, kind: input, shape index: {}]   ;;  %s3968_s2 = inlined_call_operand.vmem [shape: f32[1,128], index: 2, kind: input, shape index: {}]   ;;  %s3969_s3 = inlined_call_operand.vmem [shape: bf16[2048,128], index: 3, kind: output, shape index: {0}]   ;;  %s3970_s4 = inlined_call_operand.vmem [shape: f32[4,1,128], index: 4, kind: output, shape index: {1}]   ;;  %s3971_s5 = inlined_call_operand.vmem [shape: f32[4,1,128], index: 5, kind: output, shape index: {2}]  }
   0x1 LB: > { %s3449_s19 = sadd.s32 4294967295, %s3411_s18   ;;  %p2394_p0 = scmp.ge.s32.totalorder %s3411_s18, 1  ;;  %s3411_s18 = sphi %s3443_s18, %s16_s18  }
   0x2   : > { %p194_p1 = scmp.lt.s32.totalorder %s3411_s18, 5 }
   0x4   : > { %p195_p2 = pnand %p2394_p0, %p194_p1 }
   0x5   : > { %s2395_s21 = sshll.u32 (!%p195_p2), %s3449_s19, 6  ;;  %p242_p4 = scmp.lt.s32.totalorder (!%p195_p2), %s3449_s19, 3 }
   0x6   : > { %198 = sbr.rel (%p195_p2) target bundleno = 702 (0x2be), region = 32  ;;  %p230_p3 = scmp.lt.s32.totalorder (!%p195_p2), %s2395_s21, 255 }
   0xb   : > { %v3178_v0 = vld [vmem:[%s3967_s1 + $0x38] sm:$0xff]  ;;  %v3177_v4 = vld [vmem:[%s3967_s1 + $0x30] sm:$0xff]  ;;  %v3176_v8 = vld [vmem:[%s3967_s1 + $0x28] sm:$0xff]  ;;  %s3973_s21 = smov (!%p230_p3, %s2395_s21), 255  ;;  %s3975_s19 = smov (!%p242_p4, %s3449_s19), 3 }
   0xc   : > { %v3186_v1 = vld [vmem:[%s3967_s1 + $0x78] sm:$0xff]  ;;  %1276 = vmatpush.bf16.msra.mxu0 %v3178_v0  ;;  %v3185_v5 = vld [vmem:[%s3967_s1 + $0x70] sm:$0xff]  ;;  %v3184_v9 = vld [vmem:[%s3967_s1 + $0x68] sm:$0xff]  ;;  %s3042_s24 = sshll.u32 %s3973_s21, 4  ;;  %s244_s8 = scalar_lea.vmem %s3970_s4, %s3975_s19 }
   0xd   : > { %v3194_v2 = vld [vmem:[%s3967_s1 + $0xb8] sm:$0xff]  ;;  %1445 = vmatpush.bf16.msra.mxu1 %v3186_v1  ;;  %v3193_v6 = vld [vmem:[%s3967_s1 + $0xb0] sm:$0xff]  ;;  %v3192_v10 = vld [vmem:[%s3967_s1 + $0xa8] sm:$0xff]  ;;  %s3538_s6 = scalar_lea.vmem %s3966_s0, %s3042_s24  ;;  %s2399_s24 = sshll.u32 %s3973_s21, 2 }
   0xe   : > { %v3202_v3 = vld [vmem:[%s3967_s1 + $0xf8] sm:$0xff]  ;;  %1614 = vmatpush.bf16.msra.mxu2 %v3194_v2  ;;  %v3201_v7 = vld [vmem:[%s3967_s1 + $0xf0] sm:$0xff]  ;;  %v3200_v11 = vld [vmem:[%s3967_s1 + $0xe8] sm:$0xff]  ;;  %s3650_s27 = scalar_lea.vmem %s3969_s3, %s2399_s24  ;;  %s247_s11 = scalar_lea.vmem %s3971_s5, %s3975_s19 }
   0xf   : > { %1783 = vmatpush.bf16.msra.mxu3 %v3202_v3  ;;  %v3175_v12 = vld [vmem:[%s3967_s1 + $0x20] sm:$0xff]  ;;  %v3174_v16 = vld [vmem:[%s3967_s1 + $0x18] sm:$0xff]  ;;  %v3173_v20 = vld [vmem:[%s3967_s1 + $0x10] sm:$0xff] }
  0x10   : > { %1277 = vmatpush.bf16.msra.mxu0 %v3177_v4  ;;  %v3183_v13 = vld [vmem:[%s3967_s1 + $0x60] sm:$0xff]  ;;  %v3182_v17 = vld [vmem:[%s3967_s1 + $0x58] sm:$0xff]  ;;  %v3181_v21 = vld [vmem:[%s3967_s1 + $0x50] sm:$0xff] }
  0x11   : > { %1446 = vmatpush.bf16.msra.mxu1 %v3185_v5  ;;  %v3191_v14 = vld [vmem:[%s3967_s1 + $0xa0] sm:$0xff]  ;;  %v3190_v18 = vld [vmem:[%s3967_s1 + $0x98] sm:$0xff]  ;;  %v3189_v22 = vld [vmem:[%s3967_s1 + $0x90] sm:$0xff] }
  0x12   : > { %1615 = vmatpush.bf16.msra.mxu2 %v3193_v6  ;;  %v3199_v15 = vld [vmem:[%s3967_s1 + $0xe0] sm:$0xff]  ;;  %v3198_v19 = vld [vmem:[%s3967_s1 + $0xd8] sm:$0xff]  ;;  %v3197_v23 = vld [vmem:[%s3967_s1 + $0xd0] sm:$0xff] }
  0x13   : > { %1784 = vmatpush.bf16.msra.mxu3 %v3201_v7  ;;  %v3172_v24 = vld [vmem:[%s3967_s1 + $0x8] sm:$0xff]  ;;  %v3171_v28 = vld [vmem:[%s3967_s1] sm:$0xff]  ;;  %v3045_v33 = vld [vmem:[%s3538_s6 + $0xc] sm:$0xf0] }
  0x14   : > { %1278 = vmatpush.bf16.msra.mxu0 %v3176_v8  ;;  %v3180_v25 = vld [vmem:[%s3967_s1 + $0x48] sm:$0xff]  ;;  %v3179_v29 = vld [vmem:[%s3967_s1 + $0x40] sm:$0xff]  ;;  %v2404_v35 = vld [vmem:[%s3538_s6 + $0x10] sm:$0xf0] }
  0x15   : > { %1447 = vmatpush.bf16.msra.mxu1 %v3184_v9  ;;  %v3188_v26 = vld [vmem:[%s3967_s1 + $0x88] sm:$0xff]  ;;  %v3187_v30 = vld [vmem:[%s3967_s1 + $0x80] sm:$0xff]  ;;  %v3046_v37 = vld [vmem:[%s3538_s6 + $0x14] sm:$0xf0] }
  0x16   : > { %1616 = vmatpush.bf16.msra.mxu2 %v3192_v10  ;;  %v3196_v27 = vld [vmem:[%s3967_s1 + $0xc8] sm:$0xff]  ;;  %v3195_v31 = vld [vmem:[%s3967_s1 + $0xc0] sm:$0xff]  ;;  %v2412_v39 = vld [vmem:[%s3538_s6 + $0x18] sm:$0xf0] }
  0x17   : > { %1785 = vmatpush.bf16.msra.mxu3 %v3200_v11  ;;  %v2402_v32 = vld [vmem:[%s3538_s6] sm:$0xf]  ;;  %v3043_v34 = vld [vmem:[%s3538_s6 + $0x4] sm:$0xf]  ;;  %v2410_v36 = vld [vmem:[%s3538_s6 + $0x8] sm:$0xf] }
  0x18   : > { %1279 = vmatpush.bf16.msra.mxu0 %v3175_v12  ;;  %v3044_v38 = vld [vmem:[%s3538_s6 + $0xc] sm:$0xf]  ;;  %v2403_v40 = vor.u32 %v3045_v33, %v2402_v32  ;;  %v2407_v41 = vor.u32 %v3043_v34, %v2404_v35  ;;  %v2411_v42 = vor.u32 %v3046_v37, %v2410_v36  ;;  %v2418_v44 = vld [vmem:[%s3538_s6 + $0x20] sm:$0xf]  ;;  %v3049_v45 = vld [vmem:[%s3538_s6 + $0x2c] sm:$0xf0] }
  0x19   : > { %1448 = vmatpush.bf16.msra.mxu1 %v3183_v13  ;;  %v2415_v43 = vor.u32 %v3044_v38, %v2412_v39  ;;  %v3047_v46 = vld [vmem:[%s3538_s6 + $0x24] sm:$0xf]  ;;  %v2420_v47 = vld [vmem:[%s3538_s6 + $0x30] sm:$0xf0]  ;;  %v2426_v48 = vld [vmem:[%s3538_s6 + $0x28] sm:$0xf]  ;;  %v2419_v52 = vor.u32 %v3049_v45, %v2418_v44 }
  0x1a   : > { %1617 = vmatpush.bf16.msra.mxu2 %v3191_v14  ;;  %v3050_v49 = vld [vmem:[%s3538_s6 + $0x34] sm:$0xf0]  ;;  %v3048_v50 = vld [vmem:[%s3538_s6 + $0x2c] sm:$0xf]  ;;  %v2428_v51 = vld [vmem:[%s3538_s6 + $0x38] sm:$0xf0]  ;;  %v2423_v53 = vor.u32 %v3047_v46, %v2420_v47 }
  0x1b   : > { %1786 = vmatpush.bf16.msra.mxu3 %v3199_v15  ;;  %v2427_v54 = vor.u32 %v3050_v49, %v2426_v48  ;;  %v2431_v55 = vor.u32 %v3048_v50, %v2428_v51  ;;  %v2434_v56 = vld [vmem:[%s3538_s6 + $0x40] sm:$0xf]  ;;  %v3053_v57 = vld [vmem:[%s3538_s6 + $0x4c] sm:$0xf0]  ;;  %v3051_v58 = vld [vmem:[%s3538_s6 + $0x44] sm:$0xf] }
  0x1c   : > { %1280 = vmatpush.bf16.msra.mxu0 %v3174_v16  ;;  %v2436_v59 = vld [vmem:[%s3538_s6 + $0x50] sm:$0xf0]  ;;  %v2442_v60 = vld [vmem:[%s3538_s6 + $0x48] sm:$0xf]  ;;  %v3054_v61 = vld [vmem:[%s3538_s6 + $0x54] sm:$0xf0]  ;;  %v2435_v0 = vor.u32 %v3053_v57, %v2434_v56 }
  0x1d   : > { %1449 = vmatpush.bf16.msra.mxu1 %v3182_v17  ;;  %v3052_v62 = vld [vmem:[%s3538_s6 + $0x4c] sm:$0xf]  ;;  %v2444_v63 = vld [vmem:[%s3538_s6 + $0x58] sm:$0xf0]  ;;  %v2439_v1 = vor.u32 %v3051_v58, %v2436_v59  ;;  %v2443_v2 = vor.u32 %v3054_v61, %v2442_v60  ;;  %v2450_v4 = vld [vmem:[%s3538_s6 + $0x60] sm:$0xf] }
  0x1e   : > { %1618 = vmatpush.bf16.msra.mxu2 %v3190_v18  ;;  %v2447_v3 = vor.u32 %v3052_v62, %v2444_v63  ;;  %v3057_v5 = vld [vmem:[%s3538_s6 + $0x6c] sm:$0xf0]  ;;  %v3055_v6 = vld [vmem:[%s3538_s6 + $0x64] sm:$0xf]  ;;  %v2452_v7 = vld [vmem:[%s3538_s6 + $0x70] sm:$0xf0] }
  0x1f   : > { %1787 = vmatpush.bf16.msra.mxu3 %v3198_v19  ;;  %v2458_v8 = vld [vmem:[%s3538_s6 + $0x68] sm:$0xf]  ;;  %v3058_v9 = vld [vmem:[%s3538_s6 + $0x74] sm:$0xf0]  ;;  %v3056_v10 = vld [vmem:[%s3538_s6 + $0x6c] sm:$0xf]  ;;  %v2451_v12 = vor.u32 %v3057_v5, %v2450_v4  ;;  %v2455_v13 = vor.u32 %v3055_v6, %v2452_v7 }
  0x20   : > { %1281 = vmatpush.bf16.msra.mxu0 %v3173_v20  ;;  %v2460_v11 = vld [vmem:[%s3538_s6 + $0x78] sm:$0xf0]  ;;  %v2459_v14 = vor.u32 %v3058_v9, %v2458_v8  ;;  %v2466_v16 = vld [vmem:[%s3538_s6 + $0x80] sm:$0xf]  ;;  %v3061_v17 = vld [vmem:[%s3538_s6 + $0x8c] sm:$0xf0] }
  0x21   : > { %1450 = vmatpush.bf16.msra.mxu1 %v3181_v21  ;;  %v2463_v15 = vor.u32 %v3056_v10, %v2460_v11  ;;  %v3059_v18 = vld [vmem:[%s3538_s6 + $0x84] sm:$0xf]  ;;  %v2468_v19 = vld [vmem:[%s3538_s6 + $0x90] sm:$0xf0]  ;;  %v2474_v20 = vld [vmem:[%s3538_s6 + $0x88] sm:$0xf] }
  0x22   : > { %1619 = vmatpush.bf16.msra.mxu2 %v3189_v22  ;;  %v3062_v21 = vld [vmem:[%s3538_s6 + $0x94] sm:$0xf0]  ;;  %v3060_v22 = vld [vmem:[%s3538_s6 + $0x8c] sm:$0xf]  ;;  %v2490_v32 = vld [vmem:[%s3538_s6 + $0xa8] sm:$0xf] }
  0x23   : > { %1788 = vmatpush.bf16.msra.mxu3 %v3197_v23  ;;  %v2476_v23 = vld [vmem:[%s3538_s6 + $0x98] sm:$0xf0]  ;;  %v3066_v33 = vld [vmem:[%s3538_s6 + $0xb4] sm:$0xf0]  ;;  %v3064_v34 = vld [vmem:[%s3538_s6 + $0xac] sm:$0xf] }
  0x24   : > { %1282 = vmatpush.bf16.msra.mxu0 %v3172_v24  ;;  %v2467_v24 = vor.u32 %v3061_v17, %v2466_v16  ;;  %v2492_v35 = vld [vmem:[%s3538_s6 + $0xb8] sm:$0xf0]  ;;  %v2491_v38 = vor.u32 %v3066_v33, %v2490_v32  ;;  %v2506_v44 = vld [vmem:[%s3538_s6 + $0xc8] sm:$0xf]  ;;  %v3070_v45 = vld [vmem:[%s3538_s6 + $0xd4] sm:$0xf0] }
  0x25   : > { %1451 = vmatpush.bf16.msra.mxu1 %v3180_v25  ;;  %v2471_v25 = vor.u32 %v3059_v18, %v2468_v19  ;;  %v2495_v39 = vor.u32 %v3064_v34, %v2492_v35  ;;  %v3068_v46 = vld [vmem:[%s3538_s6 + $0xcc] sm:$0xf]  ;;  %v2508_v47 = vld [vmem:[%s3538_s6 + $0xd8] sm:$0xf0]  ;;  %v2507_v50 = vor.u32 %v3070_v45, %v2506_v44  ;;  %v2522_v56 = vld [vmem:[%s3538_s6 + $0xe8] sm:$0xf] }
  0x26   : > { %1620 = vmatpush.bf16.msra.mxu2 %v3188_v26  ;;  %v2475_v26 = vor.u32 %v3062_v21, %v2474_v20  ;;  %v2511_v51 = vor.u32 %v3068_v46, %v2508_v47  ;;  %v3074_v57 = vld [vmem:[%s3538_s6 + $0xf4] sm:$0xf0]  ;;  %v3072_v58 = vld [vmem:[%s3538_s6 + $0xec] sm:$0xf]  ;;  %v2524_v59 = vld [vmem:[%s3538_s6 + $0xf8] sm:$0xf0] }
  0x27   : > { %1789 = vmatpush.bf16.msra.mxu3 %v3196_v27  ;;  %v2479_v27 = vor.u32 %v3060_v22, %v2476_v23  ;;  %v2523_v62 = vor.u32 %v3074_v57, %v2522_v56  ;;  %v2527_v63 = vor.u32 %v3072_v58, %v2524_v59  ;;  %v2538_v4 = vld [vmem:[%s3538_s6 + $0x108] sm:$0xf]  ;;  %v3078_v5 = vld [vmem:[%s3538_s6 + $0x114] sm:$0xf0]  ;;  %v3076_v6 = vld [vmem:[%s3538_s6 + $0x10c] sm:$0xf] }
  0x28   : > { %1283 = vmatpush.bf16.msra.mxu0 %v3171_v28  ;;  %v2482_v28 = vld [vmem:[%s3538_s6 + $0xa0] sm:$0xf]  ;;  %v2540_v7 = vld [vmem:[%s3538_s6 + $0x118] sm:$0xf0]  ;;  %v3085_v58 = vld [vmem:[%s3538_s6 + $0x14c] sm:$0xf0] }
  0x29   : > { %1452 = vmatpush.bf16.msra.mxu1 %v3179_v29  ;;  %v3065_v29 = vld [vmem:[%s3538_s6 + $0xac] sm:$0xf0]  ;;  %v3633_v8 = vld [vmem:[%s3968_s2] ss:$0 sm:$0xff] }
  0x2a   : > { %1621 = vmatpush.bf16.msra.mxu2 %v3187_v30  ;;  %v3063_v30 = vld [vmem:[%s3538_s6 + $0xa4] sm:$0xf]  ;;  %v2483_v36 = vor.u32 %v3065_v29, %v2482_v28  ;;  %v2546_v23 = vld [vmem:[%s3538_s6 + $0x120] sm:$0xf]  ;;  %v3082_v28 = vld [vmem:[%s3538_s6 + $0x134] sm:$0xf0] }
  0x2b   : > { %1790 = vmatpush.bf16.msra.mxu3 %v3195_v31  ;;  %1284 = vmatmul.bf16.vlgmr.msra.gmra.mxu0 %v2403_v40  ;;  %v2484_v31 = vld [vmem:[%s3538_s6 + $0xb0] sm:$0xf0]  ;;  %v2498_v40 = vld [vmem:[%s3538_s6 + $0xc0] sm:$0xf]  ;;  %v3080_v29 = vld [vmem:[%s3538_s6 + $0x12c] sm:$0xf] }
  0x2c   : > { %1453 = vmatmul.bf16.vlgmr.msra.gmra.mxu1 %v2407_v41  ;;  %v2487_v37 = vor.u32 %v3063_v30, %v2484_v31  ;;  %v3069_v41 = vld [vmem:[%s3538_s6 + $0xcc] sm:$0xf0]  ;;  %v2556_v30 = vld [vmem:[%s3538_s6 + $0x138] sm:$0xf0]  ;;  %v2562_v57 = vld [vmem:[%s3538_s6 + $0x140] sm:$0xf] }
  0x2d   : > { %1622 = vmatmul.bf16.vlgmr.msra.gmra.mxu2 %v2411_v42  ;;  %v3067_v42 = vld [vmem:[%s3538_s6 + $0xc4] sm:$0xf]  ;;  %v2499_v48 = vor.u32 %v3069_v41, %v2498_v40  ;;  %v2559_v41 = vor.u32 %v3080_v29, %v2556_v30  ;;  %v2578_v29 = vld [vmem:[%s3538_s6 + $0x160] sm:$0xf]  ;;  %v3089_v30 = vld [vmem:[%s3538_s6 + $0x16c] sm:$0xf0] }
  0x2e   : > { %1791 = vmatmul.bf16.vlgmr.msra.gmra.mxu3 %v2415_v43  ;;  %v2500_v43 = vld [vmem:[%s3538_s6 + $0xd0] sm:$0xf0] }
  0x2f   : > { %v2503_v49 = vor.u32 %v3067_v42, %v2500_v43 }
  0x3b   : > { %1289 = vmatmul.bf16.gmra.mxu0 %v2419_v52  ;;  %v2514_v52 = vld [vmem:[%s3538_s6 + $0xe0] sm:$0xf] }
  0x3c   : > { %1458 = vmatmul.bf16.gmra.mxu1 %v2423_v53  ;;  %v3073_v53 = vld [vmem:[%s3538_s6 + $0xec] sm:$0xf0] }
  0x3d   : > { %1627 = vmatmul.bf16.gmra.mxu2 %v2427_v54  ;;  %v3071_v54 = vld [vmem:[%s3538_s6 + $0xe4] sm:$0xf]  ;;  %v2515_v60 = vor.u32 %v3073_v53, %v2514_v52 }
  0x3e   : > { %1796 = vmatmul.bf16.gmra.mxu3 %v2431_v55  ;;  %v2516_v55 = vld [vmem:[%s3538_s6 + $0xf0] sm:$0xf0] }
  0x3f   : > { %v2519_v61 = vor.u32 %v3071_v54, %v2516_v55 }
  0x4b   : > { %1294 = vmatmul.bf16.gmra.mxu0 %v2435_v0  ;;  %v2530_v0 = vld [vmem:[%s3538_s6 + $0x100] sm:$0xf] }
  0x4c   : > { %1463 = vmatmul.bf16.gmra.mxu1 %v2439_v1  ;;  %v3077_v1 = vld [vmem:[%s3538_s6 + $0x10c] sm:$0xf0] }
  0x4d   : > { %1632 = vmatmul.bf16.gmra.mxu2 %v2443_v2  ;;  %v3075_v2 = vld [vmem:[%s3538_s6 + $0x104] sm:$0xf]  ;;  %v2531_v9 = vor.u32 %v3077_v1, %v2530_v0  ;;  %v3086_v0 = vld [vmem:[%s3538_s6 + $0x154] sm:$0xf0]  ;;  %v3084_v1 = vld [vmem:[%s3538_s6 + $0x14c] sm:$0xf] }
  0x4e   : > { %1801 = vmatmul.bf16.gmra.mxu3 %v2447_v3  ;;  %v2532_v3 = vld [vmem:[%s3538_s6 + $0x110] sm:$0xf0] }
  0x4f   : > { %v2535_v10 = vor.u32 %v3075_v2, %v2532_v3  ;;  %v2572_v2 = vld [vmem:[%s3538_s6 + $0x158] sm:$0xf0] }
  0x5b   : > { %1299 = vmatmul.bf16.gmra.mxu0 %v2451_v12 }
  0x5c   : > { %1468 = vmatmul.bf16.gmra.mxu1 %v2455_v13  ;;  %v2539_v13 = vor.u32 %v3078_v5, %v2538_v4 }
  0x5d   : > { %1637 = vmatmul.bf16.gmra.mxu2 %v2459_v14  ;;  %v2543_v14 = vor.u32 %v3076_v6, %v2540_v7  ;;  %v2563_v7 = vor.u32 %v3085_v58, %v2562_v57 }
  0x5e   : > { %1806 = vmatmul.bf16.gmra.mxu3 %v2463_v15 }
  0x6b   : > { %1304 = vmatmul.bf16.gmra.mxu0 %v2467_v24  ;;  %v3081_v24 = vld [vmem:[%s3538_s6 + $0x12c] sm:$0xf0] }
  0x6c   : > { %1473 = vmatmul.bf16.gmra.mxu1 %v2471_v25  ;;  %v3079_v25 = vld [vmem:[%s3538_s6 + $0x124] sm:$0xf]  ;;  %v2547_v35 = vor.u32 %v3081_v24, %v2546_v23 }
  0x6d   : > { %1642 = vmatmul.bf16.gmra.mxu2 %v2475_v26  ;;  %v2548_v26 = vld [vmem:[%s3538_s6 + $0x130] sm:$0xf0] }
  0x6e   : > { %1811 = vmatmul.bf16.gmra.mxu3 %v2479_v27  ;;  %v2554_v27 = vld [vmem:[%s3538_s6 + $0x128] sm:$0xf] }
  0x6f   : > { %v2555_v40 = vor.u32 %v3082_v28, %v2554_v27 }
  0x7b   : > { %1309 = vmatmul.bf16.gmra.mxu0 %v2483_v36  ;;  %v2551_v36 = vor.u32 %v3079_v25, %v2548_v26 }
  0x7c   : > { %1478 = vmatmul.bf16.gmra.mxu1 %v2487_v37 }
  0x7d   : > { %1647 = vmatmul.bf16.gmra.mxu2 %v2491_v38 }
  0x7e   : > { %1816 = vmatmul.bf16.gmra.mxu3 %v2495_v39 }
  0x8b   : > { %1314 = vmatmul.bf16.gmra.mxu0 %v2499_v48 }
  0x8c   : > { %1483 = vmatmul.bf16.gmra.mxu1 %v2503_v49 }
  0x8d   : > { %1652 = vmatmul.bf16.gmra.mxu2 %v2507_v50 }
  0x8e   : > { %1821 = vmatmul.bf16.gmra.mxu3 %v2511_v51 }
  0x9b   : > { %1319 = vmatmul.bf16.gmra.mxu0 %v2515_v60 }
  0x9c   : > { %1488 = vmatmul.bf16.gmra.mxu1 %v2519_v61  ;;  %v3083_v61 = vld [vmem:[%s3538_s6 + $0x144] sm:$0xf] }
  0x9d   : > { %1657 = vmatmul.bf16.gmra.mxu2 %v2523_v62  ;;  %v2564_v62 = vld [vmem:[%s3538_s6 + $0x150] sm:$0xf0] }
  0x9e   : > { %1826 = vmatmul.bf16.gmra.mxu3 %v2527_v63  ;;  %v2570_v63 = vld [vmem:[%s3538_s6 + $0x148] sm:$0xf] }
  0xa8   : > { %v1285_v11 = vpop.f32.mrf.mxu0 }
  0xa9   : > { %v1454_v12 = vpop.f32.mrf.mxu1  ;;  %v1286_v15 = vadd.f32 %v3633_v8, %v1285_v11 }
  0xab   : > { %1324 = vmatmul.bf16.gmra.mxu0 %v2531_v9  ;;  %v1455_v16 = vadd.f32 %v1454_v12, %v1286_v15  ;;  %v2567_v9 = vor.u32 %v3083_v61, %v2564_v62 }
  0xac   : > { %1493 = vmatmul.bf16.gmra.mxu1 %v2535_v10 }
  0xad   : > { %1662 = vmatmul.bf16.gmra.mxu2 %v2539_v13  ;;  %v2571_v13 = vor.u32 %v3086_v0, %v2570_v63  ;;  %v2594_v0 = vld [vmem:[%s3538_s6 + $0x180] sm:$0xf] }
  0xae   : > { %1831 = vmatmul.bf16.gmra.mxu3 %v2543_v14  ;;  %v2575_v14 = vor.u32 %v3084_v1, %v2572_v2  ;;  %v3093_v1 = vld [vmem:[%s3538_s6 + $0x18c] sm:$0xf0] }
  0xb0   : > { %v1623_v17 = vpop.f32.mrf.mxu2  ;;  %v1287_v19 = vpop.f32.mrf.mxu0 }
  0xb1   : > { %v1792_v18 = vpop.f32.mrf.mxu3  ;;  %v1456_v20 = vpop.f32.mrf.mxu1  ;;  %v1288_v21 = vadd.f32 %v3633_v8, %v1287_v19  ;;  %v1624_v22 = vadd.f32 %v1623_v17, %v1455_v16 }
  0xb3   : > { %v1457_v31 = vadd.f32 %v1456_v20, %v1288_v21  ;;  %v1793_v32 = vadd.f32 %v1792_v18, %v1624_v22 }
  0xb5   : > { %v2022_v44 = vmul.f32 %v1793_v32, %v1793_v32 }
  0xb8   : > { %v1625_v33 = vpop.f32.mrf.mxu2  ;;  %v1290_v38 = vpop.f32.mrf.mxu0 }
  0xb9   : > { %v1794_v34 = vpop.f32.mrf.mxu3  ;;  %v1626_v37 = vadd.f32 %v1625_v33, %v1457_v31  ;;  %v1459_v39 = vpop.f32.mrf.mxu1  ;;  %v1291_v42 = vadd.f32 %v3633_v8, %v1290_v38  ;;  %v3087_v33 = vld [vmem:[%s3538_s6 + $0x164] sm:$0xf]  ;;  %v2588_v38 = vld [vmem:[%s3538_s6 + $0x178] sm:$0xf0] }
  0xbb   : > { %v1795_v43 = vadd.f32 %v1794_v34, %v1626_v37  ;;  %v1460_v45 = vadd.f32 %v1459_v39, %v1291_v42  ;;  %1329 = vmatmul.bf16.gmra.mxu0 %v2547_v35  ;;  %v2580_v34 = vld [vmem:[%s3538_s6 + $0x170] sm:$0xf0]  ;;  %v2586_v35 = vld [vmem:[%s3538_s6 + $0x168] sm:$0xf]  ;;  %v3088_v37 = vld [vmem:[%s3538_s6 + $0x16c] sm:$0xf] }
  0xbc   : > { %1498 = vmatmul.bf16.gmra.mxu1 %v2551_v36  ;;  %v3090_v36 = vld [vmem:[%s3538_s6 + $0x174] sm:$0xf0] }
  0xbd   : > { %v1952_v46 = vadd.f32 %v1795_v43, %v1793_v32  ;;  %v2023_v47 = vmul.f32 %v1795_v43, %v1795_v43  ;;  %v3206_v48 = vpack.c.bf16 %v1795_v43, %v1793_v32  ;;  %1667 = vmatmul.bf16.gmra.mxu2 %v2555_v40  ;;  %v2579_v43 = vor.u32 %v3089_v30, %v2578_v29 }
  0xbe   : > { %1836 = vmatmul.bf16.gmra.mxu3 %v2559_v41 }
  0xbf   : > { %v2086_v49 = vadd.f32 %v2023_v47, %v2022_v44  ;;  %3207 = vst [vmem:[%s3650_s27] sm:$0xff] %v3206_v48   ;;  %v2583_v44 = vor.u32 %v3087_v33, %v2580_v34  ;;  %v2587_v48 = vor.u32 %v3090_v36, %v2586_v35  ;;  %v2610_v36 = vld [vmem:[%s3538_s6 + $0x1a0] sm:$0xf] }
  0xc0   : > { %v1628_v50 = vpop.f32.mrf.mxu2  ;;  %v1292_v53 = vpop.f32.mrf.mxu0 }
  0xc1   : > { %v1797_v51 = vpop.f32.mrf.mxu3  ;;  %v1629_v52 = vadd.f32 %v1628_v50, %v1460_v45  ;;  %v1461_v54 = vpop.f32.mrf.mxu1  ;;  %v1293_v56 = vadd.f32 %v3633_v8, %v1292_v53 }
  0xc3   : > { %v1798_v55 = vadd.f32 %v1797_v51, %v1629_v52  ;;  %v1462_v4 = vadd.f32 %v1461_v54, %v1293_v56 }
  0xc5   : > { %v1953_v59 = vadd.f32 %v1952_v46, %v1798_v55  ;;  %v2024_v60 = vmul.f32 %v1798_v55, %v1798_v55 }
  0xc7   : > { %v2087_v3 = vadd.f32 %v2086_v49, %v2024_v60  ;;  %v2591_v49 = vor.u32 %v3088_v37, %v2588_v38  ;;  %v3097_v37 = vld [vmem:[%s3538_s6 + $0x1ac] sm:$0xf0] }
  0xc8   : > { %v1630_v5 = vpop.f32.mrf.mxu2  ;;  %v1295_v11 = vpop.f32.mrf.mxu0 }
  0xc9   : > { %v1799_v6 = vpop.f32.mrf.mxu3  ;;  %v1631_v10 = vadd.f32 %v1630_v5, %v1462_v4  ;;  %v1464_v12 = vpop.f32.mrf.mxu1  ;;  %v1296_v15 = vadd.f32 %v3633_v8, %v1295_v11  ;;  %v3091_v4 = vld [vmem:[%s3538_s6 + $0x184] sm:$0xf]  ;;  %v2596_v5 = vld [vmem:[%s3538_s6 + $0x190] sm:$0xf0] }
  0xcb   : > { %v1800_v16 = vadd.f32 %v1799_v6, %v1631_v10  ;;  %v1465_v17 = vadd.f32 %v1464_v12, %v1296_v15  ;;  %1334 = vmatmul.bf16.gmra.mxu0 %v2563_v7  ;;  %v2602_v6 = vld [vmem:[%s3538_s6 + $0x188] sm:$0xf]  ;;  %v3094_v7 = vld [vmem:[%s3538_s6 + $0x194] sm:$0xf0]  ;;  %v2604_v10 = vld [vmem:[%s3538_s6 + $0x198] sm:$0xf0]  ;;  %v2595_v15 = vor.u32 %v3093_v1, %v2594_v0 }
  0xcc   : > { %1503 = vmatmul.bf16.gmra.mxu1 %v2567_v9  ;;  %v3092_v9 = vld [vmem:[%s3538_s6 + $0x18c] sm:$0xf] }
  0xcd   : > { %v1954_v18 = vadd.f32 %v1953_v59, %v1800_v16  ;;  %v2025_v19 = vmul.f32 %v1800_v16, %v1800_v16  ;;  %v3211_v20 = vpack.c.bf16 %v1800_v16, %v1798_v55  ;;  %1672 = vmatmul.bf16.gmra.mxu2 %v2571_v13  ;;  %v2599_v16 = vor.u32 %v3091_v4, %v2596_v5 }
  0xce   : > { %1841 = vmatmul.bf16.gmra.mxu3 %v2575_v14 }
  0xcf   : > { %v2088_v21 = vadd.f32 %v2087_v3, %v2025_v19  ;;  %3363 = vst [vmem:[%s3650_s27 + $0x8] sm:$0xff] %v3211_v20   ;;  %v2603_v20 = vor.u32 %v3094_v7, %v2602_v6  ;;  %v2626_v7 = vld [vmem:[%s3538_s6 + $0x1c0] sm:$0xf] }
  0xd0   : > { %v1633_v22 = vpop.f32.mrf.mxu2  ;;  %v1297_v25 = vpop.f32.mrf.mxu0 }
  0xd1   : > { %v1802_v23 = vpop.f32.mrf.mxu3  ;;  %v1634_v24 = vadd.f32 %v1633_v22, %v1465_v17  ;;  %v1466_v26 = vpop.f32.mrf.mxu1  ;;  %v1298_v28 = vadd.f32 %v3633_v8, %v1297_v25 }
  0xd3   : > { %v1803_v27 = vadd.f32 %v1802_v23, %v1634_v24  ;;  %v1467_v40 = vadd.f32 %v1466_v26, %v1298_v28 }
  0xd5   : > { %v1955_v31 = vadd.f32 %v1954_v18, %v1803_v27  ;;  %v2026_v32 = vmul.f32 %v1803_v27, %v1803_v27 }
  0xd7   : > { %v2089_v39 = vadd.f32 %v2088_v21, %v2026_v32  ;;  %v2607_v21 = vor.u32 %v3092_v9, %v2604_v10  ;;  %v3101_v9 = vld [vmem:[%s3538_s6 + $0x1cc] sm:$0xf0] }
  0xd8   : > { %v1635_v41 = vpop.f32.mrf.mxu2  ;;  %v1300_v46 = vpop.f32.mrf.mxu0 }
  0xd9   : > { %v1804_v42 = vpop.f32.mrf.mxu3  ;;  %v1636_v45 = vadd.f32 %v1635_v41, %v1467_v40  ;;  %v1469_v47 = vpop.f32.mrf.mxu1  ;;  %v1301_v50 = vadd.f32 %v3633_v8, %v1300_v46  ;;  %v3095_v40 = vld [vmem:[%s3538_s6 + $0x1a4] sm:$0xf]  ;;  %v2612_v41 = vld [vmem:[%s3538_s6 + $0x1b0] sm:$0xf0] }
  0xdb   : > { %v1805_v51 = vadd.f32 %v1804_v42, %v1636_v45  ;;  %v1470_v52 = vadd.f32 %v1469_v47, %v1301_v50  ;;  %1339 = vmatmul.bf16.gmra.mxu0 %v2579_v43  ;;  %v2618_v42 = vld [vmem:[%s3538_s6 + $0x1a8] sm:$0xf]  ;;  %v3098_v43 = vld [vmem:[%s3538_s6 + $0x1b4] sm:$0xf0]  ;;  %v2620_v45 = vld [vmem:[%s3538_s6 + $0x1b8] sm:$0xf0]  ;;  %v2611_v50 = vor.u32 %v3097_v37, %v2610_v36 }
  0xdc   : > { %1508 = vmatmul.bf16.gmra.mxu1 %v2583_v44  ;;  %v3096_v44 = vld [vmem:[%s3538_s6 + $0x1ac] sm:$0xf] }
  0xdd   : > { %v1956_v53 = vadd.f32 %v1955_v31, %v1805_v51  ;;  %v2027_v54 = vmul.f32 %v1805_v51, %v1805_v51  ;;  %v3216_v55 = vpack.c.bf16 %v1805_v51, %v1803_v27  ;;  %1677 = vmatmul.bf16.gmra.mxu2 %v2587_v48  ;;  %v2615_v51 = vor.u32 %v3095_v40, %v2612_v41 }
  0xde   : > { %1846 = vmatmul.bf16.gmra.mxu3 %v2591_v49 }
  0xdf   : > { %v2090_v56 = vadd.f32 %v2089_v39, %v2027_v54  ;;  %3364 = vst [vmem:[%s3650_s27 + $0x10] sm:$0xff] %v3216_v55   ;;  %v2619_v55 = vor.u32 %v3098_v43, %v2618_v42  ;;  %v2642_v43 = vld [vmem:[%s3538_s6 + $0x1e0] sm:$0xf] }
  0xe0   : > { %v1638_v57 = vpop.f32.mrf.mxu2  ;;  %v1302_v60 = vpop.f32.mrf.mxu0 }
  0xe1   : > { %v1807_v58 = vpop.f32.mrf.mxu3  ;;  %v1639_v59 = vadd.f32 %v1638_v57, %v1470_v52  ;;  %v1471_v61 = vpop.f32.mrf.mxu1  ;;  %v1303_v63 = vadd.f32 %v3633_v8, %v1302_v60 }
  0xe3   : > { %v1808_v62 = vadd.f32 %v1807_v58, %v1639_v59  ;;  %v1472_v12 = vadd.f32 %v1471_v61, %v1303_v63 }
  0xe5   : > { %v1957_v2 = vadd.f32 %v1956_v53, %v1808_v62  ;;  %v2028_v3 = vmul.f32 %v1808_v62, %v1808_v62 }
  0xe7   : > { %v2091_v11 = vadd.f32 %v2090_v56, %v2028_v3  ;;  %v2623_v56 = vor.u32 %v3096_v44, %v2620_v45  ;;  %v3105_v44 = vld [vmem:[%s3538_s6 + $0x1ec] sm:$0xf0] }
  0xe8   : > { %v1640_v13 = vpop.f32.mrf.mxu2  ;;  %v1305_v18 = vpop.f32.mrf.mxu0 }
  0xe9   : > { %v1809_v14 = vpop.f32.mrf.mxu3  ;;  %v1641_v17 = vadd.f32 %v1640_v13, %v1472_v12  ;;  %v1474_v19 = vpop.f32.mrf.mxu1  ;;  %v1306_v22 = vadd.f32 %v3633_v8, %v1305_v18  ;;  %v3099_v12 = vld [vmem:[%s3538_s6 + $0x1c4] sm:$0xf]  ;;  %v2628_v13 = vld [vmem:[%s3538_s6 + $0x1d0] sm:$0xf0] }
  0xeb   : > { %v1810_v23 = vadd.f32 %v1809_v14, %v1641_v17  ;;  %v1475_v24 = vadd.f32 %v1474_v19, %v1306_v22  ;;  %1344 = vmatmul.bf16.gmra.mxu0 %v2595_v15  ;;  %v2634_v14 = vld [vmem:[%s3538_s6 + $0x1c8] sm:$0xf]  ;;  %v3102_v15 = vld [vmem:[%s3538_s6 + $0x1d4] sm:$0xf0]  ;;  %v2636_v17 = vld [vmem:[%s3538_s6 + $0x1d8] sm:$0xf0]  ;;  %v2627_v22 = vor.u32 %v3101_v9, %v2626_v7 }
  0xec   : > { %1513 = vmatmul.bf16.gmra.mxu1 %v2599_v16  ;;  %v3100_v16 = vld [vmem:[%s3538_s6 + $0x1cc] sm:$0xf] }
  0xed   : > { %v1958_v25 = vadd.f32 %v1957_v2, %v1810_v23  ;;  %v2029_v26 = vmul.f32 %v1810_v23, %v1810_v23  ;;  %v3221_v27 = vpack.c.bf16 %v1810_v23, %v1808_v62  ;;  %1682 = vmatmul.bf16.gmra.mxu2 %v2603_v20  ;;  %v2631_v23 = vor.u32 %v3099_v12, %v2628_v13 }
  0xee   : > { %1851 = vmatmul.bf16.gmra.mxu3 %v2607_v21 }
  0xef   : > { %v2092_v28 = vadd.f32 %v2091_v11, %v2029_v26  ;;  %3365 = vst [vmem:[%s3650_s27 + $0x18] sm:$0xff] %v3221_v27   ;;  %v2635_v27 = vor.u32 %v3102_v15, %v2634_v14  ;;  %v2658_v15 = vld [vmem:[%s3538_s6 + $0x200] sm:$0xf] }
  0xf0   : > { %v1643_v29 = vpop.f32.mrf.mxu2  ;;  %v1307_v32 = vpop.f32.mrf.mxu0 }
  0xf1   : > { %v1812_v30 = vpop.f32.mrf.mxu3  ;;  %v1644_v31 = vadd.f32 %v1643_v29, %v1475_v24  ;;  %v1476_v33 = vpop.f32.mrf.mxu1  ;;  %v1308_v35 = vadd.f32 %v3633_v8, %v1307_v32 }
  0xf3   : > { %v1813_v34 = vadd.f32 %v1812_v30, %v1644_v31  ;;  %v1477_v47 = vadd.f32 %v1476_v33, %v1308_v35 }
  0xf5   : > { %v1959_v38 = vadd.f32 %v1958_v25, %v1813_v34  ;;  %v2030_v39 = vmul.f32 %v1813_v34, %v1813_v34 }
  0xf7   : > { %v2093_v46 = vadd.f32 %v2092_v28, %v2030_v39  ;;  %v2639_v28 = vor.u32 %v3100_v16, %v2636_v17  ;;  %v3109_v16 = vld [vmem:[%s3538_s6 + $0x20c] sm:$0xf0] }
  0xf8   : > { %v1645_v48 = vpop.f32.mrf.mxu2  ;;  %v1310_v53 = vpop.f32.mrf.mxu0 }
  0xf9   : > { %v1814_v49 = vpop.f32.mrf.mxu3  ;;  %v1646_v52 = vadd.f32 %v1645_v48, %v1477_v47  ;;  %v1479_v54 = vpop.f32.mrf.mxu1  ;;  %v1311_v57 = vadd.f32 %v3633_v8, %v1310_v53  ;;  %v3103_v47 = vld [vmem:[%s3538_s6 + $0x1e4] sm:$0xf]  ;;  %v2644_v48 = vld [vmem:[%s3538_s6 + $0x1f0] sm:$0xf0] }
  0xfb   : > { %v1815_v58 = vadd.f32 %v1814_v49, %v1646_v52  ;;  %v1480_v59 = vadd.f32 %v1479_v54, %v1311_v57  ;;  %1349 = vmatmul.bf16.gmra.mxu0 %v2611_v50  ;;  %v2650_v49 = vld [vmem:[%s3538_s6 + $0x1e8] sm:$0xf]  ;;  %v3106_v50 = vld [vmem:[%s3538_s6 + $0x1f4] sm:$0xf0]  ;;  %v2652_v52 = vld [vmem:[%s3538_s6 + $0x1f8] sm:$0xf0]  ;;  %v2643_v57 = vor.u32 %v3105_v44, %v2642_v43 }
  0xfc   : > { %1518 = vmatmul.bf16.gmra.mxu1 %v2615_v51  ;;  %v3104_v51 = vld [vmem:[%s3538_s6 + $0x1ec] sm:$0xf] }
  0xfd   : > { %v1960_v60 = vadd.f32 %v1959_v38, %v1815_v58  ;;  %v2031_v61 = vmul.f32 %v1815_v58, %v1815_v58  ;;  %v3226_v62 = vpack.c.bf16 %v1815_v58, %v1813_v34  ;;  %1687 = vmatmul.bf16.gmra.mxu2 %v2619_v55  ;;  %v2647_v58 = vor.u32 %v3103_v47, %v2644_v48 }
  0xfe   : > { %1856 = vmatmul.bf16.gmra.mxu3 %v2623_v56 }
  0xff   : > { %v2094_v63 = vadd.f32 %v2093_v46, %v2031_v61  ;;  %3366 = vst [vmem:[%s3650_s27 + $0x20] sm:$0xff] %v3226_v62   ;;  %v2651_v62 = vor.u32 %v3106_v50, %v2650_v49  ;;  %v2674_v50 = vld [vmem:[%s3538_s6 + $0x220] sm:$0xf] }
 0x100   : > { %v1648_v0 = vpop.f32.mrf.mxu2  ;;  %v1312_v3 = vpop.f32.mrf.mxu0 }
 0x101   : > { %v1817_v1 = vpop.f32.mrf.mxu3  ;;  %v1649_v2 = vadd.f32 %v1648_v0, %v1480_v59  ;;  %v1481_v4 = vpop.f32.mrf.mxu1  ;;  %v1313_v6 = vadd.f32 %v3633_v8, %v1312_v3 }
 0x103   : > { %v1818_v5 = vadd.f32 %v1817_v1, %v1649_v2  ;;  %v1482_v19 = vadd.f32 %v1481_v4, %v1313_v6 }
 0x105   : > { %v1961_v10 = vadd.f32 %v1960_v60, %v1818_v5  ;;  %v2032_v11 = vmul.f32 %v1818_v5, %v1818_v5 }
 0x107   : > { %v2095_v18 = vadd.f32 %v2094_v63, %v2032_v11  ;;  %v2655_v63 = vor.u32 %v3104_v51, %v2652_v52  ;;  %v3113_v51 = vld [vmem:[%s3538_s6 + $0x22c] sm:$0xf0] }
 0x108   : > { %v1650_v20 = vpop.f32.mrf.mxu2  ;;  %v1315_v25 = vpop.f32.mrf.mxu0 }
 0x109   : > { %v1819_v21 = vpop.f32.mrf.mxu3  ;;  %v1651_v24 = vadd.f32 %v1650_v20, %v1482_v19  ;;  %v1484_v26 = vpop.f32.mrf.mxu1  ;;  %v1316_v29 = vadd.f32 %v3633_v8, %v1315_v25  ;;  %v3107_v19 = vld [vmem:[%s3538_s6 + $0x204] sm:$0xf]  ;;  %v2660_v20 = vld [vmem:[%s3538_s6 + $0x210] sm:$0xf0] }
 0x10b   : > { %v1820_v30 = vadd.f32 %v1819_v21, %v1651_v24  ;;  %v1485_v31 = vadd.f32 %v1484_v26, %v1316_v29  ;;  %1354 = vmatmul.bf16.gmra.mxu0 %v2627_v22  ;;  %v2666_v21 = vld [vmem:[%s3538_s6 + $0x208] sm:$0xf]  ;;  %v3110_v22 = vld [vmem:[%s3538_s6 + $0x214] sm:$0xf0]  ;;  %v2668_v24 = vld [vmem:[%s3538_s6 + $0x218] sm:$0xf0]  ;;  %v2659_v29 = vor.u32 %v3109_v16, %v2658_v15 }
 0x10c   : > { %1523 = vmatmul.bf16.gmra.mxu1 %v2631_v23  ;;  %v3108_v23 = vld [vmem:[%s3538_s6 + $0x20c] sm:$0xf] }
 0x10d   : > { %v1962_v32 = vadd.f32 %v1961_v10, %v1820_v30  ;;  %v2033_v33 = vmul.f32 %v1820_v30, %v1820_v30  ;;  %v3231_v34 = vpack.c.bf16 %v1820_v30, %v1818_v5  ;;  %1692 = vmatmul.bf16.gmra.mxu2 %v2635_v27  ;;  %v2663_v30 = vor.u32 %v3107_v19, %v2660_v20 }
 0x10e   : > { %1861 = vmatmul.bf16.gmra.mxu3 %v2639_v28 }
 0x10f   : > { %v2096_v35 = vadd.f32 %v2095_v18, %v2033_v33  ;;  %3367 = vst [vmem:[%s3650_s27 + $0x28] sm:$0xff] %v3231_v34   ;;  %v2667_v34 = vor.u32 %v3110_v22, %v2666_v21  ;;  %v2690_v22 = vld [vmem:[%s3538_s6 + $0x240] sm:$0xf] }
 0x110   : > { %v1653_v36 = vpop.f32.mrf.mxu2  ;;  %v1317_v39 = vpop.f32.mrf.mxu0 }
 0x111   : > { %v1822_v37 = vpop.f32.mrf.mxu3  ;;  %v1654_v38 = vadd.f32 %v1653_v36, %v1485_v31  ;;  %v1486_v40 = vpop.f32.mrf.mxu1  ;;  %v1318_v42 = vadd.f32 %v3633_v8, %v1317_v39 }
 0x113   : > { %v1823_v41 = vadd.f32 %v1822_v37, %v1654_v38  ;;  %v1487_v54 = vadd.f32 %v1486_v40, %v1318_v42 }
 0x115   : > { %v1963_v45 = vadd.f32 %v1962_v32, %v1823_v41  ;;  %v2034_v46 = vmul.f32 %v1823_v41, %v1823_v41 }
 0x117   : > { %v2097_v53 = vadd.f32 %v2096_v35, %v2034_v46  ;;  %v2671_v35 = vor.u32 %v3108_v23, %v2668_v24  ;;  %v3117_v23 = vld [vmem:[%s3538_s6 + $0x24c] sm:$0xf0] }
 0x118   : > { %v1655_v55 = vpop.f32.mrf.mxu2  ;;  %v1320_v60 = vpop.f32.mrf.mxu0 }
 0x119   : > { %v1824_v56 = vpop.f32.mrf.mxu3  ;;  %v1656_v59 = vadd.f32 %v1655_v55, %v1487_v54  ;;  %v1489_v61 = vpop.f32.mrf.mxu1  ;;  %v1321_v0 = vadd.f32 %v3633_v8, %v1320_v60  ;;  %v3111_v54 = vld [vmem:[%s3538_s6 + $0x224] sm:$0xf]  ;;  %v2676_v55 = vld [vmem:[%s3538_s6 + $0x230] sm:$0xf0] }
 0x11b   : > { %v1825_v1 = vadd.f32 %v1824_v56, %v1656_v59  ;;  %v1490_v2 = vadd.f32 %v1489_v61, %v1321_v0  ;;  %1359 = vmatmul.bf16.gmra.mxu0 %v2643_v57  ;;  %v2682_v56 = vld [vmem:[%s3538_s6 + $0x228] sm:$0xf]  ;;  %v3114_v57 = vld [vmem:[%s3538_s6 + $0x234] sm:$0xf0]  ;;  %v2684_v59 = vld [vmem:[%s3538_s6 + $0x238] sm:$0xf0]  ;;  %v2675_v0 = vor.u32 %v3113_v51, %v2674_v50 }
 0x11c   : > { %1528 = vmatmul.bf16.gmra.mxu1 %v2647_v58  ;;  %v3112_v58 = vld [vmem:[%s3538_s6 + $0x22c] sm:$0xf] }
 0x11d   : > { %v1964_v3 = vadd.f32 %v1963_v45, %v1825_v1  ;;  %v2035_v4 = vmul.f32 %v1825_v1, %v1825_v1  ;;  %v3236_v5 = vpack.c.bf16 %v1825_v1, %v1823_v41  ;;  %1697 = vmatmul.bf16.gmra.mxu2 %v2651_v62  ;;  %v2679_v1 = vor.u32 %v3111_v54, %v2676_v55 }
 0x11e   : > { %1866 = vmatmul.bf16.gmra.mxu3 %v2655_v63 }
 0x11f   : > { %v2098_v6 = vadd.f32 %v2097_v53, %v2035_v4  ;;  %3368 = vst [vmem:[%s3650_s27 + $0x30] sm:$0xff] %v3236_v5   ;;  %v2683_v5 = vor.u32 %v3114_v57, %v2682_v56  ;;  %v2706_v57 = vld [vmem:[%s3538_s6 + $0x260] sm:$0xf] }
 0x120   : > { %v1658_v7 = vpop.f32.mrf.mxu2  ;;  %v1322_v11 = vpop.f32.mrf.mxu0 }
 0x121   : > { %v1827_v9 = vpop.f32.mrf.mxu3  ;;  %v1659_v10 = vadd.f32 %v1658_v7, %v1490_v2  ;;  %v1491_v12 = vpop.f32.mrf.mxu1  ;;  %v1323_v14 = vadd.f32 %v3633_v8, %v1322_v11 }
 0x123   : > { %v1828_v13 = vadd.f32 %v1827_v9, %v1659_v10  ;;  %v1492_v26 = vadd.f32 %v1491_v12, %v1323_v14 }
 0x125   : > { %v1965_v17 = vadd.f32 %v1964_v3, %v1828_v13  ;;  %v2036_v18 = vmul.f32 %v1828_v13, %v1828_v13 }
 0x127   : > { %v2099_v25 = vadd.f32 %v2098_v6, %v2036_v18  ;;  %v2687_v6 = vor.u32 %v3112_v58, %v2684_v59  ;;  %v3121_v58 = vld [vmem:[%s3538_s6 + $0x26c] sm:$0xf0] }
 0x128   : > { %v1660_v27 = vpop.f32.mrf.mxu2  ;;  %v1325_v32 = vpop.f32.mrf.mxu0 }
 0x129   : > { %v1829_v28 = vpop.f32.mrf.mxu3  ;;  %v1661_v31 = vadd.f32 %v1660_v27, %v1492_v26  ;;  %v1494_v33 = vpop.f32.mrf.mxu1  ;;  %v1326_v36 = vadd.f32 %v3633_v8, %v1325_v32  ;;  %v3115_v26 = vld [vmem:[%s3538_s6 + $0x244] sm:$0xf]  ;;  %v2692_v27 = vld [vmem:[%s3538_s6 + $0x250] sm:$0xf0] }
 0x12b   : > { %v1830_v37 = vadd.f32 %v1829_v28, %v1661_v31  ;;  %v1495_v38 = vadd.f32 %v1494_v33, %v1326_v36  ;;  %1364 = vmatmul.bf16.gmra.mxu0 %v2659_v29  ;;  %v2698_v28 = vld [vmem:[%s3538_s6 + $0x248] sm:$0xf]  ;;  %v3118_v29 = vld [vmem:[%s3538_s6 + $0x254] sm:$0xf0]  ;;  %v2700_v31 = vld [vmem:[%s3538_s6 + $0x258] sm:$0xf0]  ;;  %v2691_v36 = vor.u32 %v3117_v23, %v2690_v22 }
 0x12c   : > { %1533 = vmatmul.bf16.gmra.mxu1 %v2663_v30  ;;  %v3116_v30 = vld [vmem:[%s3538_s6 + $0x24c] sm:$0xf] }
 0x12d   : > { %v1966_v39 = vadd.f32 %v1965_v17, %v1830_v37  ;;  %v2037_v40 = vmul.f32 %v1830_v37, %v1830_v37  ;;  %v3241_v41 = vpack.c.bf16 %v1830_v37, %v1828_v13  ;;  %1702 = vmatmul.bf16.gmra.mxu2 %v2667_v34  ;;  %v2695_v37 = vor.u32 %v3115_v26, %v2692_v27 }
 0x12e   : > { %1871 = vmatmul.bf16.gmra.mxu3 %v2671_v35 }
 0x12f   : > { %v2100_v42 = vadd.f32 %v2099_v25, %v2037_v40  ;;  %3369 = vst [vmem:[%s3650_s27 + $0x38] sm:$0xff] %v3241_v41   ;;  %v2699_v41 = vor.u32 %v3118_v29, %v2698_v28  ;;  %v2722_v29 = vld [vmem:[%s3538_s6 + $0x280] sm:$0xf] }
 0x130   : > { %v1663_v43 = vpop.f32.mrf.mxu2  ;;  %v1327_v46 = vpop.f32.mrf.mxu0 }
 0x131   : > { %v1832_v44 = vpop.f32.mrf.mxu3  ;;  %v1664_v45 = vadd.f32 %v1663_v43, %v1495_v38  ;;  %v1496_v47 = vpop.f32.mrf.mxu1  ;;  %v1328_v49 = vadd.f32 %v3633_v8, %v1327_v46 }
 0x133   : > { %v1833_v48 = vadd.f32 %v1832_v44, %v1664_v45  ;;  %v1497_v61 = vadd.f32 %v1496_v47, %v1328_v49 }
 0x135   : > { %v1967_v52 = vadd.f32 %v1966_v39, %v1833_v48  ;;  %v2038_v53 = vmul.f32 %v1833_v48, %v1833_v48 }
 0x137   : > { %v2101_v60 = vadd.f32 %v2100_v42, %v2038_v53  ;;  %v2703_v42 = vor.u32 %v3116_v30, %v2700_v31  ;;  %v3125_v30 = vld [vmem:[%s3538_s6 + $0x28c] sm:$0xf0] }
 0x138   : > { %v1665_v62 = vpop.f32.mrf.mxu2  ;;  %v1330_v3 = vpop.f32.mrf.mxu0 }
 0x139   : > { %v1834_v63 = vpop.f32.mrf.mxu3  ;;  %v1666_v2 = vadd.f32 %v1665_v62, %v1497_v61  ;;  %v1499_v4 = vpop.f32.mrf.mxu1  ;;  %v1331_v7 = vadd.f32 %v3633_v8, %v1330_v3  ;;  %v3119_v61 = vld [vmem:[%s3538_s6 + $0x264] sm:$0xf]  ;;  %v2708_v62 = vld [vmem:[%s3538_s6 + $0x270] sm:$0xf0] }
 0x13b   : > { %v1835_v9 = vadd.f32 %v1834_v63, %v1666_v2  ;;  %v1500_v10 = vadd.f32 %v1499_v4, %v1331_v7  ;;  %1369 = vmatmul.bf16.gmra.mxu0 %v2675_v0  ;;  %v2714_v63 = vld [vmem:[%s3538_s6 + $0x268] sm:$0xf]  ;;  %v3122_v0 = vld [vmem:[%s3538_s6 + $0x274] sm:$0xf0]  ;;  %v2716_v2 = vld [vmem:[%s3538_s6 + $0x278] sm:$0xf0]  ;;  %v2707_v7 = vor.u32 %v3121_v58, %v2706_v57 }
 0x13c   : > { %1538 = vmatmul.bf16.gmra.mxu1 %v2679_v1  ;;  %v3120_v1 = vld [vmem:[%s3538_s6 + $0x26c] sm:$0xf] }
 0x13d   : > { %v1968_v11 = vadd.f32 %v1967_v52, %v1835_v9  ;;  %v2039_v12 = vmul.f32 %v1835_v9, %v1835_v9  ;;  %v3246_v13 = vpack.c.bf16 %v1835_v9, %v1833_v48  ;;  %1707 = vmatmul.bf16.gmra.mxu2 %v2683_v5  ;;  %v2711_v9 = vor.u32 %v3119_v61, %v2708_v62 }
 0x13e   : > { %1876 = vmatmul.bf16.gmra.mxu3 %v2687_v6 }
 0x13f   : > { %v2102_v14 = vadd.f32 %v2101_v60, %v2039_v12  ;;  %3370 = vst [vmem:[%s3650_s27 + $0x40] sm:$0xff] %v3246_v13   ;;  %v2715_v13 = vor.u32 %v3122_v0, %v2714_v63  ;;  %v2738_v0 = vld [vmem:[%s3538_s6 + $0x2a0] sm:$0xf] }
 0x140   : > { %v1668_v15 = vpop.f32.mrf.mxu2  ;;  %v1332_v18 = vpop.f32.mrf.mxu0 }
 0x141   : > { %v1837_v16 = vpop.f32.mrf.mxu3  ;;  %v1669_v17 = vadd.f32 %v1668_v15, %v1500_v10  ;;  %v1501_v19 = vpop.f32.mrf.mxu1  ;;  %v1333_v21 = vadd.f32 %v3633_v8, %v1332_v18 }
 0x143   : > { %v1838_v20 = vadd.f32 %v1837_v16, %v1669_v17  ;;  %v1502_v33 = vadd.f32 %v1501_v19, %v1333_v21 }
 0x145   : > { %v1969_v24 = vadd.f32 %v1968_v11, %v1838_v20  ;;  %v2040_v25 = vmul.f32 %v1838_v20, %v1838_v20 }
 0x147   : > { %v2103_v32 = vadd.f32 %v2102_v14, %v2040_v25  ;;  %v2719_v14 = vor.u32 %v3120_v1, %v2716_v2  ;;  %v3129_v1 = vld [vmem:[%s3538_s6 + $0x2ac] sm:$0xf0] }
 0x148   : > { %v1670_v34 = vpop.f32.mrf.mxu2  ;;  %v1335_v39 = vpop.f32.mrf.mxu0 }
 0x149   : > { %v1839_v35 = vpop.f32.mrf.mxu3  ;;  %v1671_v38 = vadd.f32 %v1670_v34, %v1502_v33  ;;  %v1504_v40 = vpop.f32.mrf.mxu1  ;;  %v1336_v43 = vadd.f32 %v3633_v8, %v1335_v39  ;;  %v3123_v33 = vld [vmem:[%s3538_s6 + $0x284] sm:$0xf]  ;;  %v2724_v34 = vld [vmem:[%s3538_s6 + $0x290] sm:$0xf0] }
 0x14b   : > { %v1840_v44 = vadd.f32 %v1839_v35, %v1671_v38  ;;  %v1505_v45 = vadd.f32 %v1504_v40, %v1336_v43  ;;  %1374 = vmatmul.bf16.gmra.mxu0 %v2691_v36  ;;  %v2730_v35 = vld [vmem:[%s3538_s6 + $0x288] sm:$0xf]  ;;  %v3126_v36 = vld [vmem:[%s3538_s6 + $0x294] sm:$0xf0]  ;;  %v2732_v38 = vld [vmem:[%s3538_s6 + $0x298] sm:$0xf0]  ;;  %v2723_v43 = vor.u32 %v3125_v30, %v2722_v29 }
 0x14c   : > { %1543 = vmatmul.bf16.gmra.mxu1 %v2695_v37  ;;  %v3124_v37 = vld [vmem:[%s3538_s6 + $0x28c] sm:$0xf] }
 0x14d   : > { %v1970_v46 = vadd.f32 %v1969_v24, %v1840_v44  ;;  %v2041_v47 = vmul.f32 %v1840_v44, %v1840_v44  ;;  %v3251_v48 = vpack.c.bf16 %v1840_v44, %v1838_v20  ;;  %1712 = vmatmul.bf16.gmra.mxu2 %v2699_v41  ;;  %v2727_v44 = vor.u32 %v3123_v33, %v2724_v34 }
 0x14e   : > { %1881 = vmatmul.bf16.gmra.mxu3 %v2703_v42 }
 0x14f   : > { %v2104_v49 = vadd.f32 %v2103_v32, %v2041_v47  ;;  %3371 = vst [vmem:[%s3650_s27 + $0x48] sm:$0xff] %v3251_v48   ;;  %v2731_v48 = vor.u32 %v3126_v36, %v2730_v35  ;;  %v2754_v36 = vld [vmem:[%s3538_s6 + $0x2c0] sm:$0xf] }
 0x150   : > { %v1673_v50 = vpop.f32.mrf.mxu2  ;;  %v1337_v53 = vpop.f32.mrf.mxu0 }
 0x151   : > { %v1842_v51 = vpop.f32.mrf.mxu3  ;;  %v1674_v52 = vadd.f32 %v1673_v50, %v1505_v45  ;;  %v1506_v54 = vpop.f32.mrf.mxu1  ;;  %v1338_v56 = vadd.f32 %v3633_v8, %v1337_v53 }
 0x153   : > { %v1843_v55 = vadd.f32 %v1842_v51, %v1674_v52  ;;  %v1507_v4 = vadd.f32 %v1506_v54, %v1338_v56 }
 0x155   : > { %v1971_v59 = vadd.f32 %v1970_v46, %v1843_v55  ;;  %v2042_v60 = vmul.f32 %v1843_v55, %v1843_v55 }
 0x157   : > { %v2105_v3 = vadd.f32 %v2104_v49, %v2042_v60  ;;  %v2735_v49 = vor.u32 %v3124_v37, %v2732_v38  ;;  %v3133_v37 = vld [vmem:[%s3538_s6 + $0x2cc] sm:$0xf0] }
 0x158   : > { %v1675_v5 = vpop.f32.mrf.mxu2  ;;  %v1340_v11 = vpop.f32.mrf.mxu0 }
 0x159   : > { %v1844_v6 = vpop.f32.mrf.mxu3  ;;  %v1676_v10 = vadd.f32 %v1675_v5, %v1507_v4  ;;  %v1509_v12 = vpop.f32.mrf.mxu1  ;;  %v1341_v15 = vadd.f32 %v3633_v8, %v1340_v11  ;;  %v3127_v4 = vld [vmem:[%s3538_s6 + $0x2a4] sm:$0xf]  ;;  %v2740_v5 = vld [vmem:[%s3538_s6 + $0x2b0] sm:$0xf0] }
 0x15b   : > { %v1845_v16 = vadd.f32 %v1844_v6, %v1676_v10  ;;  %v1510_v17 = vadd.f32 %v1509_v12, %v1341_v15  ;;  %1379 = vmatmul.bf16.gmra.mxu0 %v2707_v7  ;;  %v2746_v6 = vld [vmem:[%s3538_s6 + $0x2a8] sm:$0xf]  ;;  %v3130_v7 = vld [vmem:[%s3538_s6 + $0x2b4] sm:$0xf0]  ;;  %v2748_v10 = vld [vmem:[%s3538_s6 + $0x2b8] sm:$0xf0]  ;;  %v2739_v15 = vor.u32 %v3129_v1, %v2738_v0 }
 0x15c   : > { %1548 = vmatmul.bf16.gmra.mxu1 %v2711_v9  ;;  %v3128_v9 = vld [vmem:[%s3538_s6 + $0x2ac] sm:$0xf] }
 0x15d   : > { %v1972_v18 = vadd.f32 %v1971_v59, %v1845_v16  ;;  %v2043_v19 = vmul.f32 %v1845_v16, %v1845_v16  ;;  %v3256_v20 = vpack.c.bf16 %v1845_v16, %v1843_v55  ;;  %1717 = vmatmul.bf16.gmra.mxu2 %v2715_v13  ;;  %v2743_v16 = vor.u32 %v3127_v4, %v2740_v5 }
 0x15e   : > { %1886 = vmatmul.bf16.gmra.mxu3 %v2719_v14 }
 0x15f   : > { %v2106_v21 = vadd.f32 %v2105_v3, %v2043_v19  ;;  %3372 = vst [vmem:[%s3650_s27 + $0x50] sm:$0xff] %v3256_v20   ;;  %v2747_v19 = vor.u32 %v3130_v7, %v2746_v6  ;;  %v2751_v20 = vor.u32 %v3128_v9, %v2748_v10  ;;  %v2770_v7 = vld [vmem:[%s3538_s6 + $0x2e0] sm:$0xf]  ;;  %v3137_v9 = vld [vmem:[%s3538_s6 + $0x2ec] sm:$0xf0] }
 0x160   : > { %v1678_v22 = vpop.f32.mrf.mxu2  ;;  %v1342_v25 = vpop.f32.mrf.mxu0 }
 0x161   : > { %v1847_v23 = vpop.f32.mrf.mxu3  ;;  %v1679_v24 = vadd.f32 %v1678_v22, %v1510_v17  ;;  %v1511_v26 = vpop.f32.mrf.mxu1  ;;  %v1343_v28 = vadd.f32 %v3633_v8, %v1342_v25 }
 0x163   : > { %v1848_v27 = vadd.f32 %v1847_v23, %v1679_v24  ;;  %v1512_v40 = vadd.f32 %v1511_v26, %v1343_v28 }
 0x165   : > { %v1973_v31 = vadd.f32 %v1972_v18, %v1848_v27  ;;  %v2044_v32 = vmul.f32 %v1848_v27, %v1848_v27 }
 0x167   : > { %v2107_v39 = vadd.f32 %v2106_v21, %v2044_v32  ;;  %v3786_v21 = vld [vmem:[%s3968_s2] ss:$0 sm:$0xff] }
 0x168   : > { %v1680_v41 = vpop.f32.mrf.mxu2  ;;  %v1345_v46 = vpop.f32.mrf.mxu0 }
 0x169   : > { %v1849_v42 = vpop.f32.mrf.mxu3  ;;  %v1681_v45 = vadd.f32 %v1680_v41, %v1512_v40  ;;  %v1514_v47 = vpop.f32.mrf.mxu1  ;;  %v1346_v50 = vadd.f32 %v3633_v8, %v1345_v46  ;;  %v3131_v40 = vld [vmem:[%s3538_s6 + $0x2c4] sm:$0xf]  ;;  %v2756_v41 = vld [vmem:[%s3538_s6 + $0x2d0] sm:$0xf0] }
 0x16b   : > { %v1850_v51 = vadd.f32 %v1849_v42, %v1681_v45  ;;  %v1515_v52 = vadd.f32 %v1514_v47, %v1346_v50  ;;  %1384 = vmatmul.bf16.gmra.mxu0 %v2723_v43  ;;  %v2762_v42 = vld [vmem:[%s3538_s6 + $0x2c8] sm:$0xf]  ;;  %v3134_v43 = vld [vmem:[%s3538_s6 + $0x2d4] sm:$0xf0]  ;;  %v2764_v45 = vld [vmem:[%s3538_s6 + $0x2d8] sm:$0xf0]  ;;  %v2755_v50 = vor.u32 %v3133_v37, %v2754_v36 }
 0x16c   : > { %1553 = vmatmul.bf16.gmra.mxu1 %v2727_v44  ;;  %v3132_v44 = vld [vmem:[%s3538_s6 + $0x2cc] sm:$0xf] }
 0x16d   : > { %v1974_v53 = vadd.f32 %v1973_v31, %v1850_v51  ;;  %v2045_v54 = vmul.f32 %v1850_v51, %v1850_v51  ;;  %v3261_v55 = vpack.c.bf16 %v1850_v51, %v1848_v27  ;;  %1722 = vmatmul.bf16.gmra.mxu2 %v2731_v48  ;;  %v2759_v51 = vor.u32 %v3131_v40, %v2756_v41 }
 0x16e   : > { %1891 = vmatmul.bf16.gmra.mxu3 %v2735_v49 }
 0x16f   : > { %v2108_v56 = vadd.f32 %v2107_v39, %v2045_v54  ;;  %3373 = vst [vmem:[%s3650_s27 + $0x58] sm:$0xff] %v3261_v55   ;;  %v2763_v55 = vor.u32 %v3134_v43, %v2762_v42  ;;  %v2786_v43 = vld [vmem:[%s3538_s6 + $0x300] sm:$0xf] }
 0x170   : > { %v1683_v57 = vpop.f32.mrf.mxu2  ;;  %v1347_v60 = vpop.f32.mrf.mxu0 }
 0x171   : > { %v1852_v58 = vpop.f32.mrf.mxu3  ;;  %v1684_v59 = vadd.f32 %v1683_v57, %v1515_v52  ;;  %v1516_v61 = vpop.f32.mrf.mxu1  ;;  %v1348_v63 = vadd.f32 %v3633_v8, %v1347_v60 }
 0x173   : > { %v1853_v62 = vadd.f32 %v1852_v58, %v1684_v59  ;;  %v1517_v12 = vadd.f32 %v1516_v61, %v1348_v63 }
 0x175   : > { %v1975_v2 = vadd.f32 %v1974_v53, %v1853_v62  ;;  %v2046_v3 = vmul.f32 %v1853_v62, %v1853_v62 }
 0x177   : > { %v2109_v11 = vadd.f32 %v2108_v56, %v2046_v3  ;;  %v2767_v56 = vor.u32 %v3132_v44, %v2764_v45  ;;  %v3141_v44 = vld [vmem:[%s3538_s6 + $0x30c] sm:$0xf0] }
 0x178   : > { %v1685_v13 = vpop.f32.mrf.mxu2  ;;  %v1350_v18 = vpop.f32.mrf.mxu0 }
 0x179   : > { %v1854_v14 = vpop.f32.mrf.mxu3  ;;  %v1686_v17 = vadd.f32 %v1685_v13, %v1517_v12  ;;  %v1519_v8 = vpop.f32.mrf.mxu1  ;;  %v1351_v22 = vadd.f32 %v3786_v21, %v1350_v18  ;;  %v3135_v12 = vld [vmem:[%s3538_s6 + $0x2e4] sm:$0xf]  ;;  %v2772_v13 = vld [vmem:[%s3538_s6 + $0x2f0] sm:$0xf0] }
 0x17b   : > { %v1855_v23 = vadd.f32 %v1854_v14, %v1686_v17  ;;  %v1520_v24 = vadd.f32 %v1519_v8, %v1351_v22  ;;  %1389 = vmatmul.bf16.gmra.mxu0 %v2739_v15  ;;  %v2778_v14 = vld [vmem:[%s3538_s6 + $0x2e8] sm:$0xf]  ;;  %v3138_v15 = vld [vmem:[%s3538_s6 + $0x2f4] sm:$0xf0]  ;;  %v2780_v17 = vld [vmem:[%s3538_s6 + $0x2f8] sm:$0xf0]  ;;  %v2771_v22 = vor.u32 %v3137_v9, %v2770_v7 }
 0x17c   : > { %1558 = vmatmul.bf16.gmra.mxu1 %v2743_v16  ;;  %v3136_v16 = vld [vmem:[%s3538_s6 + $0x2ec] sm:$0xf] }
 0x17d   : > { %v1976_v25 = vadd.f32 %v1975_v2, %v1855_v23  ;;  %v2047_v26 = vmul.f32 %v1855_v23, %v1855_v23  ;;  %v3266_v27 = vpack.c.bf16 %v1855_v23, %v1853_v62  ;;  %1727 = vmatmul.bf16.gmra.mxu2 %v2747_v19  ;;  %v2775_v23 = vor.u32 %v3135_v12, %v2772_v13 }
 0x17e   : > { %1896 = vmatmul.bf16.gmra.mxu3 %v2751_v20 }
 0x17f   : > { %v2110_v28 = vadd.f32 %v2109_v11, %v2047_v26  ;;  %3374 = vst [vmem:[%s3650_s27 + $0x60] sm:$0xff] %v3266_v27   ;;  %v2779_v27 = vor.u32 %v3138_v15, %v2778_v14  ;;  %v2802_v15 = vld [vmem:[%s3538_s6 + $0x320] sm:$0xf] }
 0x180   : > { %v1688_v29 = vpop.f32.mrf.mxu2  ;;  %v1352_v32 = vpop.f32.mrf.mxu0 }
 0x181   : > { %v1857_v30 = vpop.f32.mrf.mxu3  ;;  %v1689_v31 = vadd.f32 %v1688_v29, %v1520_v24  ;;  %v1521_v33 = vpop.f32.mrf.mxu1  ;;  %v1353_v35 = vadd.f32 %v3786_v21, %v1352_v32 }
 0x183   : > { %v1858_v34 = vadd.f32 %v1857_v30, %v1689_v31  ;;  %v1522_v47 = vadd.f32 %v1521_v33, %v1353_v35 }
 0x185   : > { %v1977_v38 = vadd.f32 %v1976_v25, %v1858_v34  ;;  %v2048_v39 = vmul.f32 %v1858_v34, %v1858_v34 }
 0x187   : > { %v2111_v46 = vadd.f32 %v2110_v28, %v2048_v39  ;;  %v2783_v28 = vor.u32 %v3136_v16, %v2780_v17  ;;  %v3145_v16 = vld [vmem:[%s3538_s6 + $0x32c] sm:$0xf0] }
 0x188   : > { %v1690_v48 = vpop.f32.mrf.mxu2  ;;  %v1355_v53 = vpop.f32.mrf.mxu0 }
 0x189   : > { %v1859_v49 = vpop.f32.mrf.mxu3  ;;  %v1691_v52 = vadd.f32 %v1690_v48, %v1522_v47  ;;  %v1524_v54 = vpop.f32.mrf.mxu1  ;;  %v1356_v57 = vadd.f32 %v3786_v21, %v1355_v53  ;;  %v3139_v47 = vld [vmem:[%s3538_s6 + $0x304] sm:$0xf]  ;;  %v2788_v48 = vld [vmem:[%s3538_s6 + $0x310] sm:$0xf0] }
 0x18b   : > { %v1860_v58 = vadd.f32 %v1859_v49, %v1691_v52  ;;  %v1525_v59 = vadd.f32 %v1524_v54, %v1356_v57  ;;  %1394 = vmatmul.bf16.gmra.mxu0 %v2755_v50  ;;  %v2794_v49 = vld [vmem:[%s3538_s6 + $0x308] sm:$0xf]  ;;  %v3142_v50 = vld [vmem:[%s3538_s6 + $0x314] sm:$0xf0]  ;;  %v2796_v52 = vld [vmem:[%s3538_s6 + $0x318] sm:$0xf0]  ;;  %v2787_v57 = vor.u32 %v3141_v44, %v2786_v43 }
 0x18c   : > { %1563 = vmatmul.bf16.gmra.mxu1 %v2759_v51  ;;  %v3140_v51 = vld [vmem:[%s3538_s6 + $0x30c] sm:$0xf] }
 0x18d   : > { %v1978_v60 = vadd.f32 %v1977_v38, %v1860_v58  ;;  %v2049_v61 = vmul.f32 %v1860_v58, %v1860_v58  ;;  %v3271_v62 = vpack.c.bf16 %v1860_v58, %v1858_v34  ;;  %1732 = vmatmul.bf16.gmra.mxu2 %v2763_v55  ;;  %v2791_v58 = vor.u32 %v3139_v47, %v2788_v48 }
 0x18e   : > { %1901 = vmatmul.bf16.gmra.mxu3 %v2767_v56 }
 0x18f   : > { %v2112_v63 = vadd.f32 %v2111_v46, %v2049_v61  ;;  %3375 = vst [vmem:[%s3650_s27 + $0x68] sm:$0xff] %v3271_v62   ;;  %v2795_v62 = vor.u32 %v3142_v50, %v2794_v49  ;;  %v2818_v50 = vld [vmem:[%s3538_s6 + $0x340] sm:$0xf] }
 0x190   : > { %v1693_v0 = vpop.f32.mrf.mxu2  ;;  %v1357_v3 = vpop.f32.mrf.mxu0 }
 0x191   : > { %v1862_v1 = vpop.f32.mrf.mxu3  ;;  %v1694_v2 = vadd.f32 %v1693_v0, %v1525_v59  ;;  %v1526_v4 = vpop.f32.mrf.mxu1  ;;  %v1358_v6 = vadd.f32 %v3786_v21, %v1357_v3 }
 0x193   : > { %v1863_v5 = vadd.f32 %v1862_v1, %v1694_v2  ;;  %v1527_v8 = vadd.f32 %v1526_v4, %v1358_v6 }
 0x195   : > { %v1979_v10 = vadd.f32 %v1978_v60, %v1863_v5  ;;  %v2050_v11 = vmul.f32 %v1863_v5, %v1863_v5 }
 0x197   : > { %v2113_v18 = vadd.f32 %v2112_v63, %v2050_v11  ;;  %v2799_v63 = vor.u32 %v3140_v51, %v2796_v52  ;;  %v3149_v51 = vld [vmem:[%s3538_s6 + $0x34c] sm:$0xf0] }
 0x198   : > { %v1695_v19 = vpop.f32.mrf.mxu2  ;;  %v1360_v25 = vpop.f32.mrf.mxu0 }
 0x199   : > { %v1864_v20 = vpop.f32.mrf.mxu3  ;;  %v1696_v24 = vadd.f32 %v1695_v19, %v1527_v8  ;;  %v1529_v26 = vpop.f32.mrf.mxu1  ;;  %v1361_v29 = vadd.f32 %v3786_v21, %v1360_v25  ;;  %v3143_v8 = vld [vmem:[%s3538_s6 + $0x324] sm:$0xf]  ;;  %v2804_v19 = vld [vmem:[%s3538_s6 + $0x330] sm:$0xf0] }
 0x19b   : > { %v1865_v30 = vadd.f32 %v1864_v20, %v1696_v24  ;;  %v1530_v31 = vadd.f32 %v1529_v26, %v1361_v29  ;;  %1399 = vmatmul.bf16.gmra.mxu0 %v2771_v22  ;;  %v2810_v20 = vld [vmem:[%s3538_s6 + $0x328] sm:$0xf]  ;;  %v3146_v22 = vld [vmem:[%s3538_s6 + $0x334] sm:$0xf0]  ;;  %v2812_v24 = vld [vmem:[%s3538_s6 + $0x338] sm:$0xf0]  ;;  %v2803_v29 = vor.u32 %v3145_v16, %v2802_v15 }
 0x19c   : > { %1568 = vmatmul.bf16.gmra.mxu1 %v2775_v23  ;;  %v3144_v23 = vld [vmem:[%s3538_s6 + $0x32c] sm:$0xf] }
 0x19d   : > { %v1980_v32 = vadd.f32 %v1979_v10, %v1865_v30  ;;  %v2051_v33 = vmul.f32 %v1865_v30, %v1865_v30  ;;  %v3276_v34 = vpack.c.bf16 %v1865_v30, %v1863_v5  ;;  %1737 = vmatmul.bf16.gmra.mxu2 %v2779_v27  ;;  %v2807_v30 = vor.u32 %v3143_v8, %v2804_v19 }
 0x19e   : > { %1906 = vmatmul.bf16.gmra.mxu3 %v2783_v28 }
 0x19f   : > { %v2114_v35 = vadd.f32 %v2113_v18, %v2051_v33  ;;  %3376 = vst [vmem:[%s3650_s27 + $0x70] sm:$0xff] %v3276_v34   ;;  %v2811_v34 = vor.u32 %v3146_v22, %v2810_v20  ;;  %v2834_v22 = vld [vmem:[%s3538_s6 + $0x360] sm:$0xf] }
 0x1a0   : > { %v1698_v36 = vpop.f32.mrf.mxu2  ;;  %v1362_v39 = vpop.f32.mrf.mxu0 }
 0x1a1   : > { %v1867_v37 = vpop.f32.mrf.mxu3  ;;  %v1699_v38 = vadd.f32 %v1698_v36, %v1530_v31  ;;  %v1531_v40 = vpop.f32.mrf.mxu1  ;;  %v1363_v42 = vadd.f32 %v3786_v21, %v1362_v39 }
 0x1a3   : > { %v1868_v41 = vadd.f32 %v1867_v37, %v1699_v38  ;;  %v1532_v54 = vadd.f32 %v1531_v40, %v1363_v42 }
 0x1a5   : > { %v1981_v45 = vadd.f32 %v1980_v32, %v1868_v41  ;;  %v2052_v46 = vmul.f32 %v1868_v41, %v1868_v41 }
 0x1a7   : > { %v2115_v53 = vadd.f32 %v2114_v35, %v2052_v46  ;;  %v2815_v35 = vor.u32 %v3144_v23, %v2812_v24  ;;  %v3153_v23 = vld [vmem:[%s3538_s6 + $0x36c] sm:$0xf0] }
 0x1a8   : > { %v1700_v55 = vpop.f32.mrf.mxu2  ;;  %v1365_v60 = vpop.f32.mrf.mxu0 }
 0x1a9   : > { %v1869_v56 = vpop.f32.mrf.mxu3  ;;  %v1701_v59 = vadd.f32 %v1700_v55, %v1532_v54  ;;  %v1534_v61 = vpop.f32.mrf.mxu1  ;;  %v1366_v0 = vadd.f32 %v3786_v21, %v1365_v60  ;;  %v3147_v54 = vld [vmem:[%s3538_s6 + $0x344] sm:$0xf]  ;;  %v2820_v55 = vld [vmem:[%s3538_s6 + $0x350] sm:$0xf0] }
 0x1ab   : > { %v1870_v1 = vadd.f32 %v1869_v56, %v1701_v59  ;;  %v1535_v2 = vadd.f32 %v1534_v61, %v1366_v0  ;;  %1404 = vmatmul.bf16.gmra.mxu0 %v2787_v57  ;;  %v2826_v56 = vld [vmem:[%s3538_s6 + $0x348] sm:$0xf]  ;;  %v3150_v57 = vld [vmem:[%s3538_s6 + $0x354] sm:$0xf0]  ;;  %v2828_v59 = vld [vmem:[%s3538_s6 + $0x358] sm:$0xf0]  ;;  %v2819_v0 = vor.u32 %v3149_v51, %v2818_v50 }
 0x1ac   : > { %1573 = vmatmul.bf16.gmra.mxu1 %v2791_v58  ;;  %v3148_v58 = vld [vmem:[%s3538_s6 + $0x34c] sm:$0xf] }
 0x1ad   : > { %v1982_v3 = vadd.f32 %v1981_v45, %v1870_v1  ;;  %v2053_v4 = vmul.f32 %v1870_v1, %v1870_v1  ;;  %v3281_v5 = vpack.c.bf16 %v1870_v1, %v1868_v41  ;;  %1742 = vmatmul.bf16.gmra.mxu2 %v2795_v62  ;;  %v2823_v1 = vor.u32 %v3147_v54, %v2820_v55 }
 0x1ae   : > { %1911 = vmatmul.bf16.gmra.mxu3 %v2799_v63 }
 0x1af   : > { %v2116_v6 = vadd.f32 %v2115_v53, %v2053_v4  ;;  %3377 = vst [vmem:[%s3650_s27 + $0x78] sm:$0xff] %v3281_v5   ;;  %v2827_v5 = vor.u32 %v3150_v57, %v2826_v56  ;;  %v2850_v57 = vld [vmem:[%s3538_s6 + $0x380] sm:$0xf] }
 0x1b0   : > { %v1703_v7 = vpop.f32.mrf.mxu2  ;;  %v1367_v11 = vpop.f32.mrf.mxu0 }
 0x1b1   : > { %v1872_v9 = vpop.f32.mrf.mxu3  ;;  %v1704_v10 = vadd.f32 %v1703_v7, %v1535_v2  ;;  %v1536_v12 = vpop.f32.mrf.mxu1  ;;  %v1368_v14 = vadd.f32 %v3786_v21, %v1367_v11 }
 0x1b3   : > { %v1873_v13 = vadd.f32 %v1872_v9, %v1704_v10  ;;  %v1537_v26 = vadd.f32 %v1536_v12, %v1368_v14 }
 0x1b5   : > { %v1983_v17 = vadd.f32 %v1982_v3, %v1873_v13  ;;  %v2054_v18 = vmul.f32 %v1873_v13, %v1873_v13 }
 0x1b7   : > { %v2117_v25 = vadd.f32 %v2116_v6, %v2054_v18  ;;  %v2831_v6 = vor.u32 %v3148_v58, %v2828_v59  ;;  %v3157_v58 = vld [vmem:[%s3538_s6 + $0x38c] sm:$0xf0] }
 0x1b8   : > { %v1705_v27 = vpop.f32.mrf.mxu2  ;;  %v1370_v32 = vpop.f32.mrf.mxu0 }
 0x1b9   : > { %v1874_v28 = vpop.f32.mrf.mxu3  ;;  %v1706_v31 = vadd.f32 %v1705_v27, %v1537_v26  ;;  %v1539_v33 = vpop.f32.mrf.mxu1  ;;  %v1371_v36 = vadd.f32 %v3786_v21, %v1370_v32  ;;  %v3151_v26 = vld [vmem:[%s3538_s6 + $0x364] sm:$0xf]  ;;  %v2836_v27 = vld [vmem:[%s3538_s6 + $0x370] sm:$0xf0] }
 0x1bb   : > { %v1875_v37 = vadd.f32 %v1874_v28, %v1706_v31  ;;  %v1540_v38 = vadd.f32 %v1539_v33, %v1371_v36  ;;  %1409 = vmatmul.bf16.gmra.mxu0 %v2803_v29  ;;  %v2842_v28 = vld [vmem:[%s3538_s6 + $0x368] sm:$0xf]  ;;  %v3154_v29 = vld [vmem:[%s3538_s6 + $0x374] sm:$0xf0]  ;;  %v2844_v31 = vld [vmem:[%s3538_s6 + $0x378] sm:$0xf0]  ;;  %v2835_v36 = vor.u32 %v3153_v23, %v2834_v22 }
 0x1bc   : > { %1578 = vmatmul.bf16.gmra.mxu1 %v2807_v30  ;;  %v3152_v30 = vld [vmem:[%s3538_s6 + $0x36c] sm:$0xf] }
 0x1bd   : > { %v1984_v39 = vadd.f32 %v1983_v17, %v1875_v37  ;;  %v2055_v40 = vmul.f32 %v1875_v37, %v1875_v37  ;;  %v3286_v41 = vpack.c.bf16 %v1875_v37, %v1873_v13  ;;  %1747 = vmatmul.bf16.gmra.mxu2 %v2811_v34  ;;  %v2839_v37 = vor.u32 %v3151_v26, %v2836_v27 }
 0x1be   : > { %1916 = vmatmul.bf16.gmra.mxu3 %v2815_v35 }
 0x1bf   : > { %v2118_v42 = vadd.f32 %v2117_v25, %v2055_v40  ;;  %3378 = vst [vmem:[%s3650_s27 + $0x80] sm:$0xff] %v3286_v41   ;;  %v2843_v41 = vor.u32 %v3154_v29, %v2842_v28  ;;  %v2866_v29 = vld [vmem:[%s3538_s6 + $0x3a0] sm:$0xf] }
 0x1c0   : > { %v1708_v43 = vpop.f32.mrf.mxu2  ;;  %v1372_v46 = vpop.f32.mrf.mxu0 }
 0x1c1   : > { %v1877_v44 = vpop.f32.mrf.mxu3  ;;  %v1709_v45 = vadd.f32 %v1708_v43, %v1540_v38  ;;  %v1541_v47 = vpop.f32.mrf.mxu1  ;;  %v1373_v49 = vadd.f32 %v3786_v21, %v1372_v46 }
 0x1c3   : > { %v1878_v48 = vadd.f32 %v1877_v44, %v1709_v45  ;;  %v1542_v61 = vadd.f32 %v1541_v47, %v1373_v49 }
 0x1c5   : > { %v1985_v52 = vadd.f32 %v1984_v39, %v1878_v48  ;;  %v2056_v53 = vmul.f32 %v1878_v48, %v1878_v48 }
 0x1c7   : > { %v2119_v60 = vadd.f32 %v2118_v42, %v2056_v53  ;;  %v2847_v42 = vor.u32 %v3152_v30, %v2844_v31  ;;  %v3161_v30 = vld [vmem:[%s3538_s6 + $0x3ac] sm:$0xf0] }
 0x1c8   : > { %v1710_v62 = vpop.f32.mrf.mxu2  ;;  %v1375_v3 = vpop.f32.mrf.mxu0 }
 0x1c9   : > { %v1879_v63 = vpop.f32.mrf.mxu3  ;;  %v1711_v2 = vadd.f32 %v1710_v62, %v1542_v61  ;;  %v1544_v4 = vpop.f32.mrf.mxu1  ;;  %v1376_v7 = vadd.f32 %v3786_v21, %v1375_v3  ;;  %v3155_v61 = vld [vmem:[%s3538_s6 + $0x384] sm:$0xf]  ;;  %v2852_v62 = vld [vmem:[%s3538_s6 + $0x390] sm:$0xf0] }
 0x1cb   : > { %v1880_v9 = vadd.f32 %v1879_v63, %v1711_v2  ;;  %v1545_v10 = vadd.f32 %v1544_v4, %v1376_v7  ;;  %1414 = vmatmul.bf16.gmra.mxu0 %v2819_v0  ;;  %v2858_v63 = vld [vmem:[%s3538_s6 + $0x388] sm:$0xf]  ;;  %v3158_v0 = vld [vmem:[%s3538_s6 + $0x394] sm:$0xf0]  ;;  %v2860_v2 = vld [vmem:[%s3538_s6 + $0x398] sm:$0xf0]  ;;  %v2851_v7 = vor.u32 %v3157_v58, %v2850_v57 }
 0x1cc   : > { %1583 = vmatmul.bf16.gmra.mxu1 %v2823_v1  ;;  %v3156_v1 = vld [vmem:[%s3538_s6 + $0x38c] sm:$0xf] }
 0x1cd   : > { %v1986_v11 = vadd.f32 %v1985_v52, %v1880_v9  ;;  %v2057_v12 = vmul.f32 %v1880_v9, %v1880_v9  ;;  %v3291_v13 = vpack.c.bf16 %v1880_v9, %v1878_v48  ;;  %1752 = vmatmul.bf16.gmra.mxu2 %v2827_v5  ;;  %v2855_v9 = vor.u32 %v3155_v61, %v2852_v62 }
 0x1ce   : > { %1921 = vmatmul.bf16.gmra.mxu3 %v2831_v6 }
 0x1cf   : > { %v2120_v14 = vadd.f32 %v2119_v60, %v2057_v12  ;;  %3379 = vst [vmem:[%s3650_s27 + $0x88] sm:$0xff] %v3291_v13   ;;  %v2859_v13 = vor.u32 %v3158_v0, %v2858_v63  ;;  %v2882_v0 = vld [vmem:[%s3538_s6 + $0x3c0] sm:$0xf] }
 0x1d0   : > { %v1713_v15 = vpop.f32.mrf.mxu2  ;;  %v1377_v18 = vpop.f32.mrf.mxu0 }
 0x1d1   : > { %v1882_v16 = vpop.f32.mrf.mxu3  ;;  %v1714_v17 = vadd.f32 %v1713_v15, %v1545_v10  ;;  %v1546_v8 = vpop.f32.mrf.mxu1  ;;  %v1378_v20 = vadd.f32 %v3786_v21, %v1377_v18 }
 0x1d3   : > { %v1883_v19 = vadd.f32 %v1882_v16, %v1714_v17  ;;  %v1547_v33 = vadd.f32 %v1546_v8, %v1378_v20 }
 0x1d5   : > { %v1987_v24 = vadd.f32 %v1986_v11, %v1883_v19  ;;  %v2058_v25 = vmul.f32 %v1883_v19, %v1883_v19 }
 0x1d7   : > { %v2121_v32 = vadd.f32 %v2120_v14, %v2058_v25  ;;  %v2863_v14 = vor.u32 %v3156_v1, %v2860_v2  ;;  %v3165_v1 = vld [vmem:[%s3538_s6 + $0x3cc] sm:$0xf0] }
 0x1d8   : > { %v1715_v34 = vpop.f32.mrf.mxu2  ;;  %v1380_v39 = vpop.f32.mrf.mxu0 }
 0x1d9   : > { %v1884_v35 = vpop.f32.mrf.mxu3  ;;  %v1716_v38 = vadd.f32 %v1715_v34, %v1547_v33  ;;  %v1549_v40 = vpop.f32.mrf.mxu1  ;;  %v1381_v43 = vadd.f32 %v3786_v21, %v1380_v39  ;;  %v3159_v33 = vld [vmem:[%s3538_s6 + $0x3a4] sm:$0xf]  ;;  %v2868_v34 = vld [vmem:[%s3538_s6 + $0x3b0] sm:$0xf0] }
 0x1db   : > { %v1885_v44 = vadd.f32 %v1884_v35, %v1716_v38  ;;  %v1550_v45 = vadd.f32 %v1549_v40, %v1381_v43  ;;  %1419 = vmatmul.bf16.gmra.mxu0 %v2835_v36  ;;  %v2874_v35 = vld [vmem:[%s3538_s6 + $0x3a8] sm:$0xf]  ;;  %v3162_v36 = vld [vmem:[%s3538_s6 + $0x3b4] sm:$0xf0]  ;;  %v2876_v38 = vld [vmem:[%s3538_s6 + $0x3b8] sm:$0xf0]  ;;  %v2867_v43 = vor.u32 %v3161_v30, %v2866_v29 }
 0x1dc   : > { %1588 = vmatmul.bf16.gmra.mxu1 %v2839_v37  ;;  %v3160_v37 = vld [vmem:[%s3538_s6 + $0x3ac] sm:$0xf] }
 0x1dd   : > { %v1988_v46 = vadd.f32 %v1987_v24, %v1885_v44  ;;  %v2059_v47 = vmul.f32 %v1885_v44, %v1885_v44  ;;  %v3296_v48 = vpack.c.bf16 %v1885_v44, %v1883_v19  ;;  %1757 = vmatmul.bf16.gmra.mxu2 %v2843_v41  ;;  %v2871_v44 = vor.u32 %v3159_v33, %v2868_v34 }
 0x1de   : > { %1926 = vmatmul.bf16.gmra.mxu3 %v2847_v42 }
 0x1df   : > { %v2122_v49 = vadd.f32 %v2121_v32, %v2059_v47  ;;  %3380 = vst [vmem:[%s3650_s27 + $0x90] sm:$0xff] %v3296_v48   ;;  %v2875_v48 = vor.u32 %v3162_v36, %v2874_v35  ;;  %v2898_v36 = vld [vmem:[%s3538_s6 + $0x3e0] sm:$0xf] }
 0x1e0   : > { %v1718_v50 = vpop.f32.mrf.mxu2  ;;  %v1382_v53 = vpop.f32.mrf.mxu0 }
 0x1e1   : > { %v1887_v51 = vpop.f32.mrf.mxu3  ;;  %v1719_v52 = vadd.f32 %v1718_v50, %v1550_v45  ;;  %v1551_v54 = vpop.f32.mrf.mxu1  ;;  %v1383_v56 = vadd.f32 %v3786_v21, %v1382_v53 }
 0x1e3   : > { %v1888_v55 = vadd.f32 %v1887_v51, %v1719_v52  ;;  %v1552_v4 = vadd.f32 %v1551_v54, %v1383_v56 }
 0x1e5   : > { %v1989_v59 = vadd.f32 %v1988_v46, %v1888_v55  ;;  %v2060_v60 = vmul.f32 %v1888_v55, %v1888_v55 }
 0x1e7   : > { %v2123_v3 = vadd.f32 %v2122_v49, %v2060_v60  ;;  %v2879_v49 = vor.u32 %v3160_v37, %v2876_v38  ;;  %v3169_v37 = vld [vmem:[%s3538_s6 + $0x3ec] sm:$0xf0] }
 0x1e8   : > { %v1720_v5 = vpop.f32.mrf.mxu2  ;;  %v1385_v11 = vpop.f32.mrf.mxu0 }
 0x1e9   : > { %v1889_v6 = vpop.f32.mrf.mxu3  ;;  %v1721_v10 = vadd.f32 %v1720_v5, %v1552_v4  ;;  %v1554_v12 = vpop.f32.mrf.mxu1  ;;  %v1386_v15 = vadd.f32 %v3786_v21, %v1385_v11  ;;  %v3163_v4 = vld [vmem:[%s3538_s6 + $0x3c4] sm:$0xf]  ;;  %v2884_v5 = vld [vmem:[%s3538_s6 + $0x3d0] sm:$0xf0] }
 0x1eb   : > { %v1890_v16 = vadd.f32 %v1889_v6, %v1721_v10  ;;  %v1555_v17 = vadd.f32 %v1554_v12, %v1386_v15  ;;  %1424 = vmatmul.bf16.gmra.mxu0 %v2851_v7  ;;  %v2890_v6 = vld [vmem:[%s3538_s6 + $0x3c8] sm:$0xf]  ;;  %v3166_v7 = vld [vmem:[%s3538_s6 + $0x3d4] sm:$0xf0]  ;;  %v2892_v10 = vld [vmem:[%s3538_s6 + $0x3d8] sm:$0xf0]  ;;  %v2883_v15 = vor.u32 %v3165_v1, %v2882_v0 }
 0x1ec   : > { %1593 = vmatmul.bf16.gmra.mxu1 %v2855_v9  ;;  %v3164_v9 = vld [vmem:[%s3538_s6 + $0x3cc] sm:$0xf] }
 0x1ed   : > { %v1990_v18 = vadd.f32 %v1989_v59, %v1890_v16  ;;  %v2061_v8 = vmul.f32 %v1890_v16, %v1890_v16  ;;  %v3301_v19 = vpack.c.bf16 %v1890_v16, %v1888_v55  ;;  %1762 = vmatmul.bf16.gmra.mxu2 %v2859_v13  ;;  %v2887_v16 = vor.u32 %v3163_v4, %v2884_v5 }
 0x1ee   : > { %1931 = vmatmul.bf16.gmra.mxu3 %v2863_v14 }
 0x1ef   : > { %v2124_v20 = vadd.f32 %v2123_v3, %v2061_v8  ;;  %3381 = vst [vmem:[%s3650_s27 + $0x98] sm:$0xff] %v3301_v19   ;;  %v2891_v19 = vor.u32 %v3166_v7, %v2890_v6 }
 0x1f0   : > { %v1723_v22 = vpop.f32.mrf.mxu2  ;;  %v1387_v25 = vpop.f32.mrf.mxu0 }
 0x1f1   : > { %v1892_v23 = vpop.f32.mrf.mxu3  ;;  %v1724_v24 = vadd.f32 %v1723_v22, %v1555_v17  ;;  %v1556_v26 = vpop.f32.mrf.mxu1  ;;  %v1388_v28 = vadd.f32 %v3786_v21, %v1387_v25 }
 0x1f3   : > { %v1893_v27 = vadd.f32 %v1892_v23, %v1724_v24  ;;  %v1557_v40 = vadd.f32 %v1556_v26, %v1388_v28 }
 0x1f5   : > { %v1991_v31 = vadd.f32 %v1990_v18, %v1893_v27  ;;  %v2062_v32 = vmul.f32 %v1893_v27, %v1893_v27 }
 0x1f7   : > { %v2125_v39 = vadd.f32 %v2124_v20, %v2062_v32  ;;  %v2895_v20 = vor.u32 %v3164_v9, %v2892_v10 }
 0x1f8   : > { %v1725_v41 = vpop.f32.mrf.mxu2  ;;  %v1390_v46 = vpop.f32.mrf.mxu0 }
 0x1f9   : > { %v1894_v42 = vpop.f32.mrf.mxu3  ;;  %v1726_v45 = vadd.f32 %v1725_v41, %v1557_v40  ;;  %v1559_v47 = vpop.f32.mrf.mxu1  ;;  %v1391_v50 = vadd.f32 %v3786_v21, %v1390_v46  ;;  %v3167_v40 = vld [vmem:[%s3538_s6 + $0x3e4] sm:$0xf]  ;;  %v2900_v41 = vld [vmem:[%s3538_s6 + $0x3f0] sm:$0xf0] }
 0x1fb   : > { %v1895_v51 = vadd.f32 %v1894_v42, %v1726_v45  ;;  %v1560_v52 = vadd.f32 %v1559_v47, %v1391_v50  ;;  %1429 = vmatmul.bf16.gmra.mxu0 %v2867_v43  ;;  %v2906_v42 = vld [vmem:[%s3538_s6 + $0x3e8] sm:$0xf]  ;;  %v3170_v43 = vld [vmem:[%s3538_s6 + $0x3f4] sm:$0xf0]  ;;  %v2908_v45 = vld [vmem:[%s3538_s6 + $0x3f8] sm:$0xf0]  ;;  %v2899_v50 = vor.u32 %v3169_v37, %v2898_v36 }
 0x1fc   : > { %1598 = vmatmul.bf16.gmra.mxu1 %v2871_v44  ;;  %v3168_v44 = vld [vmem:[%s3538_s6 + $0x3ec] sm:$0xf] }
 0x1fd   : > { %v1992_v53 = vadd.f32 %v1991_v31, %v1895_v51  ;;  %v2063_v54 = vmul.f32 %v1895_v51, %v1895_v51  ;;  %v3306_v55 = vpack.c.bf16 %v1895_v51, %v1893_v27  ;;  %1767 = vmatmul.bf16.gmra.mxu2 %v2875_v48  ;;  %v2903_v51 = vor.u32 %v3167_v40, %v2900_v41 }
 0x1fe   : > { %1936 = vmatmul.bf16.gmra.mxu3 %v2879_v49 }
 0x1ff   : > { %v2126_v56 = vadd.f32 %v2125_v39, %v2063_v54  ;;  %3382 = vst [vmem:[%s3650_s27 + $0xa0] sm:$0xff] %v3306_v55   ;;  %v2907_v55 = vor.u32 %v3170_v43, %v2906_v42 }
 0x200   : > { %v1728_v57 = vpop.f32.mrf.mxu2  ;;  %v1392_v60 = vpop.f32.mrf.mxu0 }
 0x201   : > { %v1897_v58 = vpop.f32.mrf.mxu3  ;;  %v1729_v59 = vadd.f32 %v1728_v57, %v1560_v52  ;;  %v1561_v61 = vpop.f32.mrf.mxu1  ;;  %v1393_v63 = vadd.f32 %v3786_v21, %v1392_v60 }
 0x203   : > { %v1898_v62 = vadd.f32 %v1897_v58, %v1729_v59  ;;  %v1562_v12 = vadd.f32 %v1561_v61, %v1393_v63 }
 0x205   : > { %v1993_v2 = vadd.f32 %v1992_v53, %v1898_v62  ;;  %v2064_v3 = vmul.f32 %v1898_v62, %v1898_v62 }
 0x207   : > { %v2127_v11 = vadd.f32 %v2126_v56, %v2064_v3  ;;  %v2911_v56 = vor.u32 %v3168_v44, %v2908_v45 }
 0x208   : > { %v1730_v13 = vpop.f32.mrf.mxu2  ;;  %v1395_v18 = vpop.f32.mrf.mxu0 }
 0x209   : > { %v1899_v14 = vpop.f32.mrf.mxu3  ;;  %v1731_v17 = vadd.f32 %v1730_v13, %v1562_v12  ;;  %v1564_v8 = vpop.f32.mrf.mxu1  ;;  %v1396_v22 = vadd.f32 %v3786_v21, %v1395_v18 }
 0x20b   : > { %v1900_v23 = vadd.f32 %v1899_v14, %v1731_v17  ;;  %v1565_v24 = vadd.f32 %v1564_v8, %v1396_v22  ;;  %1434 = vmatmul.bf16.gmra.mxu0 %v2883_v15 }
 0x20c   : > { %1603 = vmatmul.bf16.gmra.mxu1 %v2887_v16 }
 0x20d   : > { %v1994_v25 = vadd.f32 %v1993_v2, %v1900_v23  ;;  %v2065_v26 = vmul.f32 %v1900_v23, %v1900_v23  ;;  %v3311_v27 = vpack.c.bf16 %v1900_v23, %v1898_v62  ;;  %1772 = vmatmul.bf16.gmra.mxu2 %v2891_v19 }
 0x20e   : > { %1941 = vmatmul.bf16.gmra.mxu3 %v2895_v20 }
 0x20f   : > { %v2128_v28 = vadd.f32 %v2127_v11, %v2065_v26  ;;  %3383 = vst [vmem:[%s3650_s27 + $0xa8] sm:$0xff] %v3311_v27  }
 0x210   : > { %v1733_v29 = vpop.f32.mrf.mxu2  ;;  %v1397_v32 = vpop.f32.mrf.mxu0 }
 0x211   : > { %v1902_v30 = vpop.f32.mrf.mxu3  ;;  %v1734_v31 = vadd.f32 %v1733_v29, %v1565_v24  ;;  %v1566_v33 = vpop.f32.mrf.mxu1  ;;  %v1398_v35 = vadd.f32 %v3786_v21, %v1397_v32 }
 0x213   : > { %v1903_v34 = vadd.f32 %v1902_v30, %v1734_v31  ;;  %v1567_v47 = vadd.f32 %v1566_v33, %v1398_v35 }
 0x215   : > { %v1995_v38 = vadd.f32 %v1994_v25, %v1903_v34  ;;  %v2066_v39 = vmul.f32 %v1903_v34, %v1903_v34 }
 0x217   : > { %v2129_v46 = vadd.f32 %v2128_v28, %v2066_v39 }
 0x218   : > { %v1735_v48 = vpop.f32.mrf.mxu2  ;;  %v1400_v53 = vpop.f32.mrf.mxu0 }
 0x219   : > { %v1904_v49 = vpop.f32.mrf.mxu3  ;;  %v1736_v52 = vadd.f32 %v1735_v48, %v1567_v47  ;;  %v1569_v54 = vpop.f32.mrf.mxu1  ;;  %v1401_v57 = vadd.f32 %v3786_v21, %v1400_v53 }
 0x21b   : > { %v1905_v58 = vadd.f32 %v1904_v49, %v1736_v52  ;;  %v1570_v59 = vadd.f32 %v1569_v54, %v1401_v57  ;;  %1439 = vmatmul.bf16.gmra.mxu0 %v2899_v50 }
 0x21c   : > { %1608 = vmatmul.bf16.gmra.mxu1 %v2903_v51 }
 0x21d   : > { %v1996_v60 = vadd.f32 %v1995_v38, %v1905_v58  ;;  %v2067_v61 = vmul.f32 %v1905_v58, %v1905_v58  ;;  %v3316_v62 = vpack.c.bf16 %v1905_v58, %v1903_v34  ;;  %1777 = vmatmul.bf16.gmra.mxu2 %v2907_v55 }
 0x21e   : > { %1946 = vmatmul.bf16.gmra.mxu3 %v2911_v56 }
 0x21f   : > { %v2130_v63 = vadd.f32 %v2129_v46, %v2067_v61  ;;  %3384 = vst [vmem:[%s3650_s27 + $0xb0] sm:$0xff] %v3316_v62  }
 0x220   : > { %v1738_v0 = vpop.f32.mrf.mxu2  ;;  %v1402_v3 = vpop.f32.mrf.mxu0 }
 0x221   : > { %v1907_v1 = vpop.f32.mrf.mxu3  ;;  %v1739_v2 = vadd.f32 %v1738_v0, %v1570_v59  ;;  %v1571_v4 = vpop.f32.mrf.mxu1  ;;  %v1403_v6 = vadd.f32 %v3786_v21, %v1402_v3 }
 0x223   : > { %v1908_v5 = vadd.f32 %v1907_v1, %v1739_v2  ;;  %v1572_v11 = vadd.f32 %v1571_v4, %v1403_v6 }
 0x225   : > { %v1997_v7 = vadd.f32 %v1996_v60, %v1908_v5  ;;  %v2068_v9 = vmul.f32 %v1908_v5, %v1908_v5 }
 0x227   : > { %v2131_v10 = vadd.f32 %v2130_v63, %v2068_v9 }
 0x228   : > { %v1740_v12 = vpop.f32.mrf.mxu2  ;;  %v1405_v15 = vpop.f32.mrf.mxu0 }
 0x229   : > { %v1909_v13 = vpop.f32.mrf.mxu3  ;;  %v1741_v14 = vadd.f32 %v1740_v12, %v1572_v11  ;;  %v1574_v16 = vpop.f32.mrf.mxu1  ;;  %v1406_v17 = vadd.f32 %v3786_v21, %v1405_v15 }
 0x22b   : > { %v1910_v18 = vadd.f32 %v1909_v13, %v1741_v14  ;;  %v1575_v22 = vadd.f32 %v1574_v16, %v1406_v17 }
 0x22d   : > { %v1998_v8 = vadd.f32 %v1997_v7, %v1910_v18  ;;  %v2069_v19 = vmul.f32 %v1910_v18, %v1910_v18  ;;  %v3321_v20 = vpack.c.bf16 %v1910_v18, %v1908_v5 }
 0x22f   : > { %v2132_v23 = vadd.f32 %v2131_v10, %v2069_v19  ;;  %3385 = vst [vmem:[%s3650_s27 + $0xb8] sm:$0xff] %v3321_v20  }
 0x230   : > { %v1743_v24 = vpop.f32.mrf.mxu2  ;;  %v1407_v27 = vpop.f32.mrf.mxu0 }
 0x231   : > { %v1912_v25 = vpop.f32.mrf.mxu3  ;;  %v1744_v26 = vadd.f32 %v1743_v24, %v1575_v22  ;;  %v1576_v28 = vpop.f32.mrf.mxu1  ;;  %v1408_v30 = vadd.f32 %v3786_v21, %v1407_v27 }
 0x233   : > { %v1913_v29 = vadd.f32 %v1912_v25, %v1744_v26  ;;  %v1577_v34 = vadd.f32 %v1576_v28, %v1408_v30 }
 0x235   : > { %v1999_v31 = vadd.f32 %v1998_v8, %v1913_v29  ;;  %v2070_v32 = vmul.f32 %v1913_v29, %v1913_v29 }
 0x237   : > { %v2133_v33 = vadd.f32 %v2132_v23, %v2070_v32 }
 0x238   : > { %v1745_v35 = vpop.f32.mrf.mxu2  ;;  %v1410_v38 = vpop.f32.mrf.mxu0 }
 0x239   : > { %v1914_v36 = vpop.f32.mrf.mxu3  ;;  %v1746_v37 = vadd.f32 %v1745_v35, %v1577_v34  ;;  %v1579_v39 = vpop.f32.mrf.mxu1  ;;  %v1411_v40 = vadd.f32 %v3786_v21, %v1410_v38 }
 0x23b   : > { %v1915_v41 = vadd.f32 %v1914_v36, %v1746_v37  ;;  %v1580_v45 = vadd.f32 %v1579_v39, %v1411_v40  ;;  %v3930_v39 = vld [vmem:[%s3968_s2] ss:$0 sm:$0xff] }
 0x23d   : > { %v2000_v42 = vadd.f32 %v1999_v31, %v1915_v41  ;;  %v2071_v43 = vmul.f32 %v1915_v41, %v1915_v41  ;;  %v3326_v44 = vpack.c.bf16 %v1915_v41, %v1913_v29 }
 0x23f   : > { %v2134_v46 = vadd.f32 %v2133_v33, %v2071_v43  ;;  %3386 = vst [vmem:[%s3650_s27 + $0xc0] sm:$0xff] %v3326_v44  }
 0x240   : > { %v1748_v47 = vpop.f32.mrf.mxu2  ;;  %v1412_v50 = vpop.f32.mrf.mxu0 }
 0x241   : > { %v1917_v48 = vpop.f32.mrf.mxu3  ;;  %v1749_v49 = vadd.f32 %v1748_v47, %v1580_v45  ;;  %v1581_v51 = vpop.f32.mrf.mxu1  ;;  %v1413_v53 = vadd.f32 %v3786_v21, %v1412_v50 }
 0x243   : > { %v1918_v52 = vadd.f32 %v1917_v48, %v1749_v49  ;;  %v1582_v57 = vadd.f32 %v1581_v51, %v1413_v53 }
 0x245   : > { %v2001_v54 = vadd.f32 %v2000_v42, %v1918_v52  ;;  %v2072_v55 = vmul.f32 %v1918_v52, %v1918_v52 }
 0x247   : > { %v2135_v56 = vadd.f32 %v2134_v46, %v2072_v55 }
 0x248   : > { %v1750_v58 = vpop.f32.mrf.mxu2  ;;  %v1415_v61 = vpop.f32.mrf.mxu0 }
 0x249   : > { %v1919_v59 = vpop.f32.mrf.mxu3  ;;  %v1751_v60 = vadd.f32 %v1750_v58, %v1582_v57  ;;  %v1584_v62 = vpop.f32.mrf.mxu1  ;;  %v1416_v4 = vadd.f32 %v3786_v21, %v1415_v61 }
 0x24b   : > { %v1920_v63 = vadd.f32 %v1919_v59, %v1751_v60  ;;  %v1585_v10 = vadd.f32 %v1584_v62, %v1416_v4 }
 0x24d   : > { %v3907_v0 = vadd.f32 %v2001_v54, %v1920_v63  ;;  %v2073_v1 = vmul.f32 %v1920_v63, %v1920_v63  ;;  %v3331_v2 = vpack.c.bf16 %v1920_v63, %v1918_v52 }
 0x24f   : > { %v3909_v3 = vadd.f32 %v2135_v56, %v2073_v1  ;;  %3387 = vst [vmem:[%s3650_s27 + $0xc8] sm:$0xff] %v3331_v2  }
 0x250   : > { %v1753_v5 = vpop.f32.mrf.mxu2  ;;  %v1417_v7 = vpop.f32.mrf.mxu0 }
 0x251   : > { %v1922_v6 = vpop.f32.mrf.mxu3  ;;  %v1586_v9 = vpop.f32.mrf.mxu1  ;;  %v1418_v11 = vadd.f32 %v3786_v21, %v1417_v7  ;;  %v1754_v12 = vadd.f32 %v1753_v5, %v1585_v10 }
 0x253   : > { %v1587_v13 = vadd.f32 %v1586_v9, %v1418_v11  ;;  %v3914_v8 = vadd.f32 %v1922_v6, %v1754_v12 }
 0x258   : > { %v1755_v14 = vpop.f32.mrf.mxu2  ;;  %v1420_v17 = vpop.f32.mrf.mxu0 }
 0x259   : > { %v1924_v15 = vpop.f32.mrf.mxu3  ;;  %v1756_v16 = vadd.f32 %v1755_v14, %v1587_v13  ;;  %v1589_v18 = vpop.f32.mrf.mxu1  ;;  %v1421_v22 = vadd.f32 %v3786_v21, %v1420_v17 }
 0x25b   : > { %v3916_v19 = vadd.f32 %v1924_v15, %v1756_v16  ;;  %v1590_v27 = vadd.f32 %v1589_v18, %v1421_v22 }
 0x25d   : > { %v3336_v20 = vpack.c.bf16 %v3916_v19, %v3914_v8  ;;  %v2075_v22 = vmul.f32 %v3916_v19, %v3916_v19 }
 0x25f   : > { %3388 = vst [vmem:[%s3650_s27 + $0xd0] sm:$0xff] %v3336_v20   ;;  %v2074_v20 = vmul.f32 %v3914_v8, %v3914_v8 }
 0x260   : > { %v1758_v23 = vpop.f32.mrf.mxu2  ;;  %v1422_v25 = vpop.f32.mrf.mxu0 }
 0x261   : > { %v1927_v24 = vpop.f32.mrf.mxu3  ;;  %v1591_v26 = vpop.f32.mrf.mxu1  ;;  %v1423_v28 = vadd.f32 %v3786_v21, %v1422_v25  ;;  %v1759_v29 = vadd.f32 %v1758_v23, %v1590_v27  ;;  %v2003_v23 = vadd.f32 %v3907_v0, %v3914_v8 }
 0x263   : > { %v1592_v30 = vadd.f32 %v1591_v26, %v1423_v28  ;;  %v1928_v36 = vadd.f32 %v1927_v24, %v1759_v29  ;;  %v2137_v26 = vadd.f32 %v3909_v3, %v2074_v20 }
 0x265   : > { %v2076_v27 = vmul.f32 %v1928_v36, %v1928_v36 }
 0x268   : > { %v1760_v31 = vpop.f32.mrf.mxu2  ;;  %v1425_v34 = vpop.f32.mrf.mxu0 }
 0x269   : > { %v1929_v32 = vpop.f32.mrf.mxu3  ;;  %v1761_v33 = vadd.f32 %v1760_v31, %v1592_v30  ;;  %v1594_v35 = vpop.f32.mrf.mxu1  ;;  %v1426_v21 = vadd.f32 %v3930_v39, %v1425_v34  ;;  %v2004_v30 = vadd.f32 %v2003_v23, %v3916_v19 }
 0x26b   : > { %v3923_v37 = vadd.f32 %v1929_v32, %v1761_v33  ;;  %v1595_v44 = vadd.f32 %v1594_v35, %v1426_v21  ;;  %v2138_v33 = vadd.f32 %v2137_v26, %v2075_v22  ;;  %v2005_v35 = vadd.f32 %v2004_v30, %v1928_v36 }
 0x26d   : > { %v3341_v38 = vpack.c.bf16 %v3923_v37, %v1928_v36  ;;  %v2139_v21 = vadd.f32 %v2138_v33, %v2076_v27  ;;  %v2006_v3 = vadd.f32 %v2005_v35, %v3923_v37 }
 0x26f   : > { %3389 = vst [vmem:[%s3650_s27 + $0xd8] sm:$0xff] %v3341_v38   ;;  %v2077_v38 = vmul.f32 %v3923_v37, %v3923_v37 }
 0x270   : > { %v1763_v40 = vpop.f32.mrf.mxu2  ;;  %v1427_v42 = vpop.f32.mrf.mxu0 }
 0x271   : > { %v1932_v41 = vpop.f32.mrf.mxu3  ;;  %v1596_v43 = vpop.f32.mrf.mxu1  ;;  %v1428_v45 = vadd.f32 %v3930_v39, %v1427_v42  ;;  %v1764_v46 = vadd.f32 %v1763_v40, %v1595_v44  ;;  %v2140_v19 = vadd.f32 %v2139_v21, %v2077_v38 }
 0x273   : > { %v1597_v47 = vadd.f32 %v1596_v43, %v1428_v45  ;;  %v1933_v53 = vadd.f32 %v1932_v41, %v1764_v46 }
 0x275   : > { %v2078_v41 = vmul.f32 %v1933_v53, %v1933_v53  ;;  %v2007_v44 = vadd.f32 %v2006_v3, %v1933_v53 }
 0x278   : > { %v1765_v48 = vpop.f32.mrf.mxu2  ;;  %v1430_v51 = vpop.f32.mrf.mxu0 }
 0x279   : > { %v1934_v49 = vpop.f32.mrf.mxu3  ;;  %v1766_v50 = vadd.f32 %v1765_v48, %v1597_v47  ;;  %v1599_v52 = vpop.f32.mrf.mxu1  ;;  %v1431_v56 = vadd.f32 %v3930_v39, %v1430_v51  ;;  %v2141_v48 = vadd.f32 %v2140_v19, %v2078_v41 }
 0x27b   : > { %v1935_v54 = vadd.f32 %v1934_v49, %v1766_v50  ;;  %v1600_v61 = vadd.f32 %v1599_v52, %v1431_v56 }
 0x27d   : > { %v3346_v55 = vpack.c.bf16 %v1935_v54, %v1933_v53  ;;  %v2079_v45 = vmul.f32 %v1935_v54, %v1935_v54  ;;  %v2008_v36 = vadd.f32 %v2007_v44, %v1935_v54 }
 0x27f   : > { %3390 = vst [vmem:[%s3650_s27 + $0xe0] sm:$0xff] %v3346_v55   ;;  %v2142_v52 = vadd.f32 %v2141_v48, %v2079_v45 }
 0x280   : > { %v1768_v57 = vpop.f32.mrf.mxu2  ;;  %v1432_v59 = vpop.f32.mrf.mxu0 }
 0x281   : > { %v1937_v58 = vpop.f32.mrf.mxu3  ;;  %v1601_v60 = vpop.f32.mrf.mxu1  ;;  %v1433_v62 = vadd.f32 %v3930_v39, %v1432_v59  ;;  %v1769_v63 = vadd.f32 %v1768_v57, %v1600_v61 }
 0x283   : > { %v1602_v1 = vadd.f32 %v1601_v60, %v1433_v62  ;;  %v1938_v9 = vadd.f32 %v1937_v58, %v1769_v63 }
 0x285   : > { %v2080_v49 = vmul.f32 %v1938_v9, %v1938_v9  ;;  %v2009_v55 = vadd.f32 %v2008_v36, %v1938_v9 }
 0x287   : > { %v2143_v37 = vadd.f32 %v2142_v52, %v2080_v49 }
 0x288   : > { %v1770_v2 = vpop.f32.mrf.mxu2  ;;  %v1435_v6 = vpop.f32.mrf.mxu0 }
 0x289   : > { %v1939_v4 = vpop.f32.mrf.mxu3  ;;  %v1771_v5 = vadd.f32 %v1770_v2, %v1602_v1  ;;  %v1604_v7 = vpop.f32.mrf.mxu1  ;;  %v1436_v12 = vadd.f32 %v3930_v39, %v1435_v6 }
 0x28b   : > { %v1940_v10 = vadd.f32 %v1939_v4, %v1771_v5  ;;  %v1605_v17 = vadd.f32 %v1604_v7, %v1436_v12 }
 0x28d   : > { %v3351_v11 = vpack.c.bf16 %v1940_v10, %v1938_v9  ;;  %v2081_v56 = vmul.f32 %v1940_v10, %v1940_v10  ;;  %v2010_v58 = vadd.f32 %v2009_v55, %v1940_v10 }
 0x28f   : > { %3391 = vst [vmem:[%s3650_s27 + $0xe8] sm:$0xff] %v3351_v11   ;;  %v2144_v53 = vadd.f32 %v2143_v37, %v2081_v56 }
 0x290   : > { %v1773_v13 = vpop.f32.mrf.mxu2  ;;  %v1437_v15 = vpop.f32.mrf.mxu0 }
 0x291   : > { %v1942_v14 = vpop.f32.mrf.mxu3  ;;  %v1606_v16 = vpop.f32.mrf.mxu1  ;;  %v1438_v18 = vadd.f32 %v3930_v39, %v1437_v15  ;;  %v1774_v24 = vadd.f32 %v1773_v13, %v1605_v17 }
 0x293   : > { %v1607_v25 = vadd.f32 %v1606_v16, %v1438_v18  ;;  %v1943_v0 = vadd.f32 %v1942_v14, %v1774_v24 }
 0x295   : > { %v2082_v59 = vmul.f32 %v1943_v0, %v1943_v0  ;;  %v2011_v62 = vadd.f32 %v2010_v58, %v1943_v0 }
 0x297   : > { %v2145_v54 = vadd.f32 %v2144_v53, %v2082_v59 }
 0x298   : > { %v1775_v28 = vpop.f32.mrf.mxu2  ;;  %v1440_v32 = vpop.f32.mrf.mxu0 }
 0x299   : > { %v1944_v29 = vpop.f32.mrf.mxu3  ;;  %v1776_v31 = vadd.f32 %v1775_v28, %v1607_v25  ;;  %v1441_v34 = vadd.f32 %v3930_v39, %v1440_v32  ;;  %v1609_v40 = vpop.f32.mrf.mxu1 }
 0x29b   : > { %v1945_v8 = vadd.f32 %v1944_v29, %v1776_v31  ;;  %v1610_v43 = vadd.f32 %v1609_v40, %v1441_v34 }
 0x29d   : > { %v3356_v42 = vpack.c.bf16 %v1945_v8, %v1943_v0  ;;  %v2083_v63 = vmul.f32 %v1945_v8, %v1945_v8  ;;  %v2012_v4 = vadd.f32 %v2011_v62, %v1945_v8 }
 0x29f   : > { %3392 = vst [vmem:[%s3650_s27 + $0xf0] sm:$0xff] %v3356_v42   ;;  %v2146_v9 = vadd.f32 %v2145_v54, %v2083_v63 }
 0x2a0   : > { %v1778_v46 = vpop.f32.mrf.mxu2  ;;  %v1442_v51 = vpop.f32.mrf.mxu0 }
 0x2a1   : > { %v1947_v47 = vpop.f32.mrf.mxu3  ;;  %v1779_v50 = vadd.f32 %v1778_v46, %v1610_v43  ;;  %v1443_v57 = vadd.f32 %v3930_v39, %v1442_v51  ;;  %v1611_v61 = vpop.f32.mrf.mxu1 }
 0x2a3   : > { %v1948_v60 = vadd.f32 %v1947_v47, %v1779_v50  ;;  %v1612_v1 = vadd.f32 %v1611_v61, %v1443_v57 }
 0x2a5   : > { %v2084_v5 = vmul.f32 %v1948_v60, %v1948_v60  ;;  %v2013_v39 = vadd.f32 %v2012_v4, %v1948_v60 }
 0x2a7   : > { %v2147_v10 = vadd.f32 %v2146_v9, %v2084_v5 }
 0x2a8   : > { %v1780_v2 = vpop.f32.mrf.mxu2 }
 0x2a9   : > { %v1781_v6 = vadd.f32 %v1780_v2, %v1612_v1  ;;  %v1949_v7 = vpop.f32.mrf.mxu3 }
 0x2ab   : > { %v1950_v11 = vadd.f32 %v1949_v7, %v1781_v6 }
 0x2ad   : > { %v2014_v12 = vadd.f32 %v2013_v39, %v1950_v11  ;;  %v2085_v13 = vmul.f32 %v1950_v11, %v1950_v11  ;;  %v3361_v14 = vpack.c.bf16 %v1950_v11, %v1948_v60 }
 0x2af   : > { %v2015_v15 = vrot.slane %v2014_v12, 4  ;;  %v2148_v16 = vadd.f32 %v2147_v10, %v2085_v13  ;;  %3393 = vst [vmem:[%s3650_s27 + $0xf8] sm:$0xff] %v3361_v14  }
 0x2b1   : > { %v2016_v17 = vadd.f32 %v2015_v15, %v2014_v12  ;;  %v2149_v18 = vrot.slane %v2148_v16, 4 }
 0x2b3   : > { %v2017_v20 = vrot.slane %v2016_v17, 2  ;;  %v2150_v22 = vadd.f32 %v2149_v18, %v2148_v16 }
 0x2b5   : > { %v2018_v23 = vadd.f32 %v2017_v20, %v2016_v17  ;;  %v2151_v24 = vrot.slane %v2150_v22, 2 }
 0x2b7   : > { %v2019_v25 = vrot.slane %v2018_v23, 1  ;;  %v2152_v26 = vadd.f32 %v2151_v24, %v2150_v22 }
 0x2b9   : > { %v2020_v27 = vadd.f32 %v2019_v25, %v2018_v23  ;;  %v2153_v28 = vrot.slane %v2152_v26, 1 }
 0x2bb   : > { %2021 = vst [vmem:[%s244_s8] sm:$0x1] %v2020_v27  ;;  %v2154_v29 = vadd.f32 %v2153_v28, %v2152_v26 }
 0x2bd   : > { %2155 = vst [vmem:[%s247_s11] sm:$0x1] %v2154_v29 }
 0x2be PF: > { %s16_s18 = sadd.s32 1, %s3411_s18  }
 0x2bf   : > { %p13_p5 = scmp.ge.s32.totalorder %s16_s18, 6  }
 0x2c1   :  { %15 = sbr.rel (!%p13_p5) target bundleno = 1 (0x1), region = 86 }

// kernel: forward.15
= control target key start
LH: loop header
LB: loop body
LE: loop exit
PB: predicated region body
PF: predicated region fallthrough
CT: control target
= control target key end

     0   :  { %s1439_s18 = smov 0   ;;  %s1760_s0 = inlined_call_operand.vmem [shape: bf16[512,256], index: 0, kind: input, shape index: {}]   ;;  %s1761_s1 = inlined_call_operand.vmem [shape: bf16[256,128], index: 1, kind: input, shape index: {}]   ;;  %s1762_s2 = inlined_call_operand.vmem [shape: f32[1,128], index: 2, kind: input, shape index: {}]   ;;  %s1763_s3 = inlined_call_operand.vmem [shape: bf16[512,128], index: 3, kind: output, shape index: {0}]   ;;  %s1764_s4 = inlined_call_operand.vmem [shape: f32[2,1,128], index: 4, kind: output, shape index: {1}]   ;;  %s1765_s5 = inlined_call_operand.vmem [shape: f32[2,1,128], index: 5, kind: output, shape index: {2}]  }
   0x1 LB: > { %s1445_s19 = sadd.s32 4294967295, %s1407_s18   ;;  %p1032_p0 = scmp.ge.s32.totalorder %s1407_s18, 1  ;;  %s1407_s18 = sphi %s1439_s18, %s16_s18  }
   0x2   : > { %p194_p1 = scmp.lt.s32.totalorder %s1407_s18, 3 }
   0x4   : > { %p195_p2 = pnand %p1032_p0, %p194_p1 }
   0x5   : > { %s1033_s7 = sshll.u32 (!%p195_p2), %s1445_s19, 5  ;;  %p242_p4 = scmp.lt.s32.totalorder (!%p195_p2), %s1445_s19, 1 }
   0x6   : > { %198 = sbr.rel (%p195_p2) target bundleno = 342 (0x156), region = 32  ;;  %p230_p3 = scmp.lt.s32.totalorder (!%p195_p2), %s1033_s7, 63 }
   0xb   : > { %v1272_v0 = vld [vmem:[%s1761_s1 + $0x38] sm:$0xff]  ;;  %v1271_v2 = vld [vmem:[%s1761_s1 + $0x30] sm:$0xff]  ;;  %v1270_v4 = vld [vmem:[%s1761_s1 + $0x28] sm:$0xff]  ;;  %s1767_s7 = smov (!%p230_p3, %s1033_s7), 63  ;;  %s1769_s19 = smov (!%p242_p4, %s1445_s19), 1 }
   0xc   : > { %v1280_v1 = vld [vmem:[%s1761_s1 + $0x78] sm:$0xff]  ;;  %572 = vmatpush.bf16.msra.mxu0 %v1272_v0  ;;  %v1279_v3 = vld [vmem:[%s1761_s1 + $0x70] sm:$0xff]  ;;  %1376 = vmatpush.bf16.msra.mxu2 %v1272_v0  ;;  %v1278_v5 = vld [vmem:[%s1761_s1 + $0x68] sm:$0xff]  ;;  %s1232_s22 = sshll.u32 %s1767_s7, 3  ;;  %s1037_s12 = sshll.u32 %s1767_s7, 2 }
   0xd   : > { %661 = vmatpush.bf16.msra.mxu1 %v1280_v1  ;;  %1384 = vmatpush.bf16.msra.mxu3 %v1280_v1  ;;  %v1269_v6 = vld [vmem:[%s1761_s1 + $0x20] sm:$0xff]  ;;  %v1268_v8 = vld [vmem:[%s1761_s1 + $0x18] sm:$0xff]  ;;  %v1267_v10 = vld [vmem:[%s1761_s1 + $0x10] sm:$0xff]  ;;  %s1498_s29 = scalar_lea.vmem %s1760_s0, %s1232_s22  ;;  %s1581_s15 = scalar_lea.vmem %s1763_s3, %s1037_s12 }
   0xe   : > { %v1277_v7 = vld [vmem:[%s1761_s1 + $0x60] sm:$0xff]  ;;  %v1276_v9 = vld [vmem:[%s1761_s1 + $0x58] sm:$0xff]  ;;  %v1275_v11 = vld [vmem:[%s1761_s1 + $0x50] sm:$0xff]  ;;  %s244_s17 = scalar_lea.vmem %s1764_s4, %s1769_s19  ;;  %s247_s22 = scalar_lea.vmem %s1765_s5, %s1769_s19 }
   0xf   : > { %v1266_v12 = vld [vmem:[%s1761_s1 + $0x8] sm:$0xff]  ;;  %v1265_v14 = vld [vmem:[%s1761_s1] sm:$0xff]  ;;  %v1048_v28 = vld [vmem:[%s1498_s29 + $0x10] sm:$0xf] }
  0x10   : > { %573 = vmatpush.bf16.msra.mxu0 %v1271_v2  ;;  %1377 = vmatpush.bf16.msra.mxu2 %v1271_v2  ;;  %v1274_v13 = vld [vmem:[%s1761_s1 + $0x48] sm:$0xff]  ;;  %v1273_v15 = vld [vmem:[%s1761_s1 + $0x40] sm:$0xff]  ;;  %v1236_v29 = vld [vmem:[%s1498_s29 + $0x14] sm:$0xf0] }
  0x11   : > { %662 = vmatpush.bf16.msra.mxu1 %v1279_v3  ;;  %1385 = vmatpush.bf16.msra.mxu3 %v1279_v3  ;;  %v1040_v16 = vld [vmem:[%s1498_s29] sm:$0xf]  ;;  %v1234_v17 = vld [vmem:[%s1498_s29 + $0x4] sm:$0xf0]  ;;  %v1233_v18 = vld [vmem:[%s1498_s29 + $0x4] sm:$0xf]  ;;  %v1049_v36 = vor.u32 %v1236_v29, %v1048_v28 }
  0x12   : > { %v1042_v19 = vld [vmem:[%s1498_s29 + $0x8] sm:$0xf0]  ;;  %v1104_v20 = vld [vmem:[%s1498_s29 + $0x80] sm:$0xf]  ;;  %v1250_v21 = vld [vmem:[%s1498_s29 + $0x84] sm:$0xf0]  ;;  %v1041_v24 = vor.u32 %v1234_v17, %v1040_v16 }
  0x13   : > { %v1249_v22 = vld [vmem:[%s1498_s29 + $0x84] sm:$0xf]  ;;  %v1106_v23 = vld [vmem:[%s1498_s29 + $0x88] sm:$0xf0]  ;;  %v1045_v25 = vor.u32 %v1233_v18, %v1042_v19  ;;  %v1105_v26 = vor.u32 %v1250_v21, %v1104_v20  ;;  %v1235_v30 = vld [vmem:[%s1498_s29 + $0x14] sm:$0xf] }
  0x14   : > { %574 = vmatpush.bf16.msra.mxu0 %v1270_v4  ;;  %1378 = vmatpush.bf16.msra.mxu2 %v1270_v4  ;;  %v1109_v27 = vor.u32 %v1249_v22, %v1106_v23  ;;  %v1050_v31 = vld [vmem:[%s1498_s29 + $0x18] sm:$0xf0]  ;;  %v1112_v32 = vld [vmem:[%s1498_s29 + $0x90] sm:$0xf]  ;;  %v1252_v33 = vld [vmem:[%s1498_s29 + $0x94] sm:$0xf0] }
  0x15   : > { %663 = vmatpush.bf16.msra.mxu1 %v1278_v5  ;;  %1386 = vmatpush.bf16.msra.mxu3 %v1278_v5  ;;  %v1251_v34 = vld [vmem:[%s1498_s29 + $0x94] sm:$0xf]  ;;  %v1114_v35 = vld [vmem:[%s1498_s29 + $0x98] sm:$0xf0]  ;;  %v1053_v37 = vor.u32 %v1235_v30, %v1050_v31  ;;  %v1113_v38 = vor.u32 %v1252_v33, %v1112_v32  ;;  %v1056_v40 = vld [vmem:[%s1498_s29 + $0x20] sm:$0xf] }
  0x16   : > { %v1117_v39 = vor.u32 %v1251_v34, %v1114_v35  ;;  %v1238_v41 = vld [vmem:[%s1498_s29 + $0x24] sm:$0xf0]  ;;  %v1237_v42 = vld [vmem:[%s1498_s29 + $0x24] sm:$0xf]  ;;  %v1058_v43 = vld [vmem:[%s1498_s29 + $0x28] sm:$0xf0] }
  0x17   : > { %v1120_v44 = vld [vmem:[%s1498_s29 + $0xa0] sm:$0xf]  ;;  %v1254_v45 = vld [vmem:[%s1498_s29 + $0xa4] sm:$0xf0]  ;;  %v1253_v46 = vld [vmem:[%s1498_s29 + $0xa4] sm:$0xf]  ;;  %v1057_v48 = vor.u32 %v1238_v41, %v1056_v40  ;;  %v1061_v49 = vor.u32 %v1237_v42, %v1058_v43 }
  0x18   : > { %575 = vmatpush.bf16.msra.mxu0 %v1269_v6  ;;  %1379 = vmatpush.bf16.msra.mxu2 %v1269_v6  ;;  %v1122_v47 = vld [vmem:[%s1498_s29 + $0xa8] sm:$0xf0]  ;;  %v1121_v50 = vor.u32 %v1254_v45, %v1120_v44  ;;  %v1064_v52 = vld [vmem:[%s1498_s29 + $0x30] sm:$0xf]  ;;  %v1240_v53 = vld [vmem:[%s1498_s29 + $0x34] sm:$0xf0] }
  0x19   : > { %664 = vmatpush.bf16.msra.mxu1 %v1277_v7  ;;  %1387 = vmatpush.bf16.msra.mxu3 %v1277_v7  ;;  %v1125_v51 = vor.u32 %v1253_v46, %v1122_v47  ;;  %v1239_v54 = vld [vmem:[%s1498_s29 + $0x34] sm:$0xf]  ;;  %v1066_v55 = vld [vmem:[%s1498_s29 + $0x38] sm:$0xf0]  ;;  %v1128_v56 = vld [vmem:[%s1498_s29 + $0xb0] sm:$0xf]  ;;  %v1065_v60 = vor.u32 %v1240_v53, %v1064_v52 }
  0x1a   : > { %v1256_v57 = vld [vmem:[%s1498_s29 + $0xb4] sm:$0xf0]  ;;  %v1255_v58 = vld [vmem:[%s1498_s29 + $0xb4] sm:$0xf]  ;;  %v1130_v59 = vld [vmem:[%s1498_s29 + $0xb8] sm:$0xf0]  ;;  %v1069_v61 = vor.u32 %v1239_v54, %v1066_v55 }
  0x1b   : > { %v1129_v62 = vor.u32 %v1256_v57, %v1128_v56  ;;  %v1133_v63 = vor.u32 %v1255_v58, %v1130_v59  ;;  %v1072_v0 = vld [vmem:[%s1498_s29 + $0x40] sm:$0xf]  ;;  %v1242_v1 = vld [vmem:[%s1498_s29 + $0x44] sm:$0xf0]  ;;  %v1241_v2 = vld [vmem:[%s1498_s29 + $0x44] sm:$0xf] }
  0x1c   : > { %576 = vmatpush.bf16.msra.mxu0 %v1268_v8  ;;  %1380 = vmatpush.bf16.msra.mxu2 %v1268_v8  ;;  %v1074_v3 = vld [vmem:[%s1498_s29 + $0x48] sm:$0xf0]  ;;  %v1136_v4 = vld [vmem:[%s1498_s29 + $0xc0] sm:$0xf]  ;;  %v1258_v5 = vld [vmem:[%s1498_s29 + $0xc4] sm:$0xf0]  ;;  %v1073_v8 = vor.u32 %v1242_v1, %v1072_v0 }
  0x1d   : > { %665 = vmatpush.bf16.msra.mxu1 %v1276_v9  ;;  %1388 = vmatpush.bf16.msra.mxu3 %v1276_v9  ;;  %v1257_v6 = vld [vmem:[%s1498_s29 + $0xc4] sm:$0xf]  ;;  %v1138_v7 = vld [vmem:[%s1498_s29 + $0xc8] sm:$0xf0]  ;;  %v1077_v9 = vor.u32 %v1241_v2, %v1074_v3  ;;  %v1144_v16 = vld [vmem:[%s1498_s29 + $0xd0] sm:$0xf] }
  0x1e   : > { %v1260_v17 = vld [vmem:[%s1498_s29 + $0xd4] sm:$0xf0]  ;;  %v1259_v18 = vld [vmem:[%s1498_s29 + $0xd4] sm:$0xf]  ;;  %v1146_v19 = vld [vmem:[%s1498_s29 + $0xd8] sm:$0xf0] }
  0x1f   : > { %v1145_v22 = vor.u32 %v1260_v17, %v1144_v16  ;;  %v1149_v23 = vor.u32 %v1259_v18, %v1146_v19  ;;  %v1152_v28 = vld [vmem:[%s1498_s29 + $0xe0] sm:$0xf]  ;;  %v1262_v29 = vld [vmem:[%s1498_s29 + $0xe4] sm:$0xf0]  ;;  %v1261_v30 = vld [vmem:[%s1498_s29 + $0xe4] sm:$0xf] }
  0x20   : > { %577 = vmatpush.bf16.msra.mxu0 %v1267_v10  ;;  %1381 = vmatpush.bf16.msra.mxu2 %v1267_v10  ;;  %v1137_v10 = vor.u32 %v1258_v5, %v1136_v4  ;;  %v1154_v31 = vld [vmem:[%s1498_s29 + $0xe8] sm:$0xf0]  ;;  %v1153_v34 = vor.u32 %v1262_v29, %v1152_v28  ;;  %v1160_v40 = vld [vmem:[%s1498_s29 + $0xf0] sm:$0xf]  ;;  %v1264_v41 = vld [vmem:[%s1498_s29 + $0xf4] sm:$0xf0] }
  0x21   : > { %666 = vmatpush.bf16.msra.mxu1 %v1275_v11  ;;  %1389 = vmatpush.bf16.msra.mxu3 %v1275_v11  ;;  %v1141_v11 = vor.u32 %v1257_v6, %v1138_v7  ;;  %v1157_v35 = vor.u32 %v1261_v30, %v1154_v31  ;;  %v1263_v42 = vld [vmem:[%s1498_s29 + $0xf4] sm:$0xf]  ;;  %v1162_v43 = vld [vmem:[%s1498_s29 + $0xf8] sm:$0xf0]  ;;  %v1161_v46 = vor.u32 %v1264_v41, %v1160_v40 }
  0x22   : > { %v1165_v47 = vor.u32 %v1263_v42, %v1162_v43 }
  0x24   : > { %578 = vmatpush.bf16.msra.mxu0 %v1266_v12  ;;  %1382 = vmatpush.bf16.msra.mxu2 %v1266_v12  ;;  %v1080_v12 = vld [vmem:[%s1498_s29 + $0x50] sm:$0xf] }
  0x25   : > { %667 = vmatpush.bf16.msra.mxu1 %v1274_v13  ;;  %1390 = vmatpush.bf16.msra.mxu3 %v1274_v13  ;;  %v1244_v13 = vld [vmem:[%s1498_s29 + $0x54] sm:$0xf0] }
  0x26   : > { %v1081_v20 = vor.u32 %v1244_v13, %v1080_v12 }
  0x28   : > { %579 = vmatpush.bf16.msra.mxu0 %v1265_v14  ;;  %1383 = vmatpush.bf16.msra.mxu2 %v1265_v14  ;;  %v1243_v14 = vld [vmem:[%s1498_s29 + $0x54] sm:$0xf] }
  0x29   : > { %668 = vmatpush.bf16.msra.mxu1 %v1273_v15  ;;  %1391 = vmatpush.bf16.msra.mxu3 %v1273_v15  ;;  %v1082_v15 = vld [vmem:[%s1498_s29 + $0x58] sm:$0xf0] }
  0x2a   : > { %v1085_v21 = vor.u32 %v1243_v14, %v1082_v15 }
  0x2b   : > { %580 = vmatmul.bf16.vlgmr.msra.gmra.mxu0 %v1041_v24  ;;  %620 = vmatmul.bf16.vlgmr.msra.gmra.mxu2 %v1105_v26  ;;  %v1088_v24 = vld [vmem:[%s1498_s29 + $0x60] sm:$0xf]  ;;  %v1245_v26 = vld [vmem:[%s1498_s29 + $0x64] sm:$0xf] }
  0x2c   : > { %669 = vmatmul.bf16.vlgmr.msra.gmra.mxu1 %v1045_v25  ;;  %709 = vmatmul.bf16.vlgmr.msra.gmra.mxu3 %v1109_v27  ;;  %v1246_v25 = vld [vmem:[%s1498_s29 + $0x64] sm:$0xf0]  ;;  %v1090_v27 = vld [vmem:[%s1498_s29 + $0x68] sm:$0xf0] }
  0x2d   : > { %v1089_v32 = vor.u32 %v1246_v25, %v1088_v24  ;;  %v1093_v33 = vor.u32 %v1245_v26, %v1090_v27 }
  0x3b   : > { %585 = vmatmul.bf16.gmra.mxu0 %v1049_v36  ;;  %625 = vmatmul.bf16.gmra.mxu2 %v1113_v38  ;;  %v1096_v36 = vld [vmem:[%s1498_s29 + $0x70] sm:$0xf]  ;;  %v1247_v38 = vld [vmem:[%s1498_s29 + $0x74] sm:$0xf] }
  0x3c   : > { %674 = vmatmul.bf16.gmra.mxu1 %v1053_v37  ;;  %714 = vmatmul.bf16.gmra.mxu3 %v1117_v39  ;;  %v1248_v37 = vld [vmem:[%s1498_s29 + $0x74] sm:$0xf0]  ;;  %v1098_v39 = vld [vmem:[%s1498_s29 + $0x78] sm:$0xf0] }
  0x3d   : > { %v1097_v44 = vor.u32 %v1248_v37, %v1096_v36  ;;  %v1101_v45 = vor.u32 %v1247_v38, %v1098_v39 }
  0x4b   : > { %590 = vmatmul.bf16.gmra.mxu0 %v1057_v48  ;;  %630 = vmatmul.bf16.gmra.mxu2 %v1121_v50  ;;  %v1573_v50 = vld [vmem:[%s1762_s2] ss:$0 sm:$0xff] }
  0x4c   : > { %679 = vmatmul.bf16.gmra.mxu1 %v1061_v49  ;;  %719 = vmatmul.bf16.gmra.mxu3 %v1125_v51 }
  0x5b   : > { %595 = vmatmul.bf16.gmra.mxu0 %v1065_v60  ;;  %635 = vmatmul.bf16.gmra.mxu2 %v1129_v62 }
  0x5c   : > { %684 = vmatmul.bf16.gmra.mxu1 %v1069_v61  ;;  %724 = vmatmul.bf16.gmra.mxu3 %v1133_v63 }
  0x6b   : > { %600 = vmatmul.bf16.gmra.mxu0 %v1073_v8  ;;  %640 = vmatmul.bf16.gmra.mxu2 %v1137_v10 }
  0x6c   : > { %689 = vmatmul.bf16.gmra.mxu1 %v1077_v9  ;;  %729 = vmatmul.bf16.gmra.mxu3 %v1141_v11 }
  0x7b   : > { %605 = vmatmul.bf16.gmra.mxu0 %v1081_v20  ;;  %645 = vmatmul.bf16.gmra.mxu2 %v1145_v22 }
  0x7c   : > { %694 = vmatmul.bf16.gmra.mxu1 %v1085_v21  ;;  %734 = vmatmul.bf16.gmra.mxu3 %v1149_v23 }
  0x8b   : > { %610 = vmatmul.bf16.gmra.mxu0 %v1089_v32  ;;  %650 = vmatmul.bf16.gmra.mxu2 %v1153_v34 }
  0x8c   : > { %699 = vmatmul.bf16.gmra.mxu1 %v1093_v33  ;;  %739 = vmatmul.bf16.gmra.mxu3 %v1157_v35 }
  0x9b   : > { %615 = vmatmul.bf16.gmra.mxu0 %v1097_v44  ;;  %655 = vmatmul.bf16.gmra.mxu2 %v1161_v46 }
  0x9c   : > { %704 = vmatmul.bf16.gmra.mxu1 %v1101_v45  ;;  %744 = vmatmul.bf16.gmra.mxu3 %v1165_v47 }
  0xa8   : > { %v581_v48 = vpop.f32.mrf.mxu0 }
  0xa9   : > { %v670_v49 = vpop.f32.mrf.mxu1  ;;  %v582_v51 = vadd.f32 %v1573_v50, %v581_v48 }
  0xab   : > { %v671_v56 = vadd.f32 %v670_v49, %v582_v51 }
  0xad   : > { %v788_v60 = vmul.f32 %v671_v56, %v671_v56 }
  0xae   : > { %v621_v52 = vpop.f32.mrf.mxu2 }
  0xaf   : > { %v710_v53 = vpop.f32.mrf.mxu3  ;;  %v622_v59 = vadd.f32 %v1573_v50, %v621_v52 }
  0xb0   : > { %v583_v54 = vpop.f32.mrf.mxu0 }
  0xb1   : > { %v672_v55 = vpop.f32.mrf.mxu1  ;;  %v584_v57 = vadd.f32 %v1573_v50, %v583_v54  ;;  %v1585_v5 = vadd.f32 %v710_v53, %v622_v59 }
  0xb3   : > { %v673_v58 = vadd.f32 %v672_v55, %v584_v57 }
  0xb5   : > { %v750_v61 = vadd.f32 %v673_v58, %v671_v56  ;;  %v789_v62 = vmul.f32 %v673_v58, %v673_v58  ;;  %v1284_v63 = vpack.c.bf16 %v673_v58, %v671_v56 }
  0xb6   : > { %v623_v1 = vpop.f32.mrf.mxu2 }
  0xb7   : > { %v820_v0 = vadd.f32 %v789_v62, %v788_v60  ;;  %1285 = vst [vmem:[%s1581_s15] sm:$0xff] %v1284_v63   ;;  %v712_v2 = vpop.f32.mrf.mxu3  ;;  %v624_v6 = vadd.f32 %v1573_v50, %v623_v1 }
  0xb8   : > { %v586_v3 = vpop.f32.mrf.mxu0 }
  0xb9   : > { %v675_v4 = vpop.f32.mrf.mxu1  ;;  %v587_v7 = vadd.f32 %v1573_v50, %v586_v3  ;;  %v1589_v8 = vadd.f32 %v712_v2, %v624_v6 }
  0xbb   : > { %v676_v9 = vadd.f32 %v675_v4, %v587_v7  ;;  %v1324_v10 = vpack.c.bf16 %v1589_v8, %v1585_v5 }
  0xbd   : > { %v751_v11 = vadd.f32 %v750_v61, %v676_v9  ;;  %v790_v12 = vmul.f32 %v676_v9, %v676_v9  ;;  %1368 = vst [vmem:[%s1581_s15 + $0x40] sm:$0xff] %v1324_v10  }
  0xbe   : > { %v626_v14 = vpop.f32.mrf.mxu2 }
  0xbf   : > { %v821_v13 = vadd.f32 %v820_v0, %v790_v12  ;;  %v715_v15 = vpop.f32.mrf.mxu3  ;;  %v627_v20 = vadd.f32 %v1573_v50, %v626_v14 }
  0xc0   : > { %v588_v16 = vpop.f32.mrf.mxu0 }
  0xc1   : > { %v677_v17 = vpop.f32.mrf.mxu1  ;;  %v589_v18 = vadd.f32 %v1573_v50, %v588_v16  ;;  %v1601_v29 = vadd.f32 %v715_v15, %v627_v20 }
  0xc3   : > { %v678_v19 = vadd.f32 %v677_v17, %v589_v18 }
  0xc5   : > { %v1596_v21 = vadd.f32 %v751_v11, %v678_v19  ;;  %v791_v22 = vmul.f32 %v678_v19, %v678_v19  ;;  %v1289_v23 = vpack.c.bf16 %v678_v19, %v676_v9 }
  0xc6   : > { %v628_v25 = vpop.f32.mrf.mxu2 }
  0xc7   : > { %v1598_v24 = vadd.f32 %v821_v13, %v791_v22  ;;  %1361 = vst [vmem:[%s1581_s15 + $0x8] sm:$0xff] %v1289_v23   ;;  %v717_v26 = vpop.f32.mrf.mxu3  ;;  %v629_v30 = vadd.f32 %v1573_v50, %v628_v25 }
  0xc8   : > { %v591_v27 = vpop.f32.mrf.mxu0 }
  0xc9   : > { %v680_v28 = vpop.f32.mrf.mxu1  ;;  %v1604_v31 = vadd.f32 %v717_v26, %v629_v30  ;;  %v592_v33 = vadd.f32 %v1573_v50, %v591_v27 }
  0xcb   : > { %v1329_v32 = vpack.c.bf16 %v1604_v31, %v1601_v29  ;;  %v1611_v39 = vadd.f32 %v680_v28, %v592_v33 }
  0xcd   : > { %1369 = vst [vmem:[%s1581_s15 + $0x48] sm:$0xff] %v1329_v32  }
  0xce   : > { %v631_v34 = vpop.f32.mrf.mxu2 }
  0xcf   : > { %v720_v35 = vpop.f32.mrf.mxu3  ;;  %v632_v41 = vadd.f32 %v1573_v50, %v631_v34 }
  0xd0   : > { %v593_v36 = vpop.f32.mrf.mxu0 }
  0xd1   : > { %v682_v37 = vpop.f32.mrf.mxu1  ;;  %v594_v38 = vadd.f32 %v1573_v50, %v593_v36  ;;  %v1619_v47 = vadd.f32 %v720_v35, %v632_v41 }
  0xd3   : > { %v1613_v40 = vadd.f32 %v682_v37, %v594_v38 }
  0xd5   : > { %v1294_v42 = vpack.c.bf16 %v1613_v40, %v1611_v39 }
  0xd6   : > { %v633_v43 = vpop.f32.mrf.mxu2 }
  0xd7   : > { %1362 = vst [vmem:[%s1581_s15 + $0x10] sm:$0xff] %v1294_v42   ;;  %v722_v44 = vpop.f32.mrf.mxu3  ;;  %v634_v48 = vadd.f32 %v1573_v50, %v633_v43 }
  0xd8   : > { %v596_v45 = vpop.f32.mrf.mxu0 }
  0xd9   : > { %v685_v46 = vpop.f32.mrf.mxu1  ;;  %v1622_v49 = vadd.f32 %v722_v44, %v634_v48  ;;  %v597_v52 = vadd.f32 %v1573_v50, %v596_v45 }
  0xdb   : > { %v1334_v51 = vpack.c.bf16 %v1622_v49, %v1619_v47  ;;  %v1629_v58 = vadd.f32 %v685_v46, %v597_v52  ;;  %v792_v52 = vmul.f32 %v1611_v39, %v1611_v39 }
  0xdd   : > { %1370 = vst [vmem:[%s1581_s15 + $0x50] sm:$0xff] %v1334_v51  }
  0xde   : > { %v636_v53 = vpop.f32.mrf.mxu2 }
  0xdf   : > { %v725_v54 = vpop.f32.mrf.mxu3  ;;  %v637_v60 = vadd.f32 %v1573_v50, %v636_v53 }
  0xe0   : > { %v598_v55 = vpop.f32.mrf.mxu0 }
  0xe1   : > { %v687_v56 = vpop.f32.mrf.mxu1  ;;  %v599_v57 = vadd.f32 %v1573_v50, %v598_v55  ;;  %v1637_v2 = vadd.f32 %v725_v54, %v637_v60  ;;  %v793_v54 = vmul.f32 %v1613_v40, %v1613_v40  ;;  %v753_v55 = vadd.f32 %v1596_v21, %v1611_v39 }
  0xe3   : > { %v1631_v59 = vadd.f32 %v687_v56, %v599_v57 }
  0xe5   : > { %v1299_v61 = vpack.c.bf16 %v1631_v59, %v1629_v58  ;;  %v795_v21 = vmul.f32 %v1631_v59, %v1631_v59 }
  0xe6   : > { %v638_v62 = vpop.f32.mrf.mxu2 }
  0xe7   : > { %1363 = vst [vmem:[%s1581_s15 + $0x18] sm:$0xff] %v1299_v61   ;;  %v727_v63 = vpop.f32.mrf.mxu3  ;;  %v639_v3 = vadd.f32 %v1573_v50, %v638_v62  ;;  %v823_v61 = vadd.f32 %v1598_v24, %v792_v52 }
  0xe8   : > { %v601_v0 = vpop.f32.mrf.mxu0 }
  0xe9   : > { %v690_v1 = vpop.f32.mrf.mxu1  ;;  %v1640_v4 = vadd.f32 %v727_v63, %v639_v3  ;;  %v602_v7 = vadd.f32 %v1573_v50, %v601_v0  ;;  %v754_v0 = vadd.f32 %v753_v55, %v1613_v40 }
  0xeb   : > { %v1339_v6 = vpack.c.bf16 %v1640_v4, %v1637_v2  ;;  %v691_v14 = vadd.f32 %v690_v1, %v602_v7  ;;  %v794_v1 = vmul.f32 %v1629_v58, %v1629_v58  ;;  %v755_v7 = vadd.f32 %v754_v0, %v1629_v58 }
  0xed   : > { %1371 = vst [vmem:[%s1581_s15 + $0x58] sm:$0xff] %v1339_v6   ;;  %v824_v6 = vadd.f32 %v823_v61, %v793_v54  ;;  %v796_v40 = vmul.f32 %v691_v14, %v691_v14 }
  0xee   : > { %v641_v9 = vpop.f32.mrf.mxu2 }
  0xef   : > { %v730_v10 = vpop.f32.mrf.mxu3  ;;  %v642_v16 = vadd.f32 %v1573_v50, %v641_v9 }
  0xf0   : > { %v603_v11 = vpop.f32.mrf.mxu0 }
  0xf1   : > { %v692_v12 = vpop.f32.mrf.mxu1  ;;  %v604_v13 = vadd.f32 %v1573_v50, %v603_v11  ;;  %v1652_v23 = vadd.f32 %v730_v10, %v642_v16  ;;  %v825_v10 = vadd.f32 %v824_v6, %v794_v1  ;;  %v756_v11 = vadd.f32 %v755_v7, %v1631_v59 }
  0xf2   : > { %v804_v6 = vmul.f32 %v1585_v5, %v1585_v5 }
  0xf3   : > { %v1647_v15 = vadd.f32 %v692_v12, %v604_v13  ;;  %v826_v13 = vadd.f32 %v825_v10, %v795_v21  ;;  %v757_v16 = vadd.f32 %v756_v11, %v691_v14  ;;  %v805_v11 = vmul.f32 %v1589_v8, %v1589_v8 }
  0xf5   : > { %v1304_v17 = vpack.c.bf16 %v1647_v15, %v691_v14  ;;  %v758_v59 = vadd.f32 %v757_v16, %v1647_v15  ;;  %v806_v16 = vmul.f32 %v1601_v29, %v1601_v29 }
  0xf6   : > { %v643_v18 = vpop.f32.mrf.mxu2 }
  0xf7   : > { %1364 = vst [vmem:[%s1581_s15 + $0x20] sm:$0xff] %v1304_v17   ;;  %v732_v19 = vpop.f32.mrf.mxu3  ;;  %v644_v25 = vadd.f32 %v1573_v50, %v643_v18  ;;  %v797_v17 = vmul.f32 %v1647_v15, %v1647_v15 }
  0xf8   : > { %v606_v20 = vpop.f32.mrf.mxu0 }
  0xf9   : > { %v695_v22 = vpop.f32.mrf.mxu1  ;;  %v1655_v26 = vadd.f32 %v732_v19, %v644_v25  ;;  %v607_v28 = vadd.f32 %v1573_v50, %v606_v20 }
  0xfb   : > { %v1344_v27 = vpack.c.bf16 %v1655_v26, %v1652_v23  ;;  %v696_v36 = vadd.f32 %v695_v22, %v607_v28 }
  0xfd   : > { %1372 = vst [vmem:[%s1581_s15 + $0x60] sm:$0xff] %v1344_v27   ;;  %v827_v27 = vadd.f32 %v826_v13, %v796_v40  ;;  %v798_v28 = vmul.f32 %v696_v36, %v696_v36 }
  0xfe   : > { %v646_v30 = vpop.f32.mrf.mxu2 }
  0xff   : > { %v735_v32 = vpop.f32.mrf.mxu3  ;;  %v647_v38 = vadd.f32 %v1573_v50, %v646_v30 }
 0x100   : > { %v608_v33 = vpop.f32.mrf.mxu0 }
 0x101   : > { %v697_v34 = vpop.f32.mrf.mxu1  ;;  %v609_v35 = vadd.f32 %v1573_v50, %v608_v33  ;;  %v1664_v46 = vadd.f32 %v735_v32, %v647_v38  ;;  %v828_v32 = vadd.f32 %v827_v27, %v797_v17  ;;  %v759_v33 = vadd.f32 %v758_v59, %v696_v36 }
 0x102   : > { %v809_v27 = vmul.f32 %v1622_v49, %v1622_v49 }
 0x103   : > { %v698_v37 = vadd.f32 %v697_v34, %v609_v35  ;;  %v829_v38 = vadd.f32 %v828_v32, %v798_v28  ;;  %v810_v28 = vmul.f32 %v1637_v2, %v1637_v2  ;;  %v811_v32 = vmul.f32 %v1640_v4, %v1640_v4 }
 0x105   : > { %v1309_v41 = vpack.c.bf16 %v698_v37, %v696_v36  ;;  %v799_v34 = vmul.f32 %v698_v37, %v698_v37 }
 0x106   : > { %v648_v42 = vpop.f32.mrf.mxu2 }
 0x107   : > { %1365 = vst [vmem:[%s1581_s15 + $0x28] sm:$0xff] %v1309_v41   ;;  %v737_v43 = vpop.f32.mrf.mxu3  ;;  %v649_v48 = vadd.f32 %v1573_v50, %v648_v42  ;;  %v760_v41 = vadd.f32 %v759_v33, %v698_v37 }
 0x108   : > { %v611_v44 = vpop.f32.mrf.mxu0 }
 0x109   : > { %v700_v45 = vpop.f32.mrf.mxu1  ;;  %v1667_v51 = vadd.f32 %v737_v43, %v649_v48  ;;  %v612_v56 = vadd.f32 %v1573_v50, %v611_v44  ;;  %v830_v44 = vadd.f32 %v829_v38, %v799_v34 }
 0x10b   : > { %v1349_v53 = vpack.c.bf16 %v1667_v51, %v1664_v46  ;;  %v701_v39 = vadd.f32 %v700_v45, %v612_v56 }
 0x10d   : > { %1373 = vst [vmem:[%s1581_s15 + $0x68] sm:$0xff] %v1349_v53   ;;  %v800_v42 = vmul.f32 %v701_v39, %v701_v39  ;;  %v761_v45 = vadd.f32 %v760_v41, %v701_v39 }
 0x10e   : > { %v651_v57 = vpop.f32.mrf.mxu2 }
 0x10f   : > { %v740_v60 = vpop.f32.mrf.mxu3  ;;  %v652_v24 = vadd.f32 %v1573_v50, %v651_v57  ;;  %v831_v54 = vadd.f32 %v830_v44, %v800_v42 }
 0x110   : > { %v613_v62 = vpop.f32.mrf.mxu0 }
 0x111   : > { %v702_v63 = vpop.f32.mrf.mxu1  ;;  %v614_v3 = vadd.f32 %v1573_v50, %v613_v62  ;;  %v1692_v22 = vadd.f32 %v740_v60, %v652_v24 }
 0x113   : > { %v703_v9 = vadd.f32 %v702_v63, %v614_v3 }
 0x115   : > { %v1314_v12 = vpack.c.bf16 %v703_v9, %v701_v39  ;;  %v801_v48 = vmul.f32 %v703_v9, %v703_v9  ;;  %v762_v55 = vadd.f32 %v761_v45, %v703_v9 }
 0x116   : > { %v653_v18 = vpop.f32.mrf.mxu2 }
 0x117   : > { %1366 = vst [vmem:[%s1581_s15 + $0x30] sm:$0xff] %v1314_v12   ;;  %v742_v58 = vpop.f32.mrf.mxu3  ;;  %v654_v25 = vadd.f32 %v1573_v50, %v653_v18  ;;  %v832_v60 = vadd.f32 %v831_v54, %v801_v48 }
 0x118   : > { %v616_v19 = vpop.f32.mrf.mxu0 }
 0x119   : > { %v705_v20 = vpop.f32.mrf.mxu1  ;;  %v617_v30 = vadd.f32 %v1573_v50, %v616_v19  ;;  %v1697_v14 = vadd.f32 %v742_v58, %v654_v25  ;;  %v807_v58 = vmul.f32 %v1604_v31, %v1604_v31 }
 0x11b   : > { %v1354_v35 = vpack.c.bf16 %v1697_v14, %v1692_v22  ;;  %v706_v43 = vadd.f32 %v705_v20, %v617_v30  ;;  %v808_v20 = vmul.f32 %v1619_v47, %v1619_v47 }
 0x11d   : > { %1374 = vst [vmem:[%s1581_s15 + $0x70] sm:$0xff] %v1354_v35   ;;  %v802_v56 = vmul.f32 %v706_v43, %v706_v43  ;;  %v763_v61 = vadd.f32 %v762_v55, %v706_v43 }
 0x11e   : > { %v656_v15 = vpop.f32.mrf.mxu2 }
 0x11f   : > { %v745_v52 = vpop.f32.mrf.mxu3  ;;  %v657_v37 = vadd.f32 %v1573_v50, %v656_v15  ;;  %v833_v63 = vadd.f32 %v832_v60, %v802_v56  ;;  %v816_v15 = vmul.f32 %v1692_v22, %v1692_v22 }
 0x120   : > { %v618_v53 = vpop.f32.mrf.mxu0 }
 0x121   : > { %v619_v36 = vadd.f32 %v1573_v50, %v618_v53  ;;  %v707_v57 = vpop.f32.mrf.mxu1  ;;  %v746_v24 = vadd.f32 %v745_v52, %v657_v37 }
 0x123   : > { %v708_v62 = vadd.f32 %v707_v57, %v619_v36  ;;  %v818_v56 = vmul.f32 %v746_v24, %v746_v24 }
 0x125   : > { %v764_v0 = vadd.f32 %v763_v61, %v708_v62  ;;  %v803_v1 = vmul.f32 %v708_v62, %v708_v62  ;;  %v1319_v3 = vpack.c.bf16 %v708_v62, %v706_v43 }
 0x126   : > { %v658_v39 = vpop.f32.mrf.mxu2 }
 0x127   : > { %v765_v7 = vadd.f32 %v764_v0, %v1585_v5  ;;  %v834_v21 = vadd.f32 %v833_v63, %v803_v1  ;;  %1367 = vst [vmem:[%s1581_s15 + $0x38] sm:$0xff] %v1319_v3   ;;  %v747_v9 = vpop.f32.mrf.mxu3  ;;  %v659_v10 = vadd.f32 %v1573_v50, %v658_v39 }
 0x129   : > { %v766_v40 = vadd.f32 %v765_v7, %v1589_v8  ;;  %v835_v12 = vadd.f32 %v834_v21, %v804_v6  ;;  %v748_v13 = vadd.f32 %v747_v9, %v659_v10 }
 0x12b   : > { %v767_v5 = vadd.f32 %v766_v40, %v1601_v29  ;;  %v836_v17 = vadd.f32 %v835_v12, %v805_v11  ;;  %v1359_v18 = vpack.c.bf16 %v748_v13, %v746_v24  ;;  %v819_v57 = vmul.f32 %v748_v13, %v748_v13 }
 0x12d   : > { %v768_v19 = vadd.f32 %v767_v5, %v1604_v31  ;;  %v837_v50 = vadd.f32 %v836_v17, %v806_v16  ;;  %1375 = vst [vmem:[%s1581_s15 + $0x78] sm:$0xff] %v1359_v18  }
 0x12f   : > { %v769_v8 = vadd.f32 %v768_v19, %v1619_v47  ;;  %v838_v25 = vadd.f32 %v837_v50, %v807_v58  ;;  %v812_v47 = vmul.f32 %v1652_v23, %v1652_v23 }
 0x131   : > { %v770_v29 = vadd.f32 %v769_v8, %v1622_v49  ;;  %v839_v59 = vadd.f32 %v838_v25, %v808_v20  ;;  %v813_v49 = vmul.f32 %v1655_v26, %v1655_v26 }
 0x133   : > { %v840_v30 = vadd.f32 %v839_v59, %v809_v27  ;;  %v771_v31 = vadd.f32 %v770_v29, %v1637_v2  ;;  %v814_v2 = vmul.f32 %v1664_v46, %v1664_v46 }
 0x135   : > { %v772_v33 = vadd.f32 %v771_v31, %v1640_v4  ;;  %v841_v34 = vadd.f32 %v840_v30, %v810_v28  ;;  %v815_v4 = vmul.f32 %v1667_v51, %v1667_v51 }
 0x137   : > { %v773_v35 = vadd.f32 %v772_v33, %v1652_v23  ;;  %v842_v38 = vadd.f32 %v841_v34, %v811_v32 }
 0x139   : > { %v774_v41 = vadd.f32 %v773_v35, %v1655_v26  ;;  %v843_v42 = vadd.f32 %v842_v38, %v812_v47 }
 0x13b   : > { %v775_v43 = vadd.f32 %v774_v41, %v1664_v46  ;;  %v844_v44 = vadd.f32 %v843_v42, %v813_v49  ;;  %v817_v46 = vmul.f32 %v1697_v14, %v1697_v14 }
 0x13d   : > { %v776_v45 = vadd.f32 %v775_v43, %v1667_v51  ;;  %v845_v23 = vadd.f32 %v844_v44, %v814_v2 }
 0x13f   : > { %v777_v48 = vadd.f32 %v776_v45, %v1692_v22  ;;  %v846_v26 = vadd.f32 %v845_v23, %v815_v4 }
 0x141   : > { %v847_v52 = vadd.f32 %v846_v26, %v816_v15  ;;  %v778_v53 = vadd.f32 %v777_v48, %v1697_v14 }
 0x143   : > { %v848_v54 = vadd.f32 %v847_v52, %v817_v46  ;;  %v779_v55 = vadd.f32 %v778_v53, %v746_v24 }
 0x145   : > { %v849_v36 = vadd.f32 %v848_v54, %v818_v56  ;;  %v780_v51 = vadd.f32 %v779_v55, %v748_v13 }
 0x147   : > { %v781_v60 = vrot.slane %v780_v51, 4  ;;  %v850_v61 = vadd.f32 %v849_v36, %v819_v57 }
 0x149   : > { %v782_v62 = vadd.f32 %v781_v60, %v780_v51  ;;  %v851_v37 = vrot.slane %v850_v61, 4 }
 0x14b   : > { %v783_v22 = vrot.slane %v782_v62, 2  ;;  %v852_v63 = vadd.f32 %v851_v37, %v850_v61 }
 0x14d   : > { %v784_v0 = vadd.f32 %v783_v22, %v782_v62  ;;  %v853_v1 = vrot.slane %v852_v63, 2 }
 0x14f   : > { %v785_v3 = vrot.slane %v784_v0, 1  ;;  %v854_v6 = vadd.f32 %v853_v1, %v852_v63 }
 0x151   : > { %v786_v14 = vadd.f32 %v785_v3, %v784_v0  ;;  %v855_v7 = vrot.slane %v854_v6, 1 }
 0x153   : > { %787 = vst [vmem:[%s244_s17] sm:$0x1] %v786_v14  ;;  %v856_v21 = vadd.f32 %v855_v7, %v854_v6 }
 0x155   : > { %857 = vst [vmem:[%s247_s22] sm:$0x1] %v856_v21 }
 0x156 PF: > { %s16_s18 = sadd.s32 1, %s1407_s18  }
 0x157   : > { %p13_p5 = scmp.ge.s32.totalorder %s16_s18, 4  }
 0x159   :  { %15 = sbr.rel (!%p13_p5) target bundleno = 1 (0x1), region = 86 }

// kernel: forward.16
= control target key start
LH: loop header
LB: loop body
LE: loop exit
PB: predicated region body
PF: predicated region fallthrough
CT: control target
= control target key end

     0   :  { %s842_s18 = smov 0   ;;  %s1050_s0 = inlined_call_operand.vmem [shape: bf16[512,128], index: 0, kind: input, shape index: {}]   ;;  %s1051_s1 = inlined_call_operand.vmem [shape: f32[2,1,128], index: 1, kind: input, shape index: {}]   ;;  %s1052_s2 = inlined_call_operand.vmem [shape: f32[2,1,128], index: 2, kind: input, shape index: {}]   ;;  %s1053_s3 = inlined_call_operand.vmem [shape: f32[1,128], index: 3, kind: input, shape index: {}]   ;;  %s1054_s4 = inlined_call_operand.vmem [shape: f32[1,128], index: 4, kind: input, shape index: {}]   ;;  %s1055_s5 = inlined_call_operand.vmem [shape: bf16[512,128], index: 5, kind: output, shape index: {}]  }
   0x1 LB: > { %s609_s19 = sadd.s32 4294967295, %s810_s18   ;;  %p613_p0 = scmp.ge.s32.totalorder %s810_s18, 1  ;;  %s810_s18 = sphi %s842_s18, %s15_s18  }
   0x2   : > { %p188_p1 = scmp.lt.s32.totalorder %s810_s18, 3 }
   0x4   : > { %p189_p2 = pnand %p613_p0, %p188_p1 }
   0x5   : > { %s614_s28 = sshll.u32 (!%p189_p2), %s609_s19, 5 }
   0x6   : > { %192 = sbr.rel (%p189_p2) target bundleno = 96 (0x60), region = 40  ;;  %p217_p3 = scmp.lt.s32.totalorder (!%p189_p2), %s614_s28, 63 }
   0xb   : > { %v228_v0 = vld [vmem:[%s1051_s1] sm:$0x1]  ;;  %v229_v1 = vld [vmem:[%s1051_s1 + $0x1] sm:$0x1]  ;;  %vm230_vm0 = vcmask 1040384   ;;  %s1059_s28 = smov (!%p217_p3, %s614_s28), 63 }
   0xc   : > { %v231_v2 = vsel %vm230_vm0, %v228_v0, 0.0  ;;  %v232_v3 = vsel %vm230_vm0, %v229_v1, 0.0  ;;  %v235_v4 = vld [vmem:[%s1052_s2] sm:$0x1]  ;;  %v236_v6 = vld [vmem:[%s1052_s2 + $0x1] sm:$0x1] }
   0xd   : > { %v233_v5 = vadd.f32 %v232_v3, %v231_v2  ;;  %v237_v7 = vsel %vm230_vm0, %v235_v4, 0.0  ;;  %v238_v8 = vsel %vm230_vm0, %v236_v6, 0.0  ;;  %s615_s29 = sshll.u32 %s1059_s28, 2  ;;  %v243_v34 = vld [vmem:[%s1053_s3] sm:$0x1] }
   0xe   : > { %v239_v10 = vadd.f32 %v238_v8, %v237_v7  ;;  %s870_s7 = scalar_lea.vmem %s1050_s0, %s615_s29  ;;  %v256_v57 = vld [vmem:[%s1054_s4] sm:$0x1]  ;;  %s957_s14 = scalar_lea.vmem %s1055_s5, %s615_s29 }
   0xf   : > { %v234_v9 = vmul.f32 0.001953125, %v233_v5  ;;  %v621_v18 = vld [vmem:[%s870_s7] sm:$0xff]   ;;  %v764_v20 = vld [vmem:[%s870_s7 + $0x8] sm:$0xff]   ;;  %v765_v21 = vld [vmem:[%s870_s7 + $0x10] sm:$0xff]  }
  0x10   : > { %v240_v11 = vmul.f32 0.001953125, %v239_v10  ;;  %v766_v22 = vld [vmem:[%s870_s7 + $0x18] sm:$0xff]   ;;  %v622_v24 = vunpack.c.l.bf16 %v621_v18  ;;  %v767_v25 = vld [vmem:[%s870_s7 + $0x20] sm:$0xff]   ;;  %v768_v26 = vld [vmem:[%s870_s7 + $0x28] sm:$0xff]   ;;  %v623_v28 = vunpack.c.h.bf16 %v621_v18  ;;  %v626_v29 = vunpack.c.l.bf16 %v764_v20 }
  0x11   : > { %v241_v12 = vmul.f32 %v234_v9, %v234_v9  ;;  %v627_v30 = vunpack.c.h.bf16 %v764_v20  ;;  %v630_v31 = vunpack.c.l.bf16 %v765_v21  ;;  %v769_v32 = vld [vmem:[%s870_s7 + $0x30] sm:$0xff]   ;;  %v884_v33 = vld [vmem:[%s870_s7 + $0x38] sm:$0xff]   ;;  %v631_v36 = vunpack.c.h.bf16 %v765_v21  ;;  %v890_v39 = vld [vmem:[%s870_s7 + $0x40] sm:$0xff]  }
  0x12   : > { %v634_v37 = vunpack.c.l.bf16 %v766_v22  ;;  %v635_v38 = vunpack.c.h.bf16 %v766_v22  ;;  %v638_v40 = vunpack.c.l.bf16 %v767_v25  ;;  %v639_v41 = vunpack.c.h.bf16 %v767_v25  ;;  %v893_v44 = vld [vmem:[%s870_s7 + $0x48] sm:$0xff]   ;;  %v896_v45 = vld [vmem:[%s870_s7 + $0x50] sm:$0xff]   ;;  %v902_v50 = vld [vmem:[%s870_s7 + $0x58] sm:$0xff]  }
  0x13   : > { %v242_v13 = vsub.f32 %v240_v11, %v241_v12  ;;  %v642_v42 = vunpack.c.l.bf16 %v768_v26  ;;  %v643_v43 = vunpack.c.h.bf16 %v768_v26  ;;  %v646_v47 = vunpack.c.l.bf16 %v769_v32  ;;  %v908_v55 = vld [vmem:[%s870_s7 + $0x60] sm:$0xff]   ;;  %v911_v56 = vld [vmem:[%s870_s7 + $0x68] sm:$0xff]  }
  0x14   : > { %v647_v48 = vunpack.c.h.bf16 %v769_v32  ;;  %v650_v49 = vunpack.c.l.bf16 %v884_v33  ;;  %v651_v52 = vunpack.c.h.bf16 %v884_v33  ;;  %v654_v53 = vunpack.c.l.bf16 %v890_v39 }
  0x15   : > { %v244_v14 = vadd.f32 1e-05, %v242_v13  ;;  %v655_v54 = vunpack.c.h.bf16 %v890_v39  ;;  %v658_v58 = vunpack.c.l.bf16 %v893_v44  ;;  %v659_v59 = vunpack.c.h.bf16 %v893_v44 }
  0x16   : > { %v662_v60 = vunpack.c.l.bf16 %v896_v45  ;;  %v663_v61 = vunpack.c.h.bf16 %v896_v45  ;;  %v666_v0 = vunpack.c.l.bf16 %v902_v50  ;;  %v667_v1 = vunpack.c.h.bf16 %v902_v50 }
  0x17   : > { %802 = vrsqrt.f32 %v244_v14  ;;  %vm251_vm1 = vweird.f32 %v244_v14  ;;  %v670_v2 = vunpack.c.l.bf16 %v908_v55  ;;  %v671_v3 = vunpack.c.h.bf16 %v908_v55 }
  0x18   : > { %v674_v4 = vunpack.c.l.bf16 %v911_v56  ;;  %v675_v5 = vunpack.c.h.bf16 %v911_v56 }
  0x1d   : > { %v803_v15 = vpop.eup %802 }
  0x1e   : > { %v246_v16 = vmul.f32 %v803_v15, %v244_v14  ;;  %vm252_vm2 = vweird.f32 %v803_v15 }
  0x1f   : > { %vm878_vm3 = vmor %vm251_vm1, %vm252_vm2 }
  0x20   : > { %v247_v17 = vmul.f32 %v803_v15, %v246_v16 }
  0x22   : > { %v248_v19 = vmul.f32 0.5, %v247_v17 }
  0x24   : > { %v249_v23 = vsub.f32 1.5, %v248_v19 }
  0x26   : > { %v250_v35 = vmul.f32 %v803_v15, %v249_v23 }
  0x28   : > { %v254_v46 = vsel %vm878_vm3, %v803_v15, %v250_v35 }
  0x29   : > { %v255_v51 = vmul.f32 %v254_v46, %v243_v34 }
  0x2b   : > { %v257_v62 = vmul.f32 %v255_v51, %v234_v9  ;;  %v920_v63 = vperm.slane %v255_v51, 0 }
  0x2d   : > { %v258_v6 = vsub.f32 %v256_v57, %v257_v62  ;;  %v326_v7 = vmul.f32 %v622_v24, %v920_v63  ;;  %v327_v8 = vmul.f32 %v623_v28, %v920_v63  ;;  %v328_v9 = vmul.f32 %v626_v29, %v920_v63 }
  0x2e   : > { %v329_v10 = vmul.f32 %v627_v30, %v920_v63  ;;  %v330_v11 = vmul.f32 %v630_v31, %v920_v63  ;;  %v331_v12 = vmul.f32 %v631_v36, %v920_v63  ;;  %v332_v13 = vmul.f32 %v634_v37, %v920_v63 }
  0x2f   : > { %v935_v14 = vperm.slane %v258_v6, 0  ;;  %v333_v15 = vmul.f32 %v635_v38, %v920_v63  ;;  %v334_v16 = vmul.f32 %v638_v40, %v920_v63  ;;  %v335_v17 = vmul.f32 %v639_v41, %v920_v63 }
  0x30   : > { %v336_v18 = vmul.f32 %v642_v42, %v920_v63  ;;  %v337_v19 = vmul.f32 %v643_v43, %v920_v63  ;;  %v338_v20 = vmul.f32 %v646_v47, %v920_v63  ;;  %v339_v21 = vmul.f32 %v647_v48, %v920_v63 }
  0x31   : > { %v361_v22 = vadd.f32 %v935_v14, %v326_v7  ;;  %v362_v23 = vadd.f32 %v935_v14, %v327_v8  ;;  %v363_v24 = vadd.f32 %v935_v14, %v328_v9  ;;  %v364_v25 = vadd.f32 %v935_v14, %v329_v10 }
  0x32   : > { %v365_v26 = vadd.f32 %v935_v14, %v330_v11  ;;  %v366_v27 = vadd.f32 %v935_v14, %v331_v12  ;;  %v367_v28 = vadd.f32 %v935_v14, %v332_v13  ;;  %v368_v29 = vadd.f32 %v935_v14, %v333_v15 }
  0x33   : > { %vm393_vm4 = vcmp.ge.f32.partialorder %v361_v22, 0.0  ;;  %vm394_vm5 = vcmp.ge.f32.partialorder %v362_v23, 0.0  ;;  %v425_v30 = vmul.f32 0.2, %v361_v22  ;;  %v426_v31 = vmul.f32 0.2, %v362_v23 }
  0x34   : > { %vm395_vm6 = vcmp.ge.f32.partialorder %v363_v24, 0.0  ;;  %vm396_vm7 = vcmp.ge.f32.partialorder %v364_v25, 0.0  ;;  %v427_v32 = vmul.f32 0.2, %v363_v24  ;;  %v428_v34 = vmul.f32 0.2, %v364_v25 }
  0x35   : > { %v457_v35 = vsel %vm393_vm4, %v361_v22, %v425_v30  ;;  %v458_v36 = vsel %vm394_vm5, %v362_v23, %v426_v31  ;;  %vm397_vm8 = vcmp.ge.f32.partialorder %v365_v26, 0.0  ;;  %vm398_vm9 = vcmp.ge.f32.partialorder %v366_v27, 0.0 }
  0x36   : > { %v687_v37 = vpack.c.bf16 %v458_v36, %v457_v35  ;;  %v459_v38 = vsel %vm395_vm6, %v363_v24, %v427_v32  ;;  %v460_v40 = vsel %vm396_vm7, %v364_v25, %v428_v34  ;;  %v429_v41 = vmul.f32 0.2, %v365_v26 }
  0x37   : > { %v692_v42 = vpack.c.bf16 %v460_v40, %v459_v38  ;;  %v430_v43 = vmul.f32 0.2, %v366_v27  ;;  %vm399_vm10 = vcmp.ge.f32.partialorder %v367_v28, 0.0  ;;  %vm400_vm11 = vcmp.ge.f32.partialorder %v368_v29, 0.0 }
  0x38   : > { %688 = vst [vmem:[%s957_s14] sm:$0xff] %v687_v37   ;;  %v461_v46 = vsel %vm397_vm8, %v365_v26, %v429_v41  ;;  %v431_v47 = vmul.f32 0.2, %v367_v28  ;;  %v432_v48 = vmul.f32 0.2, %v368_v29  ;;  %v369_v51 = vadd.f32 %v935_v14, %v334_v16 }
  0x39   : > { %779 = vst [vmem:[%s957_s14 + $0x8] sm:$0xff] %v692_v42   ;;  %v462_v57 = vsel %vm398_vm9, %v366_v27, %v430_v43  ;;  %v370_v62 = vadd.f32 %v935_v14, %v335_v17  ;;  %v371_v6 = vadd.f32 %v935_v14, %v336_v18  ;;  %v372_v7 = vadd.f32 %v935_v14, %v337_v19 }
  0x3a   : > { %v697_v8 = vpack.c.bf16 %v462_v57, %v461_v46  ;;  %v463_v9 = vsel %vm399_vm10, %v367_v28, %v431_v47  ;;  %v464_v10 = vsel %vm400_vm11, %v368_v29, %v432_v48  ;;  %vm401_vm12 = vcmp.ge.f32.partialorder %v369_v51, 0.0 }
  0x3b   : > { %v702_v11 = vpack.c.bf16 %v464_v10, %v463_v9  ;;  %vm402_vm13 = vcmp.ge.f32.partialorder %v370_v62, 0.0  ;;  %v433_v12 = vmul.f32 0.2, %v369_v51  ;;  %v434_v13 = vmul.f32 0.2, %v370_v62 }
  0x3c   : > { %780 = vst [vmem:[%s957_s14 + $0x10] sm:$0xff] %v697_v8   ;;  %vm403_vm14 = vcmp.ge.f32.partialorder %v371_v6, 0.0  ;;  %vm404_vm15 = vcmp.ge.f32.partialorder %v372_v7, 0.0  ;;  %v435_v15 = vmul.f32 0.2, %v371_v6  ;;  %v373_v16 = vadd.f32 %v935_v14, %v338_v20 }
  0x3d   : > { %781 = vst [vmem:[%s957_s14 + $0x18] sm:$0xff] %v702_v11   ;;  %v465_v17 = vsel %vm401_vm12, %v369_v51, %v433_v12  ;;  %v466_v18 = vsel %vm402_vm13, %v370_v62, %v434_v13  ;;  %v436_v22 = vmul.f32 0.2, %v372_v7  ;;  %v374_v19 = vadd.f32 %v935_v14, %v339_v21 }
  0x3e   : > { %v707_v23 = vpack.c.bf16 %v466_v18, %v465_v17  ;;  %v467_v24 = vsel %vm403_vm14, %v371_v6, %v435_v15  ;;  %vm405_vm0 = vcmp.ge.f32.partialorder %v373_v16, 0.0  ;;  %v437_v25 = vmul.f32 0.2, %v373_v16 }
  0x3f   : > { %v468_v26 = vsel %vm404_vm15, %v372_v7, %v436_v22  ;;  %vm406_vm1 = vcmp.ge.f32.partialorder %v374_v19, 0.0  ;;  %v438_v27 = vmul.f32 0.2, %v374_v19  ;;  %v340_v28 = vmul.f32 %v650_v49, %v920_v63 }
  0x40   : > { %782 = vst [vmem:[%s957_s14 + $0x20] sm:$0xff] %v707_v23   ;;  %v712_v20 = vpack.c.bf16 %v468_v26, %v467_v24  ;;  %v469_v29 = vsel %vm405_vm0, %v373_v16, %v437_v25  ;;  %v341_v21 = vmul.f32 %v651_v52, %v920_v63  ;;  %v342_v30 = vmul.f32 %v654_v53, %v920_v63  ;;  %v777_v16 = vld [vmem:[%s870_s7 + $0x70] sm:$0xff]   ;;  %v778_v26 = vld [vmem:[%s870_s7 + $0x78] sm:$0xff]  }
  0x41   : > { %v470_v31 = vsel %vm406_vm1, %v374_v19, %v438_v27  ;;  %v375_v32 = vadd.f32 %v935_v14, %v340_v28  ;;  %v343_v34 = vmul.f32 %v655_v54, %v920_v63  ;;  %v344_v49 = vmul.f32 %v658_v58, %v920_v63 }
  0x42   : > { %783 = vst [vmem:[%s957_s14 + $0x28] sm:$0xff] %v712_v20   ;;  %v717_v35 = vpack.c.bf16 %v470_v31, %v469_v29  ;;  %v376_v33 = vadd.f32 %v935_v14, %v341_v21  ;;  %v377_v52 = vadd.f32 %v935_v14, %v342_v30  ;;  %v345_v53 = vmul.f32 %v659_v59, %v920_v63 }
  0x43   : > { %vm407_vm2 = vcmp.ge.f32.partialorder %v375_v32, 0.0  ;;  %v439_v36 = vmul.f32 0.2, %v375_v32  ;;  %v378_v37 = vadd.f32 %v935_v14, %v343_v34  ;;  %v379_v39 = vadd.f32 %v935_v14, %v344_v49 }
  0x44   : > { %784 = vst [vmem:[%s957_s14 + $0x30] sm:$0xff] %v717_v35   ;;  %vm408_vm3 = vcmp.ge.f32.partialorder %v376_v33, 0.0  ;;  %v440_v54 = vmul.f32 0.2, %v376_v33  ;;  %vm409_vm4 = vcmp.ge.f32.partialorder %v377_v52, 0.0  ;;  %v380_v58 = vadd.f32 %v935_v14, %v345_v53 }
  0x45   : > { %v471_v38 = vsel %vm407_vm2, %v375_v32, %v439_v36  ;;  %vm410_vm5 = vcmp.ge.f32.partialorder %v378_v37, 0.0  ;;  %v441_v40 = vmul.f32 0.2, %v377_v52  ;;  %v442_v41 = vmul.f32 0.2, %v378_v37 }
  0x46   : > { %v472_v42 = vsel %vm408_vm3, %v376_v33, %v440_v54  ;;  %vm411_vm6 = vcmp.ge.f32.partialorder %v379_v39, 0.0  ;;  %vm412_vm7 = vcmp.ge.f32.partialorder %v380_v58, 0.0  ;;  %v443_v44 = vmul.f32 0.2, %v379_v39 }
  0x47   : > { %v722_v59 = vpack.c.bf16 %v472_v42, %v471_v38  ;;  %v473_v43 = vsel %vm409_vm4, %v377_v52, %v441_v40  ;;  %v474_v46 = vsel %vm410_vm5, %v378_v37, %v442_v41  ;;  %v444_v47 = vmul.f32 0.2, %v380_v58 }
  0x48   : > { %v727_v48 = vpack.c.bf16 %v474_v46, %v473_v43  ;;  %v475_v51 = vsel %vm411_vm6, %v379_v39, %v443_v44  ;;  %v346_v57 = vmul.f32 %v662_v60, %v920_v63  ;;  %v347_v62 = vmul.f32 %v663_v61, %v920_v63 }
  0x49   : > { %785 = vst [vmem:[%s957_s14 + $0x38] sm:$0xff] %v722_v59   ;;  %v476_v6 = vsel %vm412_vm7, %v380_v58, %v444_v47  ;;  %v348_v7 = vmul.f32 %v666_v0, %v920_v63  ;;  %v349_v8 = vmul.f32 %v667_v1, %v920_v63  ;;  %v350_v9 = vmul.f32 %v670_v2, %v920_v63 }
  0x4a   : > { %786 = vst [vmem:[%s957_s14 + $0x40] sm:$0xff] %v727_v48   ;;  %v732_v60 = vpack.c.bf16 %v476_v6, %v475_v51  ;;  %v381_v45 = vadd.f32 %v935_v14, %v346_v57  ;;  %v382_v61 = vadd.f32 %v935_v14, %v347_v62  ;;  %v351_v10 = vmul.f32 %v671_v3, %v920_v63 }
  0x4b   : > { %v383_v0 = vadd.f32 %v935_v14, %v348_v7  ;;  %v384_v11 = vadd.f32 %v935_v14, %v349_v8  ;;  %v385_v50 = vadd.f32 %v935_v14, %v350_v9  ;;  %v352_v1 = vmul.f32 %v674_v4, %v920_v63 }
  0x4c   : > { %787 = vst [vmem:[%s957_s14 + $0x48] sm:$0xff] %v732_v60   ;;  %vm413_vm8 = vcmp.ge.f32.partialorder %v381_v45, 0.0  ;;  %vm414_vm9 = vcmp.ge.f32.partialorder %v382_v61, 0.0  ;;  %v445_v2 = vmul.f32 0.2, %v381_v45  ;;  %v386_v12 = vadd.f32 %v935_v14, %v351_v10 }
  0x4d   : > { %v446_v13 = vmul.f32 0.2, %v382_v61  ;;  %vm415_vm10 = vcmp.ge.f32.partialorder %v383_v0, 0.0  ;;  %vm416_vm11 = vcmp.ge.f32.partialorder %v384_v11, 0.0  ;;  %v447_v55 = vmul.f32 0.2, %v383_v0 }
  0x4e   : > { %v477_v3 = vsel %vm413_vm8, %v381_v45, %v445_v2  ;;  %v448_v15 = vmul.f32 0.2, %v384_v11  ;;  %vm417_vm12 = vcmp.ge.f32.partialorder %v385_v50, 0.0  ;;  %vm418_vm13 = vcmp.ge.f32.partialorder %v386_v12, 0.0 }
  0x4f   : > { %v478_v17 = vsel %vm414_vm9, %v382_v61, %v446_v13  ;;  %v479_v18 = vsel %vm415_vm10, %v383_v0, %v447_v55  ;;  %v449_v4 = vmul.f32 0.2, %v385_v50  ;;  %v450_v22 = vmul.f32 0.2, %v386_v12 }
  0x50   : > { %v737_v19 = vpack.c.bf16 %v478_v17, %v477_v3  ;;  %v480_v23 = vsel %vm416_vm11, %v384_v11, %v448_v15  ;;  %v353_v24 = vmul.f32 %v675_v5, %v920_v63  ;;  %v387_v25 = vadd.f32 %v935_v14, %v352_v1 }
  0x51   : > { %v742_v27 = vpack.c.bf16 %v480_v23, %v479_v18  ;;  %v481_v28 = vsel %vm417_vm12, %v385_v50, %v449_v4  ;;  %v482_v20 = vsel %vm418_vm13, %v386_v12, %v450_v22  ;;  %v678_v29 = vunpack.c.l.bf16 %v777_v16 }
  0x52   : > { %788 = vst [vmem:[%s957_s14 + $0x50] sm:$0xff] %v737_v19   ;;  %v747_v21 = vpack.c.bf16 %v482_v20, %v481_v28  ;;  %v388_v30 = vadd.f32 %v935_v14, %v353_v24  ;;  %vm419_vm14 = vcmp.ge.f32.partialorder %v387_v25, 0.0  ;;  %v451_v31 = vmul.f32 0.2, %v387_v25 }
  0x53   : > { %789 = vst [vmem:[%s957_s14 + $0x58] sm:$0xff] %v742_v27   ;;  %v679_v32 = vunpack.c.h.bf16 %v777_v16  ;;  %v354_v34 = vmul.f32 %v678_v29, %v920_v63  ;;  %v682_v56 = vunpack.c.l.bf16 %v778_v26  ;;  %v683_v5 = vunpack.c.h.bf16 %v778_v26 }
  0x54   : > { %790 = vst [vmem:[%s957_s14 + $0x60] sm:$0xff] %v747_v21   ;;  %vm420_vm15 = vcmp.ge.f32.partialorder %v388_v30, 0.0  ;;  %v452_v49 = vmul.f32 0.2, %v388_v30  ;;  %v483_v35 = vsel %vm419_vm14, %v387_v25, %v451_v31 }
  0x55   : > { %v355_v33 = vmul.f32 %v679_v32, %v920_v63  ;;  %v389_v52 = vadd.f32 %v935_v14, %v354_v34  ;;  %v356_v53 = vmul.f32 %v682_v56, %v920_v63  ;;  %v357_v36 = vmul.f32 %v683_v5, %v920_v63 }
  0x56   : > { %v484_v37 = vsel %vm420_vm15, %v388_v30, %v452_v49 }
  0x57   : > { %v752_v39 = vpack.c.bf16 %v484_v37, %v483_v35  ;;  %v390_v54 = vadd.f32 %v935_v14, %v355_v33  ;;  %vm421_vm0 = vcmp.ge.f32.partialorder %v389_v52, 0.0  ;;  %v453_v58 = vmul.f32 0.2, %v389_v52 }
  0x58   : > { %v391_v38 = vadd.f32 %v935_v14, %v356_v53  ;;  %v392_v40 = vadd.f32 %v935_v14, %v357_v36 }
  0x59   : > { %791 = vst [vmem:[%s957_s14 + $0x68] sm:$0xff] %v752_v39   ;;  %vm422_vm1 = vcmp.ge.f32.partialorder %v390_v54, 0.0  ;;  %v454_v41 = vmul.f32 0.2, %v390_v54  ;;  %v485_v42 = vsel %vm421_vm0, %v389_v52, %v453_v58 }
  0x5a   : > { %vm423_vm2 = vcmp.ge.f32.partialorder %v391_v38, 0.0  ;;  %vm424_vm3 = vcmp.ge.f32.partialorder %v392_v40, 0.0  ;;  %v455_v44 = vmul.f32 0.2, %v391_v38  ;;  %v456_v63 = vmul.f32 0.2, %v392_v40 }
  0x5b   : > { %v486_v59 = vsel %vm422_vm1, %v390_v54, %v454_v41 }
  0x5c   : > { %v757_v43 = vpack.c.bf16 %v486_v59, %v485_v42  ;;  %v487_v46 = vsel %vm423_vm2, %v391_v38, %v455_v44  ;;  %v488_v47 = vsel %vm424_vm3, %v392_v40, %v456_v63 }
  0x5d   : > { %v762_v48 = vpack.c.bf16 %v488_v47, %v487_v46 }
  0x5e   : > { %792 = vst [vmem:[%s957_s14 + $0x70] sm:$0xff] %v757_v43  }
  0x5f   : > { %793 = vst [vmem:[%s957_s14 + $0x78] sm:$0xff] %v762_v48  }
  0x60 PF: > { %s15_s18 = sadd.s32 1, %s810_s18  }
  0x61   : > { %p12_p4 = scmp.ge.s32.totalorder %s15_s18, 4  }
  0x63   :  { %14 = sbr.rel (!%p12_p4) target bundleno = 1 (0x1), region = 70 }

// kernel: forward.17
= control target key start
LH: loop header
LB: loop body
LE: loop exit
PB: predicated region body
PF: predicated region fallthrough
CT: control target
= control target key end

     0   :  { %s1847_s18 = smov 0   ;;  %s2278_s0 = inlined_call_operand.vmem [shape: bf16[512,384], index: 0, kind: input, shape index: {}]   ;;  %s2279_s1 = inlined_call_operand.vmem [shape: bf16[384,128], index: 1, kind: input, shape index: {}]   ;;  %s2280_s2 = inlined_call_operand.vmem [shape: f32[1,128], index: 2, kind: input, shape index: {}]   ;;  %s2281_s3 = inlined_call_operand.vmem [shape: bf16[512,128], index: 3, kind: output, shape index: {0}]   ;;  %s2282_s4 = inlined_call_operand.vmem [shape: f32[2,1,128], index: 4, kind: output, shape index: {1}]   ;;  %s2283_s5 = inlined_call_operand.vmem [shape: f32[2,1,128], index: 5, kind: output, shape index: {2}]  }
   0x1 LB: > { %s1853_s19 = sadd.s32 4294967295, %s1815_s18   ;;  %p1313_p0 = scmp.ge.s32.totalorder %s1815_s18, 1  ;;  %s1815_s18 = sphi %s1847_s18, %s16_s18  }
   0x2   : > { %p194_p1 = scmp.lt.s32.totalorder %s1815_s18, 3 }
   0x4   : > { %p195_p2 = pnand %p1313_p0, %p194_p1 }
   0x5   : > { %s1314_s13 = sshll.u32 (!%p195_p2), %s1853_s19, 5  ;;  %p242_p4 = scmp.lt.s32.totalorder (!%p195_p2), %s1853_s19, 1 }
   0x6   : > { %198 = sbr.rel (%p195_p2) target bundleno = 396 (0x18c), region = 32  ;;  %p230_p3 = scmp.lt.s32.totalorder (!%p195_p2), %s1314_s13, 63 }
   0xb   : > { %v1663_v0 = vld [vmem:[%s2279_s1 + $0x38] sm:$0xff]  ;;  %v1662_v3 = vld [vmem:[%s2279_s1 + $0x30] sm:$0xff]  ;;  %v1661_v6 = vld [vmem:[%s2279_s1 + $0x28] sm:$0xff]  ;;  %s2285_s13 = smov (!%p230_p3, %s1314_s13), 63  ;;  %s2287_s19 = smov (!%p242_p4, %s1853_s19), 1 }
   0xc   : > { %v1863_v1 = vld [vmem:[%s2279_s1 + $0x78] sm:$0xff]  ;;  %764 = vmatpush.bf16.msra.mxu0 %v1663_v0  ;;  %1775 = vmatpush.bf16.msra.mxu3 %v1663_v0  ;;  %v1878_v4 = vld [vmem:[%s2279_s1 + $0x70] sm:$0xff]  ;;  %v1893_v7 = vld [vmem:[%s2279_s1 + $0x68] sm:$0xff]  ;;  %s1799_s30 = smul.u32 12, %s2285_s13  ;;  %s244_s10 = scalar_lea.vmem %s2282_s4, %s2287_s19 }
   0xd   : > { %v1868_v2 = vld [vmem:[%s2279_s1 + $0xb8] sm:$0xff]  ;;  %853 = vmatpush.bf16.msra.mxu1 %v1863_v1  ;;  %v1883_v5 = vld [vmem:[%s2279_s1 + $0xb0] sm:$0xff]  ;;  %v1898_v8 = vld [vmem:[%s2279_s1 + $0xa8] sm:$0xff]  ;;  %s247_s14 = scalar_lea.vmem %s2283_s5, %s2287_s19 }
   0xe   : > { %942 = vmatpush.bf16.msra.mxu2 %v1868_v2  ;;  %v1660_v9 = vld [vmem:[%s2279_s1 + $0x20] sm:$0xff]  ;;  %v1659_v12 = vld [vmem:[%s2279_s1 + $0x18] sm:$0xff]  ;;  %v1658_v15 = vld [vmem:[%s2279_s1 + $0x10] sm:$0xff]  ;;  %s1950_s15 = scalar_lea.vmem %s2278_s0, %s1799_s30  ;;  %s1317_s30 = sshll.u32 %s2285_s13, 2 }
   0xf   : > { %v1909_v10 = vld [vmem:[%s2279_s1 + $0x60] sm:$0xff]  ;;  %v1667_v13 = vld [vmem:[%s2279_s1 + $0x58] sm:$0xff]  ;;  %v1666_v16 = vld [vmem:[%s2279_s1 + $0x50] sm:$0xff]  ;;  %s2081_s8 = scalar_lea.vmem %s2281_s3, %s1317_s30 }
  0x10   : > { %765 = vmatpush.bf16.msra.mxu0 %v1662_v3  ;;  %1776 = vmatpush.bf16.msra.mxu3 %v1662_v3  ;;  %v1914_v11 = vld [vmem:[%s2279_s1 + $0xa0] sm:$0xff]  ;;  %v1929_v14 = vld [vmem:[%s2279_s1 + $0x98] sm:$0xff]  ;;  %v1942_v17 = vld [vmem:[%s2279_s1 + $0x90] sm:$0xff] }
  0x11   : > { %854 = vmatpush.bf16.msra.mxu1 %v1878_v4  ;;  %v1657_v18 = vld [vmem:[%s2279_s1 + $0x8] sm:$0xff]  ;;  %v1656_v21 = vld [vmem:[%s2279_s1] sm:$0xff]  ;;  %v1322_v29 = vld [vmem:[%s1950_s15 + $0xc] sm:$0xf0] }
  0x12   : > { %943 = vmatpush.bf16.msra.mxu2 %v1883_v5  ;;  %v1665_v19 = vld [vmem:[%s2279_s1 + $0x48] sm:$0xff]  ;;  %v1664_v22 = vld [vmem:[%s2279_s1 + $0x40] sm:$0xff]  ;;  %v1610_v31 = vld [vmem:[%s1950_s15 + $0x10] sm:$0xf0] }
  0x13   : > { %v1959_v20 = vld [vmem:[%s2279_s1 + $0x88] sm:$0xff]  ;;  %v1970_v23 = vld [vmem:[%s2279_s1 + $0x80] sm:$0xff]  ;;  %v1332_v36 = vld [vmem:[%s1950_s15 + $0x18] sm:$0xf] }
  0x14   : > { %766 = vmatpush.bf16.msra.mxu0 %v1661_v6  ;;  %1777 = vmatpush.bf16.msra.mxu3 %v1661_v6  ;;  %v1320_v24 = vld [vmem:[%s1950_s15] sm:$0xf]  ;;  %v1609_v25 = vld [vmem:[%s1950_s15 + $0x8] sm:$0xf0]  ;;  %v1608_v28 = vld [vmem:[%s1950_s15 + $0x4] sm:$0xf] }
  0x15   : > { %855 = vmatpush.bf16.msra.mxu1 %v1893_v7  ;;  %v1464_v26 = vld [vmem:[%s1950_s15 + $0x120] sm:$0xf]  ;;  %v1645_v27 = vld [vmem:[%s1950_s15 + $0x128] sm:$0xf0]  ;;  %v1328_v30 = vld [vmem:[%s1950_s15 + $0x8] sm:$0xf]  ;;  %v1321_v32 = vor.u32 %v1609_v25, %v1320_v24  ;;  %v1325_v34 = vor.u32 %v1608_v28, %v1322_v29 }
  0x16   : > { %944 = vmatpush.bf16.msra.mxu2 %v1898_v8  ;;  %v1465_v33 = vor.u32 %v1645_v27, %v1464_v26  ;;  %v1329_v35 = vor.u32 %v1610_v31, %v1328_v30  ;;  %v1612_v37 = vld [vmem:[%s1950_s15 + $0x20] sm:$0xf0]  ;;  %v1476_v38 = vld [vmem:[%s1950_s15 + $0x138] sm:$0xf]  ;;  %v1611_v40 = vld [vmem:[%s1950_s15 + $0x1c] sm:$0xf] }
  0x17   : > { %v1648_v39 = vld [vmem:[%s1950_s15 + $0x140] sm:$0xf0]  ;;  %v1334_v41 = vld [vmem:[%s1950_s15 + $0x24] sm:$0xf0]  ;;  %v1340_v42 = vld [vmem:[%s1950_s15 + $0x20] sm:$0xf]  ;;  %v1333_v44 = vor.u32 %v1612_v37, %v1332_v36 }
  0x18   : > { %767 = vmatpush.bf16.msra.mxu0 %v1660_v9  ;;  %1778 = vmatpush.bf16.msra.mxu3 %v1660_v9  ;;  %v1613_v43 = vld [vmem:[%s1950_s15 + $0x28] sm:$0xf0]  ;;  %v1477_v45 = vor.u32 %v1648_v39, %v1476_v38  ;;  %v1337_v46 = vor.u32 %v1611_v40, %v1334_v41  ;;  %v1344_v48 = vld [vmem:[%s1950_s15 + $0x30] sm:$0xf]  ;;  %v1615_v49 = vld [vmem:[%s1950_s15 + $0x38] sm:$0xf0] }
  0x19   : > { %856 = vmatpush.bf16.msra.mxu1 %v1909_v10  ;;  %v1341_v47 = vor.u32 %v1613_v43, %v1340_v42  ;;  %v1488_v50 = vld [vmem:[%s1950_s15 + $0x150] sm:$0xf]  ;;  %v1651_v51 = vld [vmem:[%s1950_s15 + $0x158] sm:$0xf0]  ;;  %v1614_v52 = vld [vmem:[%s1950_s15 + $0x34] sm:$0xf]  ;;  %v1345_v56 = vor.u32 %v1615_v49, %v1344_v48 }
  0x1a   : > { %945 = vmatpush.bf16.msra.mxu2 %v1914_v11  ;;  %v1346_v53 = vld [vmem:[%s1950_s15 + $0x3c] sm:$0xf0]  ;;  %v1352_v54 = vld [vmem:[%s1950_s15 + $0x38] sm:$0xf]  ;;  %v1616_v55 = vld [vmem:[%s1950_s15 + $0x40] sm:$0xf0]  ;;  %v1489_v57 = vor.u32 %v1651_v51, %v1488_v50 }
  0x1b   : > { %v1349_v58 = vor.u32 %v1614_v52, %v1346_v53  ;;  %v1353_v59 = vor.u32 %v1616_v55, %v1352_v54  ;;  %v1356_v60 = vld [vmem:[%s1950_s15 + $0x48] sm:$0xf]  ;;  %v1618_v61 = vld [vmem:[%s1950_s15 + $0x50] sm:$0xf0]  ;;  %v1617_v0 = vld [vmem:[%s1950_s15 + $0x4c] sm:$0xf] }
  0x1c   : > { %768 = vmatpush.bf16.msra.mxu0 %v1659_v12  ;;  %1779 = vmatpush.bf16.msra.mxu3 %v1659_v12  ;;  %v1500_v62 = vld [vmem:[%s1950_s15 + $0x168] sm:$0xf]  ;;  %v1654_v63 = vld [vmem:[%s1950_s15 + $0x170] sm:$0xf0]  ;;  %v1619_v3 = vld [vmem:[%s1950_s15 + $0x58] sm:$0xf0] }
  0x1d   : > { %857 = vmatpush.bf16.msra.mxu1 %v1667_v13  ;;  %v1621_v9 = vld [vmem:[%s1950_s15 + $0x68] sm:$0xf0]  ;;  %v1466_v12 = vld [vmem:[%s1950_s15 + $0x12c] sm:$0xf0]  ;;  %v1647_v24 = vld [vmem:[%s1950_s15 + $0x13c] sm:$0xf] }
  0x1e   : > { %946 = vmatpush.bf16.msra.mxu2 %v1929_v14  ;;  %v1478_v25 = vld [vmem:[%s1950_s15 + $0x144] sm:$0xf0]  ;;  %v1388_v26 = vld [vmem:[%s1950_s15 + $0x80] sm:$0xf]  ;;  %v1625_v27 = vld [vmem:[%s1950_s15 + $0x88] sm:$0xf0] }
  0x1f   : > { %v1481_v29 = vor.u32 %v1647_v24, %v1478_v25  ;;  %v1389_v31 = vor.u32 %v1625_v27, %v1388_v26  ;;  %v1490_v36 = vld [vmem:[%s1950_s15 + $0x15c] sm:$0xf0]  ;;  %v1400_v38 = vld [vmem:[%s1950_s15 + $0x98] sm:$0xf]  ;;  %v1628_v39 = vld [vmem:[%s1950_s15 + $0xa0] sm:$0xf0] }
  0x20   : > { %769 = vmatpush.bf16.msra.mxu0 %v1658_v15  ;;  %1780 = vmatpush.bf16.msra.mxu3 %v1658_v15  ;;  %v1622_v15 = vld [vmem:[%s1950_s15 + $0x70] sm:$0xf0]  ;;  %v1394_v37 = vld [vmem:[%s1950_s15 + $0x9c] sm:$0xf0]  ;;  %v1401_v43 = vor.u32 %v1628_v39, %v1400_v38  ;;  %v1502_v48 = vld [vmem:[%s1950_s15 + $0x174] sm:$0xf0] }
  0x21   : > { %858 = vmatpush.bf16.msra.mxu1 %v1666_v16  ;;  %v1406_v49 = vld [vmem:[%s1950_s15 + $0xb4] sm:$0xf0]  ;;  %v1412_v50 = vld [vmem:[%s1950_s15 + $0xb0] sm:$0xf]  ;;  %v1631_v51 = vld [vmem:[%s1950_s15 + $0xb8] sm:$0xf0] }
  0x22   : > { %947 = vmatpush.bf16.msra.mxu2 %v1942_v17  ;;  %v1413_v55 = vor.u32 %v1631_v51, %v1412_v50  ;;  %v1638_v51 = vld [vmem:[%s1950_s15 + $0xf4] sm:$0xf] }
  0x24   : > { %770 = vmatpush.bf16.msra.mxu0 %v1657_v18  ;;  %1781 = vmatpush.bf16.msra.mxu3 %v1657_v18 }
  0x25   : > { %859 = vmatpush.bf16.msra.mxu1 %v1665_v19 }
  0x26   : > { %948 = vmatpush.bf16.msra.mxu2 %v1959_v20 }
  0x28   : > { %771 = vmatpush.bf16.msra.mxu0 %v1656_v21  ;;  %1782 = vmatpush.bf16.msra.mxu3 %v1656_v21  ;;  %v1624_v21 = vld [vmem:[%s1950_s15 + $0x80] sm:$0xf0] }
  0x29   : > { %860 = vmatpush.bf16.msra.mxu1 %v1664_v22 }
  0x2a   : > { %949 = vmatpush.bf16.msra.mxu2 %v1970_v23 }
  0x2b   : > { %772 = vmatmul.bf16.vlgmr.msra.gmra.mxu0 %v1321_v32  ;;  %832 = vmatmul.bf16.vlgmr.msra.gmra.mxu3 %v1465_v33  ;;  %v1392_v32 = vld [vmem:[%s1950_s15 + $0x90] sm:$0xf]  ;;  %v1627_v33 = vld [vmem:[%s1950_s15 + $0x98] sm:$0xf0] }
  0x2c   : > { %1783 = vmatpush.bf16.msrb.mxu3 %v1863_v1  ;;  %861 = vmatmul.bf16.vlgmr.msra.gmra.mxu1 %v1325_v34  ;;  %v1358_v1 = vld [vmem:[%s1950_s15 + $0x54] sm:$0xf0]  ;;  %v1626_v34 = vld [vmem:[%s1950_s15 + $0x94] sm:$0xf]  ;;  %v1393_v40 = vor.u32 %v1627_v33, %v1392_v32 }
  0x2d   : > { %950 = vmatmul.bf16.vlgmr.msra.gmra.mxu2 %v1329_v35  ;;  %v1361_v6 = vor.u32 %v1617_v0, %v1358_v1  ;;  %v1650_v35 = vld [vmem:[%s1950_s15 + $0x154] sm:$0xf]  ;;  %v1397_v42 = vor.u32 %v1626_v34, %v1394_v37 }
  0x2e   : > { %v1493_v41 = vor.u32 %v1650_v35, %v1490_v36 }
  0x30   : > { %1784 = vmatpush.bf16.msrb.mxu3 %v1878_v4  ;;  %v1357_v4 = vor.u32 %v1618_v61, %v1356_v60  ;;  %v1646_v60 = vld [vmem:[%s1950_s15 + $0x130] sm:$0xf0]  ;;  %v1418_v61 = vld [vmem:[%s1950_s15 + $0xcc] sm:$0xf0] }
  0x34   : > { %1785 = vmatpush.bf16.msrb.mxu3 %v1893_v7 }
  0x38   : > { %1786 = vmatpush.bf16.msrb.mxu3 %v1909_v10  ;;  %v1620_v10 = vld [vmem:[%s1950_s15 + $0x64] sm:$0xf] }
  0x3b   : > { %777 = vmatmul.bf16.gmra.mxu0 %v1333_v44  ;;  %837 = vmatmul.bf16.gmra.mxu3 %v1477_v45  ;;  %v1404_v44 = vld [vmem:[%s1950_s15 + $0xa8] sm:$0xf]  ;;  %v1630_v45 = vld [vmem:[%s1950_s15 + $0xb0] sm:$0xf0] }
  0x3c   : > { %1787 = vmatpush.bf16.msrb.mxu3 %v1667_v13  ;;  %866 = vmatmul.bf16.gmra.mxu1 %v1337_v46  ;;  %v1370_v13 = vld [vmem:[%s1950_s15 + $0x6c] sm:$0xf0]  ;;  %v1629_v46 = vld [vmem:[%s1950_s15 + $0xac] sm:$0xf]  ;;  %v1405_v52 = vor.u32 %v1630_v45, %v1404_v44 }
  0x3d   : > { %955 = vmatmul.bf16.gmra.mxu2 %v1341_v47  ;;  %v1373_v18 = vor.u32 %v1620_v10, %v1370_v13  ;;  %v1653_v47 = vld [vmem:[%s1950_s15 + $0x16c] sm:$0xf]  ;;  %v1409_v54 = vor.u32 %v1629_v46, %v1406_v49  ;;  %v1639_v49 = vld [vmem:[%s1950_s15 + $0xf8] sm:$0xf0] }
  0x3e   : > { %v1505_v53 = vor.u32 %v1653_v47, %v1502_v48  ;;  %v1440_v48 = vld [vmem:[%s1950_s15 + $0xf0] sm:$0xf] }
  0x40   : > { %1788 = vmatpush.bf16.msrb.mxu3 %v1666_v16 }
  0x44   : > { %1789 = vmatpush.bf16.msrb.mxu3 %v1665_v19 }
  0x48   : > { %1790 = vmatpush.bf16.msrb.mxu3 %v1664_v22  ;;  %v1623_v22 = vld [vmem:[%s1950_s15 + $0x7c] sm:$0xf] }
  0x4b   : > { %782 = vmatmul.bf16.gmra.mxu0 %v1345_v56  ;;  %842 = vmatmul.bf16.gmra.mxu3 %v1489_v57  ;;  %v1416_v56 = vld [vmem:[%s1950_s15 + $0xc0] sm:$0xf]  ;;  %v1633_v57 = vld [vmem:[%s1950_s15 + $0xc8] sm:$0xf0] }
  0x4c   : > { %1791 = vmatpush.bf16.msra.mxu3 %v1868_v2  ;;  %871 = vmatmul.bf16.gmra.mxu1 %v1349_v58  ;;  %v1364_v2 = vld [vmem:[%s1950_s15 + $0x50] sm:$0xf]  ;;  %v1632_v58 = vld [vmem:[%s1950_s15 + $0xc4] sm:$0xf]  ;;  %v1417_v0 = vor.u32 %v1633_v57, %v1416_v56 }
  0x4d   : > { %960 = vmatmul.bf16.gmra.mxu2 %v1353_v59  ;;  %v1365_v7 = vor.u32 %v1619_v3, %v1364_v2  ;;  %v1472_v59 = vld [vmem:[%s1950_s15 + $0x128] sm:$0xf]  ;;  %v1421_v3 = vor.u32 %v1632_v58, %v1418_v61  ;;  %v1640_v56 = vld [vmem:[%s1950_s15 + $0x100] sm:$0xf0] }
  0x4e   : > { %v1473_v1 = vor.u32 %v1646_v60, %v1472_v59  ;;  %v1441_v60 = vor.u32 %v1639_v49, %v1440_v48 }
  0x50   : > { %1792 = vmatpush.bf16.msra.mxu3 %v1883_v5  ;;  %v1501_v5 = vor.u32 %v1654_v63, %v1500_v62  ;;  %v1424_v62 = vld [vmem:[%s1950_s15 + $0xc8] sm:$0xf]  ;;  %v1634_v63 = vld [vmem:[%s1950_s15 + $0xd0] sm:$0xf0] }
  0x54   : > { %1793 = vmatpush.bf16.msra.mxu3 %v1898_v8  ;;  %v1368_v8 = vld [vmem:[%s1950_s15 + $0x60] sm:$0xf] }
  0x55   : > { %v1369_v16 = vor.u32 %v1621_v9, %v1368_v8 }
  0x58   : > { %1794 = vmatpush.bf16.msra.mxu3 %v1914_v11  ;;  %v1644_v11 = vld [vmem:[%s1950_s15 + $0x124] sm:$0xf] }
  0x5b   : > { %787 = vmatmul.bf16.gmra.mxu0 %v1357_v4  ;;  %847 = vmatmul.bf16.gmra.mxu3 %v1501_v5  ;;  %v1425_v4 = vor.u32 %v1634_v63, %v1424_v62 }
  0x5c   : > { %1795 = vmatpush.bf16.msra.mxu3 %v1929_v14  ;;  %876 = vmatmul.bf16.gmra.mxu1 %v1361_v6  ;;  %v1376_v14 = vld [vmem:[%s1950_s15 + $0x68] sm:$0xf]  ;;  %v2061_v6 = vld [vmem:[%s2280_s2] ss:$0 sm:$0xff] }
  0x5d   : > { %965 = vmatmul.bf16.gmra.mxu2 %v1365_v7  ;;  %v1377_v19 = vor.u32 %v1622_v15, %v1376_v14  ;;  %v1428_v14 = vld [vmem:[%s1950_s15 + $0xd8] sm:$0xf]  ;;  %v1636_v15 = vld [vmem:[%s1950_s15 + $0xe0] sm:$0xf0] }
  0x5e   : > { %v1429_v26 = vor.u32 %v1636_v15, %v1428_v14 }
  0x60   : > { %1796 = vmatpush.bf16.msra.mxu3 %v1942_v17  ;;  %v1469_v17 = vor.u32 %v1644_v11, %v1466_v12 }
  0x64   : > { %1797 = vmatpush.bf16.msra.mxu3 %v1959_v20  ;;  %v1380_v20 = vld [vmem:[%s1950_s15 + $0x78] sm:$0xf] }
  0x65   : > { %v1381_v28 = vor.u32 %v1624_v21, %v1380_v20  ;;  %v1436_v20 = vld [vmem:[%s1950_s15 + $0xe0] sm:$0xf]  ;;  %v1637_v21 = vld [vmem:[%s1950_s15 + $0xe8] sm:$0xf0] }
  0x68   : > { %1798 = vmatpush.bf16.msra.mxu3 %v1970_v23  ;;  %v1382_v23 = vld [vmem:[%s1950_s15 + $0x84] sm:$0xf0] }
  0x69   : > { %v1385_v30 = vor.u32 %v1623_v22, %v1382_v23 }
  0x6b   : > { %792 = vmatmul.bf16.gmra.mxu0 %v1369_v16  ;;  %921 = vmatmul.bf16.vlgmr.msrb.gmra.mxu3 %v1469_v17  ;;  %v1635_v16 = vld [vmem:[%s1950_s15 + $0xdc] sm:$0xf]  ;;  %v1484_v17 = vld [vmem:[%s1950_s15 + $0x140] sm:$0xf] }
  0x6c   : > { %881 = vmatmul.bf16.gmra.mxu1 %v1373_v18  ;;  %v1649_v18 = vld [vmem:[%s1950_s15 + $0x148] sm:$0xf0] }
  0x6d   : > { %970 = vmatmul.bf16.gmra.mxu2 %v1377_v19  ;;  %v1430_v19 = vld [vmem:[%s1950_s15 + $0xe4] sm:$0xf0]  ;;  %v1485_v27 = vor.u32 %v1649_v18, %v1484_v17 }
  0x7b   : > { %797 = vmatmul.bf16.gmra.mxu0 %v1381_v28  ;;  %926 = vmatmul.bf16.gmra.mxu3 %v1481_v29 }
  0x7c   : > { %886 = vmatmul.bf16.gmra.mxu1 %v1385_v30  ;;  %v1433_v30 = vor.u32 %v1635_v16, %v1430_v19  ;;  %v1452_v19 = vld [vmem:[%s1950_s15 + $0x108] sm:$0xf] }
  0x7d   : > { %975 = vmatmul.bf16.gmra.mxu2 %v1389_v31  ;;  %v1437_v31 = vor.u32 %v1637_v21, %v1436_v20  ;;  %v1642_v20 = vld [vmem:[%s1950_s15 + $0x110] sm:$0xf0] }
  0x8b   : > { %802 = vmatmul.bf16.gmra.mxu0 %v1393_v40  ;;  %931 = vmatmul.bf16.gmra.mxu3 %v1493_v41 }
  0x8c   : > { %891 = vmatmul.bf16.gmra.mxu1 %v1397_v42 }
  0x8d   : > { %980 = vmatmul.bf16.gmra.mxu2 %v1401_v43 }
  0x9b   : > { %807 = vmatmul.bf16.gmra.mxu0 %v1405_v52  ;;  %936 = vmatmul.bf16.gmra.mxu3 %v1505_v53  ;;  %v1496_v52 = vld [vmem:[%s1950_s15 + $0x158] sm:$0xf]  ;;  %v1652_v53 = vld [vmem:[%s1950_s15 + $0x160] sm:$0xf0] }
  0x9c   : > { %896 = vmatmul.bf16.gmra.mxu1 %v1409_v54  ;;  %v1442_v54 = vld [vmem:[%s1950_s15 + $0xfc] sm:$0xf0]  ;;  %v1497_v61 = vor.u32 %v1652_v53, %v1496_v52 }
  0x9d   : > { %985 = vmatmul.bf16.gmra.mxu2 %v1413_v55  ;;  %v1448_v55 = vld [vmem:[%s1950_s15 + $0xf8] sm:$0xf] }
  0xa8   : > { %v773_v2 = vpop.f32.mrf.mxu0 }
  0xa9   : > { %v862_v5 = vpop.f32.mrf.mxu1  ;;  %v774_v7 = vadd.f32 %v2061_v6, %v773_v2 }
  0xab   : > { %812 = vmatmul.bf16.gmra.mxu0 %v1417_v0  ;;  %1010 = vmatmul.bf16.vlgmr.msra.gmra.mxu3 %v1473_v1  ;;  %v863_v12 = vadd.f32 %v862_v5, %v774_v7  ;;  %v1445_v0 = vor.u32 %v1638_v51, %v1442_v54  ;;  %v1449_v1 = vor.u32 %v1640_v56, %v1448_v55 }
  0xac   : > { %901 = vmatmul.bf16.gmra.mxu1 %v1421_v3 }
  0xad   : > { %990 = vmatmul.bf16.gmra.mxu2 %v1425_v4 }
  0xae   : > { %v2064_v8 = vpop.f32.mrf.mxu3 }
  0xb0   : > { %v951_v9 = vpop.f32.mrf.mxu2  ;;  %v775_v10 = vpop.f32.mrf.mxu0 }
  0xb1   : > { %v864_v11 = vpop.f32.mrf.mxu1  ;;  %v776_v13 = vadd.f32 %v2061_v6, %v775_v10  ;;  %v952_v22 = vadd.f32 %v951_v9, %v863_v12 }
  0xb3   : > { %v865_v24 = vadd.f32 %v864_v11, %v776_v13  ;;  %v1069_v34 = vmul.f32 %v952_v22, %v952_v22 }
  0xb6   : > { %v2075_v25 = vpop.f32.mrf.mxu3 }
  0xb8   : > { %v953_v23 = vpop.f32.mrf.mxu2  ;;  %v778_v29 = vpop.f32.mrf.mxu0 }
  0xb9   : > { %v954_v28 = vadd.f32 %v953_v23, %v865_v24  ;;  %v779_v32 = vadd.f32 %v2061_v6, %v778_v29  ;;  %v867_v33 = vpop.f32.mrf.mxu1  ;;  %v1508_v24 = vld [vmem:[%s1950_s15 + $0x170] sm:$0xf]  ;;  %v1655_v23 = vld [vmem:[%s1950_s15 + $0x178] sm:$0xf0] }
  0xbb   : > { %v1031_v35 = vadd.f32 %v954_v28, %v952_v22  ;;  %v1070_v36 = vmul.f32 %v954_v28, %v954_v28  ;;  %v1683_v37 = vpack.c.bf16 %v954_v28, %v952_v22  ;;  %817 = vmatmul.bf16.gmra.mxu0 %v1429_v26  ;;  %1015 = vmatmul.bf16.gmra.mxu3 %v1485_v27  ;;  %v1641_v22 = vld [vmem:[%s1950_s15 + $0x10c] sm:$0xf]  ;;  %v1454_v26 = vld [vmem:[%s1950_s15 + $0x114] sm:$0xf0]  ;;  %v1460_v27 = vld [vmem:[%s1950_s15 + $0x110] sm:$0xf] }
  0xbc   : > { %v868_v39 = vadd.f32 %v867_v33, %v779_v32  ;;  %906 = vmatmul.bf16.gmra.mxu1 %v1433_v30  ;;  %v1643_v28 = vld [vmem:[%s1950_s15 + $0x118] sm:$0xf0]  ;;  %v1453_v32 = vor.u32 %v1642_v20, %v1452_v19  ;;  %v1509_v33 = vor.u32 %v1655_v23, %v1508_v24 }
  0xbd   : > { %v1101_v38 = vadd.f32 %v1070_v36, %v1069_v34  ;;  %1684 = vst [vmem:[%s2081_s8] sm:$0xff] %v1683_v37   ;;  %995 = vmatmul.bf16.gmra.mxu2 %v1437_v31  ;;  %v1457_v36 = vor.u32 %v1641_v22, %v1454_v26  ;;  %v1461_v37 = vor.u32 %v1643_v28, %v1460_v27 }
  0xbe   : > { %v2085_v40 = vpop.f32.mrf.mxu3 }
  0xc0   : > { %v956_v41 = vpop.f32.mrf.mxu2  ;;  %v780_v43 = vpop.f32.mrf.mxu0 }
  0xc1   : > { %v957_v42 = vadd.f32 %v956_v41, %v868_v39  ;;  %v869_v44 = vpop.f32.mrf.mxu1  ;;  %v781_v47 = vadd.f32 %v2061_v6, %v780_v43 }
  0xc3   : > { %v1032_v45 = vadd.f32 %v1031_v35, %v957_v42  ;;  %v1071_v46 = vmul.f32 %v957_v42, %v957_v42  ;;  %v870_v57 = vadd.f32 %v869_v44, %v781_v47 }
  0xc5   : > { %v1102_v50 = vadd.f32 %v1101_v38, %v1071_v46 }
  0xc6   : > { %v2096_v58 = vpop.f32.mrf.mxu3 }
  0xc8   : > { %v958_v59 = vpop.f32.mrf.mxu2  ;;  %v783_v63 = vpop.f32.mrf.mxu0 }
  0xc9   : > { %v959_v62 = vadd.f32 %v958_v59, %v870_v57  ;;  %v784_v2 = vadd.f32 %v2061_v6, %v783_v63  ;;  %v872_v3 = vpop.f32.mrf.mxu1 }
  0xcb   : > { %v1033_v4 = vadd.f32 %v1032_v45, %v959_v62  ;;  %v1072_v5 = vmul.f32 %v959_v62, %v959_v62  ;;  %v1688_v7 = vpack.c.bf16 %v959_v62, %v957_v42  ;;  %822 = vmatmul.bf16.gmra.mxu0 %v1441_v60  ;;  %1020 = vmatmul.bf16.gmra.mxu3 %v1497_v61 }
  0xcc   : > { %v873_v10 = vadd.f32 %v872_v3, %v784_v2  ;;  %911 = vmatmul.bf16.gmra.mxu1 %v1445_v0 }
  0xcd   : > { %v1103_v9 = vadd.f32 %v1102_v50, %v1072_v5  ;;  %1760 = vst [vmem:[%s2081_s8 + $0x8] sm:$0xff] %v1688_v7   ;;  %1000 = vmatmul.bf16.gmra.mxu2 %v1449_v1 }
  0xce   : > { %v2100_v11 = vpop.f32.mrf.mxu3 }
  0xd0   : > { %v961_v12 = vpop.f32.mrf.mxu2  ;;  %v785_v14 = vpop.f32.mrf.mxu0 }
  0xd1   : > { %v962_v13 = vadd.f32 %v961_v12, %v873_v10  ;;  %v874_v15 = vpop.f32.mrf.mxu1  ;;  %v786_v18 = vadd.f32 %v2061_v6, %v785_v14 }
  0xd3   : > { %v1034_v16 = vadd.f32 %v1033_v4, %v962_v13  ;;  %v1073_v17 = vmul.f32 %v962_v13, %v962_v13  ;;  %v875_v29 = vadd.f32 %v874_v15, %v786_v18  ;;  %v834_v4 = vadd.f32 %v2061_v6, %v2064_v8 }
  0xd5   : > { %v1104_v21 = vadd.f32 %v1103_v9, %v1073_v17 }
  0xd6   : > { %v2111_v30 = vpop.f32.mrf.mxu3 }
  0xd8   : > { %v963_v31 = vpop.f32.mrf.mxu2  ;;  %v788_v35 = vpop.f32.mrf.mxu0 }
  0xd9   : > { %v964_v34 = vadd.f32 %v963_v31, %v875_v29  ;;  %v789_v38 = vadd.f32 %v2061_v6, %v788_v35  ;;  %v877_v39 = vpop.f32.mrf.mxu1  ;;  %v839_v31 = vadd.f32 %v2061_v6, %v2085_v40 }
  0xdb   : > { %v1035_v41 = vadd.f32 %v1034_v16, %v964_v34  ;;  %v1074_v42 = vmul.f32 %v964_v34, %v964_v34  ;;  %v1693_v43 = vpack.c.bf16 %v964_v34, %v962_v13  ;;  %827 = vmatmul.bf16.gmra.mxu0 %v1453_v32  ;;  %1025 = vmatmul.bf16.gmra.mxu3 %v1509_v33 }
  0xdc   : > { %v878_v45 = vadd.f32 %v877_v39, %v789_v38  ;;  %916 = vmatmul.bf16.gmra.mxu1 %v1457_v36 }
  0xdd   : > { %v1105_v44 = vadd.f32 %v1104_v21, %v1074_v42  ;;  %1761 = vst [vmem:[%s2081_s8 + $0x10] sm:$0xff] %v1693_v43   ;;  %1005 = vmatmul.bf16.gmra.mxu2 %v1461_v37 }
  0xde   : > { %v2115_v46 = vpop.f32.mrf.mxu3 }
  0xe0   : > { %v966_v47 = vpop.f32.mrf.mxu2  ;;  %v790_v49 = vpop.f32.mrf.mxu0 }
  0xe1   : > { %v967_v48 = vadd.f32 %v966_v47, %v878_v45  ;;  %v879_v50 = vpop.f32.mrf.mxu1  ;;  %v791_v53 = vadd.f32 %v2061_v6, %v790_v49 }
  0xe3   : > { %v1036_v51 = vadd.f32 %v1035_v41, %v967_v48  ;;  %v1075_v52 = vmul.f32 %v967_v48, %v967_v48  ;;  %v880_v55 = vadd.f32 %v879_v50, %v791_v53  ;;  %v844_v53 = vadd.f32 %v2061_v6, %v2100_v11 }
  0xe5   : > { %v1106_v54 = vadd.f32 %v1105_v44, %v1075_v52 }
  0xe6   : > { %v2118_v56 = vpop.f32.mrf.mxu3 }
  0xe8   : > { %v968_v57 = vpop.f32.mrf.mxu2  ;;  %v793_v60 = vpop.f32.mrf.mxu0 }
  0xe9   : > { %v969_v59 = vadd.f32 %v968_v57, %v880_v55  ;;  %v794_v61 = vadd.f32 %v2061_v6, %v793_v60  ;;  %v882_v62 = vpop.f32.mrf.mxu1 }
  0xeb   : > { %v1037_v63 = vadd.f32 %v1036_v51, %v969_v59  ;;  %v1076_v0 = vmul.f32 %v969_v59, %v969_v59  ;;  %v1698_v1 = vpack.c.bf16 %v969_v59, %v967_v48  ;;  %v883_v3 = vadd.f32 %v882_v62, %v794_v61 }
  0xed   : > { %v1107_v2 = vadd.f32 %v1106_v54, %v1076_v0  ;;  %1762 = vst [vmem:[%s2081_s8 + $0x18] sm:$0xff] %v1698_v1  }
  0xee   : > { %v922_v5 = vpop.f32.mrf.mxu3 }
  0xef   : > { %v2124_v7 = vadd.f32 %v922_v5, %v834_v4 }
  0xf0   : > { %v971_v9 = vpop.f32.mrf.mxu2  ;;  %v795_v12 = vpop.f32.mrf.mxu0 }
  0xf1   : > { %v972_v10 = vadd.f32 %v971_v9, %v883_v3  ;;  %v884_v13 = vpop.f32.mrf.mxu1  ;;  %v796_v16 = vadd.f32 %v2061_v6, %v795_v12 }
  0xf3   : > { %v1038_v14 = vadd.f32 %v1037_v63, %v972_v10  ;;  %v1077_v15 = vmul.f32 %v972_v10, %v972_v10  ;;  %v885_v18 = vadd.f32 %v884_v13, %v796_v16 }
  0xf5   : > { %v1108_v17 = vadd.f32 %v1107_v2, %v1077_v15 }
  0xf6   : > { %v2127_v19 = vpop.f32.mrf.mxu3 }
  0xf8   : > { %v973_v20 = vpop.f32.mrf.mxu2  ;;  %v798_v22 = vpop.f32.mrf.mxu0 }
  0xf9   : > { %v974_v21 = vadd.f32 %v973_v20, %v885_v18  ;;  %v799_v8 = vadd.f32 %v2061_v6, %v798_v22  ;;  %v887_v24 = vpop.f32.mrf.mxu1 }
  0xfb   : > { %v1039_v23 = vadd.f32 %v1038_v14, %v974_v21  ;;  %v1078_v26 = vmul.f32 %v974_v21, %v974_v21  ;;  %v1703_v27 = vpack.c.bf16 %v974_v21, %v972_v10  ;;  %v888_v29 = vadd.f32 %v887_v24, %v799_v8 }
  0xfc   : > { %v849_v10 = vadd.f32 %v2061_v6, %v2115_v46 }
  0xfd   : > { %v1109_v28 = vadd.f32 %v1108_v17, %v1078_v26  ;;  %1763 = vst [vmem:[%s2081_s8 + $0x20] sm:$0xff] %v1703_v27  }
  0xfe   : > { %v927_v32 = vpop.f32.mrf.mxu3 }
  0xff   : > { %v2133_v33 = vadd.f32 %v927_v32, %v839_v31 }
 0x100   : > { %v976_v34 = vpop.f32.mrf.mxu2  ;;  %v800_v36 = vpop.f32.mrf.mxu0 }
 0x101   : > { %v977_v35 = vadd.f32 %v976_v34, %v888_v29  ;;  %v889_v37 = vpop.f32.mrf.mxu1  ;;  %v801_v41 = vadd.f32 %v2061_v6, %v800_v36  ;;  %v836_v36 = vadd.f32 %v2061_v6, %v2075_v25 }
 0x103   : > { %v1040_v38 = vadd.f32 %v1039_v23, %v977_v35  ;;  %v1079_v39 = vmul.f32 %v977_v35, %v977_v35  ;;  %v890_v43 = vadd.f32 %v889_v37, %v801_v41 }
 0x105   : > { %v1110_v42 = vadd.f32 %v1109_v28, %v1079_v39 }
 0x106   : > { %v2136_v44 = vpop.f32.mrf.mxu3 }
 0x108   : > { %v978_v45 = vpop.f32.mrf.mxu2  ;;  %v803_v48 = vpop.f32.mrf.mxu0 }
 0x109   : > { %v979_v47 = vadd.f32 %v978_v45, %v890_v43  ;;  %v892_v40 = vpop.f32.mrf.mxu1  ;;  %v804_v59 = vadd.f32 %v2061_v6, %v803_v48 }
 0x10b   : > { %v2138_v49 = vadd.f32 %v1040_v38, %v979_v47  ;;  %v1080_v50 = vmul.f32 %v979_v47, %v979_v47  ;;  %v1708_v51 = vpack.c.bf16 %v979_v47, %v977_v35  ;;  %v893_v63 = vadd.f32 %v892_v40, %v804_v59 }
 0x10c   : > { %v925_v38 = vadd.f32 %v2127_v19, %v836_v36 }
 0x10d   : > { %v2140_v52 = vadd.f32 %v1110_v42, %v1080_v50  ;;  %1764 = vst [vmem:[%s2081_s8 + $0x28] sm:$0xff] %v1708_v51  }
 0x10e   : > { %v932_v54 = vpop.f32.mrf.mxu3 }
 0x10f   : > { %v2145_v55 = vadd.f32 %v932_v54, %v844_v53 }
 0x110   : > { %v981_v57 = vpop.f32.mrf.mxu2  ;;  %v805_v60 = vpop.f32.mrf.mxu0 }
 0x111   : > { %v894_v61 = vpop.f32.mrf.mxu1  ;;  %v806_v62 = vadd.f32 %v2061_v6, %v805_v60  ;;  %v2151_v3 = vadd.f32 %v981_v57, %v893_v63  ;;  %v841_v60 = vadd.f32 %v2061_v6, %v2096_v58 }
 0x113   : > { %v895_v0 = vadd.f32 %v894_v61, %v806_v62  ;;  %v930_v62 = vadd.f32 %v2136_v44, %v841_v60 }
 0x116   : > { %v2149_v1 = vpop.f32.mrf.mxu3 }
 0x118   : > { %v983_v2 = vpop.f32.mrf.mxu2  ;;  %v808_v11 = vpop.f32.mrf.mxu0 }
 0x119   : > { %v2153_v4 = vadd.f32 %v983_v2, %v895_v0  ;;  %v897_v5 = vpop.f32.mrf.mxu1  ;;  %v809_v15 = vadd.f32 %v2061_v6, %v808_v11 }
 0x11b   : > { %v1713_v9 = vpack.c.bf16 %v2153_v4, %v2151_v3  ;;  %v898_v20 = vadd.f32 %v897_v5, %v809_v15 }
 0x11d   : > { %1765 = vst [vmem:[%s2081_s8 + $0x30] sm:$0xff] %v1713_v9  }
 0x11e   : > { %v937_v12 = vpop.f32.mrf.mxu3 }
 0x11f   : > { %v2160_v13 = vadd.f32 %v937_v12, %v849_v10 }
 0x120   : > { %v986_v14 = vpop.f32.mrf.mxu2  ;;  %v810_v16 = vpop.f32.mrf.mxu0 }
 0x121   : > { %v899_v17 = vpop.f32.mrf.mxu1  ;;  %v811_v18 = vadd.f32 %v2061_v6, %v810_v16  ;;  %v2166_v24 = vadd.f32 %v986_v14, %v898_v20 }
 0x123   : > { %v900_v21 = vadd.f32 %v899_v17, %v811_v18 }
 0x126   : > { %v2164_v22 = vpop.f32.mrf.mxu3 }
 0x128   : > { %v988_v8 = vpop.f32.mrf.mxu2  ;;  %v813_v46 = vpop.f32.mrf.mxu0 }
 0x129   : > { %v2168_v23 = vadd.f32 %v988_v8, %v900_v21  ;;  %v902_v26 = vpop.f32.mrf.mxu1  ;;  %v814_v31 = vadd.f32 %v2061_v6, %v813_v46  ;;  %v846_v8 = vadd.f32 %v2061_v6, %v2111_v30  ;;  %v1082_v46 = vmul.f32 %v2153_v4, %v2153_v4 }
 0x12b   : > { %v1718_v27 = vpack.c.bf16 %v2168_v23, %v2166_v24  ;;  %v903_v37 = vadd.f32 %v902_v26, %v814_v31  ;;  %v1042_v26 = vadd.f32 %v2138_v49, %v2151_v3  ;;  %v1083_v31 = vmul.f32 %v2166_v24, %v2166_v24 }
 0x12c   : > { %v1084_v30 = vmul.f32 %v2168_v23, %v2168_v23 }
 0x12d   : > { %1766 = vst [vmem:[%s2081_s8 + $0x38] sm:$0xff] %v1718_v27  }
 0x12e   : > { %v1011_v28 = vpop.f32.mrf.mxu3 }
 0x12f   : > { %v2179_v42 = vadd.f32 %v1011_v28, %v2124_v7 }
 0x130   : > { %v991_v29 = vpop.f32.mrf.mxu2  ;;  %v815_v32 = vpop.f32.mrf.mxu0 }
 0x131   : > { %v904_v34 = vpop.f32.mrf.mxu1  ;;  %v816_v35 = vadd.f32 %v2061_v6, %v815_v32  ;;  %v2183_v47 = vadd.f32 %v991_v29, %v903_v37  ;;  %v935_v29 = vadd.f32 %v2149_v1, %v846_v8  ;;  %v1043_v32 = vadd.f32 %v1042_v26, %v2153_v4 }
 0x133   : > { %v905_v39 = vadd.f32 %v904_v34, %v816_v35 }
 0x136   : > { %v1013_v41 = vpop.f32.mrf.mxu3 }
 0x137   : > { %v2181_v45 = vadd.f32 %v1013_v41, %v925_v38  ;;  %v1085_v41 = vmul.f32 %v2183_v47, %v2183_v47 }
 0x138   : > { %v993_v43 = vpop.f32.mrf.mxu2  ;;  %v818_v40 = vpop.f32.mrf.mxu0 }
 0x139   : > { %v2185_v48 = vadd.f32 %v993_v43, %v905_v39  ;;  %v1743_v50 = vpack.c.bf16 %v2181_v45, %v2179_v42  ;;  %v907_v25 = vpop.f32.mrf.mxu1  ;;  %v819_v53 = vadd.f32 %v2061_v6, %v818_v40 }
 0x13b   : > { %v1723_v19 = vpack.c.bf16 %v2185_v48, %v2183_v47  ;;  %1771 = vst [vmem:[%s2081_s8 + $0x60] sm:$0xff] %v1743_v50   ;;  %v908_v61 = vadd.f32 %v907_v25, %v819_v53 }
 0x13d   : > { %1767 = vst [vmem:[%s2081_s8 + $0x40] sm:$0xff] %v1723_v19   ;;  %v1086_v19 = vmul.f32 %v2185_v48, %v2185_v48 }
 0x13e   : > { %v1016_v51 = vpop.f32.mrf.mxu3 }
 0x13f   : > { %v2199_v2 = vadd.f32 %v1016_v51, %v2133_v33  ;;  %v1081_v33 = vmul.f32 %v2151_v3, %v2151_v3 }
 0x140   : > { %v996_v7 = vpop.f32.mrf.mxu2  ;;  %v820_v54 = vpop.f32.mrf.mxu0 }
 0x141   : > { %v909_v57 = vpop.f32.mrf.mxu1  ;;  %v821_v59 = vadd.f32 %v2061_v6, %v820_v54  ;;  %v997_v9 = vadd.f32 %v996_v7, %v908_v61  ;;  %v1112_v28 = vadd.f32 %v2140_v52, %v1081_v33  ;;  %v1044_v52 = vadd.f32 %v1043_v32, %v2166_v24 }
 0x142   : > { %v1093_v32 = vmul.f32 %v2179_v42, %v2179_v42 }
 0x143   : > { %v910_v63 = vadd.f32 %v909_v57, %v821_v59  ;;  %v1113_v36 = vadd.f32 %v1112_v28, %v1082_v46  ;;  %v1045_v40 = vadd.f32 %v1044_v52, %v2168_v23  ;;  %v1087_v53 = vmul.f32 %v997_v9, %v997_v9 }
 0x145   : > { %v1114_v4 = vadd.f32 %v1113_v36, %v1083_v31  ;;  %v1046_v51 = vadd.f32 %v1045_v40, %v2183_v47  ;;  %v851_v47 = vadd.f32 %v2061_v6, %v2118_v56 }
 0x146   : > { %v1018_v0 = vpop.f32.mrf.mxu3 }
 0x147   : > { %v2201_v5 = vadd.f32 %v1018_v0, %v930_v62  ;;  %v1115_v25 = vadd.f32 %v1114_v4, %v1084_v30  ;;  %v1047_v54 = vadd.f32 %v1046_v51, %v2185_v48  ;;  %v940_v48 = vadd.f32 %v2164_v22, %v851_v47 }
 0x148   : > { %v998_v11 = vpop.f32.mrf.mxu2  ;;  %v823_v12 = vpop.f32.mrf.mxu0 }
 0x149   : > { %v999_v10 = vadd.f32 %v998_v11, %v910_v63  ;;  %v1748_v14 = vpack.c.bf16 %v2201_v5, %v2199_v2  ;;  %v912_v15 = vpop.f32.mrf.mxu1  ;;  %v824_v17 = vadd.f32 %v2061_v6, %v823_v12  ;;  %v1116_v7 = vadd.f32 %v1115_v25, %v1085_v41 }
 0x14a   : > { %v1048_v61 = vadd.f32 %v1047_v54, %v997_v9 }
 0x14b   : > { %v1728_v16 = vpack.c.bf16 %v999_v10, %v997_v9  ;;  %1772 = vst [vmem:[%s2081_s8 + $0x68] sm:$0xff] %v1748_v14   ;;  %v913_v27 = vadd.f32 %v912_v15, %v824_v17  ;;  %v1117_v60 = vadd.f32 %v1116_v7, %v1086_v19  ;;  %v1088_v62 = vmul.f32 %v999_v10, %v999_v10 }
 0x14c   : > { %v1049_v11 = vadd.f32 %v1048_v61, %v999_v10 }
 0x14d   : > { %1768 = vst [vmem:[%s2081_s8 + $0x48] sm:$0xff] %v1728_v16   ;;  %v1118_v0 = vadd.f32 %v1117_v60, %v1087_v53 }
 0x14e   : > { %v1021_v58 = vpop.f32.mrf.mxu3 }
 0x14f   : > { %v2225_v37 = vadd.f32 %v1021_v58, %v2145_v55  ;;  %v1119_v16 = vadd.f32 %v1118_v0, %v1088_v62 }
 0x150   : > { %v1001_v44 = vpop.f32.mrf.mxu2  ;;  %v825_v18 = vpop.f32.mrf.mxu0 }
 0x151   : > { %v914_v20 = vpop.f32.mrf.mxu1  ;;  %v826_v21 = vadd.f32 %v2061_v6, %v825_v18  ;;  %v1002_v1 = vadd.f32 %v1001_v44, %v913_v27  ;;  %v1097_v4 = vmul.f32 %v2225_v37, %v2225_v37 }
 0x153   : > { %v915_v34 = vadd.f32 %v914_v20, %v826_v21  ;;  %v1089_v12 = vmul.f32 %v1002_v1, %v1002_v1  ;;  %v1050_v58 = vadd.f32 %v1049_v11, %v1002_v1 }
 0x155   : > { %v1120_v18 = vadd.f32 %v1119_v16, %v1089_v12 }
 0x156   : > { %v1023_v35 = vpop.f32.mrf.mxu3 }
 0x157   : > { %v2227_v3 = vadd.f32 %v1023_v35, %v935_v29 }
 0x158   : > { %v1003_v49 = vpop.f32.mrf.mxu2  ;;  %v828_v39 = vpop.f32.mrf.mxu0 }
 0x159   : > { %v1004_v38 = vadd.f32 %v1003_v49, %v915_v34  ;;  %v1753_v43 = vpack.c.bf16 %v2227_v3, %v2225_v37  ;;  %v829_v50 = vadd.f32 %v2061_v6, %v828_v39  ;;  %v917_v24 = vpop.f32.mrf.mxu1  ;;  %v1095_v49 = vmul.f32 %v2199_v2, %v2199_v2 }
 0x15b   : > { %v1733_v55 = vpack.c.bf16 %v1004_v38, %v1002_v1  ;;  %1773 = vst [vmem:[%s2081_s8 + $0x70] sm:$0xff] %v1753_v43   ;;  %v918_v57 = vadd.f32 %v917_v24, %v829_v50  ;;  %v1090_v44 = vmul.f32 %v1004_v38, %v1004_v38  ;;  %v1051_v9 = vadd.f32 %v1050_v58, %v1004_v38 }
 0x15c   : > { %v1096_v38 = vmul.f32 %v2201_v5, %v2201_v5  ;;  %v1098_v43 = vmul.f32 %v2227_v3, %v2227_v3 }
 0x15d   : > { %1769 = vst [vmem:[%s2081_s8 + $0x50] sm:$0xff] %v1733_v55   ;;  %v1121_v26 = vadd.f32 %v1120_v18, %v1090_v44 }
 0x15e   : > { %v1026_v59 = vpop.f32.mrf.mxu3 }
 0x15f   : > { %v1027_v10 = vadd.f32 %v1026_v59, %v2160_v13  ;;  %v1094_v13 = vmul.f32 %v2181_v45, %v2181_v45 }
 0x160   : > { %v1006_v23 = vpop.f32.mrf.mxu2  ;;  %v830_v63 = vpop.f32.mrf.mxu0 }
 0x161   : > { %v1007_v14 = vadd.f32 %v1006_v23, %v918_v57  ;;  %v831_v15 = vadd.f32 %v2061_v6, %v830_v63  ;;  %v919_v17 = vpop.f32.mrf.mxu1  ;;  %v1099_v55 = vmul.f32 %v1027_v10, %v1027_v10 }
 0x163   : > { %v1091_v33 = vmul.f32 %v1007_v14, %v1007_v14  ;;  %v920_v20 = vadd.f32 %v919_v17, %v831_v15  ;;  %v1052_v27 = vadd.f32 %v1051_v9, %v1007_v14 }
 0x165   : > { %v1122_v28 = vadd.f32 %v1121_v26, %v1091_v33 }
 0x166   : > { %v1028_v21 = vpop.f32.mrf.mxu3 }
 0x167   : > { %v1029_v46 = vadd.f32 %v1028_v21, %v940_v48 }
 0x168   : > { %v1008_v8 = vpop.f32.mrf.mxu2 }
 0x169   : > { %v1009_v6 = vadd.f32 %v1008_v8, %v920_v20  ;;  %v1758_v56 = vpack.c.bf16 %v1029_v46, %v1027_v10  ;;  %v1100_v24 = vmul.f32 %v1029_v46, %v1029_v46 }
 0x16b   : > { %v1053_v29 = vadd.f32 %v1052_v27, %v1009_v6  ;;  %v1092_v31 = vmul.f32 %v1009_v6, %v1009_v6  ;;  %v1738_v22 = vpack.c.bf16 %v1009_v6, %v1007_v14  ;;  %1774 = vst [vmem:[%s2081_s8 + $0x78] sm:$0xff] %v1758_v56  }
 0x16d   : > { %v1054_v34 = vadd.f32 %v1053_v29, %v2179_v42  ;;  %v1123_v35 = vadd.f32 %v1122_v28, %v1092_v31  ;;  %1770 = vst [vmem:[%s2081_s8 + $0x58] sm:$0xff] %v1738_v22  }
 0x16f   : > { %v1055_v36 = vadd.f32 %v1054_v34, %v2181_v45  ;;  %v1124_v30 = vadd.f32 %v1123_v35, %v1093_v32 }
 0x171   : > { %v1056_v52 = vadd.f32 %v1055_v36, %v2199_v2  ;;  %v1125_v1 = vadd.f32 %v1124_v30, %v1094_v13 }
 0x173   : > { %v1126_v39 = vadd.f32 %v1125_v1, %v1095_v49  ;;  %v1057_v42 = vadd.f32 %v1056_v52, %v2201_v5 }
 0x175   : > { %v1058_v41 = vadd.f32 %v1057_v42, %v2225_v37  ;;  %v1127_v45 = vadd.f32 %v1126_v39, %v1096_v38 }
 0x177   : > { %v1059_v2 = vadd.f32 %v1058_v41, %v2227_v3  ;;  %v1128_v40 = vadd.f32 %v1127_v45, %v1097_v4 }
 0x179   : > { %v1060_v50 = vadd.f32 %v1059_v2, %v1027_v10  ;;  %v1129_v25 = vadd.f32 %v1128_v40, %v1098_v43 }
 0x17b   : > { %v1061_v19 = vadd.f32 %v1060_v50, %v1029_v46  ;;  %v1130_v51 = vadd.f32 %v1129_v25, %v1099_v55 }
 0x17d   : > { %v1062_v5 = vrot.slane %v1061_v19, 4  ;;  %v1131_v7 = vadd.f32 %v1130_v51, %v1100_v24 }
 0x17f   : > { %v1063_v53 = vadd.f32 %v1062_v5, %v1061_v19  ;;  %v1132_v54 = vrot.slane %v1131_v7, 4 }
 0x181   : > { %v1064_v37 = vrot.slane %v1063_v53, 2  ;;  %v1133_v57 = vadd.f32 %v1132_v54, %v1131_v7 }
 0x183   : > { %v1065_v59 = vadd.f32 %v1064_v37, %v1063_v53  ;;  %v1134_v60 = vrot.slane %v1133_v57, 2 }
 0x185   : > { %v1066_v23 = vrot.slane %v1065_v59, 1  ;;  %v1135_v61 = vadd.f32 %v1134_v60, %v1133_v57 }
 0x187   : > { %v1067_v3 = vadd.f32 %v1066_v23, %v1065_v59  ;;  %v1136_v62 = vrot.slane %v1135_v61, 1 }
 0x189   : > { %1068 = vst [vmem:[%s244_s10] sm:$0x1] %v1067_v3  ;;  %v1137_v63 = vadd.f32 %v1136_v62, %v1135_v61 }
 0x18b   : > { %1138 = vst [vmem:[%s247_s14] sm:$0x1] %v1137_v63 }
 0x18c PF: > { %s16_s18 = sadd.s32 1, %s1815_s18  }
 0x18d   : > { %p13_p5 = scmp.ge.s32.totalorder %s16_s18, 4  }
 0x18f   :  { %15 = sbr.rel (!%p13_p5) target bundleno = 1 (0x1), region = 86 }

// kernel: forward.19
= control target key start
LH: loop header
LB: loop body
LE: loop exit
PB: predicated region body
PF: predicated region fallthrough
CT: control target
= control target key end

     0   :  { %s1201_s18 = smov 0   ;;  %s1382_s0 = inlined_call_operand.vmem [shape: bf16[128,512], index: 0, kind: input, shape index: {}]   ;;  %s1383_s1 = inlined_call_operand.vmem [shape: bf16[512,128], index: 1, kind: input, shape index: {}]   ;;  %s1384_s2 = inlined_call_operand.vmem [shape: f32[1,128], index: 2, kind: input, shape index: {}]   ;;  %s1385_s3 = inlined_call_operand.vmem [shape: bf16[128,128], index: 3, kind: output, shape index: {0}]   ;;  %s1386_s4 = inlined_call_operand.vmem [shape: f32[2,1,128], index: 4, kind: output, shape index: {1}]   ;;  %s1387_s5 = inlined_call_operand.vmem [shape: f32[2,1,128], index: 5, kind: output, shape index: {2}]  }
   0x1 LB: > { %s1207_s19 = sadd.s32 4294967295, %s1169_s18   ;;  %p882_p0 = scmp.ge.s32.totalorder %s1169_s18, 1  ;;  %s1169_s18 = sphi %s1201_s18, %s16_s18  }
   0x2   : > { %p194_p1 = scmp.lt.s32.totalorder %s1169_s18, 3 }
   0x4   : > { %p195_p2 = pnand %p882_p0, %p194_p1 }
   0x5   : > { %s883_s21 = sshll.u32 (!%p195_p2), %s1207_s19, 3  ;;  %p242_p4 = scmp.lt.s32.totalorder (!%p195_p2), %s1207_s19, 1 }
   0x6   : > { %198 = sbr.rel (%p195_p2) target bundleno = 254 (0xfe), region = 32  ;;  %p230_p3 = scmp.lt.s32.totalorder (!%p195_p2), %s883_s21, 15 }
   0xb   : > { %v1106_v0 = vld [vmem:[%s1383_s1 + $0x38] sm:$0xff]  ;;  %v1105_v4 = vld [vmem:[%s1383_s1 + $0x30] sm:$0xff]  ;;  %v1104_v8 = vld [vmem:[%s1383_s1 + $0x28] sm:$0xff]  ;;  %s1389_s21 = smov (!%p230_p3, %s883_s21), 15  ;;  %s1391_s19 = smov (!%p242_p4, %s1207_s19), 1 }
   0xc   : > { %v1114_v1 = vld [vmem:[%s1383_s1 + $0x78] sm:$0xff]  ;;  %604 = vmatpush.bf16.msra.mxu0 %v1106_v0  ;;  %v1113_v5 = vld [vmem:[%s1383_s1 + $0x70] sm:$0xff]  ;;  %v1112_v9 = vld [vmem:[%s1383_s1 + $0x68] sm:$0xff]  ;;  %s1082_s24 = sshll.u32 %s1389_s21, 4  ;;  %s244_s29 = scalar_lea.vmem %s1386_s4, %s1391_s19 }
   0xd   : > { %v1122_v2 = vld [vmem:[%s1383_s1 + $0xb8] sm:$0xff]  ;;  %633 = vmatpush.bf16.msra.mxu1 %v1114_v1  ;;  %v1121_v6 = vld [vmem:[%s1383_s1 + $0xb0] sm:$0xff]  ;;  %v1120_v10 = vld [vmem:[%s1383_s1 + $0xa8] sm:$0xff]  ;;  %s1296_s6 = scalar_lea.vmem %s1382_s0, %s1082_s24  ;;  %s887_s24 = sshll.u32 %s1389_s21, 2 }
   0xe   : > { %v1130_v3 = vld [vmem:[%s1383_s1 + $0xf8] sm:$0xff]  ;;  %662 = vmatpush.bf16.msra.mxu2 %v1122_v2  ;;  %v1129_v7 = vld [vmem:[%s1383_s1 + $0xf0] sm:$0xff]  ;;  %v1128_v11 = vld [vmem:[%s1383_s1 + $0xe8] sm:$0xff]  ;;  %s1359_s27 = scalar_lea.vmem %s1385_s3, %s887_s24  ;;  %s247_s7 = scalar_lea.vmem %s1387_s5, %s1391_s19 }
   0xf   : > { %691 = vmatpush.bf16.msra.mxu3 %v1130_v3  ;;  %v1103_v12 = vld [vmem:[%s1383_s1 + $0x20] sm:$0xff]  ;;  %v1102_v16 = vld [vmem:[%s1383_s1 + $0x18] sm:$0xff]  ;;  %v1101_v20 = vld [vmem:[%s1383_s1 + $0x10] sm:$0xff] }
  0x10   : > { %605 = vmatpush.bf16.msra.mxu0 %v1105_v4  ;;  %v1111_v13 = vld [vmem:[%s1383_s1 + $0x60] sm:$0xff]  ;;  %v1110_v17 = vld [vmem:[%s1383_s1 + $0x58] sm:$0xff]  ;;  %v1109_v21 = vld [vmem:[%s1383_s1 + $0x50] sm:$0xff] }
  0x11   : > { %634 = vmatpush.bf16.msra.mxu1 %v1113_v5  ;;  %v1119_v14 = vld [vmem:[%s1383_s1 + $0xa0] sm:$0xff]  ;;  %v1118_v18 = vld [vmem:[%s1383_s1 + $0x98] sm:$0xff]  ;;  %v1117_v22 = vld [vmem:[%s1383_s1 + $0x90] sm:$0xff] }
  0x12   : > { %663 = vmatpush.bf16.msra.mxu2 %v1121_v6  ;;  %v1127_v15 = vld [vmem:[%s1383_s1 + $0xe0] sm:$0xff]  ;;  %v1126_v19 = vld [vmem:[%s1383_s1 + $0xd8] sm:$0xff]  ;;  %v1125_v23 = vld [vmem:[%s1383_s1 + $0xd0] sm:$0xff] }
  0x13   : > { %692 = vmatpush.bf16.msra.mxu3 %v1129_v7  ;;  %v1100_v24 = vld [vmem:[%s1383_s1 + $0x8] sm:$0xff]  ;;  %v1099_v28 = vld [vmem:[%s1383_s1] sm:$0xff]  ;;  %v1085_v33 = vld [vmem:[%s1296_s6 + $0xc] sm:$0xf0] }
  0x14   : > { %606 = vmatpush.bf16.msra.mxu0 %v1104_v8  ;;  %v1108_v25 = vld [vmem:[%s1383_s1 + $0x48] sm:$0xff]  ;;  %v1107_v29 = vld [vmem:[%s1383_s1 + $0x40] sm:$0xff]  ;;  %v892_v35 = vld [vmem:[%s1296_s6 + $0x10] sm:$0xf0] }
  0x15   : > { %635 = vmatpush.bf16.msra.mxu1 %v1112_v9  ;;  %v1116_v26 = vld [vmem:[%s1383_s1 + $0x88] sm:$0xff]  ;;  %v1115_v30 = vld [vmem:[%s1383_s1 + $0x80] sm:$0xff]  ;;  %v1086_v37 = vld [vmem:[%s1296_s6 + $0x14] sm:$0xf0] }
  0x16   : > { %664 = vmatpush.bf16.msra.mxu2 %v1120_v10  ;;  %v1124_v27 = vld [vmem:[%s1383_s1 + $0xc8] sm:$0xff]  ;;  %v1123_v31 = vld [vmem:[%s1383_s1 + $0xc0] sm:$0xff]  ;;  %v900_v39 = vld [vmem:[%s1296_s6 + $0x18] sm:$0xf0] }
  0x17   : > { %693 = vmatpush.bf16.msra.mxu3 %v1128_v11  ;;  %v890_v32 = vld [vmem:[%s1296_s6] sm:$0xf]  ;;  %v1083_v34 = vld [vmem:[%s1296_s6 + $0x4] sm:$0xf]  ;;  %v898_v36 = vld [vmem:[%s1296_s6 + $0x8] sm:$0xf] }
  0x18   : > { %607 = vmatpush.bf16.msra.mxu0 %v1103_v12  ;;  %v1084_v38 = vld [vmem:[%s1296_s6 + $0xc] sm:$0xf]  ;;  %v891_v40 = vor.u32 %v1085_v33, %v890_v32  ;;  %v895_v41 = vor.u32 %v1083_v34, %v892_v35  ;;  %v899_v42 = vor.u32 %v1086_v37, %v898_v36  ;;  %v906_v44 = vld [vmem:[%s1296_s6 + $0x20] sm:$0xf]  ;;  %v1089_v45 = vld [vmem:[%s1296_s6 + $0x2c] sm:$0xf0] }
  0x19   : > { %636 = vmatpush.bf16.msra.mxu1 %v1111_v13  ;;  %v903_v43 = vor.u32 %v1084_v38, %v900_v39  ;;  %v1087_v46 = vld [vmem:[%s1296_s6 + $0x24] sm:$0xf]  ;;  %v908_v47 = vld [vmem:[%s1296_s6 + $0x30] sm:$0xf0]  ;;  %v914_v48 = vld [vmem:[%s1296_s6 + $0x28] sm:$0xf]  ;;  %v907_v52 = vor.u32 %v1089_v45, %v906_v44 }
  0x1a   : > { %665 = vmatpush.bf16.msra.mxu2 %v1119_v14  ;;  %v1090_v49 = vld [vmem:[%s1296_s6 + $0x34] sm:$0xf0]  ;;  %v1088_v50 = vld [vmem:[%s1296_s6 + $0x2c] sm:$0xf]  ;;  %v916_v51 = vld [vmem:[%s1296_s6 + $0x38] sm:$0xf0]  ;;  %v911_v53 = vor.u32 %v1087_v46, %v908_v47 }
  0x1b   : > { %694 = vmatpush.bf16.msra.mxu3 %v1127_v15  ;;  %v915_v54 = vor.u32 %v1090_v49, %v914_v48  ;;  %v919_v55 = vor.u32 %v1088_v50, %v916_v51  ;;  %v922_v56 = vld [vmem:[%s1296_s6 + $0x40] sm:$0xf]  ;;  %v1093_v57 = vld [vmem:[%s1296_s6 + $0x4c] sm:$0xf0]  ;;  %v1091_v58 = vld [vmem:[%s1296_s6 + $0x44] sm:$0xf] }
  0x1c   : > { %608 = vmatpush.bf16.msra.mxu0 %v1102_v16  ;;  %v924_v59 = vld [vmem:[%s1296_s6 + $0x50] sm:$0xf0]  ;;  %v930_v60 = vld [vmem:[%s1296_s6 + $0x48] sm:$0xf]  ;;  %v1094_v61 = vld [vmem:[%s1296_s6 + $0x54] sm:$0xf0]  ;;  %v923_v0 = vor.u32 %v1093_v57, %v922_v56 }
  0x1d   : > { %637 = vmatpush.bf16.msra.mxu1 %v1110_v17  ;;  %v1092_v62 = vld [vmem:[%s1296_s6 + $0x4c] sm:$0xf]  ;;  %v932_v63 = vld [vmem:[%s1296_s6 + $0x58] sm:$0xf0]  ;;  %v927_v1 = vor.u32 %v1091_v58, %v924_v59  ;;  %v931_v2 = vor.u32 %v1094_v61, %v930_v60  ;;  %v938_v4 = vld [vmem:[%s1296_s6 + $0x60] sm:$0xf] }
  0x1e   : > { %666 = vmatpush.bf16.msra.mxu2 %v1118_v18  ;;  %v935_v3 = vor.u32 %v1092_v62, %v932_v63  ;;  %v1097_v5 = vld [vmem:[%s1296_s6 + $0x6c] sm:$0xf0]  ;;  %v1095_v6 = vld [vmem:[%s1296_s6 + $0x64] sm:$0xf]  ;;  %v940_v7 = vld [vmem:[%s1296_s6 + $0x70] sm:$0xf0] }
  0x1f   : > { %695 = vmatpush.bf16.msra.mxu3 %v1126_v19  ;;  %v946_v8 = vld [vmem:[%s1296_s6 + $0x68] sm:$0xf]  ;;  %v1098_v9 = vld [vmem:[%s1296_s6 + $0x74] sm:$0xf0]  ;;  %v1096_v10 = vld [vmem:[%s1296_s6 + $0x6c] sm:$0xf]  ;;  %v939_v12 = vor.u32 %v1097_v5, %v938_v4  ;;  %v943_v13 = vor.u32 %v1095_v6, %v940_v7 }
  0x20   : > { %609 = vmatpush.bf16.msra.mxu0 %v1101_v20  ;;  %v948_v11 = vld [vmem:[%s1296_s6 + $0x78] sm:$0xf0]  ;;  %v947_v14 = vor.u32 %v1098_v9, %v946_v8  ;;  %v1351_v18 = vld [vmem:[%s1384_s2] ss:$0 sm:$0xff] }
  0x21   : > { %638 = vmatpush.bf16.msra.mxu1 %v1109_v21  ;;  %v951_v15 = vor.u32 %v1096_v10, %v948_v11 }
  0x22   : > { %667 = vmatpush.bf16.msra.mxu2 %v1117_v22 }
  0x23   : > { %696 = vmatpush.bf16.msra.mxu3 %v1125_v23 }
  0x24   : > { %610 = vmatpush.bf16.msra.mxu0 %v1100_v24 }
  0x25   : > { %639 = vmatpush.bf16.msra.mxu1 %v1108_v25 }
  0x26   : > { %668 = vmatpush.bf16.msra.mxu2 %v1116_v26 }
  0x27   : > { %697 = vmatpush.bf16.msra.mxu3 %v1124_v27 }
  0x28   : > { %611 = vmatpush.bf16.msra.mxu0 %v1099_v28 }
  0x29   : > { %640 = vmatpush.bf16.msra.mxu1 %v1107_v29 }
  0x2a   : > { %669 = vmatpush.bf16.msra.mxu2 %v1115_v30 }
  0x2b   : > { %698 = vmatpush.bf16.msra.mxu3 %v1123_v31  ;;  %612 = vmatmul.bf16.vlgmr.msra.gmra.mxu0 %v891_v40 }
  0x2c   : > { %641 = vmatmul.bf16.vlgmr.msra.gmra.mxu1 %v895_v41 }
  0x2d   : > { %670 = vmatmul.bf16.vlgmr.msra.gmra.mxu2 %v899_v42 }
  0x2e   : > { %699 = vmatmul.bf16.vlgmr.msra.gmra.mxu3 %v903_v43 }
  0x3b   : > { %617 = vmatmul.bf16.gmra.mxu0 %v907_v52 }
  0x3c   : > { %646 = vmatmul.bf16.gmra.mxu1 %v911_v53 }
  0x3d   : > { %675 = vmatmul.bf16.gmra.mxu2 %v915_v54 }
  0x3e   : > { %704 = vmatmul.bf16.gmra.mxu3 %v919_v55 }
  0x4b   : > { %622 = vmatmul.bf16.gmra.mxu0 %v923_v0 }
  0x4c   : > { %651 = vmatmul.bf16.gmra.mxu1 %v927_v1 }
  0x4d   : > { %680 = vmatmul.bf16.gmra.mxu2 %v931_v2 }
  0x4e   : > { %709 = vmatmul.bf16.gmra.mxu3 %v935_v3 }
  0x5b   : > { %627 = vmatmul.bf16.gmra.mxu0 %v939_v12 }
  0x5c   : > { %656 = vmatmul.bf16.gmra.mxu1 %v943_v13 }
  0x5d   : > { %685 = vmatmul.bf16.gmra.mxu2 %v947_v14 }
  0x5e   : > { %714 = vmatmul.bf16.gmra.mxu3 %v951_v15 }
  0xa8   : > { %v613_v16 = vpop.f32.mrf.mxu0 }
  0xa9   : > { %v642_v17 = vpop.f32.mrf.mxu1  ;;  %v614_v19 = vadd.f32 %v1351_v18, %v613_v16 }
  0xab   : > { %v643_v24 = vadd.f32 %v642_v17, %v614_v19 }
  0xb0   : > { %v671_v20 = vpop.f32.mrf.mxu2  ;;  %v615_v22 = vpop.f32.mrf.mxu0 }
  0xb1   : > { %v700_v21 = vpop.f32.mrf.mxu3  ;;  %v644_v23 = vpop.f32.mrf.mxu1  ;;  %v616_v25 = vadd.f32 %v1351_v18, %v615_v22  ;;  %v672_v26 = vadd.f32 %v671_v20, %v643_v24 }
  0xb3   : > { %v645_v27 = vadd.f32 %v644_v23, %v616_v25  ;;  %v701_v33 = vadd.f32 %v700_v21, %v672_v26 }
  0xb5   : > { %v734_v11 = vmul.f32 %v701_v33, %v701_v33 }
  0xb8   : > { %v673_v28 = vpop.f32.mrf.mxu2  ;;  %v618_v31 = vpop.f32.mrf.mxu0 }
  0xb9   : > { %v702_v29 = vpop.f32.mrf.mxu3  ;;  %v674_v30 = vadd.f32 %v673_v28, %v645_v27  ;;  %v647_v32 = vpop.f32.mrf.mxu1  ;;  %v619_v36 = vadd.f32 %v1351_v18, %v618_v31 }
  0xbb   : > { %v703_v34 = vadd.f32 %v702_v29, %v674_v30  ;;  %v648_v41 = vadd.f32 %v647_v32, %v619_v36 }
  0xbd   : > { %v1134_v35 = vpack.c.bf16 %v703_v34, %v701_v33  ;;  %v735_v8 = vmul.f32 %v703_v34, %v703_v34  ;;  %v720_v12 = vadd.f32 %v703_v34, %v701_v33 }
  0xbf   : > { %1135 = vst [vmem:[%s1359_s27] sm:$0xff] %v1134_v35   ;;  %v742_v16 = vadd.f32 %v735_v8, %v734_v11 }
  0xc0   : > { %v676_v37 = vpop.f32.mrf.mxu2  ;;  %v620_v39 = vpop.f32.mrf.mxu0 }
  0xc1   : > { %v705_v38 = vpop.f32.mrf.mxu3  ;;  %v649_v40 = vpop.f32.mrf.mxu1  ;;  %v621_v42 = vadd.f32 %v1351_v18, %v620_v39  ;;  %v677_v43 = vadd.f32 %v676_v37, %v648_v41 }
  0xc3   : > { %v650_v44 = vadd.f32 %v649_v40, %v621_v42  ;;  %v706_v50 = vadd.f32 %v705_v38, %v677_v43 }
  0xc5   : > { %v736_v13 = vmul.f32 %v706_v50, %v706_v50  ;;  %v721_v17 = vadd.f32 %v720_v12, %v706_v50 }
  0xc7   : > { %v743_v21 = vadd.f32 %v742_v16, %v736_v13 }
  0xc8   : > { %v678_v45 = vpop.f32.mrf.mxu2  ;;  %v623_v48 = vpop.f32.mrf.mxu0 }
  0xc9   : > { %v707_v46 = vpop.f32.mrf.mxu3  ;;  %v679_v47 = vadd.f32 %v678_v45, %v650_v44  ;;  %v652_v49 = vpop.f32.mrf.mxu1  ;;  %v624_v53 = vadd.f32 %v1351_v18, %v623_v48 }
  0xcb   : > { %v708_v51 = vadd.f32 %v707_v46, %v679_v47  ;;  %v653_v58 = vadd.f32 %v652_v49, %v624_v53 }
  0xcd   : > { %v1139_v52 = vpack.c.bf16 %v708_v51, %v706_v50  ;;  %v737_v19 = vmul.f32 %v708_v51, %v708_v51  ;;  %v722_v22 = vadd.f32 %v721_v17, %v708_v51 }
  0xcf   : > { %1151 = vst [vmem:[%s1359_s27 + $0x8] sm:$0xff] %v1139_v52   ;;  %v744_v26 = vadd.f32 %v743_v21, %v737_v19 }
  0xd0   : > { %v681_v54 = vpop.f32.mrf.mxu2  ;;  %v625_v56 = vpop.f32.mrf.mxu0 }
  0xd1   : > { %v710_v55 = vpop.f32.mrf.mxu3  ;;  %v654_v57 = vpop.f32.mrf.mxu1  ;;  %v626_v59 = vadd.f32 %v1351_v18, %v625_v56  ;;  %v682_v60 = vadd.f32 %v681_v54, %v653_v58 }
  0xd3   : > { %v655_v61 = vadd.f32 %v654_v57, %v626_v59  ;;  %v711_v3 = vadd.f32 %v710_v55, %v682_v60 }
  0xd5   : > { %v738_v23 = vmul.f32 %v711_v3, %v711_v3  ;;  %v723_v27 = vadd.f32 %v722_v22, %v711_v3 }
  0xd7   : > { %v745_v31 = vadd.f32 %v744_v26, %v738_v23 }
  0xd8   : > { %v683_v62 = vpop.f32.mrf.mxu2  ;;  %v628_v1 = vpop.f32.mrf.mxu0 }
  0xd9   : > { %v712_v63 = vpop.f32.mrf.mxu3  ;;  %v684_v0 = vadd.f32 %v683_v62, %v655_v61  ;;  %v629_v2 = vadd.f32 %v1351_v18, %v628_v1  ;;  %v657_v5 = vpop.f32.mrf.mxu1 }
  0xdb   : > { %v713_v4 = vadd.f32 %v712_v63, %v684_v0  ;;  %v658_v7 = vadd.f32 %v657_v5, %v629_v2 }
  0xdd   : > { %v1144_v6 = vpack.c.bf16 %v713_v4, %v711_v3  ;;  %v739_v28 = vmul.f32 %v713_v4, %v713_v4  ;;  %v724_v32 = vadd.f32 %v723_v27, %v713_v4 }
  0xdf   : > { %1152 = vst [vmem:[%s1359_s27 + $0x10] sm:$0xff] %v1144_v6   ;;  %v746_v36 = vadd.f32 %v745_v31, %v739_v28 }
  0xe0   : > { %v686_v9 = vpop.f32.mrf.mxu2  ;;  %v630_v15 = vpop.f32.mrf.mxu0 }
  0xe1   : > { %v715_v10 = vpop.f32.mrf.mxu3  ;;  %v687_v14 = vadd.f32 %v686_v9, %v658_v7  ;;  %v631_v20 = vadd.f32 %v1351_v18, %v630_v15  ;;  %v659_v25 = vpop.f32.mrf.mxu1 }
  0xe3   : > { %v716_v24 = vadd.f32 %v715_v10, %v687_v14  ;;  %v660_v29 = vadd.f32 %v659_v25, %v631_v20 }
  0xe5   : > { %v740_v33 = vmul.f32 %v716_v24, %v716_v24  ;;  %v725_v18 = vadd.f32 %v724_v32, %v716_v24 }
  0xe7   : > { %v747_v38 = vadd.f32 %v746_v36, %v740_v33 }
  0xe8   : > { %v688_v30 = vpop.f32.mrf.mxu2 }
  0xe9   : > { %v689_v34 = vadd.f32 %v688_v30, %v660_v29  ;;  %v717_v35 = vpop.f32.mrf.mxu3 }
  0xeb   : > { %v718_v37 = vadd.f32 %v717_v35, %v689_v34 }
  0xed   : > { %v726_v39 = vadd.f32 %v725_v18, %v718_v37  ;;  %v741_v40 = vmul.f32 %v718_v37, %v718_v37  ;;  %v1149_v41 = vpack.c.bf16 %v718_v37, %v716_v24 }
  0xef   : > { %v727_v42 = vrot.slane %v726_v39, 4  ;;  %v748_v43 = vadd.f32 %v747_v38, %v741_v40  ;;  %1153 = vst [vmem:[%s1359_s27 + $0x18] sm:$0xff] %v1149_v41  }
  0xf1   : > { %v728_v44 = vadd.f32 %v727_v42, %v726_v39  ;;  %v749_v45 = vrot.slane %v748_v43, 4 }
  0xf3   : > { %v729_v46 = vrot.slane %v728_v44, 2  ;;  %v750_v47 = vadd.f32 %v749_v45, %v748_v43 }
  0xf5   : > { %v730_v48 = vadd.f32 %v729_v46, %v728_v44  ;;  %v751_v49 = vrot.slane %v750_v47, 2 }
  0xf7   : > { %v731_v50 = vrot.slane %v730_v48, 1  ;;  %v752_v51 = vadd.f32 %v751_v49, %v750_v47 }
  0xf9   : > { %v732_v52 = vadd.f32 %v731_v50, %v730_v48  ;;  %v753_v53 = vrot.slane %v752_v51, 1 }
  0xfb   : > { %733 = vst [vmem:[%s244_s29] sm:$0x1] %v732_v52  ;;  %v754_v54 = vadd.f32 %v753_v53, %v752_v51 }
  0xfd   : > { %755 = vst [vmem:[%s247_s7] sm:$0x1] %v754_v54 }
  0xfe PF: > { %s16_s18 = sadd.s32 1, %s1169_s18  }
  0xff   : > { %p13_p5 = scmp.ge.s32.totalorder %s16_s18, 4  }
 0x101   :  { %15 = sbr.rel (!%p13_p5) target bundleno = 1 (0x1), region = 86 }

// kernel: forward.20
= control target key start
LH: loop header
LB: loop body
LE: loop exit
PB: predicated region body
PF: predicated region fallthrough
CT: control target
= control target key end

     0   :  { %s494_s18 = smov 0   ;;  %s536_s0 = inlined_call_operand.vmem [shape: bf16[128,128], index: 0, kind: input, shape index: {}]   ;;  %s537_s1 = inlined_call_operand.vmem [shape: f32[2,1,128], index: 1, kind: input, shape index: {}]   ;;  %s538_s2 = inlined_call_operand.vmem [shape: f32[2,1,128], index: 2, kind: input, shape index: {}]   ;;  %s539_s3 = inlined_call_operand.vmem [shape: f32[1,128], index: 3, kind: input, shape index: {}]   ;;  %s540_s4 = inlined_call_operand.vmem [shape: f32[1,128], index: 4, kind: input, shape index: {}]   ;;  %s541_s5 = inlined_call_operand.vmem [shape: bf16[128,128], index: 5, kind: output, shape index: {}]  }
   0x1 LB: > { %s393_s19 = sadd.s32 4294967295, %s462_s18   ;;  %p397_p0 = scmp.ge.s32.totalorder %s462_s18, 1  ;;  %s462_s18 = sphi %s494_s18, %s15_s18  }
   0x2   : > { %p188_p1 = scmp.lt.s32.totalorder %s462_s18, 3 }
   0x4   : > { %p189_p2 = pnand %p397_p0, %p188_p1 }
   0x5   : > { %s398_s28 = sshll.u32 (!%p189_p2), %s393_s19, 3 }
   0x6   : > { %192 = sbr.rel (%p189_p2) target bundleno = 62 (0x3e), region = 40  ;;  %p217_p3 = scmp.lt.s32.totalorder (!%p189_p2), %s398_s28, 15 }
   0xb   : > { %v228_v0 = vld [vmem:[%s537_s1] sm:$0x1]  ;;  %v229_v1 = vld [vmem:[%s537_s1 + $0x1] sm:$0x1]  ;;  %vm230_vm0 = vcmask 1040384   ;;  %s543_s28 = smov (!%p217_p3, %s398_s28), 15 }
   0xc   : > { %v231_v2 = vsel %vm230_vm0, %v228_v0, 0.0  ;;  %v232_v3 = vsel %vm230_vm0, %v229_v1, 0.0  ;;  %v235_v4 = vld [vmem:[%s538_s2] sm:$0x1]  ;;  %v236_v6 = vld [vmem:[%s538_s2 + $0x1] sm:$0x1] }
   0xd   : > { %v233_v5 = vadd.f32 %v232_v3, %v231_v2  ;;  %v237_v7 = vsel %vm230_vm0, %v235_v4, 0.0  ;;  %v238_v8 = vsel %vm230_vm0, %v236_v6, 0.0  ;;  %s399_s29 = sshll.u32 %s543_s28, 2  ;;  %v243_v20 = vld [vmem:[%s539_s3] sm:$0x1] }
   0xe   : > { %v239_v10 = vadd.f32 %v238_v8, %v237_v7  ;;  %s220_s7 = scalar_lea.vmem %s536_s0, %s399_s29  ;;  %v256_v31 = vld [vmem:[%s540_s4] sm:$0x1]  ;;  %s226_s14 = scalar_lea.vmem %s541_s5, %s399_s29 }
   0xf   : > { %v234_v9 = vmul.f32 0.0078125, %v233_v5  ;;  %v405_v22 = vld [vmem:[%s220_s7] sm:$0xff]   ;;  %v440_v23 = vld [vmem:[%s220_s7 + $0x8] sm:$0xff]   ;;  %v441_v24 = vld [vmem:[%s220_s7 + $0x10] sm:$0xff]  }
  0x10   : > { %v240_v11 = vmul.f32 0.0078125, %v239_v10  ;;  %v442_v25 = vld [vmem:[%s220_s7 + $0x18] sm:$0xff]   ;;  %v406_v28 = vunpack.c.l.bf16 %v405_v22  ;;  %v407_v29 = vunpack.c.h.bf16 %v405_v22  ;;  %v410_v30 = vunpack.c.l.bf16 %v440_v23 }
  0x11   : > { %v241_v12 = vmul.f32 %v234_v9, %v234_v9  ;;  %v411_v32 = vunpack.c.h.bf16 %v440_v23  ;;  %v414_v33 = vunpack.c.l.bf16 %v441_v24  ;;  %v415_v34 = vunpack.c.h.bf16 %v441_v24 }
  0x12   : > { %v418_v35 = vunpack.c.l.bf16 %v442_v25  ;;  %v419_v37 = vunpack.c.h.bf16 %v442_v25 }
  0x13   : > { %v242_v13 = vsub.f32 %v240_v11, %v241_v12 }
  0x15   : > { %v244_v14 = vadd.f32 1e-05, %v242_v13 }
  0x17   : > { %454 = vrsqrt.f32 %v244_v14  ;;  %vm251_vm1 = vweird.f32 %v244_v14 }
  0x1d   : > { %v455_v15 = vpop.eup %454 }
  0x1e   : > { %v246_v16 = vmul.f32 %v455_v15, %v244_v14  ;;  %vm252_vm2 = vweird.f32 %v455_v15 }
  0x1f   : > { %vm253_vm3 = vmor %vm251_vm1, %vm252_vm2 }
  0x20   : > { %v247_v17 = vmul.f32 %v455_v15, %v246_v16 }
  0x22   : > { %v248_v18 = vmul.f32 0.5, %v247_v17 }
  0x24   : > { %v249_v19 = vsub.f32 1.5, %v248_v18 }
  0x26   : > { %v250_v21 = vmul.f32 %v455_v15, %v249_v19 }
  0x28   : > { %v254_v26 = vsel %vm253_vm3, %v455_v15, %v250_v21 }
  0x29   : > { %v255_v27 = vmul.f32 %v254_v26, %v243_v20 }
  0x2b   : > { %v257_v36 = vmul.f32 %v255_v27, %v234_v9  ;;  %v276_v38 = vperm.slane %v255_v27, 0 }
  0x2d   : > { %v258_v39 = vsub.f32 %v256_v31, %v257_v36  ;;  %v278_v40 = vmul.f32 %v406_v28, %v276_v38  ;;  %v279_v41 = vmul.f32 %v407_v29, %v276_v38  ;;  %v280_v42 = vmul.f32 %v410_v30, %v276_v38 }
  0x2e   : > { %v281_v43 = vmul.f32 %v411_v32, %v276_v38  ;;  %v282_v44 = vmul.f32 %v414_v33, %v276_v38  ;;  %v283_v45 = vmul.f32 %v415_v34, %v276_v38  ;;  %v284_v46 = vmul.f32 %v418_v35, %v276_v38 }
  0x2f   : > { %v287_v47 = vperm.slane %v258_v39, 0  ;;  %v285_v48 = vmul.f32 %v419_v37, %v276_v38 }
  0x31   : > { %v289_v49 = vadd.f32 %v287_v47, %v278_v40  ;;  %v290_v50 = vadd.f32 %v287_v47, %v279_v41  ;;  %v291_v51 = vadd.f32 %v287_v47, %v280_v42  ;;  %v292_v52 = vadd.f32 %v287_v47, %v281_v43 }
  0x32   : > { %v293_v53 = vadd.f32 %v287_v47, %v282_v44  ;;  %v294_v54 = vadd.f32 %v287_v47, %v283_v45  ;;  %v295_v55 = vadd.f32 %v287_v47, %v284_v46  ;;  %v296_v56 = vadd.f32 %v287_v47, %v285_v48 }
  0x33   : > { %vm297_vm4 = vcmp.ge.f32.partialorder %v289_v49, 0.0  ;;  %vm298_vm5 = vcmp.ge.f32.partialorder %v290_v50, 0.0  ;;  %v305_v57 = vmul.f32 0.2, %v289_v49  ;;  %v306_v58 = vmul.f32 0.2, %v290_v50 }
  0x34   : > { %vm299_vm6 = vcmp.ge.f32.partialorder %v291_v51, 0.0  ;;  %vm300_vm7 = vcmp.ge.f32.partialorder %v292_v52, 0.0  ;;  %v307_v59 = vmul.f32 0.2, %v291_v51  ;;  %v308_v60 = vmul.f32 0.2, %v292_v52 }
  0x35   : > { %v313_v61 = vsel %vm297_vm4, %v289_v49, %v305_v57  ;;  %v314_v62 = vsel %vm298_vm5, %v290_v50, %v306_v58  ;;  %vm301_vm8 = vcmp.ge.f32.partialorder %v293_v53, 0.0  ;;  %vm302_vm9 = vcmp.ge.f32.partialorder %v294_v54, 0.0 }
  0x36   : > { %v423_v63 = vpack.c.bf16 %v314_v62, %v313_v61  ;;  %v315_v0 = vsel %vm299_vm6, %v291_v51, %v307_v59  ;;  %v316_v1 = vsel %vm300_vm7, %v292_v52, %v308_v60  ;;  %v309_v2 = vmul.f32 0.2, %v293_v53 }
  0x37   : > { %v428_v3 = vpack.c.bf16 %v316_v1, %v315_v0  ;;  %v310_v4 = vmul.f32 0.2, %v294_v54  ;;  %vm303_vm10 = vcmp.ge.f32.partialorder %v295_v55, 0.0  ;;  %vm304_vm11 = vcmp.ge.f32.partialorder %v296_v56, 0.0 }
  0x38   : > { %424 = vst [vmem:[%s226_s14] sm:$0xff] %v423_v63   ;;  %v317_v5 = vsel %vm301_vm8, %v293_v53, %v309_v2  ;;  %v311_v6 = vmul.f32 0.2, %v295_v55  ;;  %v312_v7 = vmul.f32 0.2, %v296_v56 }
  0x39   : > { %443 = vst [vmem:[%s226_s14 + $0x8] sm:$0xff] %v428_v3   ;;  %v318_v8 = vsel %vm302_vm9, %v294_v54, %v310_v4 }
  0x3a   : > { %v433_v9 = vpack.c.bf16 %v318_v8, %v317_v5  ;;  %v319_v10 = vsel %vm303_vm10, %v295_v55, %v311_v6  ;;  %v320_v11 = vsel %vm304_vm11, %v296_v56, %v312_v7 }
  0x3b   : > { %v438_v12 = vpack.c.bf16 %v320_v11, %v319_v10 }
  0x3c   : > { %444 = vst [vmem:[%s226_s14 + $0x10] sm:$0xff] %v433_v9  }
  0x3d   : > { %445 = vst [vmem:[%s226_s14 + $0x18] sm:$0xff] %v438_v12  }
  0x3e PF: > { %s15_s18 = sadd.s32 1, %s462_s18  }
  0x3f   : > { %p12_p4 = scmp.ge.s32.totalorder %s15_s18, 4  }
  0x41   :  { %14 = sbr.rel (!%p12_p4) target bundleno = 1 (0x1), region = 70 }

// kernel: forward.21
= control target key start
LH: loop header
LB: loop body
LE: loop exit
PB: predicated region body
PF: predicated region fallthrough
CT: control target
= control target key end

     0   :  { %s4744_s1 = inlined_call_operand.vmem [shape: bf16[4096,128], index: 1, kind: input, shape index: {}]   ;;  %s4745_s0 = inlined_call_operand.vmem [shape: bf16[8,4096], index: 0, kind: input, shape index: {}]   ;;  %s4746_s2 = inlined_call_operand.vmem [shape: f32[1,128], index: 2, kind: input, shape index: {}]   ;;  %s4747_s3 = inlined_call_operand.vmem [shape: f32[8,128], index: 3, kind: output, shape index: {}]  }
   0x1   :  { %v3646_v0 = vld [vmem:[%s4744_s1 + $0x38] sm:$0xff]  ;;  %v3645_v4 = vld [vmem:[%s4744_s1 + $0x30] sm:$0xff]  ;;  %v3644_v8 = vld [vmem:[%s4744_s1 + $0x28] sm:$0xff] }
   0x2   :  { %v3654_v1 = vld [vmem:[%s4744_s1 + $0x78] sm:$0xff]  ;;  %2194 = vmatpush.bf16.msra.mxu0 %v3646_v0  ;;  %v3653_v5 = vld [vmem:[%s4744_s1 + $0x70] sm:$0xff]  ;;  %v3652_v9 = vld [vmem:[%s4744_s1 + $0x68] sm:$0xff] }
   0x3   :  { %v3662_v2 = vld [vmem:[%s4744_s1 + $0xb8] sm:$0xff]  ;;  %2207 = vmatpush.bf16.msra.mxu1 %v3654_v1  ;;  %v3661_v6 = vld [vmem:[%s4744_s1 + $0xb0] sm:$0xff]  ;;  %v3660_v10 = vld [vmem:[%s4744_s1 + $0xa8] sm:$0xff] }
   0x4   :  { %v3670_v3 = vld [vmem:[%s4744_s1 + $0xf8] sm:$0xff]  ;;  %2220 = vmatpush.bf16.msra.mxu2 %v3662_v2  ;;  %v3669_v7 = vld [vmem:[%s4744_s1 + $0xf0] sm:$0xff]  ;;  %v3668_v11 = vld [vmem:[%s4744_s1 + $0xe8] sm:$0xff] }
   0x5   :  { %2233 = vmatpush.bf16.msra.mxu3 %v3670_v3  ;;  %v3643_v12 = vld [vmem:[%s4744_s1 + $0x20] sm:$0xff]  ;;  %v3642_v16 = vld [vmem:[%s4744_s1 + $0x18] sm:$0xff]  ;;  %v3641_v20 = vld [vmem:[%s4744_s1 + $0x10] sm:$0xff] }
   0x6   :  { %2195 = vmatpush.bf16.msra.mxu0 %v3645_v4  ;;  %v3651_v13 = vld [vmem:[%s4744_s1 + $0x60] sm:$0xff]  ;;  %v3650_v17 = vld [vmem:[%s4744_s1 + $0x58] sm:$0xff]  ;;  %v3649_v21 = vld [vmem:[%s4744_s1 + $0x50] sm:$0xff] }
   0x7   :  { %2208 = vmatpush.bf16.msra.mxu1 %v3653_v5  ;;  %v3659_v14 = vld [vmem:[%s4744_s1 + $0xa0] sm:$0xff]  ;;  %v3658_v18 = vld [vmem:[%s4744_s1 + $0x98] sm:$0xff]  ;;  %v3657_v22 = vld [vmem:[%s4744_s1 + $0x90] sm:$0xff] }
   0x8   :  { %2221 = vmatpush.bf16.msra.mxu2 %v3661_v6  ;;  %v3667_v15 = vld [vmem:[%s4744_s1 + $0xe0] sm:$0xff]  ;;  %v3666_v19 = vld [vmem:[%s4744_s1 + $0xd8] sm:$0xff]  ;;  %v3665_v23 = vld [vmem:[%s4744_s1 + $0xd0] sm:$0xff] }
   0x9   :  { %2234 = vmatpush.bf16.msra.mxu3 %v3669_v7  ;;  %v3640_v24 = vld [vmem:[%s4744_s1 + $0x8] sm:$0xff]  ;;  %v14_v29 = vld [vmem:[%s4745_s0] sm:$0xff]  ;;  %v3678_v38 = vld [vmem:[%s4744_s1 + $0x138] sm:$0xff] }
   0xa   :  { %2196 = vmatpush.bf16.msra.mxu0 %v3644_v8  ;;  %v3648_v25 = vld [vmem:[%s4744_s1 + $0x48] sm:$0xff]  ;;  %v3639_v30 = vld [vmem:[%s4744_s1] sm:$0xff]  ;;  %v562_v33 = vunpack.c.l.b16 %v14_v29  ;;  %v563_v37 = vunpack.c.h.b16 %v14_v29  ;;  %v3686_v39 = vld [vmem:[%s4744_s1 + $0x178] sm:$0xff] }
   0xb   :  { %2209 = vmatpush.bf16.msra.mxu1 %v3652_v9  ;;  %v3656_v26 = vld [vmem:[%s4744_s1 + $0x88] sm:$0xff]  ;;  %v3647_v31 = vld [vmem:[%s4744_s1 + $0x40] sm:$0xff]  ;;  %v3694_v40 = vld [vmem:[%s4744_s1 + $0x1b8] sm:$0xff] }
   0xc   :  { %2222 = vmatpush.bf16.msra.mxu2 %v3660_v10  ;;  %v3664_v27 = vld [vmem:[%s4744_s1 + $0xc8] sm:$0xff]  ;;  %v3655_v34 = vld [vmem:[%s4744_s1 + $0x80] sm:$0xff]  ;;  %v3702_v41 = vld [vmem:[%s4744_s1 + $0x1f8] sm:$0xff]  ;;  %v594_v43 = vpack.c.b16 %v562_v33, %v562_v33  ;;  %v595_v45 = vpack.c.b16 %v563_v37, %v563_v37 }
   0xd   :  { %2235 = vmatpush.bf16.msra.mxu3 %v3668_v11  ;;  %v15_v28 = vld [vmem:[%s4745_s0 + $0x8] sm:$0xff]  ;;  %v3663_v35 = vld [vmem:[%s4744_s1 + $0xc0] sm:$0xff]  ;;  %v3677_v46 = vld [vmem:[%s4744_s1 + $0x130] sm:$0xff] }
   0xe   :  { %2197 = vmatpush.bf16.msra.mxu0 %v3643_v12  ;;  %v564_v32 = vunpack.c.l.b16 %v15_v28  ;;  %v565_v36 = vunpack.c.h.b16 %v15_v28  ;;  %v3685_v47 = vld [vmem:[%s4744_s1 + $0x170] sm:$0xff]  ;;  %v3676_v50 = vld [vmem:[%s4744_s1 + $0x128] sm:$0xff]  ;;  %v3675_v54 = vld [vmem:[%s4744_s1 + $0x120] sm:$0xff] }
   0xf   :  { %2210 = vmatpush.bf16.msra.mxu1 %v3651_v13  ;;  %v3693_v48 = vld [vmem:[%s4744_s1 + $0x1b0] sm:$0xff]  ;;  %v3684_v51 = vld [vmem:[%s4744_s1 + $0x168] sm:$0xff]  ;;  %v3683_v55 = vld [vmem:[%s4744_s1 + $0x160] sm:$0xff] }
  0x10   :  { %2223 = vmatpush.bf16.msra.mxu2 %v3659_v14  ;;  %v596_v42 = vpack.c.b16 %v564_v32, %v564_v32  ;;  %v597_v44 = vpack.c.b16 %v565_v36, %v565_v36  ;;  %v3701_v49 = vld [vmem:[%s4744_s1 + $0x1f0] sm:$0xff]  ;;  %v3692_v52 = vld [vmem:[%s4744_s1 + $0x1a8] sm:$0xff]  ;;  %v3691_v56 = vld [vmem:[%s4744_s1 + $0x1a0] sm:$0xff] }
  0x11   :  { %2236 = vmatpush.bf16.msra.mxu3 %v3667_v15  ;;  %v3700_v53 = vld [vmem:[%s4744_s1 + $0x1e8] sm:$0xff]  ;;  %v3699_v57 = vld [vmem:[%s4744_s1 + $0x1e0] sm:$0xff]  ;;  %v3674_v58 = vld [vmem:[%s4744_s1 + $0x118] sm:$0xff] }
  0x12   :  { %2198 = vmatpush.bf16.msra.mxu0 %v3642_v16  ;;  %v3682_v59 = vld [vmem:[%s4744_s1 + $0x158] sm:$0xff]  ;;  %v3673_v62 = vld [vmem:[%s4744_s1 + $0x110] sm:$0xff]  ;;  %v3672_v2 = vld [vmem:[%s4744_s1 + $0x108] sm:$0xff] }
  0x13   :  { %2211 = vmatpush.bf16.msra.mxu1 %v3650_v17  ;;  %v3690_v60 = vld [vmem:[%s4744_s1 + $0x198] sm:$0xff]  ;;  %v3681_v63 = vld [vmem:[%s4744_s1 + $0x150] sm:$0xff]  ;;  %v3680_v3 = vld [vmem:[%s4744_s1 + $0x148] sm:$0xff] }
  0x14   :  { %2224 = vmatpush.bf16.msra.mxu2 %v3658_v18  ;;  %v3698_v61 = vld [vmem:[%s4744_s1 + $0x1d8] sm:$0xff]  ;;  %v3689_v0 = vld [vmem:[%s4744_s1 + $0x190] sm:$0xff]  ;;  %v3688_v4 = vld [vmem:[%s4744_s1 + $0x188] sm:$0xff] }
  0x15   :  { %2237 = vmatpush.bf16.msra.mxu3 %v3666_v19  ;;  %v3697_v1 = vld [vmem:[%s4744_s1 + $0x1d0] sm:$0xff]  ;;  %v3696_v5 = vld [vmem:[%s4744_s1 + $0x1c8] sm:$0xff]  ;;  %v17_v6 = vld [vmem:[%s4745_s0 + $0x18] sm:$0xff] }
  0x16   :  { %2199 = vmatpush.bf16.msra.mxu0 %v3641_v20  ;;  %v16_v7 = vld [vmem:[%s4745_s0 + $0x10] sm:$0xff]  ;;  %v3671_v8 = vld [vmem:[%s4744_s1 + $0x100] sm:$0xff]  ;;  %v568_v10 = vunpack.c.l.b16 %v17_v6  ;;  %v569_v14 = vunpack.c.h.b16 %v17_v6  ;;  %v3710_v16 = vld [vmem:[%s4744_s1 + $0x238] sm:$0xff] }
  0x17   :  { %2212 = vmatpush.bf16.msra.mxu1 %v3649_v21  ;;  %v3679_v9 = vld [vmem:[%s4744_s1 + $0x140] sm:$0xff]  ;;  %v566_v11 = vunpack.c.l.b16 %v16_v7  ;;  %v567_v15 = vunpack.c.h.b16 %v16_v7  ;;  %v3718_v17 = vld [vmem:[%s4744_s1 + $0x278] sm:$0xff]  ;;  %v3708_v28 = vld [vmem:[%s4744_s1 + $0x228] sm:$0xff] }
  0x18   :  { %2225 = vmatpush.bf16.msra.mxu2 %v3657_v22  ;;  %v3687_v12 = vld [vmem:[%s4744_s1 + $0x180] sm:$0xff]  ;;  %v3726_v18 = vld [vmem:[%s4744_s1 + $0x2b8] sm:$0xff]  ;;  %v600_v20 = vpack.c.b16 %v568_v10, %v568_v10  ;;  %v601_v22 = vpack.c.b16 %v569_v14, %v569_v14  ;;  %v3716_v29 = vld [vmem:[%s4744_s1 + $0x268] sm:$0xff] }
  0x19   :  { %2238 = vmatpush.bf16.msra.mxu3 %v3665_v23  ;;  %v3695_v13 = vld [vmem:[%s4744_s1 + $0x1c0] sm:$0xff]  ;;  %v3734_v19 = vld [vmem:[%s4744_s1 + $0x2f8] sm:$0xff]  ;;  %v598_v21 = vpack.c.b16 %v566_v11, %v566_v11  ;;  %v599_v23 = vpack.c.b16 %v567_v15, %v567_v15  ;;  %v3740_v6 = vld [vmem:[%s4744_s1 + $0x328] sm:$0xff] }
  0x1a   :  { %2200 = vmatpush.bf16.msra.mxu0 %v3640_v24  ;;  %v3709_v24 = vld [vmem:[%s4744_s1 + $0x230] sm:$0xff]  ;;  %v3707_v32 = vld [vmem:[%s4744_s1 + $0x220] sm:$0xff]  ;;  %v3706_v36 = vld [vmem:[%s4744_s1 + $0x218] sm:$0xff] }
  0x1b   :  { %2213 = vmatpush.bf16.msra.mxu1 %v3648_v25  ;;  %v3717_v25 = vld [vmem:[%s4744_s1 + $0x270] sm:$0xff]  ;;  %v3715_v33 = vld [vmem:[%s4744_s1 + $0x260] sm:$0xff]  ;;  %v3714_v37 = vld [vmem:[%s4744_s1 + $0x258] sm:$0xff] }
  0x1c   :  { %2226 = vmatpush.bf16.msra.mxu2 %v3656_v26  ;;  %v3725_v26 = vld [vmem:[%s4744_s1 + $0x2b0] sm:$0xff]  ;;  %v3748_v7 = vld [vmem:[%s4744_s1 + $0x368] sm:$0xff]  ;;  %v3739_v10 = vld [vmem:[%s4744_s1 + $0x320] sm:$0xff] }
  0x1d   :  { %2239 = vmatpush.bf16.msra.mxu3 %v3664_v27  ;;  %v3733_v27 = vld [vmem:[%s4744_s1 + $0x2f0] sm:$0xff]  ;;  %v3747_v11 = vld [vmem:[%s4744_s1 + $0x360] sm:$0xff]  ;;  %v3738_v14 = vld [vmem:[%s4744_s1 + $0x318] sm:$0xff] }
  0x1e   :  { %2201 = vmatpush.bf16.msra.mxu0 %v3639_v30  ;;  %v3724_v30 = vld [vmem:[%s4744_s1 + $0x2a8] sm:$0xff]  ;;  %v3746_v15 = vld [vmem:[%s4744_s1 + $0x358] sm:$0xff] }
  0x1f   :  { %2214 = vmatpush.bf16.msra.mxu1 %v3647_v31  ;;  %v3732_v31 = vld [vmem:[%s4744_s1 + $0x2e8] sm:$0xff] }
  0x20   :  { %2227 = vmatpush.bf16.msra.mxu2 %v3655_v34  ;;  %v3723_v34 = vld [vmem:[%s4744_s1 + $0x2a0] sm:$0xff] }
  0x21   :  { %2240 = vmatpush.bf16.msra.mxu3 %v3663_v35  ;;  %2202 = vmatmul.bf16.vlgmr.msra.gmra.mxu0 %v594_v43  ;;  %v3731_v35 = vld [vmem:[%s4744_s1 + $0x2e0] sm:$0xff]  ;;  %v3729_v43 = vld [vmem:[%s4744_s1 + $0x2d0] sm:$0xff] }
  0x22   :  { %2246 = vmatpush.bf16.msrb.mxu0 %v3678_v38  ;;  %2215 = vmatmul.bf16.vlgmr.msra.gmra.mxu1 %v595_v45  ;;  %v3722_v38 = vld [vmem:[%s4744_s1 + $0x298] sm:$0xff]  ;;  %v3712_v45 = vld [vmem:[%s4744_s1 + $0x248] sm:$0xff] }
  0x23   :  { %2259 = vmatpush.bf16.msrb.mxu1 %v3686_v39  ;;  %2228 = vmatmul.bf16.vlgmr.msra.gmra.mxu2 %v596_v42  ;;  %v3730_v39 = vld [vmem:[%s4744_s1 + $0x2d8] sm:$0xff]  ;;  %v3721_v42 = vld [vmem:[%s4744_s1 + $0x290] sm:$0xff] }
  0x24   :  { %2272 = vmatpush.bf16.msrb.mxu2 %v3694_v40  ;;  %2241 = vmatmul.bf16.vlgmr.msra.gmra.mxu3 %v597_v44  ;;  %v3705_v40 = vld [vmem:[%s4744_s1 + $0x210] sm:$0xff]  ;;  %v3704_v44 = vld [vmem:[%s4744_s1 + $0x208] sm:$0xff] }
  0x25   :  { %2285 = vmatpush.bf16.msrb.mxu3 %v3702_v41  ;;  %v3713_v41 = vld [vmem:[%s4744_s1 + $0x250] sm:$0xff] }
  0x26   :  { %2247 = vmatpush.bf16.msrb.mxu0 %v3677_v46  ;;  %v3720_v46 = vld [vmem:[%s4744_s1 + $0x288] sm:$0xff] }
  0x27   :  { %2260 = vmatpush.bf16.msrb.mxu1 %v3685_v47  ;;  %v3728_v47 = vld [vmem:[%s4744_s1 + $0x2c8] sm:$0xff] }
  0x28   :  { %2273 = vmatpush.bf16.msrb.mxu2 %v3693_v48  ;;  %v18_v48 = vld [vmem:[%s4745_s0 + $0x20] sm:$0xff] }
  0x29   :  { %2286 = vmatpush.bf16.msrb.mxu3 %v3701_v49  ;;  %v19_v49 = vld [vmem:[%s4745_s0 + $0x28] sm:$0xff] }
  0x2a   :  { %2248 = vmatpush.bf16.msrb.mxu0 %v3676_v50  ;;  %v3703_v50 = vld [vmem:[%s4744_s1 + $0x200] sm:$0xff] }
  0x2b   :  { %2261 = vmatpush.bf16.msrb.mxu1 %v3684_v51  ;;  %v3711_v51 = vld [vmem:[%s4744_s1 + $0x240] sm:$0xff] }
  0x2c   :  { %2274 = vmatpush.bf16.msrb.mxu2 %v3692_v52  ;;  %v570_v52 = vunpack.c.l.b16 %v18_v48 }
  0x2d   :  { %2287 = vmatpush.bf16.msrb.mxu3 %v3700_v53  ;;  %v572_v53 = vunpack.c.l.b16 %v19_v49 }
  0x2e   :  { %2249 = vmatpush.bf16.msrb.mxu0 %v3675_v54  ;;  %v3719_v54 = vld [vmem:[%s4744_s1 + $0x280] sm:$0xff] }
  0x2f   :  { %2262 = vmatpush.bf16.msrb.mxu1 %v3683_v55  ;;  %v3727_v55 = vld [vmem:[%s4744_s1 + $0x2c0] sm:$0xff] }
  0x30   :  { %2275 = vmatpush.bf16.msrb.mxu2 %v3691_v56  ;;  %v571_v56 = vunpack.c.h.b16 %v18_v48  ;;  %v3772_v48 = vld [vmem:[%s4744_s1 + $0x428] sm:$0xff] }
  0x31   :  { %2288 = vmatpush.bf16.msrb.mxu3 %v3699_v57  ;;  %v573_v57 = vunpack.c.h.b16 %v19_v49  ;;  %v3780_v49 = vld [vmem:[%s4744_s1 + $0x468] sm:$0xff] }
  0x32   :  { %2250 = vmatpush.bf16.msrb.mxu0 %v3674_v58  ;;  %v3742_v58 = vld [vmem:[%s4744_s1 + $0x338] sm:$0xff] }
  0x33   :  { %2263 = vmatpush.bf16.msrb.mxu1 %v3682_v59  ;;  %v3750_v59 = vld [vmem:[%s4744_s1 + $0x378] sm:$0xff] }
  0x34   :  { %2276 = vmatpush.bf16.msrb.mxu2 %v3690_v60  ;;  %v3758_v60 = vld [vmem:[%s4744_s1 + $0x3b8] sm:$0xff] }
  0x35   :  { %2289 = vmatpush.bf16.msrb.mxu3 %v3698_v61  ;;  %v3766_v61 = vld [vmem:[%s4744_s1 + $0x3f8] sm:$0xff] }
  0x36   :  { %2251 = vmatpush.bf16.msrb.mxu0 %v3673_v62  ;;  %v602_v62 = vpack.c.b16 %v570_v52, %v570_v52  ;;  %v3771_v52 = vld [vmem:[%s4744_s1 + $0x420] sm:$0xff] }
  0x37   :  { %2264 = vmatpush.bf16.msrb.mxu1 %v3681_v63  ;;  %v604_v63 = vpack.c.b16 %v572_v53, %v572_v53  ;;  %v3779_v53 = vld [vmem:[%s4744_s1 + $0x460] sm:$0xff] }
  0x38   :  { %2277 = vmatpush.bf16.msrb.mxu2 %v3689_v0  ;;  %v603_v0 = vpack.c.b16 %v571_v56, %v571_v56  ;;  %v3770_v56 = vld [vmem:[%s4744_s1 + $0x418] sm:$0xff] }
  0x39   :  { %2290 = vmatpush.bf16.msrb.mxu3 %v3697_v1  ;;  %v605_v1 = vpack.c.b16 %v573_v57, %v573_v57  ;;  %v3778_v57 = vld [vmem:[%s4744_s1 + $0x458] sm:$0xff] }
  0x3a   :  { %2252 = vmatpush.bf16.msrb.mxu0 %v3672_v2  ;;  %v3741_v2 = vld [vmem:[%s4744_s1 + $0x330] sm:$0xff] }
  0x3b   :  { %2265 = vmatpush.bf16.msrb.mxu1 %v3680_v3  ;;  %v3749_v3 = vld [vmem:[%s4744_s1 + $0x370] sm:$0xff] }
  0x3c   :  { %2278 = vmatpush.bf16.msrb.mxu2 %v3688_v4  ;;  %v3757_v4 = vld [vmem:[%s4744_s1 + $0x3b0] sm:$0xff] }
  0x3d   :  { %2291 = vmatpush.bf16.msrb.mxu3 %v3696_v5  ;;  %v3765_v5 = vld [vmem:[%s4744_s1 + $0x3f0] sm:$0xff] }
  0x3e   :  { %2253 = vmatpush.bf16.msrb.mxu0 %v3671_v8  ;;  %v3756_v8 = vld [vmem:[%s4744_s1 + $0x3a8] sm:$0xff] }
  0x3f   :  { %2266 = vmatpush.bf16.msrb.mxu1 %v3679_v9  ;;  %v3764_v9 = vld [vmem:[%s4744_s1 + $0x3e8] sm:$0xff] }
  0x40   :  { %2279 = vmatpush.bf16.msrb.mxu2 %v3687_v12  ;;  %v3755_v12 = vld [vmem:[%s4744_s1 + $0x3a0] sm:$0xff] }
  0x41   :  { %2292 = vmatpush.bf16.msrb.mxu3 %v3695_v13  ;;  %2254 = vmatmul.bf16.vlgmr.msrb.gmra.mxu0 %v598_v21  ;;  %v3763_v13 = vld [vmem:[%s4744_s1 + $0x3e0] sm:$0xff]  ;;  %v3761_v21 = vld [vmem:[%s4744_s1 + $0x3d0] sm:$0xff] }
  0x42   :  { %2298 = vmatpush.bf16.msra.mxu0 %v3710_v16  ;;  %2267 = vmatmul.bf16.vlgmr.msrb.gmra.mxu1 %v599_v23  ;;  %v3754_v16 = vld [vmem:[%s4744_s1 + $0x398] sm:$0xff]  ;;  %v3744_v23 = vld [vmem:[%s4744_s1 + $0x348] sm:$0xff] }
  0x43   :  { %2311 = vmatpush.bf16.msra.mxu1 %v3718_v17  ;;  %2280 = vmatmul.bf16.vlgmr.msrb.gmra.mxu2 %v600_v20  ;;  %v3762_v17 = vld [vmem:[%s4744_s1 + $0x3d8] sm:$0xff]  ;;  %v3753_v20 = vld [vmem:[%s4744_s1 + $0x390] sm:$0xff] }
  0x44   :  { %2324 = vmatpush.bf16.msra.mxu2 %v3726_v18  ;;  %2293 = vmatmul.bf16.vlgmr.msrb.gmra.mxu3 %v601_v22  ;;  %v3737_v18 = vld [vmem:[%s4744_s1 + $0x310] sm:$0xff]  ;;  %v3736_v22 = vld [vmem:[%s4744_s1 + $0x308] sm:$0xff] }
  0x45   :  { %2337 = vmatpush.bf16.msra.mxu3 %v3734_v19  ;;  %v3745_v19 = vld [vmem:[%s4744_s1 + $0x350] sm:$0xff] }
  0x46   :  { %2299 = vmatpush.bf16.msra.mxu0 %v3709_v24  ;;  %v3752_v24 = vld [vmem:[%s4744_s1 + $0x388] sm:$0xff] }
  0x47   :  { %2312 = vmatpush.bf16.msra.mxu1 %v3717_v25  ;;  %v3760_v25 = vld [vmem:[%s4744_s1 + $0x3c8] sm:$0xff] }
  0x48   :  { %2325 = vmatpush.bf16.msra.mxu2 %v3725_v26  ;;  %v20_v26 = vld [vmem:[%s4745_s0 + $0x30] sm:$0xff] }
  0x49   :  { %2338 = vmatpush.bf16.msra.mxu3 %v3733_v27  ;;  %v21_v27 = vld [vmem:[%s4745_s0 + $0x38] sm:$0xff] }
  0x4a   :  { %2300 = vmatpush.bf16.msra.mxu0 %v3708_v28  ;;  %v3735_v28 = vld [vmem:[%s4744_s1 + $0x300] sm:$0xff] }
  0x4b   :  { %2313 = vmatpush.bf16.msra.mxu1 %v3716_v29  ;;  %v3743_v29 = vld [vmem:[%s4744_s1 + $0x340] sm:$0xff] }
  0x4c   :  { %2326 = vmatpush.bf16.msra.mxu2 %v3724_v30  ;;  %v574_v30 = vunpack.c.l.b16 %v20_v26 }
  0x4d   :  { %2339 = vmatpush.bf16.msra.mxu3 %v3732_v31  ;;  %v576_v31 = vunpack.c.l.b16 %v21_v27 }
  0x4e   :  { %2301 = vmatpush.bf16.msra.mxu0 %v3707_v32  ;;  %v3751_v32 = vld [vmem:[%s4744_s1 + $0x380] sm:$0xff] }
  0x4f   :  { %2314 = vmatpush.bf16.msra.mxu1 %v3715_v33  ;;  %v3759_v33 = vld [vmem:[%s4744_s1 + $0x3c0] sm:$0xff] }
  0x50   :  { %2327 = vmatpush.bf16.msra.mxu2 %v3723_v34  ;;  %v575_v34 = vunpack.c.h.b16 %v20_v26  ;;  %v3804_v26 = vld [vmem:[%s4744_s1 + $0x528] sm:$0xff] }
  0x51   :  { %2340 = vmatpush.bf16.msra.mxu3 %v3731_v35  ;;  %v577_v35 = vunpack.c.h.b16 %v21_v27  ;;  %v3812_v27 = vld [vmem:[%s4744_s1 + $0x568] sm:$0xff] }
  0x52   :  { %2302 = vmatpush.bf16.msra.mxu0 %v3706_v36  ;;  %v3774_v36 = vld [vmem:[%s4744_s1 + $0x438] sm:$0xff] }
  0x53   :  { %2315 = vmatpush.bf16.msra.mxu1 %v3714_v37  ;;  %v3782_v37 = vld [vmem:[%s4744_s1 + $0x478] sm:$0xff] }
  0x54   :  { %2328 = vmatpush.bf16.msra.mxu2 %v3722_v38  ;;  %v3790_v38 = vld [vmem:[%s4744_s1 + $0x4b8] sm:$0xff] }
  0x55   :  { %2341 = vmatpush.bf16.msra.mxu3 %v3730_v39  ;;  %v3798_v39 = vld [vmem:[%s4744_s1 + $0x4f8] sm:$0xff] }
  0x56   :  { %2303 = vmatpush.bf16.msra.mxu0 %v3705_v40  ;;  %v606_v40 = vpack.c.b16 %v574_v30, %v574_v30  ;;  %v3828_v30 = vld [vmem:[%s4744_s1 + $0x5e8] sm:$0xff] }
  0x57   :  { %2316 = vmatpush.bf16.msra.mxu1 %v3713_v41  ;;  %v608_v41 = vpack.c.b16 %v576_v31, %v576_v31 }
  0x58   :  { %2329 = vmatpush.bf16.msra.mxu2 %v3721_v42  ;;  %v607_v42 = vpack.c.b16 %v575_v34, %v575_v34 }
  0x59   :  { %2342 = vmatpush.bf16.msra.mxu3 %v3729_v43  ;;  %v609_v43 = vpack.c.b16 %v577_v35, %v577_v35 }
  0x5a   :  { %2304 = vmatpush.bf16.msra.mxu0 %v3704_v44  ;;  %v3773_v44 = vld [vmem:[%s4744_s1 + $0x430] sm:$0xff] }
  0x5b   :  { %2317 = vmatpush.bf16.msra.mxu1 %v3712_v45  ;;  %v3781_v45 = vld [vmem:[%s4744_s1 + $0x470] sm:$0xff] }
  0x5c   :  { %2330 = vmatpush.bf16.msra.mxu2 %v3720_v46  ;;  %v3789_v46 = vld [vmem:[%s4744_s1 + $0x4b0] sm:$0xff] }
  0x5d   :  { %2343 = vmatpush.bf16.msra.mxu3 %v3728_v47  ;;  %v3797_v47 = vld [vmem:[%s4744_s1 + $0x4f0] sm:$0xff] }
  0x5e   :  { %2305 = vmatpush.bf16.msra.mxu0 %v3703_v50  ;;  %v3788_v50 = vld [vmem:[%s4744_s1 + $0x4a8] sm:$0xff] }
  0x5f   :  { %2318 = vmatpush.bf16.msra.mxu1 %v3711_v51  ;;  %v3796_v51 = vld [vmem:[%s4744_s1 + $0x4e8] sm:$0xff] }
  0x60   :  { %2331 = vmatpush.bf16.msra.mxu2 %v3719_v54  ;;  %v3787_v54 = vld [vmem:[%s4744_s1 + $0x4a0] sm:$0xff] }
  0x61   :  { %2344 = vmatpush.bf16.msra.mxu3 %v3727_v55  ;;  %2306 = vmatmul.bf16.vlgmr.msra.gmra.mxu0 %v602_v62  ;;  %v3795_v55 = vld [vmem:[%s4744_s1 + $0x4e0] sm:$0xff]  ;;  %v3785_v62 = vld [vmem:[%s4744_s1 + $0x490] sm:$0xff] }
  0x62   :  { %2350 = vmatpush.bf16.msrb.mxu0 %v3742_v58  ;;  %2319 = vmatmul.bf16.vlgmr.msra.gmra.mxu1 %v603_v0  ;;  %v3786_v58 = vld [vmem:[%s4744_s1 + $0x498] sm:$0xff]  ;;  %v3768_v0 = vld [vmem:[%s4744_s1 + $0x408] sm:$0xff] }
  0x63   :  { %2363 = vmatpush.bf16.msrb.mxu1 %v3750_v59  ;;  %2332 = vmatmul.bf16.vlgmr.msra.gmra.mxu2 %v604_v63  ;;  %v3794_v59 = vld [vmem:[%s4744_s1 + $0x4d8] sm:$0xff]  ;;  %v3793_v63 = vld [vmem:[%s4744_s1 + $0x4d0] sm:$0xff] }
  0x64   :  { %2376 = vmatpush.bf16.msrb.mxu2 %v3758_v60  ;;  %2345 = vmatmul.bf16.vlgmr.msra.gmra.mxu3 %v605_v1  ;;  %v3769_v60 = vld [vmem:[%s4744_s1 + $0x410] sm:$0xff]  ;;  %v3776_v1 = vld [vmem:[%s4744_s1 + $0x448] sm:$0xff] }
  0x65   :  { %2389 = vmatpush.bf16.msrb.mxu3 %v3766_v61  ;;  %v3777_v61 = vld [vmem:[%s4744_s1 + $0x450] sm:$0xff] }
  0x66   :  { %2351 = vmatpush.bf16.msrb.mxu0 %v3741_v2  ;;  %v3784_v2 = vld [vmem:[%s4744_s1 + $0x488] sm:$0xff] }
  0x67   :  { %2364 = vmatpush.bf16.msrb.mxu1 %v3749_v3  ;;  %v3792_v3 = vld [vmem:[%s4744_s1 + $0x4c8] sm:$0xff] }
  0x68   :  { %2377 = vmatpush.bf16.msrb.mxu2 %v3757_v4  ;;  %v22_v4 = vld [vmem:[%s4745_s0 + $0x40] sm:$0xff] }
  0x69   :  { %2390 = vmatpush.bf16.msrb.mxu3 %v3765_v5  ;;  %v23_v5 = vld [vmem:[%s4745_s0 + $0x48] sm:$0xff] }
  0x6a   :  { %2352 = vmatpush.bf16.msrb.mxu0 %v3740_v6  ;;  %v3767_v6 = vld [vmem:[%s4744_s1 + $0x400] sm:$0xff] }
  0x6b   :  { %2365 = vmatpush.bf16.msrb.mxu1 %v3748_v7  ;;  %v3775_v7 = vld [vmem:[%s4744_s1 + $0x440] sm:$0xff] }
  0x6c   :  { %2378 = vmatpush.bf16.msrb.mxu2 %v3756_v8  ;;  %v578_v8 = vunpack.c.l.b16 %v22_v4 }
  0x6d   :  { %2391 = vmatpush.bf16.msrb.mxu3 %v3764_v9  ;;  %v580_v9 = vunpack.c.l.b16 %v23_v5 }
  0x6e   :  { %2353 = vmatpush.bf16.msrb.mxu0 %v3739_v10  ;;  %v3783_v10 = vld [vmem:[%s4744_s1 + $0x480] sm:$0xff] }
  0x6f   :  { %2366 = vmatpush.bf16.msrb.mxu1 %v3747_v11  ;;  %v3791_v11 = vld [vmem:[%s4744_s1 + $0x4c0] sm:$0xff] }
  0x70   :  { %2379 = vmatpush.bf16.msrb.mxu2 %v3755_v12  ;;  %v579_v12 = vunpack.c.h.b16 %v22_v4 }
  0x71   :  { %2392 = vmatpush.bf16.msrb.mxu3 %v3763_v13  ;;  %v581_v13 = vunpack.c.h.b16 %v23_v5  ;;  %v3838_v5 = vld [vmem:[%s4744_s1 + $0x638] sm:$0xff] }
  0x72   :  { %2354 = vmatpush.bf16.msrb.mxu0 %v3738_v14  ;;  %v3806_v14 = vld [vmem:[%s4744_s1 + $0x538] sm:$0xff] }
  0x73   :  { %2367 = vmatpush.bf16.msrb.mxu1 %v3746_v15  ;;  %v3814_v15 = vld [vmem:[%s4744_s1 + $0x578] sm:$0xff] }
  0x74   :  { %2380 = vmatpush.bf16.msrb.mxu2 %v3754_v16  ;;  %v3822_v16 = vld [vmem:[%s4744_s1 + $0x5b8] sm:$0xff] }
  0x75   :  { %2393 = vmatpush.bf16.msrb.mxu3 %v3762_v17  ;;  %v3830_v17 = vld [vmem:[%s4744_s1 + $0x5f8] sm:$0xff] }
  0x76   :  { %2355 = vmatpush.bf16.msrb.mxu0 %v3737_v18  ;;  %v610_v18 = vpack.c.b16 %v578_v8, %v578_v8  ;;  %v3862_v8 = vld [vmem:[%s4744_s1 + $0x6f8] sm:$0xff] }
  0x77   :  { %2368 = vmatpush.bf16.msrb.mxu1 %v3745_v19  ;;  %v612_v19 = vpack.c.b16 %v580_v9, %v580_v9 }
  0x78   :  { %2381 = vmatpush.bf16.msrb.mxu2 %v3753_v20  ;;  %v611_v20 = vpack.c.b16 %v579_v12, %v579_v12 }
  0x79   :  { %2394 = vmatpush.bf16.msrb.mxu3 %v3761_v21  ;;  %v613_v21 = vpack.c.b16 %v581_v13, %v581_v13  ;;  %v3837_v13 = vld [vmem:[%s4744_s1 + $0x630] sm:$0xff] }
  0x7a   :  { %2356 = vmatpush.bf16.msrb.mxu0 %v3736_v22  ;;  %v3805_v22 = vld [vmem:[%s4744_s1 + $0x530] sm:$0xff] }
  0x7b   :  { %2369 = vmatpush.bf16.msrb.mxu1 %v3744_v23  ;;  %v3813_v23 = vld [vmem:[%s4744_s1 + $0x570] sm:$0xff] }
  0x7c   :  { %2382 = vmatpush.bf16.msrb.mxu2 %v3752_v24  ;;  %v3821_v24 = vld [vmem:[%s4744_s1 + $0x5b0] sm:$0xff] }
  0x7d   :  { %2395 = vmatpush.bf16.msrb.mxu3 %v3760_v25  ;;  %v3829_v25 = vld [vmem:[%s4744_s1 + $0x5f0] sm:$0xff] }
  0x7e   :  { %2357 = vmatpush.bf16.msrb.mxu0 %v3735_v28  ;;  %v3895_v28 = vld [vmem:[%s4746_s2] ss:$0 sm:$0xff] }
  0x7f   :  { %2370 = vmatpush.bf16.msrb.mxu1 %v3743_v29  ;;  %v3820_v29 = vld [vmem:[%s4744_s1 + $0x5a8] sm:$0xff] }
  0x80   :  { %2383 = vmatpush.bf16.msrb.mxu2 %v3751_v32  ;;  %v3803_v32 = vld [vmem:[%s4744_s1 + $0x520] sm:$0xff] }
  0x81   :  { %2396 = vmatpush.bf16.msrb.mxu3 %v3759_v33  ;;  %2358 = vmatmul.bf16.vlgmr.msrb.gmra.mxu0 %v606_v40  ;;  %v3811_v33 = vld [vmem:[%s4744_s1 + $0x560] sm:$0xff]  ;;  %v3810_v40 = vld [vmem:[%s4744_s1 + $0x558] sm:$0xff] }
  0x82   :  { %2402 = vmatpush.bf16.msra.mxu0 %v3774_v36  ;;  %2371 = vmatmul.bf16.vlgmr.msrb.gmra.mxu1 %v607_v42  ;;  %v3819_v36 = vld [vmem:[%s4744_s1 + $0x5a0] sm:$0xff]  ;;  %v3826_v42 = vld [vmem:[%s4744_s1 + $0x5d8] sm:$0xff] }
  0x83   :  { %2415 = vmatpush.bf16.msra.mxu1 %v3782_v37  ;;  %2384 = vmatmul.bf16.vlgmr.msrb.gmra.mxu2 %v608_v41  ;;  %v3827_v37 = vld [vmem:[%s4744_s1 + $0x5e0] sm:$0xff]  ;;  %v3818_v41 = vld [vmem:[%s4744_s1 + $0x598] sm:$0xff] }
  0x84   :  { %2428 = vmatpush.bf16.msra.mxu2 %v3790_v38  ;;  %2397 = vmatmul.bf16.vlgmr.msrb.gmra.mxu3 %v609_v43 }
  0x85   :  { %2441 = vmatpush.bf16.msra.mxu3 %v3798_v39  ;;  %v3802_v39 = vld [vmem:[%s4744_s1 + $0x518] sm:$0xff] }
  0x86   :  { %2403 = vmatpush.bf16.msra.mxu0 %v3773_v44 }
  0x87   :  { %2416 = vmatpush.bf16.msra.mxu1 %v3781_v45 }
  0x88   :  { %2429 = vmatpush.bf16.msra.mxu2 %v3789_v46 }
  0x89   :  { %2442 = vmatpush.bf16.msra.mxu3 %v3797_v47  ;;  %v3801_v47 = vld [vmem:[%s4744_s1 + $0x510] sm:$0xff] }
  0x8a   :  { %2404 = vmatpush.bf16.msra.mxu0 %v3772_v48  ;;  %v3809_v48 = vld [vmem:[%s4744_s1 + $0x550] sm:$0xff] }
  0x8b   :  { %2417 = vmatpush.bf16.msra.mxu1 %v3780_v49 }
  0x8c   :  { %2430 = vmatpush.bf16.msra.mxu2 %v3788_v50 }
  0x8d   :  { %2443 = vmatpush.bf16.msra.mxu3 %v3796_v51  ;;  %v3817_v51 = vld [vmem:[%s4744_s1 + $0x590] sm:$0xff] }
  0x8e   :  { %2405 = vmatpush.bf16.msra.mxu0 %v3771_v52  ;;  %v3825_v52 = vld [vmem:[%s4744_s1 + $0x5d0] sm:$0xff] }
  0x8f   :  { %2418 = vmatpush.bf16.msra.mxu1 %v3779_v53  ;;  %v3800_v53 = vld [vmem:[%s4744_s1 + $0x508] sm:$0xff] }
  0x90   :  { %2431 = vmatpush.bf16.msra.mxu2 %v3787_v54  ;;  %v3808_v54 = vld [vmem:[%s4744_s1 + $0x548] sm:$0xff] }
  0x91   :  { %2444 = vmatpush.bf16.msra.mxu3 %v3795_v55  ;;  %v3816_v55 = vld [vmem:[%s4744_s1 + $0x588] sm:$0xff] }
  0x92   :  { %2406 = vmatpush.bf16.msra.mxu0 %v3770_v56  ;;  %v3824_v56 = vld [vmem:[%s4744_s1 + $0x5c8] sm:$0xff] }
  0x93   :  { %2419 = vmatpush.bf16.msra.mxu1 %v3778_v57  ;;  %v24_v57 = vld [vmem:[%s4745_s0 + $0x50] sm:$0xff] }
  0x94   :  { %2432 = vmatpush.bf16.msra.mxu2 %v3786_v58  ;;  %v25_v58 = vld [vmem:[%s4745_s0 + $0x58] sm:$0xff] }
  0x95   :  { %2445 = vmatpush.bf16.msra.mxu3 %v3794_v59  ;;  %v585_v4 = vunpack.c.h.b16 %v25_v58 }
  0x96   :  { %2407 = vmatpush.bf16.msra.mxu0 %v3769_v60 }
  0x97   :  { %2420 = vmatpush.bf16.msra.mxu1 %v3777_v61  ;;  %v3799_v61 = vld [vmem:[%s4744_s1 + $0x500] sm:$0xff]  ;;  %v617_v12 = vpack.c.b16 %v585_v4, %v585_v4  ;;  %v3877_v4 = vld [vmem:[%s4744_s1 + $0x770] sm:$0xff] }
  0x98   :  { %2433 = vmatpush.bf16.msra.mxu2 %v3785_v62  ;;  %v3807_v62 = vld [vmem:[%s4744_s1 + $0x540] sm:$0xff] }
  0x99   :  { %2446 = vmatpush.bf16.msra.mxu3 %v3793_v63  ;;  %v582_v63 = vunpack.c.l.b16 %v24_v57 }
  0x9a   :  { %2408 = vmatpush.bf16.msra.mxu0 %v3768_v0  ;;  %v584_v0 = vunpack.c.l.b16 %v25_v58 }
  0x9b   :  { %2421 = vmatpush.bf16.msra.mxu1 %v3776_v1  ;;  %v3815_v1 = vld [vmem:[%s4744_s1 + $0x580] sm:$0xff]  ;;  %v614_v9 = vpack.c.b16 %v582_v63, %v582_v63 }
  0x9c   :  { %2434 = vmatpush.bf16.msra.mxu2 %v3784_v2  ;;  %v3823_v2 = vld [vmem:[%s4744_s1 + $0x5c0] sm:$0xff] }
  0x9d   :  { %2447 = vmatpush.bf16.msra.mxu3 %v3792_v3  ;;  %v583_v3 = vunpack.c.h.b16 %v24_v57 }
  0x9e   :  { %2409 = vmatpush.bf16.msra.mxu0 %v3767_v6  ;;  %v2203_v31 = vpop.f32.mrf.mxu0  ;;  %v3846_v6 = vld [vmem:[%s4744_s1 + $0x678] sm:$0xff] }
  0x9f   :  { %2422 = vmatpush.bf16.msra.mxu1 %v3775_v7  ;;  %v2204_v34 = vadd.f32 %v3895_v28, %v2203_v31  ;;  %v2216_v35 = vpop.f32.mrf.mxu1  ;;  %v3854_v7 = vld [vmem:[%s4744_s1 + $0x6b8] sm:$0xff] }
  0xa0   :  { %2435 = vmatpush.bf16.msra.mxu2 %v3783_v10  ;;  %v616_v10 = vpack.c.b16 %v584_v0, %v584_v0  ;;  %v3850_v31 = vld [vmem:[%s4744_s1 + $0x698] sm:$0xff] }
  0xa1   :  { %2448 = vmatpush.bf16.msra.mxu3 %v3791_v11  ;;  %2410 = vmatmul.bf16.vlgmr.msra.gmra.mxu0 %v610_v18  ;;  %v2217_v38 = vadd.f32 %v2216_v35, %v2204_v34  ;;  %v615_v11 = vpack.c.b16 %v583_v3, %v583_v3  ;;  %v3844_v18 = vld [vmem:[%s4744_s1 + $0x668] sm:$0xff]  ;;  %v3869_v3 = vld [vmem:[%s4744_s1 + $0x730] sm:$0xff] }
  0xa2   :  { %2454 = vmatpush.bf16.msrb.mxu0 %v3806_v14  ;;  %2423 = vmatmul.bf16.vlgmr.msra.gmra.mxu1 %v611_v20  ;;  %v3845_v14 = vld [vmem:[%s4744_s1 + $0x670] sm:$0xff]  ;;  %v3860_v20 = vld [vmem:[%s4744_s1 + $0x6e8] sm:$0xff] }
  0xa3   :  { %2467 = vmatpush.bf16.msrb.mxu1 %v3814_v15  ;;  %2436 = vmatmul.bf16.vlgmr.msra.gmra.mxu2 %v612_v19  ;;  %v3853_v15 = vld [vmem:[%s4744_s1 + $0x6b0] sm:$0xff]  ;;  %v3852_v19 = vld [vmem:[%s4744_s1 + $0x6a8] sm:$0xff] }
  0xa4   :  { %2480 = vmatpush.bf16.msrb.mxu2 %v3822_v16  ;;  %2449 = vmatmul.bf16.vlgmr.msra.gmra.mxu3 %v613_v21  ;;  %v3861_v16 = vld [vmem:[%s4744_s1 + $0x6f0] sm:$0xff] }
  0xa5   :  { %2493 = vmatpush.bf16.msrb.mxu3 %v3830_v17  ;;  %v3836_v17 = vld [vmem:[%s4744_s1 + $0x628] sm:$0xff] }
  0xa6   :  { %2455 = vmatpush.bf16.msrb.mxu0 %v3805_v22  ;;  %v2229_v43 = vpop.f32.mrf.mxu2  ;;  %v2205_v46 = vpop.f32.mrf.mxu0  ;;  %v3835_v22 = vld [vmem:[%s4744_s1 + $0x620] sm:$0xff] }
  0xa7   :  { %2468 = vmatpush.bf16.msrb.mxu1 %v3813_v23  ;;  %v2230_v44 = vadd.f32 %v2229_v43, %v2217_v38  ;;  %v2242_v45 = vpop.f32.mrf.mxu3  ;;  %v2218_v50 = vpop.f32.mrf.mxu1  ;;  %v3843_v23 = vld [vmem:[%s4744_s1 + $0x660] sm:$0xff]  ;;  %v3841_v38 = vld [vmem:[%s4744_s1 + $0x650] sm:$0xff]  ;;  %v3832_v43 = vld [vmem:[%s4744_s1 + $0x608] sm:$0xff] }
  0xa8   :  { %2481 = vmatpush.bf16.msrb.mxu2 %v3821_v24  ;;  %v3856_v46 = vld [vmem:[%s4744_s1 + $0x6c8] sm:$0xff] }
  0xa9   :  { %2494 = vmatpush.bf16.msrb.mxu3 %v3829_v25  ;;  %v4495_v49 = vadd.f32 %v2242_v45, %v2230_v44  ;;  %v3840_v44 = vld [vmem:[%s4744_s1 + $0x648] sm:$0xff] }
  0xaa   :  { %2456 = vmatpush.bf16.msrb.mxu0 %v3804_v26  ;;  %v3851_v26 = vld [vmem:[%s4744_s1 + $0x6a0] sm:$0xff]  ;;  %v3848_v45 = vld [vmem:[%s4744_s1 + $0x688] sm:$0xff] }
  0xab   :  { %2469 = vmatpush.bf16.msrb.mxu1 %v3812_v27  ;;  %v3859_v27 = vld [vmem:[%s4744_s1 + $0x6e0] sm:$0xff] }
  0xac   :  { %2482 = vmatpush.bf16.msrb.mxu2 %v3820_v29  ;;  %v3834_v29 = vld [vmem:[%s4744_s1 + $0x618] sm:$0xff] }
  0xad   :  { %2495 = vmatpush.bf16.msrb.mxu3 %v3828_v30  ;;  %v3842_v30 = vld [vmem:[%s4744_s1 + $0x658] sm:$0xff] }
  0xae   :  { %2457 = vmatpush.bf16.msrb.mxu0 %v3803_v32  ;;  %v2231_v59 = vpop.f32.mrf.mxu2  ;;  %v3858_v32 = vld [vmem:[%s4744_s1 + $0x6d8] sm:$0xff] }
  0xaf   :  { %2470 = vmatpush.bf16.msrb.mxu1 %v3811_v33  ;;  %v2244_v60 = vpop.f32.mrf.mxu3  ;;  %v3870_v59 = vld [vmem:[%s4744_s1 + $0x738] sm:$0xff] }
  0xb0   :  { %2483 = vmatpush.bf16.msrb.mxu2 %v3819_v36  ;;  %v3878_v60 = vld [vmem:[%s4744_s1 + $0x778] sm:$0xff] }
  0xb1   :  { %2496 = vmatpush.bf16.msrb.mxu3 %v3827_v37  ;;  %v3833_v37 = vld [vmem:[%s4744_s1 + $0x610] sm:$0xff] }
  0xb2   :  { %2458 = vmatpush.bf16.msrb.mxu0 %v3802_v39 }
  0xb3   :  { %2471 = vmatpush.bf16.msrb.mxu1 %v3810_v40 }
  0xb4   :  { %2484 = vmatpush.bf16.msrb.mxu2 %v3818_v41  ;;  %v3849_v41 = vld [vmem:[%s4744_s1 + $0x690] sm:$0xff] }
  0xb5   :  { %2497 = vmatpush.bf16.msrb.mxu3 %v3826_v42  ;;  %v3857_v42 = vld [vmem:[%s4744_s1 + $0x6d0] sm:$0xff] }
  0xb6   :  { %2459 = vmatpush.bf16.msrb.mxu0 %v3801_v47  ;;  %v26_v47 = vld [vmem:[%s4745_s0 + $0x60] sm:$0xff] }
  0xb7   :  { %2472 = vmatpush.bf16.msrb.mxu1 %v3809_v48  ;;  %v27_v48 = vld [vmem:[%s4745_s0 + $0x68] sm:$0xff]  ;;  %v587_v57 = vunpack.c.h.b16 %v26_v47 }
  0xb8   :  { %2485 = vmatpush.bf16.msrb.mxu2 %v3817_v51  ;;  %v3831_v51 = vld [vmem:[%s4744_s1 + $0x600] sm:$0xff]  ;;  %v589_v58 = vunpack.c.h.b16 %v27_v48 }
  0xb9   :  { %2498 = vmatpush.bf16.msrb.mxu3 %v3825_v52  ;;  %v3839_v52 = vld [vmem:[%s4744_s1 + $0x640] sm:$0xff] }
  0xba   :  { %2460 = vmatpush.bf16.msrb.mxu0 %v3800_v53  ;;  %v586_v53 = vunpack.c.l.b16 %v26_v47  ;;  %v3879_v47 = vld [vmem:[%s4744_s1 + $0x780] sm:$0xff] }
  0xbb   :  { %2473 = vmatpush.bf16.msrb.mxu1 %v3808_v54  ;;  %v588_v54 = vunpack.c.l.b16 %v27_v48  ;;  %v3887_v48 = vld [vmem:[%s4744_s1 + $0x7c0] sm:$0xff] }
  0xbc   :  { %2486 = vmatpush.bf16.msrb.mxu2 %v3816_v55  ;;  %v3847_v55 = vld [vmem:[%s4744_s1 + $0x680] sm:$0xff]  ;;  %v618_v63 = vpack.c.b16 %v586_v53, %v586_v53 }
  0xbd   :  { %2499 = vmatpush.bf16.msrb.mxu3 %v3824_v56  ;;  %v3855_v56 = vld [vmem:[%s4744_s1 + $0x6c0] sm:$0xff]  ;;  %v620_v0 = vpack.c.b16 %v588_v54, %v588_v54 }
  0xbe   :  { %2461 = vmatpush.bf16.msrb.mxu0 %v3799_v61  ;;  %v2255_v21 = vpop.f32.mrf.mxu0  ;;  %v3886_v61 = vld [vmem:[%s4744_s1 + $0x7b8] sm:$0xff] }
  0xbf   :  { %2474 = vmatpush.bf16.msrb.mxu1 %v3807_v62  ;;  %v2256_v24 = vadd.f32 %v2255_v21, %v4495_v49  ;;  %v2268_v25 = vpop.f32.mrf.mxu1  ;;  %v3894_v62 = vld [vmem:[%s4744_s1 + $0x7f8] sm:$0xff] }
  0xc0   :  { %2487 = vmatpush.bf16.msrb.mxu2 %v3815_v1  ;;  %v619_v1 = vpack.c.b16 %v587_v57, %v587_v57  ;;  %v3882_v21 = vld [vmem:[%s4744_s1 + $0x798] sm:$0xff] }
  0xc1   :  { %2500 = vmatpush.bf16.msrb.mxu3 %v3823_v2  ;;  %2462 = vmatmul.bf16.vlgmr.msrb.gmra.mxu0 %v614_v9  ;;  %v2269_v28 = vadd.f32 %v2268_v25, %v2256_v24  ;;  %v621_v2 = vpack.c.b16 %v589_v58, %v589_v58  ;;  %v3884_v9 = vld [vmem:[%s4744_s1 + $0x7a8] sm:$0xff] }
  0xc2   :  { %2506 = vmatpush.bf16.msra.mxu0 %v3838_v5  ;;  %2475 = vmatmul.bf16.vlgmr.msrb.gmra.mxu1 %v615_v11  ;;  %v3885_v5 = vld [vmem:[%s4744_s1 + $0x7b0] sm:$0xff] }
  0xc3   :  { %2519 = vmatpush.bf16.msra.mxu1 %v3846_v6  ;;  %2488 = vmatmul.bf16.vlgmr.msrb.gmra.mxu2 %v616_v10  ;;  %v3893_v6 = vld [vmem:[%s4744_s1 + $0x7f0] sm:$0xff]  ;;  %v3892_v10 = vld [vmem:[%s4744_s1 + $0x7e8] sm:$0xff] }
  0xc4   :  { %2532 = vmatpush.bf16.msra.mxu2 %v3854_v7  ;;  %2501 = vmatmul.bf16.vlgmr.msrb.gmra.mxu3 %v617_v12  ;;  %v3868_v7 = vld [vmem:[%s4744_s1 + $0x728] sm:$0xff] }
  0xc5   :  { %2545 = vmatpush.bf16.msra.mxu3 %v3862_v8  ;;  %v3876_v8 = vld [vmem:[%s4744_s1 + $0x768] sm:$0xff] }
  0xc6   :  { %2507 = vmatpush.bf16.msra.mxu0 %v3837_v13  ;;  %v2281_v33 = vpop.f32.mrf.mxu2  ;;  %v2257_v36 = vpop.f32.mrf.mxu0  ;;  %v3867_v13 = vld [vmem:[%s4744_s1 + $0x720] sm:$0xff] }
  0xc7   :  { %2520 = vmatpush.bf16.msra.mxu1 %v3845_v14  ;;  %v2282_v34 = vadd.f32 %v2281_v33, %v2269_v28  ;;  %v2294_v35 = vpop.f32.mrf.mxu3  ;;  %v2270_v40 = vpop.f32.mrf.mxu1  ;;  %v3875_v14 = vld [vmem:[%s4744_s1 + $0x760] sm:$0xff]  ;;  %v3865_v28 = vld [vmem:[%s4744_s1 + $0x710] sm:$0xff]  ;;  %v3864_v33 = vld [vmem:[%s4744_s1 + $0x708] sm:$0xff] }
  0xc8   :  { %2533 = vmatpush.bf16.msra.mxu2 %v3853_v15  ;;  %v3880_v36 = vld [vmem:[%s4744_s1 + $0x788] sm:$0xff] }
  0xc9   :  { %2546 = vmatpush.bf16.msra.mxu3 %v3861_v16  ;;  %v4600_v39 = vadd.f32 %v2294_v35, %v2282_v34  ;;  %v3883_v16 = vld [vmem:[%s4744_s1 + $0x7a0] sm:$0xff]  ;;  %v3872_v34 = vld [vmem:[%s4744_s1 + $0x748] sm:$0xff]  ;;  %v28_v35 = vld [vmem:[%s4745_s0 + $0x70] sm:$0xff] }
  0xca   :  { %2508 = vmatpush.bf16.msra.mxu0 %v3836_v17  ;;  %v3891_v17 = vld [vmem:[%s4744_s1 + $0x7e0] sm:$0xff] }
  0xcb   :  { %2521 = vmatpush.bf16.msra.mxu1 %v3844_v18 }
  0xcc   :  { %2534 = vmatpush.bf16.msra.mxu2 %v3852_v19  ;;  %v3866_v19 = vld [vmem:[%s4744_s1 + $0x718] sm:$0xff] }
  0xcd   :  { %2547 = vmatpush.bf16.msra.mxu3 %v3860_v20  ;;  %v3874_v20 = vld [vmem:[%s4744_s1 + $0x758] sm:$0xff] }
  0xce   :  { %2509 = vmatpush.bf16.msra.mxu0 %v3835_v22  ;;  %v2283_v49 = vpop.f32.mrf.mxu2  ;;  %v3890_v22 = vld [vmem:[%s4744_s1 + $0x7d8] sm:$0xff] }
  0xcf   :  { %2522 = vmatpush.bf16.msra.mxu1 %v3843_v23  ;;  %v2296_v50 = vpop.f32.mrf.mxu3 }
  0xd0   :  { %2535 = vmatpush.bf16.msra.mxu2 %v3851_v26 }
  0xd1   :  { %2548 = vmatpush.bf16.msra.mxu3 %v3859_v27 }
  0xd2   :  { %2510 = vmatpush.bf16.msra.mxu0 %v3834_v29  ;;  %v3873_v29 = vld [vmem:[%s4744_s1 + $0x750] sm:$0xff] }
  0xd3   :  { %2523 = vmatpush.bf16.msra.mxu1 %v3842_v30 }
  0xd4   :  { %2536 = vmatpush.bf16.msra.mxu2 %v3850_v31  ;;  %v3881_v31 = vld [vmem:[%s4744_s1 + $0x790] sm:$0xff] }
  0xd5   :  { %2549 = vmatpush.bf16.msra.mxu3 %v3858_v32  ;;  %v3889_v32 = vld [vmem:[%s4744_s1 + $0x7d0] sm:$0xff] }
  0xd6   :  { %2511 = vmatpush.bf16.msra.mxu0 %v3833_v37  ;;  %v3888_v37 = vld [vmem:[%s4744_s1 + $0x7c8] sm:$0xff] }
  0xd7   :  { %2524 = vmatpush.bf16.msra.mxu1 %v3841_v38  ;;  %v29_v38 = vld [vmem:[%s4745_s0 + $0x78] sm:$0xff] }
  0xd8   :  { %2537 = vmatpush.bf16.msra.mxu2 %v3849_v41  ;;  %v590_v41 = vunpack.c.l.b16 %v28_v35 }
  0xd9   :  { %2550 = vmatpush.bf16.msra.mxu3 %v3857_v42  ;;  %v591_v42 = vunpack.c.h.b16 %v28_v35 }
  0xda   :  { %2512 = vmatpush.bf16.msra.mxu0 %v3832_v43  ;;  %v3863_v43 = vld [vmem:[%s4744_s1 + $0x700] sm:$0xff]  ;;  %v622_v49 = vpack.c.b16 %v590_v41, %v590_v41 }
  0xdb   :  { %2525 = vmatpush.bf16.msra.mxu1 %v3840_v44  ;;  %v3871_v44 = vld [vmem:[%s4744_s1 + $0x740] sm:$0xff]  ;;  %v623_v50 = vpack.c.b16 %v591_v42, %v591_v42 }
  0xdc   :  { %2538 = vmatpush.bf16.msra.mxu2 %v3848_v45  ;;  %v592_v45 = vunpack.c.l.b16 %v29_v38 }
  0xdd   :  { %2551 = vmatpush.bf16.msra.mxu3 %v3856_v46  ;;  %v593_v46 = vunpack.c.h.b16 %v29_v38 }
  0xde   :  { %2513 = vmatpush.bf16.msra.mxu0 %v3831_v51  ;;  %v2307_v11 = vpop.f32.mrf.mxu0  ;;  %v624_v51 = vpack.c.b16 %v592_v45, %v592_v45 }
  0xdf   :  { %2526 = vmatpush.bf16.msra.mxu1 %v3839_v52  ;;  %v2308_v12 = vadd.f32 %v2307_v11, %v4600_v39  ;;  %v2320_v15 = vpop.f32.mrf.mxu1  ;;  %v625_v52 = vpack.c.b16 %v593_v46, %v593_v46 }
  0xe0   :  { %2539 = vmatpush.bf16.msra.mxu2 %v3847_v55 }
  0xe1   :  { %2552 = vmatpush.bf16.msra.mxu3 %v3855_v56  ;;  %2514 = vmatmul.bf16.vlgmr.msra.gmra.mxu0 %v618_v63  ;;  %v2321_v18 = vadd.f32 %v2320_v15, %v2308_v12 }
  0xe2   :  { %2558 = vmatpush.bf16.msrb.mxu0 %v3870_v59  ;;  %2527 = vmatmul.bf16.vlgmr.msra.gmra.mxu1 %v619_v1 }
  0xe3   :  { %2571 = vmatpush.bf16.msrb.mxu1 %v3878_v60  ;;  %2540 = vmatmul.bf16.vlgmr.msra.gmra.mxu2 %v620_v0 }
  0xe4   :  { %2584 = vmatpush.bf16.msrb.mxu2 %v3886_v61  ;;  %2553 = vmatmul.bf16.vlgmr.msra.gmra.mxu3 %v621_v2 }
  0xe5   :  { %2597 = vmatpush.bf16.msrb.mxu3 %v3894_v62 }
  0xe6   :  { %2559 = vmatpush.bf16.msrb.mxu0 %v3869_v3  ;;  %v2333_v23 = vpop.f32.mrf.mxu2  ;;  %v2309_v26 = vpop.f32.mrf.mxu0 }
  0xe7   :  { %2572 = vmatpush.bf16.msrb.mxu1 %v3877_v4  ;;  %v2334_v24 = vadd.f32 %v2333_v23, %v2321_v18  ;;  %v2346_v25 = vpop.f32.mrf.mxu3  ;;  %v2322_v30 = vpop.f32.mrf.mxu1 }
  0xe8   :  { %2585 = vmatpush.bf16.msrb.mxu2 %v3885_v5 }
  0xe9   :  { %2598 = vmatpush.bf16.msrb.mxu3 %v3893_v6  ;;  %v2347_v27 = vadd.f32 %v2346_v25, %v2334_v24 }
  0xea   :  { %2560 = vmatpush.bf16.msrb.mxu0 %v3868_v7 }
  0xeb   :  { %2573 = vmatpush.bf16.msrb.mxu1 %v3876_v8 }
  0xec   :  { %2586 = vmatpush.bf16.msrb.mxu2 %v3884_v9 }
  0xed   :  { %2599 = vmatpush.bf16.msrb.mxu3 %v3892_v10 }
  0xee   :  { %2561 = vmatpush.bf16.msrb.mxu0 %v3867_v13  ;;  %v2335_v39 = vpop.f32.mrf.mxu2 }
  0xef   :  { %2574 = vmatpush.bf16.msrb.mxu1 %v3875_v14  ;;  %v2348_v40 = vpop.f32.mrf.mxu3 }
  0xf0   :  { %2587 = vmatpush.bf16.msrb.mxu2 %v3883_v16 }
  0xf1   :  { %2600 = vmatpush.bf16.msrb.mxu3 %v3891_v17 }
  0xf2   :  { %2562 = vmatpush.bf16.msrb.mxu0 %v3866_v19 }
  0xf3   :  { %2575 = vmatpush.bf16.msrb.mxu1 %v3874_v20 }
  0xf4   :  { %2588 = vmatpush.bf16.msrb.mxu2 %v3882_v21 }
  0xf5   :  { %2601 = vmatpush.bf16.msrb.mxu3 %v3890_v22 }
  0xf6   :  { %2563 = vmatpush.bf16.msrb.mxu0 %v3865_v28 }
  0xf7   :  { %2576 = vmatpush.bf16.msrb.mxu1 %v3873_v29 }
  0xf8   :  { %2589 = vmatpush.bf16.msrb.mxu2 %v3881_v31 }
  0xf9   :  { %2602 = vmatpush.bf16.msrb.mxu3 %v3889_v32 }
  0xfa   :  { %2564 = vmatpush.bf16.msrb.mxu0 %v3864_v33 }
  0xfb   :  { %2577 = vmatpush.bf16.msrb.mxu1 %v3872_v34 }
  0xfc   :  { %2590 = vmatpush.bf16.msrb.mxu2 %v3880_v36 }
  0xfd   :  { %2603 = vmatpush.bf16.msrb.mxu3 %v3888_v37 }
  0xfe   :  { %2565 = vmatpush.bf16.msrb.mxu0 %v3863_v43  ;;  %v2359_v53 = vpop.f32.mrf.mxu0 }
  0xff   :  { %2578 = vmatpush.bf16.msrb.mxu1 %v3871_v44  ;;  %v2360_v54 = vadd.f32 %v2359_v53, %v2347_v27  ;;  %v2372_v55 = vpop.f32.mrf.mxu1 }
 0x100   :  { %2591 = vmatpush.bf16.msrb.mxu2 %v3879_v47 }
 0x101   :  { %2604 = vmatpush.bf16.msrb.mxu3 %v3887_v48  ;;  %2566 = vmatmul.bf16.vlgmr.msrb.gmra.mxu0 %v622_v49  ;;  %v2373_v56 = vadd.f32 %v2372_v55, %v2360_v54 }
 0x102   :  { %2579 = vmatmul.bf16.vlgmr.msrb.gmra.mxu1 %v623_v50 }
 0x103   :  { %2592 = vmatmul.bf16.vlgmr.msrb.gmra.mxu2 %v624_v51 }
 0x104   :  { %2605 = vmatmul.bf16.vlgmr.msrb.gmra.mxu3 %v625_v52 }
 0x106   :  { %v2385_v57 = vpop.f32.mrf.mxu2  ;;  %v2361_v60 = vpop.f32.mrf.mxu0 }
 0x107   :  { %v2386_v58 = vadd.f32 %v2385_v57, %v2373_v56  ;;  %v2398_v59 = vpop.f32.mrf.mxu3  ;;  %v2374_v62 = vpop.f32.mrf.mxu1 }
 0x109   :  { %v2399_v61 = vadd.f32 %v2398_v59, %v2386_v58 }
 0x10e   :  { %v2387_v63 = vpop.f32.mrf.mxu2 }
 0x10f   :  { %v2400_v0 = vpop.f32.mrf.mxu3 }
 0x11e   :  { %v2411_v1 = vpop.f32.mrf.mxu0 }
 0x11f   :  { %v2412_v2 = vadd.f32 %v2411_v1, %v2399_v61  ;;  %v2424_v3 = vpop.f32.mrf.mxu1 }
 0x121   :  { %v2425_v4 = vadd.f32 %v2424_v3, %v2412_v2 }
 0x126   :  { %v2437_v5 = vpop.f32.mrf.mxu2  ;;  %v2413_v8 = vpop.f32.mrf.mxu0 }
 0x127   :  { %v2438_v6 = vadd.f32 %v2437_v5, %v2425_v4  ;;  %v2450_v7 = vpop.f32.mrf.mxu3  ;;  %v2426_v10 = vpop.f32.mrf.mxu1 }
 0x129   :  { %v2451_v9 = vadd.f32 %v2450_v7, %v2438_v6 }
 0x12e   :  { %v2439_v11 = vpop.f32.mrf.mxu2 }
 0x12f   :  { %v2452_v12 = vpop.f32.mrf.mxu3 }
 0x13e   :  { %v2463_v13 = vpop.f32.mrf.mxu0 }
 0x13f   :  { %v2476_v14 = vpop.f32.mrf.mxu1  ;;  %v2464_v24 = vadd.f32 %v2463_v13, %v2451_v9 }
 0x141   :  { %v2477_v28 = vadd.f32 %v2476_v14, %v2464_v24 }
 0x146   :  { %v2489_v15 = vpop.f32.mrf.mxu2  ;;  %v2465_v17 = vpop.f32.mrf.mxu0 }
 0x147   :  { %v2502_v16 = vpop.f32.mrf.mxu3  ;;  %v2478_v18 = vpop.f32.mrf.mxu1  ;;  %v2490_v29 = vadd.f32 %v2489_v15, %v2477_v28 }
 0x149   :  { %v2503_v32 = vadd.f32 %v2502_v16, %v2490_v29 }
 0x14e   :  { %v2491_v19 = vpop.f32.mrf.mxu2 }
 0x14f   :  { %v2504_v20 = vpop.f32.mrf.mxu3 }
 0x15e   :  { %v2515_v21 = vpop.f32.mrf.mxu0 }
 0x15f   :  { %v2528_v22 = vpop.f32.mrf.mxu1  ;;  %v2516_v33 = vadd.f32 %v2515_v21, %v2503_v32 }
 0x161   :  { %v2529_v34 = vadd.f32 %v2528_v22, %v2516_v33 }
 0x166   :  { %v2541_v23 = vpop.f32.mrf.mxu2  ;;  %v2517_v26 = vpop.f32.mrf.mxu0 }
 0x167   :  { %v2554_v25 = vpop.f32.mrf.mxu3  ;;  %v2530_v27 = vpop.f32.mrf.mxu1  ;;  %v2542_v35 = vadd.f32 %v2541_v23, %v2529_v34 }
 0x169   :  { %v2555_v36 = vadd.f32 %v2554_v25, %v2542_v35 }
 0x16e   :  { %v2543_v30 = vpop.f32.mrf.mxu2 }
 0x16f   :  { %v2556_v31 = vpop.f32.mrf.mxu3 }
 0x17e   :  { %v2567_v37 = vpop.f32.mrf.mxu0 }
 0x17f   :  { %v2580_v38 = vpop.f32.mrf.mxu1  ;;  %v2568_v39 = vadd.f32 %v2567_v37, %v2555_v36 }
 0x181   :  { %v2581_v40 = vadd.f32 %v2580_v38, %v2568_v39 }
 0x186   :  { %v2593_v41 = vpop.f32.mrf.mxu2  ;;  %v2569_v44 = vpop.f32.mrf.mxu0 }
 0x187   :  { %v2606_v42 = vpop.f32.mrf.mxu3  ;;  %v2594_v43 = vadd.f32 %v2593_v41, %v2581_v40  ;;  %v2582_v45 = vpop.f32.mrf.mxu1 }
 0x189   :  { %v2607_v46 = vadd.f32 %v2606_v42, %v2594_v43 }
 0x18b   :  { %2610 = vst [vmem:[%s4747_s3] sm:$0xff] %v2607_v46 }
 0x18e   :  { %v2595_v47 = vpop.f32.mrf.mxu2 }
 0x18f   :  { %v2608_v48 = vpop.f32.mrf.mxu3 }

</bundles_post_ra>
